<compile_context>
chip_gen: v6e
topology: v6e:2x2x1
jax: 0.10.0
libtpu: 0.0.40
codegen_flags: <defaults>
</compile_context>

<pallas_src>
import functools

import jax
import jax.numpy as jnp
from jax.experimental import pallas as pl
from jax.experimental.pallas import tpu as pltpu

EPS_LN = 1e-5  # nn.LayerNorm default eps


# ---------------------------------------------------------------------------
# Fused pool + LayerNorm Pallas kernel
# ---------------------------------------------------------------------------
def _pool_ln_kernel(x_ref, g_ref, b_ref, o_ref):
    """x_ref: [tn, K, C] window-packed rows; g/b: [1, C]; o_ref: [tn, C].

    pooled = 0.5 * (max_k x + mean_k x), then LayerNorm over C with affine.
    """
    x = x_ref[...]                                        # [tn, K, C] f32
    inv_k = 1.0 / x.shape[1]
    pooled = 0.5 * (jnp.max(x, axis=1) + jnp.sum(x, axis=1) * inv_k)  # [tn, C]
    mu = jnp.mean(pooled, axis=-1, keepdims=True)
    var = jnp.mean((pooled - mu) * (pooled - mu), axis=-1, keepdims=True)
    xn = (pooled - mu) * jax.lax.rsqrt(var + EPS_LN)
    o_ref[...] = (xn * g_ref[...] + b_ref[...]).astype(o_ref.dtype)


def _pick_row_tile(n_rows, k, c, budget_bytes=4 << 20):
    """Largest multiple-of-8 divisor of n_rows whose input block fits budget."""
    row_bytes = k * c * 4
    if n_rows % 8 != 0:
        # TODO(synk): tail-masked row tiling for row counts not divisible by 8;
        # fall back to a single full-array block (correct, but larger VMEM use).
        return n_rows
    cands = [d for d in range(8, n_rows + 1, 8)
             if n_rows % d == 0 and d * row_bytes <= budget_bytes]
    if cands:
        return max(cands)
    return min(d for d in range(8, n_rows + 1, 8) if n_rows % d == 0)


# ---------------------------------------------------------------------------
# PatchEmbed_Head forward
# ---------------------------------------------------------------------------
def patch_embed_head(x, gamma, beta, *, patch_size):
    """PatchEmbed_Head.forward with type='pool' on NCHW input.

    x: [B, C, H, W]; gamma/beta: [C] (LayerNorm affine, dim == C for 'pool').
    Returns [B, C, Wh, Ww] with Wh = ceil(H/p), Ww = ceil(W/p).
    """
    # TODO(synk): type='conv' branch (grouped patchify Conv2d) not implemented;
    # only the default type='pool' path is replicated here.
    B, C, H, W = x.shape
    p = patch_size
    pad_h = (-H) % p
    pad_w = (-W) % p
    if pad_h or pad_w:
        x = jnp.pad(x, ((0, 0), (0, 0), (0, pad_h), (0, pad_w)))
    Hp, Wp = H + pad_h, W + pad_w
    Wh, Ww = Hp // p, Wp // p
    K = p * p
    N = B * Wh * Ww

    # Channels-last window packing: [B, C, Hp, Wp] -> [N, K, C]
    # (single fused XLA transpose-copy; windows are non-overlapping so no
    #  data duplication).
    xw = x.reshape(B, C, Wh, p, Ww, p)
    xw = jnp.transpose(xw, (0, 2, 4, 3, 5, 1)).reshape(N, K, C)

    tn = _pick_row_tile(N, K, C)
    grid = (N // tn,)

    y = pl.pallas_call(
        _pool_ln_kernel,
        out_shape=jax.ShapeDtypeStruct((N, C), jnp.float32),
        grid_spec=pltpu.PrefetchScalarGridSpec(
            num_scalar_prefetch=0,
            grid=grid,
            in_specs=[
                pl.BlockSpec((tn, K, C), lambda i: (i, 0, 0)),
                pl.BlockSpec((1, C), lambda i: (0, 0)),
                pl.BlockSpec((1, C), lambda i: (0, 0)),
            ],
            out_specs=pl.BlockSpec((tn, C), lambda i: (i, 0)),
        ),
        compiler_params=pltpu.CompilerParams(
            dimension_semantics=("parallel",)),
    )(xw, gamma.reshape(1, C), beta.reshape(1, C))

    # [N, C] -> [B, C, Wh, Ww]
    return jnp.transpose(y.reshape(B, Wh, Ww, C), (0, 3, 1, 2))


# ---------------------------------------------------------------------------
# Pure-JAX reference (mirrors the PyTorch module exactly) for validation
# ---------------------------------------------------------------------------
def patch_embed_head_ref(x, gamma, beta, patch_size):
    B, C, H, W = x.shape
    p = patch_size
    pad_h = (-H) % p
    pad_w = (-W) % p
    x = jnp.pad(x, ((0, 0), (0, 0), (0, pad_h), (0, pad_w)))
    Hp, Wp = H + pad_h, W + pad_w
    Wh, Ww = Hp // p, Wp // p
    xr = x.reshape(B, C, Wh, p, Ww, p)
    pooled = 0.5 * (jnp.max(xr, axis=(3, 5)) + jnp.mean(xr, axis=(3, 5)))
    t = jnp.transpose(pooled, (0, 2, 3, 1))                 # [B, Wh, Ww, C]
    mu = jnp.mean(t, axis=-1, keepdims=True)
    var = jnp.mean((t - mu) ** 2, axis=-1, keepdims=True)
    y = (t - mu) * jax.lax.rsqrt(var + EPS_LN) * gamma + beta
    return jnp.transpose(y, (0, 3, 1, 2))


if __name__ == "__main__":
    patch_size = 4
    dim = 96                  # type='pool': LayerNorm dim == in_ch
    B, H, W = 2, 30, 29       # non-multiples of patch_size exercise the pad path

    key = jax.random.PRNGKey(0)
    kx, kg, kb = jax.random.split(key, 3)
    x = jax.random.normal(kx, (B, dim, H, W), jnp.float32)
    gamma = 1.0 + 0.05 * jax.random.normal(kg, (dim,), jnp.float32)
    beta = 0.05 * jax.random.normal(kb, (dim,), jnp.float32)

    fwd = jax.jit(functools.partial(patch_embed_head, patch_size=patch_size))
    out = jax.block_until_ready(fwd(x, gamma, beta))

    Wh = (H + (-H) % patch_size) // patch_size
    Ww = (W + (-W) % patch_size) // patch_size
    assert out.shape == (B, dim, Wh, Ww), out.shape
    assert bool(jnp.all(jnp.isfinite(out)))

    ref = patch_embed_head_ref(x, gamma, beta, patch_size)
    err = float(jnp.max(jnp.abs(out - ref)))
    assert err < 1e-4, f"max abs err {err}"
    print("KERNEL_OK")
</pallas_src>

<mosaic_0001>
module attributes {stable_mosaic.version = 11 : i64} {
  func.func @_pool_ln_kernel(%arg0: i32, %arg1: memref<128x16x96xf32, #tpu.memory_space<vmem>>, %arg2: memref<1x96xf32, #tpu.memory_space<vmem>>, %arg3: memref<1x96xf32, #tpu.memory_space<vmem>>, %arg4: memref<128x96xf32, #tpu.memory_space<vmem>>) attributes {dimension_semantics = [#tpu.dimension_semantics<parallel>], iteration_bounds = array<i64: 1>, scalar_prefetch = 0 : i64, scratch_operands = 0 : i64, tpu.core_type = #tpu.core_type<tc>, window_params = [{transform_indices = @transform_0, window_bounds = array<i64: 128, 16, 96>}, {pipeline_mode = #tpu.pipeline_mode<synchronous>, transform_indices = @transform_1, window_bounds = array<i64: 1, 96>}, {pipeline_mode = #tpu.pipeline_mode<synchronous>, transform_indices = @transform_2, window_bounds = array<i64: 1, 96>}, {transform_indices = @transform_3, window_bounds = array<i64: 128, 96>}]} {
    %c0 = arith.constant 0 : index
    %c0_0 = arith.constant 0 : index
    %c0_1 = arith.constant 0 : index
    %0 = vector.load %arg1[%c0, %c0_0, %c0_1] : memref<128x16x96xf32, #tpu.memory_space<vmem>>, vector<128x16x96xf32>
    %cst = arith.constant dense<0xFF800000> : vector<128x96xf32>
    %1 = vector.multi_reduction <maximumf>, %0, %cst [1] : vector<128x16x96xf32> to vector<128x96xf32>
    %cst_2 = arith.constant dense<0.000000e+00> : vector<128x96xf32>
    %2 = vector.multi_reduction <add>, %0, %cst_2 [1] : vector<128x16x96xf32> to vector<128x96xf32>
    %cst_3 = arith.constant 6.250000e-02 : f32
    %3 = vector.broadcast %cst_3 : f32 to vector<128x96xf32>
    %4 = arith.mulf %2, %3 : vector<128x96xf32>
    %5 = arith.addf %1, %4 : vector<128x96xf32>
    %cst_4 = arith.constant 5.000000e-01 : f32
    %6 = vector.broadcast %cst_4 : f32 to vector<128x96xf32>
    %7 = arith.mulf %6, %5 : vector<128x96xf32>
    %cst_5 = arith.constant dense<0.000000e+00> : vector<128xf32>
    %8 = vector.multi_reduction <add>, %7, %cst_5 [1] : vector<128x96xf32> to vector<128xf32>
    %9 = vector.shape_cast %8 : vector<128xf32> to vector<128x1xf32>
    %cst_6 = arith.constant 9.600000e+01 : f32
    %10 = vector.broadcast %cst_6 : f32 to vector<128x1xf32>
    %11 = arith.divf %9, %10 : vector<128x1xf32>
    %12 = vector.broadcast %11 : vector<128x1xf32> to vector<128x96xf32>
    %13 = arith.subf %7, %12 : vector<128x96xf32>
    %14 = vector.broadcast %11 : vector<128x1xf32> to vector<128x96xf32>
    %15 = arith.subf %7, %14 : vector<128x96xf32>
    %16 = arith.mulf %13, %15 : vector<128x96xf32>
    %cst_7 = arith.constant dense<0.000000e+00> : vector<128xf32>
    %17 = vector.multi_reduction <add>, %16, %cst_7 [1] : vector<128x96xf32> to vector<128xf32>
    %18 = vector.shape_cast %17 : vector<128xf32> to vector<128x1xf32>
    %cst_8 = arith.constant 9.600000e+01 : f32
    %19 = vector.broadcast %cst_8 : f32 to vector<128x1xf32>
    %20 = arith.divf %18, %19 : vector<128x1xf32>
    %21 = vector.broadcast %11 : vector<128x1xf32> to vector<128x96xf32>
    %22 = arith.subf %7, %21 : vector<128x96xf32>
    %cst_9 = arith.constant 9.99999974E-6 : f32
    %23 = vector.broadcast %cst_9 : f32 to vector<128x1xf32>
    %24 = arith.addf %20, %23 : vector<128x1xf32>
    %25 = math.rsqrt %24 : vector<128x1xf32>
    %26 = vector.broadcast %25 : vector<128x1xf32> to vector<128x96xf32>
    %27 = arith.mulf %22, %26 : vector<128x96xf32>
    %c0_10 = arith.constant 0 : index
    %c0_11 = arith.constant 0 : index
    %28 = vector.load %arg2[%c0_10, %c0_11] : memref<1x96xf32, #tpu.memory_space<vmem>>, vector<1x96xf32>
    %29 = vector.broadcast %28 : vector<1x96xf32> to vector<128x96xf32>
    %30 = arith.mulf %27, %29 : vector<128x96xf32>
    %c0_12 = arith.constant 0 : index
    %c0_13 = arith.constant 0 : index
    %31 = vector.load %arg3[%c0_12, %c0_13] : memref<1x96xf32, #tpu.memory_space<vmem>>, vector<1x96xf32>
    %32 = vector.broadcast %31 : vector<1x96xf32> to vector<128x96xf32>
    %33 = arith.addf %30, %32 : vector<128x96xf32>
    %c0_14 = arith.constant 0 : index
    %c0_15 = arith.constant 0 : index
    %34 = vector.load %arg4[%c0_14, %c0_15] : memref<128x96xf32, #tpu.memory_space<vmem>>, vector<128x96xf32>
    tpu.vector_store %arg4[%c0_14, %c0_15], %33 {strides = array<i32>} : memref<128x96xf32, #tpu.memory_space<vmem>>, vector<128x96xf32>,
    return
  }
  func.func @transform_0(%arg0: i32) -> (i32, i32, i32) {
    %c0_i32 = arith.constant 0 : i32
    %c0_i32_0 = arith.constant 0 : i32
    %c0_i32_1 = arith.constant 0 : i32
    return %arg0, %c0_i32, %c0_i32_0 : i32, i32, i32
  }
  func.func @transform_1(%arg0: i32) -> (i32, i32) {
    %c0_i32 = arith.constant 0 : i32
    %c0_i32_0 = arith.constant 0 : i32
    %c0_i32_1 = arith.constant 0 : i32
    return %c0_i32, %c0_i32_0 : i32, i32
  }
  func.func @transform_2(%arg0: i32) -> (i32, i32) {
    %c0_i32 = arith.constant 0 : i32
    %c0_i32_0 = arith.constant 0 : i32
    %c0_i32_1 = arith.constant 0 : i32
    return %c0_i32, %c0_i32_0 : i32, i32
  }
  func.func @transform_3(%arg0: i32) -> (i32, i32) {
    %c0_i32 = arith.constant 0 : i32
    %c0_i32_0 = arith.constant 0 : i32
    return %arg0, %c0_i32 : i32, i32
  }
}

</mosaic_0001>

<bundles_post_ra>
// kernel: patch_embed_head.1
= control target key start
LH: loop header
LB: loop body
LE: loop exit
PB: predicated region body
PF: predicated region fallthrough
CT: control target
= control target key end

     0   :  { %vm271_vm0 = vcmask 785408   ;;  %s10408_s0 = inlined_call_operand.vmem [shape: f32[128,16,96], index: 0, kind: input, shape index: {}]   ;;  %s10409_s1 = inlined_call_operand.vmem [shape: f32[1,96], index: 1, kind: input, shape index: {}]   ;;  %s10410_s2 = inlined_call_operand.vmem [shape: f32[1,96], index: 2, kind: input, shape index: {}]   ;;  %s10411_s3 = inlined_call_operand.hbm [shape: f32[128,96], index: 3, kind: output, shape index: {}]  }
   0x1   :  { %v5405_v0 = vld [vmem:[%s10408_s0 + $0x100] sm:$0xff]  ;;  %v5410_v1 = vld [vmem:[%s10408_s0 + $0x108] sm:$0xff]  ;;  %v5415_v2 = vld [vmem:[%s10408_s0 + $0x110] sm:$0xff] }
   0x2   :  { %v5420_v3 = vld [vmem:[%s10408_s0 + $0x118] sm:$0xff]  ;;  %v5425_v4 = vld [vmem:[%s10408_s0 + $0x120] sm:$0xff]  ;;  %v5430_v5 = vld [vmem:[%s10408_s0 + $0x128] sm:$0xff]  ;;  %v416_v6 = vsel %vm271_vm0, %v5405_v0, -inf  ;;  %v417_v7 = vsel %vm271_vm0, %v5410_v1, -inf  ;;  %v425_v8 = vsel %vm271_vm0, %v5415_v2, -inf }
   0x3   :  { %v5441_v9 = vld [vmem:[%s10408_s0 + $0x130] sm:$0xff]  ;;  %v5446_v10 = vld [vmem:[%s10408_s0 + $0x138] sm:$0xff]  ;;  %v418_v11 = vmax.f32 %v416_v6, %v417_v7  ;;  %v426_v12 = vsel %vm271_vm0, %v5420_v3, -inf  ;;  %v434_v13 = vsel %vm271_vm0, %v5425_v4, -inf  ;;  %v435_v14 = vsel %vm271_vm0, %v5430_v5, -inf  ;;  %v5457_v15 = vld [vmem:[%s10408_s0 + $0x140] sm:$0xff] }
   0x4   :  { %v5462_v16 = vld [vmem:[%s10408_s0 + $0x148] sm:$0xff]  ;;  %v427_v17 = vmax.f32 %v425_v8, %v426_v12  ;;  %v436_v18 = vmax.f32 %v434_v13, %v435_v14  ;;  %v443_v19 = vsel %vm271_vm0, %v5441_v9, -inf  ;;  %v444_v20 = vsel %vm271_vm0, %v5446_v10, -inf  ;;  %v5471_v21 = vld [vmem:[%s10408_s0 + $0x150] sm:$0xff]  ;;  %v5480_v26 = vld [vmem:[%s10408_s0 + $0x158] sm:$0xff] }
   0x5   :  { %v419_v22 = vrot.slane %v418_v11, 4  ;;  %v445_v23 = vmax.f32 %v443_v19, %v444_v20  ;;  %v452_v24 = vsel %vm271_vm0, %v5457_v15, -inf  ;;  %v453_v25 = vsel %vm271_vm0, %v5462_v16, -inf  ;;  %v5485_v27 = vld [vmem:[%s10408_s0 + $0x160] sm:$0xff]  ;;  %v5496_v36 = vld [vmem:[%s10408_s0 + $0x168] sm:$0xff]  ;;  %v5501_v37 = vld [vmem:[%s10408_s0 + $0x170] sm:$0xff] }
   0x6   :  { %v428_v28 = vrot.slane %v427_v17, 4  ;;  %v437_v29 = vrot.slane %v436_v18, 4  ;;  %v454_v30 = vmax.f32 %v452_v24, %v453_v25  ;;  %v461_v31 = vsel %vm271_vm0, %v5471_v21, -inf  ;;  %v5510_v46 = vld [vmem:[%s10408_s0 + $0x178] sm:$0xff] }
   0x7   :  { %v420_v32 = vmax.f32 %v418_v11, %v419_v22  ;;  %v446_v33 = vrot.slane %v445_v23, 4  ;;  %v462_v34 = vsel %vm271_vm0, %v5480_v26, -inf  ;;  %v470_v35 = vsel %vm271_vm0, %v5485_v27, -inf }
   0x8   :  { %v429_v38 = vmax.f32 %v427_v17, %v428_v28  ;;  %v438_v39 = vmax.f32 %v436_v18, %v437_v29  ;;  %v455_v40 = vrot.slane %v454_v30, 4  ;;  %v463_v41 = vmax.f32 %v461_v31, %v462_v34 }
   0x9   :  { %v421_v42 = vrot.slane %v420_v32, 2  ;;  %v447_v43 = vmax.f32 %v445_v23, %v446_v33  ;;  %v471_v44 = vsel %vm271_vm0, %v5496_v36, -inf  ;;  %v479_v45 = vsel %vm271_vm0, %v5501_v37, -inf }
   0xa   :  { %v430_v47 = vrot.slane %v429_v38, 2  ;;  %v439_v48 = vrot.slane %v438_v39, 2  ;;  %v456_v49 = vmax.f32 %v454_v30, %v455_v40  ;;  %v464_v50 = vrot.slane %v463_v41, 4 }
   0xb   :  { %v422_v51 = vmax.f32 %v420_v32, %v421_v42  ;;  %v448_v52 = vrot.slane %v447_v43, 2  ;;  %v472_v53 = vmax.f32 %v470_v35, %v471_v44  ;;  %v480_v54 = vsel %vm271_vm0, %v5510_v46, -inf }
   0xc   :  { %v431_v55 = vmax.f32 %v429_v38, %v430_v47  ;;  %v440_v56 = vmax.f32 %v438_v39, %v439_v48  ;;  %v457_v57 = vrot.slane %v456_v49, 2  ;;  %v465_v58 = vmax.f32 %v463_v41, %v464_v50 }
   0xd   :  { %v423_v59 = vrot.slane %v422_v51, 1  ;;  %v449_v60 = vmax.f32 %v447_v43, %v448_v52  ;;  %v473_v61 = vrot.slane %v472_v53, 4  ;;  %v481_v62 = vmax.f32 %v479_v45, %v480_v54 }
   0xe   :  { %v432_v63 = vrot.slane %v431_v55, 1  ;;  %v441_v6 = vrot.slane %v440_v56, 1  ;;  %v458_v7 = vmax.f32 %v456_v49, %v457_v57  ;;  %v466_v8 = vrot.slane %v465_v58, 2 }
   0xf   :  { %v5514_v11 = vmax.f32 %v422_v51, %v423_v59  ;;  %v450_v12 = vrot.slane %v449_v60, 1  ;;  %v474_v13 = vmax.f32 %v472_v53, %v473_v61  ;;  %v482_v14 = vrot.slane %v481_v62, 4 }
  0x10   :  { %v5516_v17 = vmax.f32 %v431_v55, %v432_v63  ;;  %v5518_v18 = vmax.f32 %v440_v56, %v441_v6  ;;  %v459_v19 = vrot.slane %v458_v7, 1  ;;  %v467_v20 = vmax.f32 %v465_v58, %v466_v8 }
  0x11   :  { %v5520_v22 = vmax.f32 %v449_v60, %v450_v12  ;;  %v475_v23 = vrot.slane %v474_v13, 2  ;;  %v483_v24 = vmax.f32 %v481_v62, %v482_v14  ;;  %v1568_v25 = vsel %vm271_vm0, %v5405_v0, 0.0 }
  0x12   :  { %v5524_v28 = vmax.f32 %v458_v7, %v459_v19  ;;  %v468_v29 = vrot.slane %v467_v20, 1  ;;  %v1569_v30 = vsel %vm271_vm0, %v5410_v1, 0.0  ;;  %v1577_v31 = vsel %vm271_vm0, %v5415_v2, 0.0 }
  0x13   :  { %v476_v32 = vmax.f32 %v474_v13, %v475_v23  ;;  %v484_v33 = vrot.slane %v483_v24, 2  ;;  %v1570_v34 = vadd.f32 %v1569_v30, %v1568_v25  ;;  %v1578_v35 = vsel %vm271_vm0, %v5420_v3, 0.0 }
  0x14   :  { %v5532_v38 = vmax.f32 %v467_v20, %v468_v29  ;;  %v1579_v39 = vadd.f32 %v1578_v35, %v1577_v31  ;;  %v1586_v0 = vsel %vm271_vm0, %v5425_v4, 0.0  ;;  %v1587_v40 = vsel %vm271_vm0, %v5430_v5, 0.0 }
  0x15   :  { %v477_v41 = vrot.slane %v476_v32, 1  ;;  %v485_v1 = vmax.f32 %v483_v24, %v484_v33  ;;  %v1571_v42 = vrot.slane %v1570_v34, 4  ;;  %v1588_v43 = vadd.f32 %v1587_v40, %v1586_v0 }
  0x16   :  { %v1580_v2 = vrot.slane %v1579_v39, 4  ;;  %v1595_v44 = vsel %vm271_vm0, %v5441_v9, 0.0  ;;  %v1596_v3 = vsel %vm271_vm0, %v5446_v10, 0.0  ;;  %v1604_v45 = vsel %vm271_vm0, %v5457_v15, 0.0 }
  0x17   :  { %v5544_v47 = vmax.f32 %v476_v32, %v477_v41  ;;  %v486_v4 = vrot.slane %v485_v1, 1  ;;  %v1572_v48 = vadd.f32 %v1571_v42, %v1570_v34  ;;  %v1589_v49 = vrot.slane %v1588_v43, 4 }
  0x18   :  { %8 = vsyncpa [#allocation3], 0  ;;  %v1581_v5 = vadd.f32 %v1580_v2, %v1579_v39  ;;  %v1597_v50 = vadd.f32 %v1596_v3, %v1595_v44  ;;  %v1605_v51 = vsel %vm271_vm0, %v5462_v16, 0.0  ;;  %v1613_v9 = vsel %vm271_vm0, %v5471_v21, 0.0 }
  0x19   :  { %v5550_v52 = vmax.f32 %v485_v1, %v486_v4  ;;  %v1573_v10 = vrot.slane %v1572_v48, 2  ;;  %v1590_v53 = vadd.f32 %v1589_v49, %v1588_v43  ;;  %v1606_v54 = vadd.f32 %v1605_v51, %v1604_v45 }
  0x1a   :  { %v1582_v15 = vrot.slane %v1581_v5, 2  ;;  %v1598_v55 = vrot.slane %v1597_v50, 4  ;;  %v1614_v56 = vsel %vm271_vm0, %v5480_v26, 0.0  ;;  %v1622_v57 = vsel %vm271_vm0, %v5485_v27, 0.0 }
  0x1b   :  { %v1574_v58 = vadd.f32 %v1573_v10, %v1572_v48  ;;  %v1591_v59 = vrot.slane %v1590_v53, 2  ;;  %v1607_v60 = vrot.slane %v1606_v54, 4  ;;  %v1615_v16 = vadd.f32 %v1614_v56, %v1613_v9 }
  0x1c   :  { %v1583_v61 = vadd.f32 %v1582_v15, %v1581_v5  ;;  %v1599_v62 = vadd.f32 %v1598_v55, %v1597_v50  ;;  %v1623_v21 = vsel %vm271_vm0, %v5496_v36, 0.0  ;;  %v1631_v63 = vsel %vm271_vm0, %v5501_v37, 0.0 }
  0x1d   :  { %v1575_v6 = vrot.slane %v1574_v58, 1  ;;  %v1592_v7 = vadd.f32 %v1591_v59, %v1590_v53  ;;  %v1608_v8 = vadd.f32 %v1607_v60, %v1606_v54  ;;  %v1616_v12 = vrot.slane %v1615_v16, 4 }
  0x1e   :  { %v1584_v26 = vrot.slane %v1583_v61, 1  ;;  %v1600_v13 = vrot.slane %v1599_v62, 2  ;;  %v1624_v14 = vadd.f32 %v1623_v21, %v1622_v57  ;;  %v1632_v27 = vsel %vm271_vm0, %v5510_v46, 0.0 }
  0x1f   :  { %v1576_v19 = vadd.f32 %v1575_v6, %v1574_v58  ;;  %v1593_v20 = vrot.slane %v1592_v7, 1  ;;  %v1609_v23 = vrot.slane %v1608_v8, 2  ;;  %v1617_v24 = vadd.f32 %v1616_v12, %v1615_v16  ;;  %v5578_v58 = vld [vmem:[%s10408_s0] sm:$0xff] }
  0x20   :  { %v1585_v25 = vadd.f32 %v1584_v26, %v1583_v61  ;;  %v1601_v29 = vadd.f32 %v1600_v13, %v1599_v62  ;;  %v1625_v36 = vrot.slane %v1624_v14, 4  ;;  %v1633_v30 = vadd.f32 %v1632_v27, %v1631_v63 }
  0x21   :  { %vm3088_vm1 = vcmask 1041409   ;;  %v1594_v37 = vadd.f32 %v1593_v20, %v1592_v7  ;;  %v1610_v31 = vadd.f32 %v1609_v23, %v1608_v8  ;;  %v1618_v32 = vrot.slane %v1617_v24, 2  ;;  %v5609_v8 = vld [vmem:[%s10408_s0 + $0x18] sm:$0xff] }
  0x22   :  { %v2592_v33 = vmul.f32 0.0625, %v1576_v19  ;;  %vm3090_vm2 = vcmask 1042434   ;;  %v1602_v34 = vrot.slane %v1601_v29, 1  ;;  %v1626_v35 = vadd.f32 %v1625_v36, %v1624_v14  ;;  %v5619_v19 = vld [vmem:[%s10408_s0 + $0x20] sm:$0xff] }
  0x23   :  { %v1634_v39 = vrot.slane %v1633_v30, 4  ;;  %v2593_v0 = vmul.f32 0.0625, %v1585_v25  ;;  %v1611_v40 = vrot.slane %v1610_v31, 1  ;;  %v1619_v46 = vadd.f32 %v1618_v32, %v1617_v24  ;;  %v5628_v24 = vld [vmem:[%s10408_s0 + $0x28] sm:$0xff] }
  0x24   :  { %v2594_v41 = vmul.f32 0.0625, %v1594_v37  ;;  %v2720_v1 = vadd.f32 %v2592_v33, %v5514_v11  ;;  %v1603_v42 = vadd.f32 %v1602_v34, %v1601_v29  ;;  %v1627_v43 = vrot.slane %v1626_v35, 2  ;;  %v5652_v34 = vld [vmem:[%s10408_s0 + $0x40] sm:$0xff] }
  0x25   :  { %v1635_v2 = vadd.f32 %v1634_v39, %v1633_v30  ;;  %v2721_v44 = vadd.f32 %v2593_v0, %v5516_v17  ;;  %v1612_v3 = vadd.f32 %v1611_v40, %v1610_v31  ;;  %v1620_v45 = vrot.slane %v1619_v46, 1  ;;  %v5643_v31 = vld [vmem:[%s10408_s0 + $0x38] sm:$0xff] }
  0x26   :  { %v2722_v4 = vadd.f32 %v2594_v41, %v5518_v18  ;;  %v5565_v48 = vmul.f32 0.5, %v2720_v1  ;;  %v1628_v49 = vadd.f32 %v1627_v43, %v1626_v35  ;;  %v2595_v50 = vmul.f32 0.0625, %v1603_v42  ;;  %v5663_v41 = vld [vmem:[%s10408_s0 + $0x48] sm:$0xff]  ;;  %v5670_v43 = vld [vmem:[%s10408_s0 + $0x50] sm:$0xff] }
  0x27   :  { %v1636_v5 = vrot.slane %v1635_v2, 2  ;;  %v5567_v51 = vmul.f32 0.5, %v2721_v44  ;;  %v1621_v9 = vadd.f32 %v1620_v45, %v1619_v46  ;;  %v2596_v10 = vmul.f32 0.0625, %v1612_v3 }
  0x28   :  { %v5569_v53 = vmul.f32 0.5, %v2722_v4  ;;  %vm3092_vm3 = vcmask 1043459   ;;  %v1629_v11 = vrot.slane %v1628_v49, 1  ;;  %v2723_v17 = vadd.f32 %v2595_v50, %v5520_v22 }
  0x29   :  { %v1637_v54 = vadd.f32 %v1636_v5, %v1635_v2  ;;  %vm3094_vm4 = vcmask 1044484   ;;  %v2597_v15 = vmul.f32 0.0625, %v1621_v9  ;;  %v2724_v18 = vadd.f32 %v2596_v10, %v5524_v28  ;;  %v5589_v28 = vld [vmem:[%s10408_s0 + $0x8] sm:$0xff]  ;;  %v5682_v10 = vld [vmem:[%s10408_s0 + $0x58] sm:$0xff] }
  0x2a   :  { %vm3096_vm5 = vcmask 1045509   ;;  %vm3098_vm6 = vcmask 1046534   ;;  %v1630_v55 = vadd.f32 %v1629_v11, %v1628_v49  ;;  %v5573_v57 = vmul.f32 0.5, %v2723_v17  ;;  %v5687_v11 = vld [vmem:[%s10408_s0 + $0x60] sm:$0xff] }
  0x2b   :  { %v1638_v56 = vrot.slane %v1637_v54, 1  ;;  %vm3100_vm7 = vcmask 1047559   ;;  %v2725_v59 = vadd.f32 %v2597_v15, %v5532_v38  ;;  %v5581_v60 = vmul.f32 0.5, %v2724_v18  ;;  %v5598_v38 = vld [vmem:[%s10408_s0 + $0x10] sm:$0xff] }
  0x2c   :  { %v3109_v22 = vsel %vm3088_vm1, %v5567_v51, %v5565_v48  ;;  %v272_v16 = vsel %vm271_vm0, %v5578_v58, -inf  ;;  %v2598_v62 = vmul.f32 0.0625, %v1630_v55  ;;  %v273_v63 = vsel %vm271_vm0, %v5589_v28, -inf }
  0x2d   :  { %v1639_v61 = vadd.f32 %v1638_v56, %v1637_v54  ;;  %v3110_v21 = vsel %vm3090_vm2, %v5569_v53, %v3109_v22  ;;  %v5602_v6 = vmul.f32 0.5, %v2725_v59  ;;  %v274_v12 = vmax.f32 %v272_v16, %v273_v63  ;;  %v5696_v22 = vld [vmem:[%s10408_s0 + $0x68] sm:$0xff]  ;;  %v5701_v16 = vld [vmem:[%s10408_s0 + $0x70] sm:$0xff] }
  0x2e   :  { %v3111_v7 = vsel %vm3092_vm3, %v5573_v57, %v3110_v21  ;;  %v281_v26 = vsel %vm271_vm0, %v5598_v38, -inf  ;;  %v2726_v14 = vadd.f32 %v2598_v62, %v5544_v47  ;;  %v282_v20 = vsel %vm271_vm0, %v5609_v8, -inf  ;;  %v5633_v47 = vld [vmem:[%s10408_s0 + $0x30] sm:$0xff] }
  0x2f   :  { %v2599_v13 = vmul.f32 0.0625, %v1639_v61  ;;  %v3112_v27 = vsel %vm3094_vm4, %v5581_v60, %v3111_v7  ;;  %v275_v25 = vrot.slane %v274_v12, 4  ;;  %v283_v29 = vmax.f32 %v281_v26, %v282_v20 }
  0x30   :  { %v3113_v23 = vsel %vm3096_vm5, %v5602_v6, %v3112_v27  ;;  %v290_v36 = vsel %vm271_vm0, %v5619_v19, -inf  ;;  %v5638_v37 = vmul.f32 0.5, %v2726_v14  ;;  %v291_v32 = vsel %vm271_vm0, %v5628_v24, -inf  ;;  %v5710_v14 = vld [vmem:[%s10408_s0 + $0x78] sm:$0xff] }
  0x31   :  { %v2727_v30 = vadd.f32 %v2599_v13, %v5550_v52  ;;  %v299_v33 = vsel %vm271_vm0, %v5633_v47, -inf  ;;  %v276_v35 = vmax.f32 %v274_v12, %v275_v25  ;;  %v284_v52 = vrot.slane %v283_v29, 4 }
  0x32   :  { %v292_v39 = vmax.f32 %v290_v36, %v291_v32  ;;  %v300_v0 = vsel %vm271_vm0, %v5643_v31, -inf  ;;  %v3114_v46 = vsel %vm3098_vm6, %v5638_v37, %v3113_v23  ;;  %v308_v42 = vsel %vm271_vm0, %v5652_v34, -inf }
  0x33   :  { %v5656_v40 = vmul.f32 0.5, %v2727_v30  ;;  %v301_v1 = vmax.f32 %v299_v33, %v300_v0  ;;  %v277_v2 = vrot.slane %v276_v35, 2  ;;  %v285_v44 = vmax.f32 %v283_v29, %v284_v52 }
  0x34   :  { %v293_v3 = vrot.slane %v292_v39, 4  ;;  %v309_v45 = vsel %vm271_vm0, %v5663_v41, -inf  ;;  %v317_v50 = vsel %vm271_vm0, %v5670_v43, -inf  ;;  %v318_v56 = vsel %vm271_vm0, %v5682_v10, -inf }
  0x35   :  { %v3115_v4 = vsel %vm3100_vm7, %v5656_v40, %v3114_v46  ;;  %v302_v49 = vrot.slane %v301_v1, 4  ;;  %v310_v5 = vmax.f32 %v308_v42, %v309_v45  ;;  %v278_v54 = vmax.f32 %v276_v35, %v277_v2 }
  0x36   :  { %v3229_v9 = vsel %vm271_vm0, %v3115_v4, 0.0  ;;  %v286_v17 = vrot.slane %v285_v44, 2  ;;  %v294_v15 = vmax.f32 %v292_v39, %v293_v3  ;;  %v326_v59 = vsel %vm271_vm0, %v5687_v11, -inf }
  0x37   :  { %3230 = vadd.xlane.f32.xlu1 %v3229_v9  ;;  %v303_v18 = vmax.f32 %v301_v1, %v302_v49  ;;  %v311_v55 = vrot.slane %v310_v5, 4  ;;  %v279_v61 = vrot.slane %v278_v54, 1  ;;  %v319_v63 = vmax.f32 %v317_v50, %v318_v56 }
  0x38   :  { %v287_v62 = vmax.f32 %v285_v44, %v286_v17  ;;  %v295_v21 = vrot.slane %v294_v15, 2  ;;  %v327_v26 = vsel %vm271_vm0, %v5696_v22, -inf  ;;  %v335_v13 = vsel %vm271_vm0, %v5701_v16, -inf }
  0x39   :  { %v304_v7 = vrot.slane %v303_v18, 2  ;;  %v312_v12 = vmax.f32 %v310_v5, %v311_v55  ;;  %v5712_v27 = vmax.f32 %v278_v54, %v279_v61  ;;  %v320_v25 = vrot.slane %v319_v63, 4 }
  0x3a   :  { %v288_v20 = vrot.slane %v287_v62, 1  ;;  %v296_v23 = vmax.f32 %v294_v15, %v295_v21  ;;  %v328_v30 = vmax.f32 %v326_v59, %v327_v26  ;;  %v336_v32 = vsel %vm271_vm0, %v5710_v14, -inf }
  0x3b   :  { %v305_v29 = vmax.f32 %v303_v18, %v304_v7  ;;  %v313_v36 = vrot.slane %v312_v12, 2  ;;  %v321_v52 = vmax.f32 %v319_v63, %v320_v25  ;;  %v337_v39 = vmax.f32 %v335_v13, %v336_v32 }
  0x3c   :  { %v5716_v33 = vmax.f32 %v287_v62, %v288_v20  ;;  %v297_v35 = vrot.slane %v296_v23, 1  ;;  %v329_v1 = vrot.slane %v328_v30, 4  ;;  %v1424_v42 = vsel %vm271_vm0, %v5578_v58, 0.0 }
  0x3d   :  { %v306_v0 = vrot.slane %v305_v29, 1  ;;  %v314_v46 = vmax.f32 %v312_v12, %v313_v36  ;;  %v322_v44 = vrot.slane %v321_v52, 2  ;;  %v338_v3 = vrot.slane %v337_v39, 4 }
  0x3e   :  { %v5720_v2 = vmax.f32 %v296_v23, %v297_v35  ;;  %v1425_v45 = vsel %vm271_vm0, %v5589_v28, 0.0  ;;  %v330_v5 = vmax.f32 %v328_v30, %v329_v1  ;;  %v1433_v17 = vsel %vm271_vm0, %v5598_v38, 0.0 }
  0x3f   :  { %v5724_v4 = vmax.f32 %v305_v29, %v306_v0  ;;  %v315_v49 = vrot.slane %v314_v46, 1  ;;  %v1426_v50 = vadd.f32 %v1425_v45, %v1424_v42  ;;  %v323_v9 = vmax.f32 %v321_v52, %v322_v44 }
  0x40   :  { %v339_v54 = vmax.f32 %v337_v39, %v338_v3  ;;  %v1434_v58 = vsel %vm271_vm0, %v5609_v8, 0.0  ;;  %v331_v18 = vrot.slane %v330_v5, 2  ;;  %v1442_v61 = vsel %vm271_vm0, %v5619_v19, 0.0 }
  0x41   :  { %v5730_v15 = vmax.f32 %v314_v46, %v315_v49  ;;  %v1427_v55 = vrot.slane %v1426_v50, 4  ;;  %v1435_v56 = vadd.f32 %v1434_v58, %v1433_v17  ;;  %v324_v59 = vrot.slane %v323_v9, 1 }
  0x42   :  { %v340_v28 = vrot.slane %v339_v54, 2  ;;  %v1443_v62 = vsel %vm271_vm0, %v5628_v24, 0.0  ;;  %v332_v21 = vmax.f32 %v330_v5, %v331_v18  ;;  %v1451_v26 = vsel %vm271_vm0, %v5633_v47, 0.0 }
  0x43   :  { %v1428_v63 = vadd.f32 %v1427_v55, %v1426_v50  ;;  %v1436_v7 = vrot.slane %v1435_v56, 4  ;;  %v1444_v38 = vadd.f32 %v1443_v62, %v1442_v61  ;;  %v5736_v12 = vmax.f32 %v323_v9, %v324_v59 }
  0x44   :  { %v341_v8 = vmax.f32 %v339_v54, %v340_v28  ;;  %v1452_v13 = vsel %vm271_vm0, %v5643_v31, 0.0  ;;  %v333_v20 = vrot.slane %v332_v21, 1  ;;  %v1460_v24 = vsel %vm271_vm0, %v5652_v34, 0.0 }
  0x45   :  { %v1429_v23 = vrot.slane %v1428_v63, 2  ;;  %v1437_v25 = vadd.f32 %v1436_v7, %v1435_v56  ;;  %v1445_v19 = vrot.slane %v1444_v38, 4  ;;  %v1453_v36 = vadd.f32 %v1452_v13, %v1451_v26 }
  0x46   :  { %v342_v29 = vrot.slane %v341_v8, 1  ;;  %v1461_v30 = vsel %vm271_vm0, %v5663_v41, 0.0  ;;  %v5746_v32 = vmax.f32 %v332_v21, %v333_v20  ;;  %v1469_v46 = vsel %vm271_vm0, %v5670_v43, 0.0 }
  0x47   :  { %v1430_v35 = vadd.f32 %v1429_v23, %v1428_v63  ;;  %v1438_v52 = vrot.slane %v1437_v25, 2  ;;  %v1446_v47 = vadd.f32 %v1445_v19, %v1444_v38  ;;  %v1454_v31 = vrot.slane %v1453_v36, 4 }
  0x48   :  { %v5748_v39 = vmax.f32 %v341_v8, %v342_v29  ;;  %v1462_v0 = vadd.f32 %v1461_v30, %v1460_v24  ;;  %v1470_v34 = vsel %vm271_vm0, %v5682_v10, 0.0  ;;  %v1478_v49 = vsel %vm271_vm0, %v5687_v11, 0.0 }
  0x49   :  { %v1431_v1 = vrot.slane %v1430_v35, 1  ;;  %v1439_v42 = vadd.f32 %v1438_v52, %v1437_v25  ;;  %v1447_v44 = vrot.slane %v1446_v47, 2  ;;  %v1455_v3 = vadd.f32 %v1454_v31, %v1453_v36 }
  0x4a   :  { %v1463_v41 = vrot.slane %v1462_v0, 4  ;;  %v1471_v45 = vadd.f32 %v1470_v34, %v1469_v46  ;;  %v1479_v54 = vsel %vm271_vm0, %v5696_v22, 0.0  ;;  %v1487_v10 = vsel %vm271_vm0, %v5701_v16, 0.0 }
  0x4b   :  { %v1432_v5 = vadd.f32 %v1431_v1, %v1430_v35  ;;  %v1440_v50 = vrot.slane %v1439_v42, 1  ;;  %v1448_v9 = vadd.f32 %v1447_v44, %v1446_v47  ;;  %v1456_v17 = vrot.slane %v1455_v3, 2 }
  0x4c   :  { %v1464_v43 = vadd.f32 %v1463_v41, %v1462_v0  ;;  %v1472_v58 = vrot.slane %v1471_v45, 4  ;;  %v1480_v18 = vadd.f32 %v1479_v54, %v1478_v49  ;;  %v1488_v59 = vsel %vm271_vm0, %v5710_v14, 0.0  ;;  %v5790_v49 = vld [vmem:[%s10408_s0 + $0x190] sm:$0xff] }
  0x4d   :  { %v1441_v55 = vadd.f32 %v1440_v50, %v1439_v42  ;;  %v1449_v56 = vrot.slane %v1448_v9, 1  ;;  %v1457_v28 = vadd.f32 %v1456_v17, %v1455_v3  ;;  %v1489_v63 = vadd.f32 %v1488_v59, %v1487_v10 }
  0x4e   :  { %v1465_v11 = vrot.slane %v1464_v43, 2  ;;  %v1473_v61 = vadd.f32 %v1472_v58, %v1471_v45  ;;  %v1481_v62 = vrot.slane %v1480_v18, 4  ;;  %v2576_v7 = vmul.f32 0.0625, %v1432_v5  ;;  %v5785_v45 = vld [vmem:[%s10408_s0 + $0x188] sm:$0xff] }
  0x4f   :  { %v1450_v21 = vadd.f32 %v1449_v56, %v1448_v9  ;;  %v2577_v22 = vmul.f32 0.0625, %v1441_v55  ;;  %v1458_v38 = vrot.slane %v1457_v28, 1  ;;  %v1490_v20 = vrot.slane %v1489_v63, 4  ;;  %v5809_v55 = vld [vmem:[%s10408_s0 + $0x1a0] sm:$0xff] }
  0x50   :  { %v1466_v8 = vadd.f32 %v1465_v11, %v1464_v43  ;;  %v1474_v26 = vrot.slane %v1473_v61, 2  ;;  %v1482_v13 = vadd.f32 %v1481_v62, %v1480_v18  ;;  %v2704_v25 = vadd.f32 %v2576_v7, %v5712_v27  ;;  %v5772_v27 = vld [vmem:[%s10408_s0 + $0x180] sm:$0xff]  ;;  %v5804_v18 = vld [vmem:[%s10408_s0 + $0x198] sm:$0xff] }
  0x51   :  { %v2578_v23 = vmul.f32 0.0625, %v1450_v21  ;;  %v2705_v16 = vadd.f32 %v2577_v22, %v5716_v33  ;;  %v1459_v19 = vadd.f32 %v1458_v38, %v1457_v28  ;;  %v1491_v24 = vadd.f32 %v1490_v20, %v1489_v63  ;;  %v5823_v21 = vld [vmem:[%s10408_s0 + $0x1a8] sm:$0xff] }
  0x52   :  { %v1467_v14 = vrot.slane %v1466_v8, 1  ;;  %v1475_v29 = vadd.f32 %v1474_v26, %v1473_v61  ;;  %v1483_v36 = vrot.slane %v1482_v13, 2  ;;  %v5765_v35 = vmul.f32 0.5, %v2704_v25  ;;  %v5840_v25 = vld [vmem:[%s10408_s0 + $0x1b8] sm:$0xff] }
  0x53   :  { %v2706_v30 = vadd.f32 %v2578_v23, %v5720_v2  ;;  %v5767_v52 = vmul.f32 0.5, %v2705_v16  ;;  %v2579_v46 = vmul.f32 0.0625, %v1459_v19  ;;  %v1492_v33 = vrot.slane %v1491_v24, 2 }
  0x54   :  { %v1468_v47 = vadd.f32 %v1467_v14, %v1466_v8  ;;  %v1476_v31 = vrot.slane %v1475_v29, 1  ;;  %v1484_v0 = vadd.f32 %v1483_v36, %v1482_v13  ;;  %v488_v42 = vsel %vm271_vm0, %v5772_v27, -inf  ;;  %v5835_v13 = vld [vmem:[%s10408_s0 + $0x1b0] sm:$0xff] }
  0x55   :  { %v5774_v1 = vmul.f32 0.5, %v2706_v30  ;;  %v3089_v2 = vsel %vm3088_vm1, %v5767_v52, %v5765_v35  ;;  %v2707_v41 = vadd.f32 %v2579_v46, %v5724_v4  ;;  %v1493_v5 = vadd.f32 %v1492_v33, %v1491_v24 }
  0x56   :  { %v1477_v44 = vadd.f32 %v1476_v31, %v1475_v29  ;;  %v1485_v34 = vrot.slane %v1484_v0, 1  ;;  %v2580_v3 = vmul.f32 0.0625, %v1468_v47  ;;  %v489_v9 = vsel %vm271_vm0, %v5785_v45, -inf  ;;  %v5854_v47 = vld [vmem:[%s10408_s0 + $0x1c0] sm:$0xff]  ;;  %v5859_v31 = vld [vmem:[%s10408_s0 + $0x1c8] sm:$0xff] }
  0x57   :  { %v3091_v50 = vsel %vm3090_vm2, %v5774_v1, %v3089_v2  ;;  %v497_v4 = vsel %vm271_vm0, %v5790_v49, -inf  ;;  %v5799_v58 = vmul.f32 0.5, %v2707_v41  ;;  %v1494_v56 = vrot.slane %v1493_v5, 1  ;;  %v5877_v41 = vld [vmem:[%s10408_s0 + $0x1d8] sm:$0xff] }
  0x58   :  { %v1486_v54 = vadd.f32 %v1485_v34, %v1484_v0  ;;  %v2581_v17 = vmul.f32 0.0625, %v1477_v44  ;;  %v2708_v43 = vadd.f32 %v2580_v3, %v5730_v15  ;;  %v490_v10 = vmax.f32 %v488_v42, %v489_v9  ;;  %v5872_v3 = vld [vmem:[%s10408_s0 + $0x1d0] sm:$0xff] }
  0x59   :  { %v498_v59 = vsel %vm271_vm0, %v5804_v18, -inf  ;;  %v506_v15 = vsel %vm271_vm0, %v5809_v55, -inf  ;;  %v3093_v62 = vsel %vm3092_vm3, %v5799_v58, %v3091_v50  ;;  %v1495_v63 = vadd.f32 %v1494_v56, %v1493_v5 }
  0x5a   :  { %v2582_v28 = vmul.f32 0.0625, %v1486_v54  ;;  %v2709_v11 = vadd.f32 %v2581_v17, %v5736_v12  ;;  %v5816_v61 = vmul.f32 0.5, %v2708_v43  ;;  %v491_v7 = vrot.slane %v490_v10, 4 }
  0x5b   :  { %v499_v22 = vmax.f32 %v497_v4, %v498_v59  ;;  %v507_v38 = vsel %vm271_vm0, %v5823_v21, -inf  ;;  %v2583_v23 = vmul.f32 0.0625, %v1495_v63  ;;  %v516_v24 = vsel %vm271_vm0, %v5840_v25, -inf }
  0x5c   :  { %v2710_v8 = vadd.f32 %v2582_v28, %v5746_v32  ;;  %v5828_v26 = vmul.f32 0.5, %v2709_v11  ;;  %v3095_v12 = vsel %vm3094_vm4, %v5816_v61, %v3093_v62  ;;  %v508_v20 = vmax.f32 %v506_v15, %v507_v38  ;;  %v5889_v11 = vld [vmem:[%s10408_s0 + $0x1e0] sm:$0xff] }
  0x5d   :  { %v492_v16 = vmax.f32 %v490_v10, %v491_v7  ;;  %v500_v19 = vrot.slane %v499_v22, 4  ;;  %v515_v32 = vsel %vm271_vm0, %v5835_v13, -inf  ;;  %v2711_v30 = vadd.f32 %v2583_v23, %v5748_v39  ;;  %v5903_v23 = vld [vmem:[%s10408_s0 + $0x1f0] sm:$0xff] }
  0x5e   :  { %v5844_v14 = vmul.f32 0.5, %v2710_v8  ;;  %v3097_v29 = vsel %vm3096_vm5, %v5828_v26, %v3095_v12  ;;  %v509_v36 = vrot.slane %v508_v20, 4  ;;  %v517_v33 = vmax.f32 %v515_v32, %v516_v24 }
  0x5f   :  { %v493_v0 = vrot.slane %v492_v16, 2  ;;  %v501_v46 = vmax.f32 %v499_v22, %v500_v19  ;;  %v524_v39 = vsel %vm271_vm0, %v5854_v47, -inf  ;;  %v525_v44 = vsel %vm271_vm0, %v5859_v31, -inf  ;;  %v5894_v22 = vld [vmem:[%s10408_s0 + $0x1e8] sm:$0xff] }
  0x60   :  { %v3099_v2 = vsel %vm3098_vm6, %v5844_v14, %v3097_v29  ;;  %v510_v42 = vmax.f32 %v508_v20, %v509_v36  ;;  %v5867_v34 = vmul.f32 0.5, %v2711_v30  ;;  %v518_v9 = vrot.slane %v517_v33, 4  ;;  %v5910_v36 = vld [vmem:[%s10408_s0 + $0x1f8] sm:$0xff] }
  0x61   :  { %v494_v5 = vmax.f32 %v492_v16, %v493_v0  ;;  %v502_v50 = vrot.slane %v501_v46, 2  ;;  %v526_v54 = vmax.f32 %v524_v39, %v525_v44  ;;  %v533_v17 = vsel %vm271_vm0, %v5872_v3, -inf }
  0x62   :  { %v511_v4 = vrot.slane %v510_v42, 2  ;;  %v534_v43 = vsel %vm271_vm0, %v5877_v41, -inf  ;;  %v3101_v56 = vsel %vm3100_vm7, %v5867_v34, %v3099_v2  ;;  %v519_v15 = vmax.f32 %v517_v33, %v518_v9 }
  0x63   :  { %v495_v10 = vrot.slane %v494_v5, 1  ;;  %v503_v59 = vmax.f32 %v501_v46, %v502_v50  ;;  %v3223_v28 = vsel %vm271_vm0, %v3101_v56, 0.0  ;;  %v527_v63 = vrot.slane %v526_v54, 4 }
  0x64   :  { %v512_v62 = vmax.f32 %v510_v42, %v511_v4  ;;  %v535_v7 = vmax.f32 %v533_v17, %v534_v43  ;;  %3224 = vadd.xlane.f32.xlu0 %v3223_v28  ;;  %v520_v12 = vrot.slane %v519_v15, 2  ;;  %v542_v20 = vsel %vm271_vm0, %v5889_v11, -inf }
  0x65   :  { %v5896_v38 = vmax.f32 %v494_v5, %v495_v10  ;;  %v504_v8 = vrot.slane %v503_v59, 1  ;;  %v528_v19 = vmax.f32 %v526_v54, %v527_v63  ;;  %v543_v29 = vsel %vm271_vm0, %v5894_v22, -inf }
  0x66   :  { %v513_v16 = vrot.slane %v512_v62, 1  ;;  %v536_v32 = vrot.slane %v535_v7, 4  ;;  %v521_v30 = vmax.f32 %v519_v15, %v520_v12  ;;  %v544_v0 = vmax.f32 %v542_v20, %v543_v29 }
  0x67   :  { %v5912_v24 = vmax.f32 %v503_v59, %v504_v8  ;;  %v551_v46 = vsel %vm271_vm0, %v5903_v23, -inf  ;;  %v529_v2 = vrot.slane %v528_v19, 2  ;;  %v552_v39 = vsel %vm271_vm0, %v5910_v36, -inf }
  0x68   :  { %v5916_v33 = vmax.f32 %v512_v62, %v513_v16  ;;  %v537_v42 = vmax.f32 %v535_v7, %v536_v32  ;;  %v522_v44 = vrot.slane %v521_v30, 1  ;;  %v545_v5 = vrot.slane %v544_v0, 4 }
  0x69   :  { %v553_v50 = vmax.f32 %v551_v46, %v552_v39  ;;  %v1640_v9 = vsel %vm271_vm0, %v5772_v27, 0.0  ;;  %v530_v4 = vmax.f32 %v528_v19, %v529_v2  ;;  %v1641_v17 = vsel %vm271_vm0, %v5785_v45, 0.0 }
  0x6a   :  { %v538_v54 = vrot.slane %v537_v42, 2  ;;  %v1649_v43 = vsel %vm271_vm0, %v5790_v49, 0.0  ;;  %v5926_v56 = vmax.f32 %v521_v30, %v522_v44  ;;  %v546_v10 = vmax.f32 %v544_v0, %v545_v5 }
  0x6b   :  { %v554_v59 = vrot.slane %v553_v50, 4  ;;  %v1642_v15 = vadd.f32 %v1641_v17, %v1640_v9  ;;  %v531_v28 = vrot.slane %v530_v4, 1  ;;  %v1650_v63 = vsel %vm271_vm0, %v5804_v18, 0.0 }
  0x6c   :  { %v539_v62 = vmax.f32 %v537_v42, %v538_v54  ;;  %v1658_v27 = vsel %vm271_vm0, %v5809_v55, 0.0  ;;  %v547_v7 = vrot.slane %v546_v10, 2  ;;  %v1651_v45 = vadd.f32 %v1650_v63, %v1649_v43 }
  0x6d   :  { %v555_v8 = vmax.f32 %v553_v50, %v554_v59  ;;  %v1643_v12 = vrot.slane %v1642_v15, 4  ;;  %v5932_v20 = vmax.f32 %v530_v4, %v531_v28  ;;  %v1659_v16 = vsel %vm271_vm0, %v5823_v21, 0.0 }
  0x6e   :  { %v540_v49 = vrot.slane %v539_v62, 1  ;;  %v1667_v19 = vsel %vm271_vm0, %v5835_v13, 0.0  ;;  %v548_v32 = vmax.f32 %v546_v10, %v547_v7  ;;  %v1652_v18 = vrot.slane %v1651_v45, 4 }
  0x6f   :  { %v556_v29 = vrot.slane %v555_v8, 2  ;;  %v1644_v30 = vadd.f32 %v1643_v12, %v1642_v15  ;;  %v1660_v55 = vadd.f32 %v1659_v16, %v1658_v27  ;;  %v1668_v46 = vsel %vm271_vm0, %v5840_v25, 0.0 }
  0x70   :  { %v5938_v0 = vmax.f32 %v539_v62, %v540_v49  ;;  %v1676_v2 = vsel %vm271_vm0, %v5854_v47, 0.0  ;;  %v549_v42 = vrot.slane %v548_v32, 1  ;;  %v1653_v21 = vadd.f32 %v1652_v18, %v1651_v45 }
  0x71   :  { %v557_v39 = vmax.f32 %v555_v8, %v556_v29  ;;  %v1645_v44 = vrot.slane %v1644_v30, 2  ;;  %v1661_v5 = vrot.slane %v1660_v55, 4  ;;  %v1669_v50 = vadd.f32 %v1668_v46, %v1667_v19 }
  0x72   :  { %v1677_v13 = vsel %vm271_vm0, %v5859_v31, 0.0  ;;  %v1685_v9 = vsel %vm271_vm0, %v5872_v3, 0.0  ;;  %v5948_v4 = vmax.f32 %v548_v32, %v549_v42  ;;  %v1654_v25 = vrot.slane %v1653_v21, 2 }
  0x73   :  { %v558_v54 = vrot.slane %v557_v39, 1  ;;  %v1646_v17 = vadd.f32 %v1645_v44, %v1644_v30  ;;  %v1662_v43 = vadd.f32 %v1661_v5, %v1660_v55  ;;  %v1670_v10 = vrot.slane %v1669_v50, 4 }
  0x74   :  { %v1678_v47 = vadd.f32 %v1677_v13, %v1676_v2  ;;  %v1686_v59 = vsel %vm271_vm0, %v5877_v41, 0.0  ;;  %v1655_v62 = vadd.f32 %v1654_v25, %v1653_v21  ;;  %v1694_v3 = vsel %vm271_vm0, %v5889_v11, 0.0 }
  0x75   :  { %v5952_v15 = vmax.f32 %v557_v39, %v558_v54  ;;  %v1647_v28 = vrot.slane %v1646_v17, 1  ;;  %v1687_v63 = vadd.f32 %v1686_v59, %v1685_v9  ;;  %v1663_v31 = vrot.slane %v1662_v43, 2 }
  0x76   :  { %v1671_v27 = vadd.f32 %v1670_v10, %v1669_v50  ;;  %v1679_v7 = vrot.slane %v1678_v47, 4  ;;  %v1656_v12 = vrot.slane %v1655_v62, 1  ;;  %v1695_v49 = vsel %vm271_vm0, %v5894_v22, 0.0 }
  0x77   :  { %v1648_v8 = vadd.f32 %v1647_v28, %v1646_v17  ;;  %v1688_v45 = vrot.slane %v1687_v63, 4  ;;  %v1664_v16 = vadd.f32 %v1663_v31, %v1662_v43  ;;  %v1696_v32 = vadd.f32 %v1695_v49, %v1694_v3 }
  0x78   :  { %v1672_v19 = vrot.slane %v1671_v27, 2  ;;  %v1680_v41 = vadd.f32 %v1679_v7, %v1678_v47  ;;  %v1657_v29 = vadd.f32 %v1656_v12, %v1655_v62  ;;  %v1703_v18 = vsel %vm271_vm0, %v5903_v23, 0.0 }
  0x79   :  { %v1689_v30 = vadd.f32 %v1688_v45, %v1687_v63  ;;  %v1704_v55 = vsel %vm271_vm0, %v5910_v36, 0.0  ;;  %v1665_v46 = vrot.slane %v1664_v16, 1  ;;  %v1697_v42 = vrot.slane %v1696_v32, 4 }
  0x7a   :  { %v1673_v11 = vadd.f32 %v1672_v19, %v1671_v27  ;;  %v1681_v2 = vrot.slane %v1680_v41, 2  ;;  %v1705_v44 = vadd.f32 %v1704_v55, %v1703_v18  ;;  %v2600_v21 = vmul.f32 0.0625, %v1648_v8 }
  0x7b   :  { %v1690_v39 = vrot.slane %v1689_v30, 2  ;;  %v2601_v22 = vmul.f32 0.0625, %v1657_v29  ;;  %v1666_v5 = vadd.f32 %v1665_v46, %v1664_v16  ;;  %v1698_v9 = vadd.f32 %v1697_v42, %v1696_v32  ;;  %v5990_v32 = vld [vmem:[%s10408_s0 + $0x90] sm:$0xff]  ;;  %v6004_v42 = vld [vmem:[%s10408_s0 + $0x98] sm:$0xff] }
  0x7c   :  { %v1674_v50 = vrot.slane %v1673_v11, 1  ;;  %v1682_v13 = vadd.f32 %v1681_v2, %v1680_v41  ;;  %v1706_v17 = vrot.slane %v1705_v44, 4  ;;  %v2728_v25 = vadd.f32 %v2600_v21, %v5896_v38  ;;  %v5972_v38 = vld [vmem:[%s10408_s0 + $0x80] sm:$0xff] }
  0x7d   :  { %v1691_v54 = vadd.f32 %v1690_v39, %v1689_v30  ;;  %v2729_v23 = vadd.f32 %v2601_v22, %v5912_v24  ;;  %v1699_v10 = vrot.slane %v1698_v9, 2  ;;  %v2602_v47 = vmul.f32 0.0625, %v1666_v5 }
  0x7e   :  { %v1675_v43 = vadd.f32 %v1674_v50, %v1673_v11  ;;  %v1683_v36 = vrot.slane %v1682_v13, 1  ;;  %v1707_v28 = vadd.f32 %v1706_v17, %v1705_v44  ;;  %v5964_v62 = vmul.f32 0.5, %v2728_v25 }
  0x7f   :  { %v1692_v59 = vrot.slane %v1691_v54, 1  ;;  %v5966_v63 = vmul.f32 0.5, %v2729_v23  ;;  %v1700_v27 = vadd.f32 %v1699_v10, %v1698_v9  ;;  %v2730_v3 = vadd.f32 %v2602_v47, %v5916_v33  ;;  %v5985_v33 = vld [vmem:[%s10408_s0 + $0x88] sm:$0xff] }
  0x80   :  { %10610 = vst [vmem:[#allocation5_spill] sm:$0xff] %v5964_v62  ;;  %v1684_v31 = vadd.f32 %v1683_v36, %v1682_v13  ;;  %v2603_v7 = vmul.f32 0.0625, %v1675_v43  ;;  %v1708_v8 = vrot.slane %v1707_v28, 2  ;;  %v344_v45 = vsel %vm271_vm0, %v5972_v38, -inf  ;;  %v6016_v13 = vld [vmem:[%s10408_s0 + $0xa0] sm:$0xff] }
  0x81   :  { %10611 = vst [vmem:[#allocation6_spill] sm:$0xff] %v5966_v63  ;;  %v1693_v24 = vadd.f32 %v1692_v59, %v1691_v54  ;;  %v3116_v12 = vsel %vm3088_vm1, %v5966_v63, %v5964_v62  ;;  %v1701_v49 = vrot.slane %v1700_v27, 1  ;;  %v5980_v41 = vmul.f32 0.5, %v2730_v3 }
  0x82   :  { %v2604_v16 = vmul.f32 0.0625, %v1684_v31  ;;  %v2731_v19 = vadd.f32 %v2603_v7, %v5926_v56  ;;  %v1709_v29 = vadd.f32 %v1708_v8, %v1707_v28  ;;  %v345_v18 = vsel %vm271_vm0, %v5985_v33, -inf  ;;  %v6037_v31 = vld [vmem:[%s10408_s0 + $0xb0] sm:$0xff] }
  0x83   :  { %10612 = vst [vmem:[#allocation7_spill] sm:$0xff] %v5980_v41  ;;  %v2605_v30 = vmul.f32 0.0625, %v1693_v24  ;;  %v353_v56 = vsel %vm271_vm0, %v5990_v32, -inf  ;;  %v1702_v55 = vadd.f32 %v1701_v49, %v1700_v27  ;;  %v3117_v2 = vsel %vm3090_vm2, %v5980_v41, %v3116_v12  ;;  %v6054_v49 = vld [vmem:[%s10408_s0 + $0xc0] sm:$0xff] }
  0x84   :  { %v2732_v46 = vadd.f32 %v2604_v16, %v5932_v20  ;;  %v5997_v11 = vmul.f32 0.5, %v2731_v19  ;;  %v1710_v39 = vrot.slane %v1709_v29, 1  ;;  %v346_v21 = vmax.f32 %v344_v45, %v345_v18  ;;  %v6059_v16 = vld [vmem:[%s10408_s0 + $0xc8] sm:$0xff] }
  0x85   :  { %v2733_v44 = vadd.f32 %v2605_v30, %v5938_v0  ;;  %v354_v22 = vsel %vm271_vm0, %v6004_v42, -inf  ;;  %v2606_v5 = vmul.f32 0.0625, %v1702_v55  ;;  %v6023_v0 = vld [vmem:[%s10408_s0 + $0xa8] sm:$0xff]  ;;  %v362_v23 = vsel %vm271_vm0, %v6016_v13, -inf }
  0x86   :  { %10613 = vst [vmem:[#allocation8_spill] sm:$0xff] %v5997_v11  ;;  %v6009_v50 = vmul.f32 0.5, %v2732_v46  ;;  %v3118_v20 = vsel %vm3092_vm3, %v5997_v11, %v3117_v2  ;;  %v355_v9 = vmax.f32 %v353_v56, %v354_v22  ;;  %v1711_v54 = vadd.f32 %v1710_v39, %v1709_v29  ;;  %v6072_v2 = vld [vmem:[%s10408_s0 + $0xd0] sm:$0xff]  ;;  %v6077_v39 = vld [vmem:[%s10408_s0 + $0xd8] sm:$0xff] }
  0x87   :  { %v6018_v17 = vmul.f32 0.5, %v2733_v44  ;;  %v347_v25 = vrot.slane %v346_v21, 4  ;;  %v2734_v43 = vadd.f32 %v2606_v5, %v5948_v4  ;;  %v363_v47 = vsel %vm271_vm0, %v6023_v0, -inf  ;;  %v6042_v4 = vld [vmem:[%s10408_s0 + $0xb8] sm:$0xff] }
  0x88   :  { %10614 = vst [vmem:[#allocation9_spill] sm:$0xff] %v6009_v50  ;;  %v3119_v36 = vsel %vm3094_vm4, %v6009_v50, %v3118_v20  ;;  %v356_v10 = vrot.slane %v355_v9, 4  ;;  %v2607_v59 = vmul.f32 0.0625, %v1711_v54  ;;  %v364_v7 = vmax.f32 %v362_v23, %v363_v47  ;;  %v6089_v47 = vld [vmem:[%s10408_s0 + $0xe0] sm:$0xff] }
  0x89   :  { %10615 = vst [vmem:[#allocation10_spill] sm:$0xff] %v6018_v17  ;;  %v3120_v28 = vsel %vm3096_vm5, %v6018_v17, %v3119_v36  ;;  %v348_v27 = vmax.f32 %v346_v21, %v347_v25  ;;  %v6044_v3 = vmul.f32 0.5, %v2734_v43  ;;  %v371_v8 = vsel %vm271_vm0, %v6037_v31, -inf }
  0x8a   :  { %v357_v24 = vmax.f32 %v355_v9, %v356_v10  ;;  %v372_v12 = vsel %vm271_vm0, %v6042_v4, -inf  ;;  %v2735_v45 = vadd.f32 %v2607_v59, %v5952_v15  ;;  %v365_v29 = vrot.slane %v364_v7, 4 }
  0x8b   :  { %10616 = vst [vmem:[#allocation11_spill] sm:$0xff] %v6044_v3  ;;  %v349_v19 = vrot.slane %v348_v27, 2  ;;  %v373_v30 = vmax.f32 %v371_v8, %v372_v12  ;;  %v3121_v18 = vsel %vm3098_vm6, %v6044_v3, %v3120_v28  ;;  %v380_v15 = vsel %vm271_vm0, %v6054_v49, -inf }
  0x8c   :  { %v358_v56 = vrot.slane %v357_v24, 2  ;;  %v381_v55 = vsel %vm271_vm0, %v6059_v16, -inf  ;;  %v6067_v46 = vmul.f32 0.5, %v2735_v45  ;;  %v366_v21 = vmax.f32 %v364_v7, %v365_v29  ;;  %v6094_v7 = vld [vmem:[%s10408_s0 + $0xe8] sm:$0xff] }
  0x8d   :  { %v350_v44 = vmax.f32 %v348_v27, %v349_v19  ;;  %v374_v22 = vrot.slane %v373_v30, 4  ;;  %v382_v20 = vmax.f32 %v380_v15, %v381_v55  ;;  %v389_v9 = vsel %vm271_vm0, %v6072_v2, -inf  ;;  %v6103_v19 = vld [vmem:[%s10408_s0 + $0xf0] sm:$0xff]  ;;  %v6112_v15 = vld [vmem:[%s10408_s0 + $0xf8] sm:$0xff] }
  0x8e   :  { %10617 = vst [vmem:[#allocation12_spill] sm:$0xff] %v6067_v46  ;;  %v359_v5 = vmax.f32 %v357_v24, %v358_v56  ;;  %v390_v54 = vsel %vm271_vm0, %v6077_v39, -inf  ;;  %v3122_v25 = vsel %vm3100_vm7, %v6067_v46, %v3121_v18  ;;  %v367_v43 = vrot.slane %v366_v21, 2 }
  0x8f   :  { %v351_v23 = vrot.slane %v350_v44, 1  ;;  %v375_v36 = vmax.f32 %v373_v30, %v374_v22  ;;  %v3232_v10 = vsel %vm271_vm0, %v3122_v25, 0.0  ;;  %v383_v28 = vrot.slane %v382_v20, 4 }
  0x90   :  { %v360_v59 = vrot.slane %v359_v5, 1  ;;  %v391_v27 = vmax.f32 %v389_v9, %v390_v54  ;;  %3233 = vadd.xlane.f32.xlu1 %v3232_v10  ;;  %v368_v8 = vmax.f32 %v366_v21, %v367_v43  ;;  %v398_v45 = vsel %vm271_vm0, %v6089_v47, -inf }
  0x91   :  { %v6096_v24 = vmax.f32 %v350_v44, %v351_v23  ;;  %v376_v12 = vrot.slane %v375_v36, 2  ;;  %v384_v30 = vmax.f32 %v382_v20, %v383_v28  ;;  %v399_v56 = vsel %vm271_vm0, %v6094_v7, -inf }
  0x92   :  { %v6105_v29 = vmax.f32 %v359_v5, %v360_v59  ;;  %v392_v18 = vrot.slane %v391_v27, 4  ;;  %v369_v55 = vrot.slane %v368_v8, 1  ;;  %v400_v21 = vmax.f32 %v398_v45, %v399_v56 }
  0x93   :  { %v377_v44 = vmax.f32 %v375_v36, %v376_v12  ;;  %v407_v22 = vsel %vm271_vm0, %v6103_v19, -inf  ;;  %v385_v9 = vrot.slane %v384_v30, 2  ;;  %v408_v5 = vsel %vm271_vm0, %v6112_v15, -inf }
  0x94   :  { %v393_v54 = vmax.f32 %v391_v27, %v392_v18  ;;  %v1496_v20 = vsel %vm271_vm0, %v5972_v38, 0.0  ;;  %v6120_v25 = vmax.f32 %v368_v8, %v369_v55  ;;  %v401_v43 = vrot.slane %v400_v21, 4 }
  0x95   :  { %v378_v23 = vrot.slane %v377_v44, 1  ;;  %v409_v10 = vmax.f32 %v407_v22, %v408_v5  ;;  %v386_v59 = vmax.f32 %v384_v30, %v385_v9  ;;  %v1497_v36 = vsel %vm271_vm0, %v5985_v33, 0.0 }
  0x96   :  { %v394_v28 = vrot.slane %v393_v54, 2  ;;  %v1505_v12 = vsel %vm271_vm0, %v5990_v32, 0.0  ;;  %v402_v45 = vmax.f32 %v400_v21, %v401_v43  ;;  %v1498_v56 = vadd.f32 %v1497_v36, %v1496_v20 }
  0x97   :  { %v6126_v27 = vmax.f32 %v377_v44, %v378_v23  ;;  %v410_v18 = vrot.slane %v409_v10, 4  ;;  %v387_v46 = vrot.slane %v386_v59, 1  ;;  %v1506_v8 = vsel %vm271_vm0, %v6004_v42, 0.0 }
  0x98   :  { %v395_v38 = vmax.f32 %v393_v54, %v394_v28  ;;  %v1514_v30 = vsel %vm271_vm0, %v6016_v13, 0.0  ;;  %v403_v55 = vrot.slane %v402_v45, 2  ;;  %v1499_v9 = vrot.slane %v1498_v56, 4 }
  0x99   :  { %v411_v22 = vmax.f32 %v409_v10, %v410_v18  ;;  %v1507_v33 = vadd.f32 %v1506_v8, %v1505_v12  ;;  %v6132_v5 = vmax.f32 %v386_v59, %v387_v46  ;;  %v1515_v44 = vsel %vm271_vm0, %v6023_v0, 0.0 }
  0x9a   :  { %v396_v32 = vrot.slane %v395_v38, 1  ;;  %v1523_v21 = vsel %vm271_vm0, %v6037_v31, 0.0  ;;  %v404_v54 = vmax.f32 %v402_v45, %v403_v55  ;;  %v1500_v23 = vadd.f32 %v1499_v9, %v1498_v56 }
  0x9b   :  { %v412_v20 = vrot.slane %v411_v22, 2  ;;  %v1508_v42 = vrot.slane %v1507_v33, 4  ;;  %v1516_v13 = vadd.f32 %v1515_v44, %v1514_v30  ;;  %v1524_v10 = vsel %vm271_vm0, %v6042_v4, 0.0 }
  0x9c   :  { %v6138_v43 = vmax.f32 %v395_v38, %v396_v32  ;;  %v1532_v46 = vsel %vm271_vm0, %v6054_v49, 0.0  ;;  %v405_v59 = vrot.slane %v404_v54, 1  ;;  %v1501_v36 = vrot.slane %v1500_v23, 2 }
  0x9d   :  { %v413_v28 = vmax.f32 %v411_v22, %v412_v20  ;;  %v1509_v0 = vadd.f32 %v1508_v42, %v1507_v33  ;;  %v1517_v12 = vrot.slane %v1516_v13, 4  ;;  %v1525_v18 = vadd.f32 %v1524_v10, %v1523_v21 }
  0x9e   :  { %v1533_v31 = vsel %vm271_vm0, %v6059_v16, 0.0  ;;  %v1541_v45 = vsel %vm271_vm0, %v6072_v2, 0.0  ;;  %v6148_v56 = vmax.f32 %v404_v54, %v405_v59  ;;  %v1502_v8 = vadd.f32 %v1501_v36, %v1500_v23 }
  0x9f   :  { %v414_v38 = vrot.slane %v413_v28, 1  ;;  %v1510_v4 = vrot.slane %v1509_v0, 2  ;;  %v1518_v30 = vadd.f32 %v1517_v12, %v1516_v13  ;;  %v1526_v55 = vrot.slane %v1525_v18, 4 }
  0xa0   :  { %v1534_v49 = vadd.f32 %v1533_v31, %v1532_v46  ;;  %v1542_v22 = vsel %vm271_vm0, %v6077_v39, 0.0  ;;  %v1503_v33 = vrot.slane %v1502_v8, 1  ;;  %v1550_v2 = vsel %vm271_vm0, %v6089_v47, 0.0 }
  0xa1   :  { %v6152_v9 = vmax.f32 %v413_v28, %v414_v38  ;;  %v1511_v32 = vadd.f32 %v1510_v4, %v1509_v0  ;;  %v1543_v44 = vadd.f32 %v1542_v22, %v1541_v45  ;;  %v1519_v16 = vrot.slane %v1518_v30, 2 }
  0xa2   :  { %v1527_v21 = vadd.f32 %v1526_v55, %v1525_v18  ;;  %v1535_v20 = vrot.slane %v1534_v49, 4  ;;  %v1504_v54 = vadd.f32 %v1503_v33, %v1502_v8  ;;  %v1551_v13 = vsel %vm271_vm0, %v6094_v7, 0.0 }
  0xa3   :  { %v1512_v23 = vrot.slane %v1511_v32, 1  ;;  %v1544_v42 = vrot.slane %v1543_v44, 4  ;;  %v1520_v10 = vadd.f32 %v1519_v16, %v1518_v30  ;;  %v1552_v59 = vadd.f32 %v1551_v13, %v1550_v2 }
  0xa4   :  { %v1528_v46 = vrot.slane %v1527_v21, 2  ;;  %v1536_v39 = vadd.f32 %v1535_v20, %v1534_v49  ;;  %v1559_v0 = vsel %vm271_vm0, %v6103_v19, 0.0  ;;  %v1560_v12 = vsel %vm271_vm0, %v6112_v15, 0.0 }
  0xa5   :  { %v1513_v28 = vadd.f32 %v1512_v23, %v1511_v32  ;;  %v1545_v36 = vadd.f32 %v1544_v42, %v1543_v44  ;;  %v1521_v18 = vrot.slane %v1520_v10, 1  ;;  %v1553_v45 = vrot.slane %v1552_v59, 4 }
  0xa6   :  { %v1529_v47 = vadd.f32 %v1528_v46, %v1527_v21  ;;  %v1537_v31 = vrot.slane %v1536_v39, 2  ;;  %v1561_v8 = vadd.f32 %v1560_v12, %v1559_v0  ;;  %v2584_v4 = vmul.f32 0.0625, %v1504_v54 }
  0xa7   :  { %v1546_v38 = vrot.slane %v1545_v36, 2  ;;  %v2585_v7 = vmul.f32 0.0625, %v1513_v28  ;;  %v1522_v30 = vadd.f32 %v1521_v18, %v1520_v10  ;;  %v1554_v22 = vadd.f32 %v1553_v45, %v1552_v59 }
  0xa8   :  { %v1530_v55 = vrot.slane %v1529_v47, 1  ;;  %v1538_v49 = vadd.f32 %v1537_v31, %v1536_v39  ;;  %v1562_v32 = vrot.slane %v1561_v8, 4  ;;  %v2712_v44 = vadd.f32 %v2584_v4, %v6096_v24  ;;  %v6172_v24 = vld [vmem:[%s10408_s0 + $0x280] sm:$0xff]  ;;  %v6190_v31 = vld [vmem:[%s10408_s0 + $0x290] sm:$0xff] }
  0xa9   :  { %v1547_v33 = vadd.f32 %v1546_v38, %v1545_v36  ;;  %v2713_v19 = vadd.f32 %v2585_v7, %v6105_v29  ;;  %v1555_v20 = vrot.slane %v1554_v22, 2  ;;  %v2586_v21 = vmul.f32 0.0625, %v1522_v30 }
  0xaa   :  { %v1531_v16 = vadd.f32 %v1530_v55, %v1529_v47  ;;  %v1539_v15 = vrot.slane %v1538_v49, 1  ;;  %v1563_v23 = vadd.f32 %v1562_v32, %v1561_v8  ;;  %v6164_v42 = vmul.f32 0.5, %v2712_v44 }
  0xab   :  { %v1548_v2 = vrot.slane %v1547_v33, 1  ;;  %v6166_v54 = vmul.f32 0.5, %v2713_v19  ;;  %v1556_v10 = vadd.f32 %v1555_v20, %v1554_v22  ;;  %v2714_v39 = vadd.f32 %v2586_v21, %v6120_v25  ;;  %v6185_v25 = vld [vmem:[%s10408_s0 + $0x288] sm:$0xff] }
  0xac   :  { %v1540_v13 = vadd.f32 %v1539_v15, %v1538_v49  ;;  %v2587_v46 = vmul.f32 0.0625, %v1531_v16  ;;  %v1564_v59 = vrot.slane %v1563_v23, 2  ;;  %v632_v36 = vsel %vm271_vm0, %v6172_v24, -inf  ;;  %v6204_v49 = vld [vmem:[%s10408_s0 + $0x298] sm:$0xff]  ;;  %v6216_v15 = vld [vmem:[%s10408_s0 + $0x2a0] sm:$0xff] }
  0xad   :  { %v1549_v29 = vadd.f32 %v1548_v2, %v1547_v33  ;;  %v3102_v28 = vsel %vm3088_vm1, %v6166_v54, %v6164_v42  ;;  %v1557_v0 = vrot.slane %v1556_v10, 1  ;;  %v6180_v47 = vmul.f32 0.5, %v2714_v39 }
  0xae   :  { %v2588_v12 = vmul.f32 0.0625, %v1540_v13  ;;  %v2715_v18 = vadd.f32 %v2587_v46, %v6126_v27  ;;  %v1565_v45 = vadd.f32 %v1564_v59, %v1563_v23  ;;  %v633_v8 = vsel %vm271_vm0, %v6185_v25, -inf }
  0xaf   :  { %v2589_v38 = vmul.f32 0.0625, %v1549_v29  ;;  %v641_v27 = vsel %vm271_vm0, %v6190_v31, -inf  ;;  %v1558_v4 = vadd.f32 %v1557_v0, %v1556_v10  ;;  %v3103_v55 = vsel %vm3090_vm2, %v6180_v47, %v3102_v28 }
  0xb0   :  { %v2716_v7 = vadd.f32 %v2588_v12, %v6132_v5  ;;  %v6197_v30 = vmul.f32 0.5, %v2715_v18  ;;  %v1566_v22 = vrot.slane %v1565_v45, 1  ;;  %v634_v32 = vmax.f32 %v632_v36, %v633_v8  ;;  %v6237_v36 = vld [vmem:[%s10408_s0 + $0x2b0] sm:$0xff] }
  0xb1   :  { %v2717_v33 = vadd.f32 %v2589_v38, %v6138_v43  ;;  %v642_v44 = vsel %vm271_vm0, %v6204_v49, -inf  ;;  %v2590_v19 = vmul.f32 0.0625, %v1558_v4  ;;  %v6223_v43 = vld [vmem:[%s10408_s0 + $0x2a8] sm:$0xff]  ;;  %v650_v13 = vsel %vm271_vm0, %v6216_v15, -inf  ;;  %v6254_v4 = vld [vmem:[%s10408_s0 + $0x2c0] sm:$0xff] }
  0xb2   :  { %v6209_v16 = vmul.f32 0.5, %v2716_v7  ;;  %v3104_v5 = vsel %vm3092_vm3, %v6197_v30, %v3103_v55  ;;  %v643_v20 = vmax.f32 %v641_v27, %v642_v44  ;;  %v1567_v21 = vadd.f32 %v1566_v22, %v1565_v45  ;;  %v6259_v7 = vld [vmem:[%s10408_s0 + $0x2c8] sm:$0xff] }
  0xb3   :  { %v6218_v2 = vmul.f32 0.5, %v2717_v33  ;;  %v635_v23 = vrot.slane %v634_v32, 4  ;;  %v2718_v10 = vadd.f32 %v2590_v19, %v6148_v56  ;;  %v651_v29 = vsel %vm271_vm0, %v6223_v43, -inf  ;;  %v6242_v56 = vld [vmem:[%s10408_s0 + $0x2b8] sm:$0xff] }
  0xb4   :  { %v3105_v46 = vsel %vm3094_vm4, %v6209_v16, %v3104_v5  ;;  %v644_v39 = vrot.slane %v643_v20, 4  ;;  %v2591_v59 = vmul.f32 0.0625, %v1567_v21  ;;  %v652_v12 = vmax.f32 %v650_v13, %v651_v29  ;;  %v6277_v21 = vld [vmem:[%s10408_s0 + $0x2d8] sm:$0xff] }
  0xb5   :  { %v3106_v28 = vsel %vm3096_vm5, %v6218_v2, %v3105_v46  ;;  %v636_v0 = vmax.f32 %v634_v32, %v635_v23  ;;  %v6244_v18 = vmul.f32 0.5, %v2718_v10  ;;  %v659_v38 = vsel %vm271_vm0, %v6237_v36, -inf }
  0xb6   :  { %v645_v45 = vmax.f32 %v643_v20, %v644_v39  ;;  %v660_v8 = vsel %vm271_vm0, %v6242_v56, -inf  ;;  %v2719_v27 = vadd.f32 %v2591_v59, %v6152_v9  ;;  %v653_v22 = vrot.slane %v652_v12, 4  ;;  %v6272_v20 = vld [vmem:[%s10408_s0 + $0x2d0] sm:$0xff] }
  0xb7   :  { %v637_v55 = vrot.slane %v636_v0, 2  ;;  %v661_v33 = vmax.f32 %v659_v38, %v660_v8  ;;  %v3107_v32 = vsel %vm3098_vm6, %v6244_v18, %v3106_v28  ;;  %v668_v9 = vsel %vm271_vm0, %v6254_v4, -inf }
  0xb8   :  { %v646_v44 = vrot.slane %v645_v45, 2  ;;  %v669_v19 = vsel %vm271_vm0, %v6259_v7, -inf  ;;  %v6267_v5 = vmul.f32 0.5, %v2719_v27  ;;  %v654_v13 = vmax.f32 %v652_v12, %v653_v22  ;;  %v6294_v22 = vld [vmem:[%s10408_s0 + $0x2e8] sm:$0xff] }
  0xb9   :  { %v638_v23 = vmax.f32 %v636_v0, %v637_v55  ;;  %v662_v10 = vrot.slane %v661_v33, 4  ;;  %v670_v39 = vmax.f32 %v668_v9, %v669_v19  ;;  %v677_v29 = vsel %vm271_vm0, %v6272_v20, -inf  ;;  %v6289_v0 = vld [vmem:[%s10408_s0 + $0x2e0] sm:$0xff]  ;;  %v6303_v19 = vld [vmem:[%s10408_s0 + $0x2f0] sm:$0xff] }
  0xba   :  { %10618 = vst [vmem:[#allocation13_spill] sm:$0xff] %v6267_v5  ;;  %v647_v46 = vmax.f32 %v645_v45, %v646_v44  ;;  %v678_v59 = vsel %vm271_vm0, %v6277_v21, -inf  ;;  %v3108_v28 = vsel %vm3100_vm7, %v6267_v5, %v3107_v32  ;;  %v655_v8 = vrot.slane %v654_v13, 2 }
  0xbb   :  { %v639_v38 = vrot.slane %v638_v23, 1  ;;  %v663_v27 = vmax.f32 %v661_v33, %v662_v10  ;;  %v3226_v3 = vsel %vm271_vm0, %v3108_v28, 0.0  ;;  %v671_v45 = vrot.slane %v670_v39, 4 }
  0xbc   :  { %v648_v12 = vrot.slane %v647_v46, 1  ;;  %v679_v55 = vmax.f32 %v677_v29, %v678_v59  ;;  %3227 = vadd.xlane.f32.xlu0 %v3226_v3  ;;  %v656_v44 = vmax.f32 %v654_v13, %v655_v8  ;;  %v686_v9 = vsel %vm271_vm0, %v6289_v0, -inf }
  0xbd   :  { %v6296_v32 = vmax.f32 %v638_v23, %v639_v38  ;;  %v664_v33 = vrot.slane %v663_v27, 2  ;;  %v672_v3 = vmax.f32 %v670_v39, %v671_v45  ;;  %v687_v59 = vsel %vm271_vm0, %v6294_v22, -inf  ;;  %v6312_v23 = vld [vmem:[%s10408_s0 + $0x2f8] sm:$0xff] }
  0xbe   :  { %v6305_v10 = vmax.f32 %v647_v46, %v648_v12  ;;  %v680_v29 = vrot.slane %v679_v55, 4  ;;  %v657_v13 = vrot.slane %v656_v44, 1  ;;  %v688_v38 = vmax.f32 %v686_v9, %v687_v59 }
  0xbf   :  { %v665_v28 = vmax.f32 %v663_v27, %v664_v33  ;;  %v695_v8 = vsel %vm271_vm0, %v6303_v19, -inf  ;;  %v673_v17 = vrot.slane %v672_v3, 2  ;;  %v696_v46 = vsel %vm271_vm0, %v6312_v23, -inf }
  0xc0   :  { %v681_v50 = vmax.f32 %v679_v55, %v680_v29  ;;  %v1784_v39 = vsel %vm271_vm0, %v6172_v24, 0.0  ;;  %v6320_v12 = vmax.f32 %v656_v44, %v657_v13  ;;  %v689_v11 = vrot.slane %v688_v38, 4 }
  0xc1   :  { %v666_v45 = vrot.slane %v665_v28, 1  ;;  %v697_v41 = vmax.f32 %v695_v8, %v696_v46  ;;  %v674_v63 = vmax.f32 %v672_v3, %v673_v17  ;;  %v1785_v27 = vsel %vm271_vm0, %v6185_v25, 0.0 }
  0xc2   :  { %v682_v62 = vrot.slane %v681_v50, 2  ;;  %v1793_v33 = vsel %vm271_vm0, %v6190_v31, 0.0  ;;  %v690_v9 = vmax.f32 %v688_v38, %v689_v11  ;;  %v1786_v59 = vadd.f32 %v1785_v27, %v1784_v39 }
  0xc3   :  { %v6326_v55 = vmax.f32 %v665_v28, %v666_v45  ;;  %v698_v29 = vrot.slane %v697_v41, 4  ;;  %v675_v5 = vrot.slane %v674_v63, 1  ;;  %v1794_v44 = vsel %vm271_vm0, %v6204_v49, 0.0 }
  0xc4   :  { %v683_v24 = vmax.f32 %v681_v50, %v682_v62  ;;  %v1802_v17 = vsel %vm271_vm0, %v6216_v15, 0.0  ;;  %v691_v3 = vrot.slane %v690_v9, 2  ;;  %v1787_v8 = vrot.slane %v1786_v59, 4 }
  0xc5   :  { %v699_v13 = vmax.f32 %v697_v41, %v698_v29  ;;  %v1795_v25 = vadd.f32 %v1794_v44, %v1793_v33  ;;  %v6332_v46 = vmax.f32 %v674_v63, %v675_v5  ;;  %v1803_v11 = vsel %vm271_vm0, %v6223_v43, 0.0 }
  0xc6   :  { %v684_v31 = vrot.slane %v683_v24, 1  ;;  %v1811_v28 = vsel %vm271_vm0, %v6237_v36, 0.0  ;;  %v692_v62 = vmax.f32 %v690_v9, %v691_v3  ;;  %v1788_v38 = vadd.f32 %v1787_v8, %v1786_v59 }
  0xc7   :  { %v700_v50 = vrot.slane %v699_v13, 2  ;;  %v1796_v49 = vrot.slane %v1795_v25, 4  ;;  %v1804_v15 = vadd.f32 %v1803_v11, %v1802_v17  ;;  %v1812_v41 = vsel %vm271_vm0, %v6242_v56, 0.0 }
  0xc8   :  { %v6338_v39 = vmax.f32 %v683_v24, %v684_v31  ;;  %v1820_v63 = vsel %vm271_vm0, %v6254_v4, 0.0  ;;  %v693_v5 = vrot.slane %v692_v62, 1  ;;  %v1789_v27 = vrot.slane %v1788_v38, 2 }
  0xc9   :  { %v701_v45 = vmax.f32 %v699_v13, %v700_v50  ;;  %v1797_v43 = vadd.f32 %v1796_v49, %v1795_v25  ;;  %v1805_v33 = vrot.slane %v1804_v15, 4  ;;  %v1813_v29 = vadd.f32 %v1812_v41, %v1811_v28 }
  0xca   :  { %v1821_v36 = vsel %vm271_vm0, %v6259_v7, 0.0  ;;  %v1829_v9 = vsel %vm271_vm0, %v6272_v20, 0.0  ;;  %v6348_v59 = vmax.f32 %v692_v62, %v693_v5  ;;  %v1790_v44 = vadd.f32 %v1789_v27, %v1788_v38 }
  0xcb   :  { %v702_v24 = vrot.slane %v701_v45, 1  ;;  %v1798_v56 = vrot.slane %v1797_v43, 2  ;;  %v1806_v17 = vadd.f32 %v1805_v33, %v1804_v15  ;;  %v1814_v3 = vrot.slane %v1813_v29, 4 }
  0xcc   :  { %v1822_v4 = vadd.f32 %v1821_v36, %v1820_v63  ;;  %v1830_v13 = vsel %vm271_vm0, %v6277_v21, 0.0  ;;  %v1791_v25 = vrot.slane %v1790_v44, 1  ;;  %v1838_v20 = vsel %vm271_vm0, %v6289_v0, 0.0 }
  0xcd   :  { %v6352_v8 = vmax.f32 %v701_v45, %v702_v24  ;;  %v1799_v31 = vadd.f32 %v1798_v56, %v1797_v43  ;;  %v1831_v11 = vadd.f32 %v1830_v13, %v1829_v9  ;;  %v1807_v7 = vrot.slane %v1806_v17, 2 }
  0xce   :  { %v1815_v28 = vadd.f32 %v1814_v3, %v1813_v29  ;;  %v1823_v50 = vrot.slane %v1822_v4, 4  ;;  %v1792_v62 = vadd.f32 %v1791_v25, %v1790_v44  ;;  %v1839_v15 = vsel %vm271_vm0, %v6294_v22, 0.0 }
  0xcf   :  { %v1800_v38 = vrot.slane %v1799_v31, 1  ;;  %v1832_v49 = vrot.slane %v1831_v11, 4  ;;  %v1808_v41 = vadd.f32 %v1807_v7, %v1806_v17  ;;  %v1840_v5 = vadd.f32 %v1839_v15, %v1838_v20 }
  0xd0   :  { %v1816_v63 = vrot.slane %v1815_v28, 2  ;;  %v1824_v21 = vadd.f32 %v1823_v50, %v1822_v4  ;;  %v1847_v43 = vsel %vm271_vm0, %v6303_v19, 0.0  ;;  %v1848_v33 = vsel %vm271_vm0, %v6312_v23, 0.0 }
  0xd1   :  { %v1801_v45 = vadd.f32 %v1800_v38, %v1799_v31  ;;  %v1833_v27 = vadd.f32 %v1832_v49, %v1831_v11  ;;  %v1809_v29 = vrot.slane %v1808_v41, 1  ;;  %v1841_v9 = vrot.slane %v1840_v5, 4 }
  0xd2   :  { %v1817_v0 = vadd.f32 %v1816_v63, %v1815_v28  ;;  %v1825_v36 = vrot.slane %v1824_v21, 2  ;;  %v1849_v44 = vadd.f32 %v1848_v33, %v1847_v43  ;;  %v2616_v56 = vmul.f32 0.0625, %v1792_v62 }
  0xd3   :  { %v1834_v24 = vrot.slane %v1833_v27, 2  ;;  %v2617_v22 = vmul.f32 0.0625, %v1801_v45  ;;  %v1810_v17 = vadd.f32 %v1809_v29, %v1808_v41  ;;  %v1842_v13 = vadd.f32 %v1841_v9, %v1840_v5 }
  0xd4   :  { %v1818_v3 = vrot.slane %v1817_v0, 1  ;;  %v1826_v4 = vadd.f32 %v1825_v36, %v1824_v21  ;;  %v1850_v31 = vrot.slane %v1849_v44, 4  ;;  %v2744_v11 = vadd.f32 %v2616_v56, %v6296_v32  ;;  %v6372_v32 = vld [vmem:[%s10408_s0 + $0x200] sm:$0xff]  ;;  %v6390_v36 = vld [vmem:[%s10408_s0 + $0x210] sm:$0xff] }
  0xd5   :  { %v1835_v25 = vadd.f32 %v1834_v24, %v1833_v27  ;;  %v2745_v19 = vadd.f32 %v2617_v22, %v6305_v10  ;;  %v1843_v50 = vrot.slane %v1842_v13, 2  ;;  %v2618_v28 = vmul.f32 0.0625, %v1810_v17 }
  0xd6   :  { %v1819_v7 = vadd.f32 %v1818_v3, %v1817_v0  ;;  %v1827_v23 = vrot.slane %v1826_v4, 1  ;;  %v1851_v38 = vadd.f32 %v1850_v31, %v1849_v44  ;;  %v6364_v49 = vmul.f32 0.5, %v2744_v11 }
  0xd7   :  { %v1836_v20 = vrot.slane %v1835_v25, 1  ;;  %v6366_v62 = vmul.f32 0.5, %v2745_v19  ;;  %v1844_v41 = vadd.f32 %v1843_v50, %v1842_v13  ;;  %v2746_v21 = vadd.f32 %v2618_v28, %v6320_v12  ;;  %v6385_v12 = vld [vmem:[%s10408_s0 + $0x208] sm:$0xff] }
  0xd8   :  { %10619 = vst [vmem:[#allocation14_spill] sm:$0xff] %v6364_v49  ;;  %v1828_v15 = vadd.f32 %v1827_v23, %v1826_v4  ;;  %v2619_v63 = vmul.f32 0.0625, %v1819_v7  ;;  %v1852_v5 = vrot.slane %v1851_v38, 2  ;;  %v560_v27 = vsel %vm271_vm0, %v6372_v32, -inf  ;;  %v6404_v4 = vld [vmem:[%s10408_s0 + $0x218] sm:$0xff]  ;;  %v6416_v23 = vld [vmem:[%s10408_s0 + $0x220] sm:$0xff] }
  0xd9   :  { %10620 = vst [vmem:[#allocation15_spill] sm:$0xff] %v6366_v62  ;;  %v1837_v10 = vadd.f32 %v1836_v20, %v1835_v25  ;;  %v3130_v45 = vsel %vm3088_vm1, %v6366_v62, %v6364_v49  ;;  %v1845_v43 = vrot.slane %v1844_v41, 1  ;;  %v6380_v0 = vmul.f32 0.5, %v2746_v21 }
  0xda   :  { %v2620_v33 = vmul.f32 0.0625, %v1828_v15  ;;  %v2747_v29 = vadd.f32 %v2619_v63, %v6326_v55  ;;  %v1853_v9 = vadd.f32 %v1852_v5, %v1851_v38  ;;  %v561_v44 = vsel %vm271_vm0, %v6385_v12, -inf }
  0xdb   :  { %10621 = vst [vmem:[#allocation16_spill] sm:$0xff] %v6380_v0  ;;  %v2621_v24 = vmul.f32 0.0625, %v1837_v10  ;;  %v569_v55 = vsel %vm271_vm0, %v6390_v36, -inf  ;;  %v1846_v56 = vadd.f32 %v1845_v43, %v1844_v41  ;;  %v3131_v3 = vsel %vm3090_vm2, %v6380_v0, %v3130_v45 }
  0xdc   :  { %v2748_v22 = vadd.f32 %v2620_v33, %v6332_v46  ;;  %v6397_v17 = vmul.f32 0.5, %v2747_v29  ;;  %v1854_v13 = vrot.slane %v1853_v9, 1  ;;  %v562_v31 = vmax.f32 %v560_v27, %v561_v44  ;;  %v6437_v27 = vld [vmem:[%s10408_s0 + $0x230] sm:$0xff] }
  0xdd   :  { %v2749_v25 = vadd.f32 %v2621_v24, %v6338_v39  ;;  %v570_v11 = vsel %vm271_vm0, %v6404_v4, -inf  ;;  %v2622_v19 = vmul.f32 0.0625, %v1846_v56  ;;  %v6423_v39 = vld [vmem:[%s10408_s0 + $0x228] sm:$0xff]  ;;  %v578_v15 = vsel %vm271_vm0, %v6416_v23, -inf  ;;  %v6454_v56 = vld [vmem:[%s10408_s0 + $0x240] sm:$0xff] }
  0xde   :  { %10622 = vst [vmem:[#allocation17_spill] sm:$0xff] %v6397_v17  ;;  %v6409_v7 = vmul.f32 0.5, %v2748_v22  ;;  %v3132_v46 = vsel %vm3092_vm3, %v6397_v17, %v3131_v3  ;;  %v571_v50 = vmax.f32 %v569_v55, %v570_v11  ;;  %v1855_v28 = vadd.f32 %v1854_v13, %v1853_v9  ;;  %v6459_v22 = vld [vmem:[%s10408_s0 + $0x248] sm:$0xff] }
  0xdf   :  { %v6418_v20 = vmul.f32 0.5, %v2749_v25  ;;  %v563_v38 = vrot.slane %v562_v31, 4  ;;  %v2750_v41 = vadd.f32 %v2622_v19, %v6348_v59  ;;  %v579_v10 = vsel %vm271_vm0, %v6423_v39, -inf  ;;  %v6442_v59 = vld [vmem:[%s10408_s0 + $0x238] sm:$0xff] }
  0xe0   :  { %10623 = vst [vmem:[#allocation18_spill] sm:$0xff] %v6409_v7  ;;  %v3133_v63 = vsel %vm3094_vm4, %v6409_v7, %v3132_v46  ;;  %v572_v21 = vrot.slane %v571_v50, 4  ;;  %v2623_v5 = vmul.f32 0.0625, %v1855_v28  ;;  %v580_v33 = vmax.f32 %v578_v15, %v579_v10  ;;  %v6477_v28 = vld [vmem:[%s10408_s0 + $0x258] sm:$0xff] }
  0xe1   :  { %10624 = vst [vmem:[#allocation19_spill] sm:$0xff] %v6418_v20  ;;  %v3134_v45 = vsel %vm3096_vm5, %v6418_v20, %v3133_v63  ;;  %v564_v43 = vmax.f32 %v562_v31, %v563_v38  ;;  %v6444_v29 = vmul.f32 0.5, %v2750_v41  ;;  %v587_v24 = vsel %vm271_vm0, %v6437_v27, -inf }
  0xe2   :  { %v573_v9 = vmax.f32 %v571_v50, %v572_v21  ;;  %v588_v44 = vsel %vm271_vm0, %v6442_v59, -inf  ;;  %v2751_v55 = vadd.f32 %v2623_v5, %v6352_v8  ;;  %v581_v13 = vrot.slane %v580_v33, 4  ;;  %v6472_v50 = vld [vmem:[%s10408_s0 + $0x250] sm:$0xff] }
  0xe3   :  { %10625 = vst [vmem:[#allocation20_spill] sm:$0xff] %v6444_v29  ;;  %v565_v3 = vrot.slane %v564_v43, 2  ;;  %v589_v25 = vmax.f32 %v587_v24, %v588_v44  ;;  %v3135_v31 = vsel %vm3098_vm6, %v6444_v29, %v3134_v45  ;;  %v596_v8 = vsel %vm271_vm0, %v6454_v56, -inf }
  0xe4   :  { %v574_v11 = vrot.slane %v573_v9, 2  ;;  %v597_v19 = vsel %vm271_vm0, %v6459_v22, -inf  ;;  %v6467_v46 = vmul.f32 0.5, %v2751_v55  ;;  %v582_v15 = vmax.f32 %v580_v33, %v581_v13  ;;  %v6494_v13 = vld [vmem:[%s10408_s0 + $0x268] sm:$0xff] }
  0xe5   :  { %v566_v38 = vmax.f32 %v564_v43, %v565_v3  ;;  %v590_v41 = vrot.slane %v589_v25, 4  ;;  %v598_v21 = vmax.f32 %v596_v8, %v597_v19  ;;  %v605_v10 = vsel %vm271_vm0, %v6472_v50, -inf  ;;  %v6489_v43 = vld [vmem:[%s10408_s0 + $0x260] sm:$0xff]  ;;  %v6503_v19 = vld [vmem:[%s10408_s0 + $0x270] sm:$0xff] }
  0xe6   :  { %10626 = vst [vmem:[#allocation21_spill] sm:$0xff] %v6467_v46  ;;  %v575_v63 = vmax.f32 %v573_v9, %v574_v11  ;;  %v606_v5 = vsel %vm271_vm0, %v6477_v28, -inf  ;;  %v3136_v45 = vsel %vm3100_vm7, %v6467_v46, %v3135_v31  ;;  %v583_v44 = vrot.slane %v582_v15, 2 }
  0xe7   :  { %v567_v24 = vrot.slane %v566_v38, 1  ;;  %v591_v55 = vmax.f32 %v589_v25, %v590_v41  ;;  %v3238_v29 = vsel %vm271_vm0, %v3136_v45, 0.0  ;;  %v599_v9 = vrot.slane %v598_v21, 4 }
  0xe8   :  { %v576_v33 = vrot.slane %v575_v63, 1  ;;  %v607_v3 = vmax.f32 %v605_v10, %v606_v5  ;;  %3239 = vadd.xlane.f32.xlu1 %v3238_v29  ;;  %v584_v11 = vmax.f32 %v582_v15, %v583_v44  ;;  %v614_v8 = vsel %vm271_vm0, %v6489_v43, -inf }
  0xe9   :  { %v6496_v31 = vmax.f32 %v566_v38, %v567_v24  ;;  %v592_v25 = vrot.slane %v591_v55, 2  ;;  %v600_v29 = vmax.f32 %v598_v21, %v599_v9  ;;  %v615_v5 = vsel %vm271_vm0, %v6494_v13, -inf  ;;  %v6512_v38 = vld [vmem:[%s10408_s0 + $0x278] sm:$0xff] }
  0xea   :  { %v6505_v41 = vmax.f32 %v575_v63, %v576_v33  ;;  %v608_v10 = vrot.slane %v607_v3, 4  ;;  %v585_v15 = vrot.slane %v584_v11, 1  ;;  %v616_v24 = vmax.f32 %v614_v8, %v615_v5 }
  0xeb   :  { %v593_v45 = vmax.f32 %v591_v55, %v592_v25  ;;  %v623_v44 = vsel %vm271_vm0, %v6503_v19, -inf  ;;  %v601_v46 = vrot.slane %v600_v29, 2  ;;  %v624_v63 = vsel %vm271_vm0, %v6512_v38, -inf }
  0xec   :  { %v609_v20 = vmax.f32 %v607_v3, %v608_v10  ;;  %v1712_v21 = vsel %vm271_vm0, %v6372_v32, 0.0  ;;  %v6520_v33 = vmax.f32 %v584_v11, %v585_v15  ;;  %v617_v7 = vrot.slane %v616_v24, 4 }
  0xed   :  { %v594_v9 = vrot.slane %v593_v45, 1  ;;  %v625_v17 = vmax.f32 %v623_v44, %v624_v63  ;;  %v602_v0 = vmax.f32 %v600_v29, %v601_v46  ;;  %v1713_v55 = vsel %vm271_vm0, %v6385_v12, 0.0 }
  0xee   :  { %v610_v62 = vrot.slane %v609_v20, 2  ;;  %v1721_v25 = vsel %vm271_vm0, %v6390_v36, 0.0  ;;  %v618_v8 = vmax.f32 %v616_v24, %v617_v7  ;;  %v1714_v5 = vadd.f32 %v1713_v55, %v1712_v21 }
  0xef   :  { %v6526_v3 = vmax.f32 %v593_v45, %v594_v9  ;;  %v626_v10 = vrot.slane %v625_v17, 4  ;;  %v603_v49 = vrot.slane %v602_v0, 1  ;;  %v1722_v11 = vsel %vm271_vm0, %v6404_v4, 0.0 }
  0xf0   :  { %v611_v32 = vmax.f32 %v609_v20, %v610_v62  ;;  %v1730_v46 = vsel %vm271_vm0, %v6416_v23, 0.0  ;;  %v619_v29 = vrot.slane %v618_v8, 2  ;;  %v1715_v44 = vrot.slane %v1714_v5, 4 }
  0xf1   :  { %v627_v15 = vmax.f32 %v625_v17, %v626_v10  ;;  %v1723_v12 = vadd.f32 %v1722_v11, %v1721_v25  ;;  %v6532_v63 = vmax.f32 %v602_v0, %v603_v49  ;;  %v1731_v7 = vsel %vm271_vm0, %v6423_v39, 0.0 }
  0xf2   :  { %v612_v36 = vrot.slane %v611_v32, 1  ;;  %v1739_v45 = vsel %vm271_vm0, %v6437_v27, 0.0  ;;  %v620_v62 = vmax.f32 %v618_v8, %v619_v29  ;;  %v1716_v24 = vadd.f32 %v1715_v44, %v1714_v5 }
  0xf3   :  { %v628_v20 = vrot.slane %v627_v15, 2  ;;  %v1724_v4 = vrot.slane %v1723_v12, 4  ;;  %v1732_v23 = vadd.f32 %v1731_v7, %v1730_v46  ;;  %v1740_v17 = vsel %vm271_vm0, %v6442_v59, 0.0 }
  0xf4   :  { %v6538_v21 = vmax.f32 %v611_v32, %v612_v36  ;;  %v1748_v49 = vsel %vm271_vm0, %v6454_v56, 0.0  ;;  %v621_v0 = vrot.slane %v620_v62, 1  ;;  %v1717_v55 = vrot.slane %v1716_v24, 2 }
  0xf5   :  { %v629_v9 = vmax.f32 %v627_v15, %v628_v20  ;;  %v1725_v39 = vadd.f32 %v1724_v4, %v1723_v12  ;;  %v1733_v25 = vrot.slane %v1732_v23, 4  ;;  %v1741_v10 = vadd.f32 %v1740_v17, %v1739_v45 }
  0xf6   :  { %v1749_v27 = vsel %vm271_vm0, %v6459_v22, 0.0  ;;  %v1757_v8 = vsel %vm271_vm0, %v6472_v50, 0.0  ;;  %v6548_v5 = vmax.f32 %v620_v62, %v621_v0  ;;  %v1718_v11 = vadd.f32 %v1717_v55, %v1716_v24 }
  0xf7   :  { %v630_v32 = vrot.slane %v629_v9, 1  ;;  %v1726_v59 = vrot.slane %v1725_v39, 2  ;;  %v1734_v46 = vadd.f32 %v1733_v25, %v1732_v23  ;;  %v1742_v29 = vrot.slane %v1741_v10, 4 }
  0xf8   :  { %v1750_v56 = vadd.f32 %v1749_v27, %v1748_v49  ;;  %v1758_v15 = vsel %vm271_vm0, %v6477_v28, 0.0  ;;  %v1719_v12 = vrot.slane %v1718_v11, 1  ;;  %v1766_v50 = vsel %vm271_vm0, %v6489_v43, 0.0 }
  0xf9   :  { %v6552_v44 = vmax.f32 %v629_v9, %v630_v32  ;;  %v1727_v36 = vadd.f32 %v1726_v59, %v1725_v39  ;;  %v1759_v7 = vadd.f32 %v1758_v15, %v1757_v8  ;;  %v1735_v22 = vrot.slane %v1734_v46, 2 }
  0xfa   :  { %v1743_v45 = vadd.f32 %v1742_v29, %v1741_v10  ;;  %v1751_v20 = vrot.slane %v1750_v56, 4  ;;  %v1720_v62 = vadd.f32 %v1719_v12, %v1718_v11  ;;  %v1767_v23 = vsel %vm271_vm0, %v6494_v13, 0.0 }
  0xfb   :  { %v1728_v24 = vrot.slane %v1727_v36, 1  ;;  %v1760_v4 = vrot.slane %v1759_v7, 4  ;;  %v1736_v17 = vadd.f32 %v1735_v22, %v1734_v46  ;;  %v1768_v0 = vadd.f32 %v1767_v23, %v1766_v50 }
  0xfc   :  { %v1744_v49 = vrot.slane %v1743_v45, 2  ;;  %v1752_v28 = vadd.f32 %v1751_v20, %v1750_v56  ;;  %v1775_v39 = vsel %vm271_vm0, %v6503_v19, 0.0  ;;  %v1776_v25 = vsel %vm271_vm0, %v6512_v38, 0.0 }
  0xfd   :  { %v1729_v9 = vadd.f32 %v1728_v24, %v1727_v36  ;;  %v1761_v55 = vadd.f32 %v1760_v4, %v1759_v7  ;;  %v1737_v10 = vrot.slane %v1736_v17, 1  ;;  %v1769_v8 = vrot.slane %v1768_v0, 4 }
  0xfe   :  { %v1745_v43 = vadd.f32 %v1744_v49, %v1743_v45  ;;  %v1753_v27 = vrot.slane %v1752_v28, 2  ;;  %v1777_v11 = vadd.f32 %v1776_v25, %v1775_v39  ;;  %v2608_v59 = vmul.f32 0.0625, %v1720_v62 }
  0xff   :  { %v1762_v32 = vrot.slane %v1761_v55, 2  ;;  %v2609_v13 = vmul.f32 0.0625, %v1729_v9  ;;  %v1738_v46 = vadd.f32 %v1737_v10, %v1736_v17  ;;  %v1770_v15 = vadd.f32 %v1769_v8, %v1768_v0 }
 0x100   :  { %v1746_v29 = vrot.slane %v1745_v43, 1  ;;  %v1754_v56 = vadd.f32 %v1753_v27, %v1752_v28  ;;  %v1778_v36 = vrot.slane %v1777_v11, 4  ;;  %v2736_v7 = vadd.f32 %v2608_v59, %v6496_v31  ;;  %v6572_v31 = vld [vmem:[%s10408_s0 + $0x380] sm:$0xff]  ;;  %v6590_v27 = vld [vmem:[%s10408_s0 + $0x390] sm:$0xff] }
 0x101   :  { %v1763_v12 = vadd.f32 %v1762_v32, %v1761_v55  ;;  %v2737_v19 = vadd.f32 %v2609_v13, %v6505_v41  ;;  %v1771_v20 = vrot.slane %v1770_v15, 2  ;;  %v2610_v45 = vmul.f32 0.0625, %v1738_v46 }
 0x102   :  { %v1747_v22 = vadd.f32 %v1746_v29, %v1745_v43  ;;  %v1755_v38 = vrot.slane %v1754_v56, 1  ;;  %v1779_v24 = vadd.f32 %v1778_v36, %v1777_v11  ;;  %v6564_v4 = vmul.f32 0.5, %v2736_v7 }
 0x103   :  { %v1764_v50 = vrot.slane %v1763_v12, 1  ;;  %v6566_v62 = vmul.f32 0.5, %v2737_v19  ;;  %v1772_v17 = vadd.f32 %v1771_v20, %v1770_v15  ;;  %v2738_v28 = vadd.f32 %v2610_v45, %v6520_v33  ;;  %v6585_v33 = vld [vmem:[%s10408_s0 + $0x388] sm:$0xff] }
 0x104   :  { %10627 = vst [vmem:[#allocation22_spill] sm:$0xff] %v6564_v4  ;;  %v1756_v23 = vadd.f32 %v1755_v38, %v1754_v56  ;;  %v2611_v49 = vmul.f32 0.0625, %v1747_v22  ;;  %v1780_v0 = vrot.slane %v1779_v24, 2  ;;  %v776_v55 = vsel %vm271_vm0, %v6572_v31, -inf  ;;  %v6604_v56 = vld [vmem:[%s10408_s0 + $0x398] sm:$0xff]  ;;  %v6616_v38 = vld [vmem:[%s10408_s0 + $0x3a0] sm:$0xff] }
 0x105   :  { %10628 = vst [vmem:[#allocation23_spill] sm:$0xff] %v6566_v62  ;;  %v1765_v41 = vadd.f32 %v1764_v50, %v1763_v12  ;;  %v3123_v9 = vsel %vm3088_vm1, %v6566_v62, %v6564_v4  ;;  %v1773_v39 = vrot.slane %v1772_v17, 1  ;;  %v6580_v43 = vmul.f32 0.5, %v2738_v28 }
 0x106   :  { %v2612_v25 = vmul.f32 0.0625, %v1756_v23  ;;  %v2739_v10 = vadd.f32 %v2611_v49, %v6526_v3  ;;  %v1781_v8 = vadd.f32 %v1780_v0, %v1779_v24  ;;  %v777_v11 = vsel %vm271_vm0, %v6585_v33, -inf }
 0x107   :  { %10629 = vst [vmem:[#allocation24_spill] sm:$0xff] %v6580_v43  ;;  %v2613_v32 = vmul.f32 0.0625, %v1765_v41  ;;  %v785_v3 = vsel %vm271_vm0, %v6590_v27, -inf  ;;  %v1774_v59 = vadd.f32 %v1773_v39, %v1772_v17  ;;  %v3124_v29 = vsel %vm3090_vm2, %v6580_v43, %v3123_v9 }
 0x108   :  { %v2740_v13 = vadd.f32 %v2612_v25, %v6532_v63  ;;  %v6597_v46 = vmul.f32 0.5, %v2739_v10  ;;  %v1782_v15 = vrot.slane %v1781_v8, 1  ;;  %v778_v36 = vmax.f32 %v776_v55, %v777_v11  ;;  %v6637_v55 = vld [vmem:[%s10408_s0 + $0x3b0] sm:$0xff] }
 0x109   :  { %v2741_v12 = vadd.f32 %v2613_v32, %v6538_v21  ;;  %v786_v7 = vsel %vm271_vm0, %v6604_v56, -inf  ;;  %v2614_v19 = vmul.f32 0.0625, %v1774_v59  ;;  %v6623_v21 = vld [vmem:[%s10408_s0 + $0x3a8] sm:$0xff]  ;;  %v794_v23 = vsel %vm271_vm0, %v6616_v38, -inf  ;;  %v6654_v59 = vld [vmem:[%s10408_s0 + $0x3c0] sm:$0xff] }
 0x10a   :  { %10630 = vst [vmem:[#allocation25_spill] sm:$0xff] %v6597_v46  ;;  %v6609_v22 = vmul.f32 0.5, %v2740_v13  ;;  %v3125_v63 = vsel %vm3092_vm3, %v6597_v46, %v3124_v29  ;;  %v787_v20 = vmax.f32 %v785_v3, %v786_v7  ;;  %v1783_v45 = vadd.f32 %v1782_v15, %v1781_v8  ;;  %v6659_v13 = vld [vmem:[%s10408_s0 + $0x3c8] sm:$0xff] }
 0x10b   :  { %v6618_v50 = vmul.f32 0.5, %v2741_v12  ;;  %v779_v24 = vrot.slane %v778_v36, 4  ;;  %v2742_v17 = vadd.f32 %v2614_v19, %v6548_v5  ;;  %v795_v41 = vsel %vm271_vm0, %v6623_v21, -inf  ;;  %v6642_v5 = vld [vmem:[%s10408_s0 + $0x3b8] sm:$0xff] }
 0x10c   :  { %10631 = vst [vmem:[#allocation26_spill] sm:$0xff] %v6609_v22  ;;  %v3126_v49 = vsel %vm3094_vm4, %v6609_v22, %v3125_v63  ;;  %v788_v28 = vrot.slane %v787_v20, 4  ;;  %v2615_v0 = vmul.f32 0.0625, %v1783_v45  ;;  %v796_v25 = vmax.f32 %v794_v23, %v795_v41  ;;  %v6677_v45 = vld [vmem:[%s10408_s0 + $0x3d8] sm:$0xff] }
 0x10d   :  { %10632 = vst [vmem:[#allocation27_spill] sm:$0xff] %v6618_v50  ;;  %v3127_v9 = vsel %vm3096_vm5, %v6618_v50, %v3126_v49  ;;  %v780_v39 = vmax.f32 %v778_v36, %v779_v24  ;;  %v6644_v10 = vmul.f32 0.5, %v2742_v17  ;;  %v803_v32 = vsel %vm271_vm0, %v6637_v55, -inf }
 0x10e   :  { %v789_v8 = vmax.f32 %v787_v20, %v788_v28  ;;  %v804_v11 = vsel %vm271_vm0, %v6642_v5, -inf  ;;  %v2743_v3 = vadd.f32 %v2615_v0, %v6552_v44  ;;  %v797_v15 = vrot.slane %v796_v25, 4  ;;  %v6672_v20 = vld [vmem:[%s10408_s0 + $0x3d0] sm:$0xff] }
 0x10f   :  { %10633 = vst [vmem:[#allocation28_spill] sm:$0xff] %v6644_v10  ;;  %v781_v29 = vrot.slane %v780_v39, 2  ;;  %v805_v12 = vmax.f32 %v803_v32, %v804_v11  ;;  %v3128_v36 = vsel %vm3098_vm6, %v6644_v10, %v3127_v9  ;;  %v812_v44 = vsel %vm271_vm0, %v6654_v59, -inf }
 0x110   :  { %v790_v7 = vrot.slane %v789_v8, 2  ;;  %v813_v19 = vsel %vm271_vm0, %v6659_v13, -inf  ;;  %v6667_v63 = vmul.f32 0.5, %v2743_v3  ;;  %v798_v23 = vmax.f32 %v796_v25, %v797_v15  ;;  %v6694_v15 = vld [vmem:[%s10408_s0 + $0x3e8] sm:$0xff] }
 0x111   :  { %v782_v24 = vmax.f32 %v780_v39, %v781_v29  ;;  %v806_v17 = vrot.slane %v805_v12, 4  ;;  %v814_v28 = vmax.f32 %v812_v44, %v813_v19  ;;  %v821_v41 = vsel %vm271_vm0, %v6672_v20, -inf  ;;  %v6689_v39 = vld [vmem:[%s10408_s0 + $0x3e0] sm:$0xff]  ;;  %v6703_v19 = vld [vmem:[%s10408_s0 + $0x3f0] sm:$0xff] }
 0x112   :  { %10634 = vst [vmem:[#allocation29_spill] sm:$0xff] %v6667_v63  ;;  %v791_v49 = vmax.f32 %v789_v8, %v790_v7  ;;  %v822_v0 = vsel %vm271_vm0, %v6677_v45, -inf  ;;  %v3129_v9 = vsel %vm3100_vm7, %v6667_v63, %v3128_v36  ;;  %v799_v11 = vrot.slane %v798_v23, 2 }
 0x113   :  { %v783_v32 = vrot.slane %v782_v24, 1  ;;  %v807_v3 = vmax.f32 %v805_v12, %v806_v17  ;;  %v3235_v10 = vsel %vm271_vm0, %v3129_v9, 0.0  ;;  %v815_v8 = vrot.slane %v814_v28, 4 }
 0x114   :  { %v792_v25 = vrot.slane %v791_v49, 1  ;;  %v823_v29 = vmax.f32 %v821_v41, %v822_v0  ;;  %3236 = vadd.xlane.f32.xlu0 %v3235_v10  ;;  %v800_v7 = vmax.f32 %v798_v23, %v799_v11  ;;  %v830_v44 = vsel %vm271_vm0, %v6689_v39, -inf }
 0x115   :  { %v6696_v36 = vmax.f32 %v782_v24, %v783_v32  ;;  %v808_v12 = vrot.slane %v807_v3, 2  ;;  %v816_v10 = vmax.f32 %v814_v28, %v815_v8  ;;  %v831_v0 = vsel %vm271_vm0, %v6694_v15, -inf  ;;  %v6712_v24 = vld [vmem:[%s10408_s0 + $0x3f8] sm:$0xff] }
 0x116   :  { %v6705_v17 = vmax.f32 %v791_v49, %v792_v25  ;;  %v824_v41 = vrot.slane %v823_v29, 4  ;;  %v801_v23 = vrot.slane %v800_v7, 1  ;;  %v832_v32 = vmax.f32 %v830_v44, %v831_v0 }
 0x117   :  { %v809_v9 = vmax.f32 %v807_v3, %v808_v12  ;;  %v839_v11 = vsel %vm271_vm0, %v6703_v19, -inf  ;;  %v817_v63 = vrot.slane %v816_v10, 2  ;;  %v840_v49 = vsel %vm271_vm0, %v6712_v24, -inf }
 0x118   :  { %v825_v50 = vmax.f32 %v823_v29, %v824_v41  ;;  %v1928_v28 = vsel %vm271_vm0, %v6572_v31, 0.0  ;;  %v6720_v25 = vmax.f32 %v800_v7, %v801_v23  ;;  %v833_v22 = vrot.slane %v832_v32, 4 }
 0x119   :  { %v810_v8 = vrot.slane %v809_v9, 1  ;;  %v841_v46 = vmax.f32 %v839_v11, %v840_v49  ;;  %v818_v43 = vmax.f32 %v816_v10, %v817_v63  ;;  %v1929_v3 = vsel %vm271_vm0, %v6585_v33, 0.0 }
 0x11a   :  { %v826_v62 = vrot.slane %v825_v50, 2  ;;  %v1937_v12 = vsel %vm271_vm0, %v6590_v27, 0.0  ;;  %v834_v44 = vmax.f32 %v832_v32, %v833_v22  ;;  %v1930_v0 = vadd.f32 %v1929_v3, %v1928_v28 }
 0x11b   :  { %v6726_v29 = vmax.f32 %v809_v9, %v810_v8  ;;  %v842_v41 = vrot.slane %v841_v46, 4  ;;  %v819_v4 = vrot.slane %v818_v43, 1  ;;  %v1938_v7 = vsel %vm271_vm0, %v6604_v56, 0.0 }
 0x11c   :  { %v827_v31 = vmax.f32 %v825_v50, %v826_v62  ;;  %v1946_v63 = vsel %vm271_vm0, %v6616_v38, 0.0  ;;  %v835_v10 = vrot.slane %v834_v44, 2  ;;  %v1931_v11 = vrot.slane %v1930_v0, 4 }
 0x11d   :  { %v843_v23 = vmax.f32 %v841_v46, %v842_v41  ;;  %v1939_v33 = vadd.f32 %v1938_v7, %v1937_v12  ;;  %v6732_v49 = vmax.f32 %v818_v43, %v819_v4  ;;  %v1947_v22 = vsel %vm271_vm0, %v6623_v21, 0.0 }
 0x11e   :  { %v828_v27 = vrot.slane %v827_v31, 1  ;;  %v1955_v9 = vsel %vm271_vm0, %v6637_v55, 0.0  ;;  %v836_v62 = vmax.f32 %v834_v44, %v835_v10  ;;  %v1932_v32 = vadd.f32 %v1931_v11, %v1930_v0 }
 0x11f   :  { %v844_v50 = vrot.slane %v843_v23, 2  ;;  %v1940_v56 = vrot.slane %v1939_v33, 4  ;;  %v1948_v38 = vadd.f32 %v1947_v22, %v1946_v63  ;;  %v1956_v46 = vsel %vm271_vm0, %v6642_v5, 0.0 }
 0x120   :  { %v6738_v28 = vmax.f32 %v827_v31, %v828_v27  ;;  %v1964_v4 = vsel %vm271_vm0, %v6654_v59, 0.0  ;;  %v837_v43 = vrot.slane %v836_v62, 1  ;;  %v1933_v3 = vrot.slane %v1932_v32, 2 }
 0x121   :  { %v845_v8 = vmax.f32 %v843_v23, %v844_v50  ;;  %v1941_v21 = vadd.f32 %v1940_v56, %v1939_v33  ;;  %v1949_v12 = vrot.slane %v1948_v38, 4  ;;  %v1957_v41 = vadd.f32 %v1956_v46, %v1955_v9 }
 0x122   :  { %v1965_v55 = vsel %vm271_vm0, %v6659_v13, 0.0  ;;  %v1973_v44 = vsel %vm271_vm0, %v6672_v20, 0.0  ;;  %v6748_v0 = vmax.f32 %v836_v62, %v837_v43  ;;  %v1934_v7 = vadd.f32 %v1933_v3, %v1932_v32 }
 0x123   :  { %v846_v31 = vrot.slane %v845_v8, 1  ;;  %v1942_v5 = vrot.slane %v1941_v21, 2  ;;  %v1950_v63 = vadd.f32 %v1949_v12, %v1948_v38  ;;  %v1958_v10 = vrot.slane %v1957_v41, 4 }
 0x124   :  { %v1966_v59 = vadd.f32 %v1965_v55, %v1964_v4  ;;  %v1974_v23 = vsel %vm271_vm0, %v6677_v45, 0.0  ;;  %v1935_v33 = vrot.slane %v1934_v7, 1  ;;  %v1982_v20 = vsel %vm271_vm0, %v6689_v39, 0.0 }
 0x125   :  { %v6752_v11 = vmax.f32 %v845_v8, %v846_v31  ;;  %v1943_v27 = vadd.f32 %v1942_v5, %v1941_v21  ;;  %v1975_v22 = vadd.f32 %v1974_v23, %v1973_v44  ;;  %v1951_v13 = vrot.slane %v1950_v63, 2 }
 0x126   :  { %v1959_v9 = vadd.f32 %v1958_v10, %v1957_v41  ;;  %v1967_v50 = vrot.slane %v1966_v59, 4  ;;  %v1936_v62 = vadd.f32 %v1935_v33, %v1934_v7  ;;  %v1983_v38 = vsel %vm271_vm0, %v6694_v15, 0.0 }
 0x127   :  { %v1944_v32 = vrot.slane %v1943_v27, 1  ;;  %v1976_v56 = vrot.slane %v1975_v22, 4  ;;  %v1952_v46 = vadd.f32 %v1951_v13, %v1950_v63  ;;  %v1984_v43 = vadd.f32 %v1983_v38, %v1982_v20 }
 0x128   :  { %v1960_v4 = vrot.slane %v1959_v9, 2  ;;  %v1968_v45 = vadd.f32 %v1967_v50, %v1966_v59  ;;  %v1991_v21 = vsel %vm271_vm0, %v6703_v19, 0.0  ;;  %v1992_v12 = vsel %vm271_vm0, %v6712_v24, 0.0 }
 0x129   :  { %v1945_v8 = vadd.f32 %v1944_v32, %v1943_v27  ;;  %v1977_v3 = vadd.f32 %v1976_v56, %v1975_v22  ;;  %v1953_v41 = vrot.slane %v1952_v46, 1  ;;  %v1985_v44 = vrot.slane %v1984_v43, 4 }
 0x12a   :  { %v1961_v39 = vadd.f32 %v1960_v4, %v1959_v9  ;;  %v1969_v55 = vrot.slane %v1968_v45, 2  ;;  %v1993_v7 = vadd.f32 %v1992_v12, %v1991_v21  ;;  %v2632_v5 = vmul.f32 0.0625, %v1936_v62 }
 0x12b   :  { %v1978_v31 = vrot.slane %v1977_v3, 2  ;;  %v2633_v15 = vmul.f32 0.0625, %v1945_v8  ;;  %v1954_v63 = vadd.f32 %v1953_v41, %v1952_v46  ;;  %v1986_v23 = vadd.f32 %v1985_v44, %v1984_v43 }
 0x12c   :  { %v1962_v10 = vrot.slane %v1961_v39, 1  ;;  %v1970_v59 = vadd.f32 %v1969_v55, %v1968_v45  ;;  %v1994_v27 = vrot.slane %v1993_v7, 4  ;;  %v2760_v22 = vadd.f32 %v2632_v5, %v6696_v36  ;;  %v6772_v36 = vld [vmem:[%s10408_s0 + $0x300] sm:$0xff]  ;;  %v6790_v55 = vld [vmem:[%s10408_s0 + $0x310] sm:$0xff] }
 0x12d   :  { %v1979_v33 = vadd.f32 %v1978_v31, %v1977_v3  ;;  %v2761_v19 = vadd.f32 %v2633_v15, %v6705_v17  ;;  %v1987_v50 = vrot.slane %v1986_v23, 2  ;;  %v2634_v9 = vmul.f32 0.0625, %v1954_v63 }
 0x12e   :  { %v1963_v13 = vadd.f32 %v1962_v10, %v1961_v39  ;;  %v1971_v24 = vrot.slane %v1970_v59, 1  ;;  %v1995_v32 = vadd.f32 %v1994_v27, %v1993_v7  ;;  %v6764_v56 = vmul.f32 0.5, %v2760_v22 }
 0x12f   :  { %v1980_v20 = vrot.slane %v1979_v33, 1  ;;  %v6766_v62 = vmul.f32 0.5, %v2761_v19  ;;  %v1988_v46 = vadd.f32 %v1987_v50, %v1986_v23  ;;  %v2762_v45 = vadd.f32 %v2634_v9, %v6720_v25  ;;  %v6785_v25 = vld [vmem:[%s10408_s0 + $0x308] sm:$0xff] }
 0x130   :  { %10635 = vst [vmem:[#allocation30_spill] sm:$0xff] %v6764_v56  ;;  %v1972_v38 = vadd.f32 %v1971_v24, %v1970_v59  ;;  %v2635_v4 = vmul.f32 0.0625, %v1963_v13  ;;  %v1996_v43 = vrot.slane %v1995_v32, 2  ;;  %v704_v3 = vsel %vm271_vm0, %v6772_v36, -inf  ;;  %v6804_v59 = vld [vmem:[%s10408_s0 + $0x318] sm:$0xff]  ;;  %v6816_v24 = vld [vmem:[%s10408_s0 + $0x320] sm:$0xff] }
 0x131   :  { %10636 = vst [vmem:[#allocation31_spill] sm:$0xff] %v6766_v62  ;;  %v1981_v17 = vadd.f32 %v1980_v20, %v1979_v33  ;;  %v3144_v8 = vsel %vm3088_vm1, %v6766_v62, %v6764_v56  ;;  %v1989_v21 = vrot.slane %v1988_v46, 1  ;;  %v6780_v39 = vmul.f32 0.5, %v2762_v45 }
 0x132   :  { %v2636_v12 = vmul.f32 0.0625, %v1972_v38  ;;  %v2763_v41 = vadd.f32 %v2635_v4, %v6726_v29  ;;  %v1997_v44 = vadd.f32 %v1996_v43, %v1995_v32  ;;  %v705_v7 = vsel %vm271_vm0, %v6785_v25, -inf }
 0x133   :  { %10637 = vst [vmem:[#allocation32_spill] sm:$0xff] %v6780_v39  ;;  %v2637_v31 = vmul.f32 0.0625, %v1981_v17  ;;  %v713_v29 = vsel %vm271_vm0, %v6790_v55, -inf  ;;  %v1990_v5 = vadd.f32 %v1989_v21, %v1988_v46  ;;  %v3145_v10 = vsel %vm3090_vm2, %v6780_v39, %v3144_v8 }
 0x134   :  { %v2764_v15 = vadd.f32 %v2636_v12, %v6732_v49  ;;  %v6797_v63 = vmul.f32 0.5, %v2763_v41  ;;  %v1998_v23 = vrot.slane %v1997_v44, 1  ;;  %v706_v27 = vmax.f32 %v704_v3, %v705_v7  ;;  %v6837_v3 = vld [vmem:[%s10408_s0 + $0x330] sm:$0xff] }
 0x135   :  { %v2765_v33 = vadd.f32 %v2637_v31, %v6738_v28  ;;  %v714_v22 = vsel %vm271_vm0, %v6804_v59, -inf  ;;  %v2638_v19 = vmul.f32 0.0625, %v1990_v5  ;;  %v6823_v28 = vld [vmem:[%s10408_s0 + $0x328] sm:$0xff]  ;;  %v722_v38 = vsel %vm271_vm0, %v6816_v24, -inf  ;;  %v6854_v5 = vld [vmem:[%s10408_s0 + $0x340] sm:$0xff] }
 0x136   :  { %10638 = vst [vmem:[#allocation33_spill] sm:$0xff] %v6797_v63  ;;  %v6809_v13 = vmul.f32 0.5, %v2764_v15  ;;  %v3146_v49 = vsel %vm3092_vm3, %v6797_v63, %v3145_v10  ;;  %v715_v50 = vmax.f32 %v713_v29, %v714_v22  ;;  %v1999_v9 = vadd.f32 %v1998_v23, %v1997_v44  ;;  %v6859_v15 = vld [vmem:[%s10408_s0 + $0x348] sm:$0xff] }
 0x137   :  { %v6818_v20 = vmul.f32 0.5, %v2765_v33  ;;  %v707_v32 = vrot.slane %v706_v27, 4  ;;  %v2766_v46 = vadd.f32 %v2638_v19, %v6748_v0  ;;  %v723_v17 = vsel %vm271_vm0, %v6823_v28, -inf  ;;  %v6842_v0 = vld [vmem:[%s10408_s0 + $0x338] sm:$0xff] }
 0x138   :  { %10639 = vst [vmem:[#allocation34_spill] sm:$0xff] %v6809_v13  ;;  %v3147_v4 = vsel %vm3094_vm4, %v6809_v13, %v3146_v49  ;;  %v716_v45 = vrot.slane %v715_v50, 4  ;;  %v2639_v43 = vmul.f32 0.0625, %v1999_v9  ;;  %v724_v12 = vmax.f32 %v722_v38, %v723_v17  ;;  %v6877_v9 = vld [vmem:[%s10408_s0 + $0x358] sm:$0xff] }
 0x139   :  { %10640 = vst [vmem:[#allocation35_spill] sm:$0xff] %v6818_v20  ;;  %v3148_v8 = vsel %vm3096_vm5, %v6818_v20, %v3147_v4  ;;  %v708_v21 = vmax.f32 %v706_v27, %v707_v32  ;;  %v6844_v41 = vmul.f32 0.5, %v2766_v46  ;;  %v731_v31 = vsel %vm271_vm0, %v6837_v3, -inf }
 0x13a   :  { %v717_v44 = vmax.f32 %v715_v50, %v716_v45  ;;  %v732_v7 = vsel %vm271_vm0, %v6842_v0, -inf  ;;  %v2767_v29 = vadd.f32 %v2639_v43, %v6752_v11  ;;  %v725_v23 = vrot.slane %v724_v12, 4  ;;  %v6872_v50 = vld [vmem:[%s10408_s0 + $0x350] sm:$0xff] }
 0x13b   :  { %10641 = vst [vmem:[#allocation36_spill] sm:$0xff] %v6844_v41  ;;  %v709_v10 = vrot.slane %v708_v21, 2  ;;  %v733_v33 = vmax.f32 %v731_v31, %v732_v7  ;;  %v3149_v27 = vsel %vm3098_vm6, %v6844_v41, %v3148_v8  ;;  %v740_v11 = vsel %vm271_vm0, %v6854_v5, -inf }
 0x13c   :  { %v718_v22 = vrot.slane %v717_v44, 2  ;;  %v741_v19 = vsel %vm271_vm0, %v6859_v15, -inf  ;;  %v6867_v49 = vmul.f32 0.5, %v2767_v29  ;;  %v726_v38 = vmax.f32 %v724_v12, %v725_v23  ;;  %v6894_v23 = vld [vmem:[%s10408_s0 + $0x368] sm:$0xff] }
 0x13d   :  { %v710_v32 = vmax.f32 %v708_v21, %v709_v10  ;;  %v734_v46 = vrot.slane %v733_v33, 4  ;;  %v742_v45 = vmax.f32 %v740_v11, %v741_v19  ;;  %v749_v17 = vsel %vm271_vm0, %v6872_v50, -inf  ;;  %v6889_v21 = vld [vmem:[%s10408_s0 + $0x360] sm:$0xff]  ;;  %v6903_v19 = vld [vmem:[%s10408_s0 + $0x370] sm:$0xff] }
 0x13e   :  { %10642 = vst [vmem:[#allocation37_spill] sm:$0xff] %v6867_v49  ;;  %v719_v4 = vmax.f32 %v717_v44, %v718_v22  ;;  %v750_v43 = vsel %vm271_vm0, %v6877_v9, -inf  ;;  %v3150_v8 = vsel %vm3100_vm7, %v6867_v49, %v3149_v27  ;;  %v727_v7 = vrot.slane %v726_v38, 2 }
 0x13f   :  { %v711_v31 = vrot.slane %v710_v32, 1  ;;  %v735_v29 = vmax.f32 %v733_v33, %v734_v46  ;;  %v3244_v41 = vsel %vm271_vm0, %v3150_v8, 0.0  ;;  %v743_v44 = vrot.slane %v742_v45, 4 }
 0x140   :  { %v720_v12 = vrot.slane %v719_v4, 1  ;;  %v751_v10 = vmax.f32 %v749_v17, %v750_v43  ;;  %3245 = vadd.xlane.f32.xlu1 %v3244_v41  ;;  %v728_v22 = vmax.f32 %v726_v38, %v727_v7  ;;  %v758_v11 = vsel %vm271_vm0, %v6889_v21, -inf }
 0x141   :  { %v6896_v27 = vmax.f32 %v710_v32, %v711_v31  ;;  %v736_v33 = vrot.slane %v735_v29, 2  ;;  %v744_v41 = vmax.f32 %v742_v45, %v743_v44  ;;  %v759_v43 = vsel %vm271_vm0, %v6894_v23, -inf  ;;  %v6912_v32 = vld [vmem:[%s10408_s0 + $0x378] sm:$0xff] }
 0x142   :  { %v6905_v46 = vmax.f32 %v719_v4, %v720_v12  ;;  %v752_v17 = vrot.slane %v751_v10, 4  ;;  %v729_v38 = vrot.slane %v728_v22, 1  ;;  %v760_v31 = vmax.f32 %v758_v11, %v759_v43 }
 0x143   :  { %v737_v8 = vmax.f32 %v735_v29, %v736_v33  ;;  %v767_v7 = vsel %vm271_vm0, %v6903_v19, -inf  ;;  %v745_v49 = vrot.slane %v744_v41, 2  ;;  %v768_v4 = vsel %vm271_vm0, %v6912_v32, -inf }
 0x144   :  { %v753_v20 = vmax.f32 %v751_v10, %v752_v17  ;;  %v1856_v45 = vsel %vm271_vm0, %v6772_v36, 0.0  ;;  %v6920_v12 = vmax.f32 %v728_v22, %v729_v38  ;;  %v761_v13 = vrot.slane %v760_v31, 4 }
 0x145   :  { %v738_v44 = vrot.slane %v737_v8, 1  ;;  %v769_v63 = vmax.f32 %v767_v7, %v768_v4  ;;  %v746_v39 = vmax.f32 %v744_v41, %v745_v49  ;;  %v1857_v29 = vsel %vm271_vm0, %v6785_v25, 0.0 }
 0x146   :  { %v754_v62 = vrot.slane %v753_v20, 2  ;;  %v1865_v33 = vsel %vm271_vm0, %v6790_v55, 0.0  ;;  %v762_v11 = vmax.f32 %v760_v31, %v761_v13  ;;  %v1858_v43 = vadd.f32 %v1857_v29, %v1856_v45 }
 0x147   :  { %v6926_v10 = vmax.f32 %v737_v8, %v738_v44  ;;  %v770_v17 = vrot.slane %v769_v63, 4  ;;  %v747_v56 = vrot.slane %v746_v39, 1  ;;  %v1866_v22 = vsel %vm271_vm0, %v6804_v59, 0.0 }
 0x148   :  { %v755_v36 = vmax.f32 %v753_v20, %v754_v62  ;;  %v1874_v49 = vsel %vm271_vm0, %v6816_v24, 0.0  ;;  %v763_v41 = vrot.slane %v762_v11, 2  ;;  %v1859_v7 = vrot.slane %v1858_v43, 4 }
 0x149   :  { %v771_v38 = vmax.f32 %v769_v63, %v770_v17  ;;  %v1867_v25 = vadd.f32 %v1866_v22, %v1865_v33  ;;  %v6932_v4 = vmax.f32 %v746_v39, %v747_v56  ;;  %v1875_v13 = vsel %vm271_vm0, %v6823_v28, 0.0 }
 0x14a   :  { %v756_v55 = vrot.slane %v755_v36, 1  ;;  %v1883_v8 = vsel %vm271_vm0, %v6837_v3, 0.0  ;;  %v764_v62 = vmax.f32 %v762_v11, %v763_v41  ;;  %v1860_v31 = vadd.f32 %v1859_v7, %v1858_v43 }
 0x14b   :  { %v772_v20 = vrot.slane %v771_v38, 2  ;;  %v1868_v59 = vrot.slane %v1867_v25, 4  ;;  %v1876_v24 = vadd.f32 %v1875_v13, %v1874_v49  ;;  %v1884_v63 = vsel %vm271_vm0, %v6842_v0, 0.0 }
 0x14c   :  { %v6938_v45 = vmax.f32 %v755_v36, %v756_v55  ;;  %v1892_v56 = vsel %vm271_vm0, %v6854_v5, 0.0  ;;  %v765_v39 = vrot.slane %v764_v62, 1  ;;  %v1861_v29 = vrot.slane %v1860_v31, 2 }
 0x14d   :  { %v773_v44 = vmax.f32 %v771_v38, %v772_v20  ;;  %v1869_v28 = vadd.f32 %v1868_v59, %v1867_v25  ;;  %v1877_v33 = vrot.slane %v1876_v24, 4  ;;  %v1885_v17 = vadd.f32 %v1884_v63, %v1883_v8 }
 0x14e   :  { %v1893_v3 = vsel %vm271_vm0, %v6859_v15, 0.0  ;;  %v1901_v11 = vsel %vm271_vm0, %v6872_v50, 0.0  ;;  %v6948_v43 = vmax.f32 %v764_v62, %v765_v39  ;;  %v1862_v22 = vadd.f32 %v1861_v29, %v1860_v31 }
 0x14f   :  { %v774_v36 = vrot.slane %v773_v44, 1  ;;  %v1870_v0 = vrot.slane %v1869_v28, 2  ;;  %v1878_v49 = vadd.f32 %v1877_v33, %v1876_v24  ;;  %v1886_v41 = vrot.slane %v1885_v17, 4 }
 0x150   :  { %v1894_v5 = vadd.f32 %v1893_v3, %v1892_v56  ;;  %v1902_v38 = vsel %vm271_vm0, %v6877_v9, 0.0  ;;  %v1863_v25 = vrot.slane %v1862_v22, 1  ;;  %v1910_v50 = vsel %vm271_vm0, %v6889_v21, 0.0 }
 0x151   :  { %v6952_v7 = vmax.f32 %v773_v44, %v774_v36  ;;  %v1871_v55 = vadd.f32 %v1870_v0, %v1869_v28  ;;  %v1903_v13 = vadd.f32 %v1902_v38, %v1901_v11  ;;  %v1879_v15 = vrot.slane %v1878_v49, 2 }
 0x152   :  { %v1887_v8 = vadd.f32 %v1886_v41, %v1885_v17  ;;  %v1895_v20 = vrot.slane %v1894_v5, 4  ;;  %v1864_v62 = vadd.f32 %v1863_v25, %v1862_v22  ;;  %v1911_v24 = vsel %vm271_vm0, %v6894_v23, 0.0 }
 0x153   :  { %v1872_v31 = vrot.slane %v1871_v55, 1  ;;  %v1904_v59 = vrot.slane %v1903_v13, 4  ;;  %v1880_v63 = vadd.f32 %v1879_v15, %v1878_v49  ;;  %v1912_v39 = vadd.f32 %v1911_v24, %v1910_v50 }
 0x154   :  { %v1888_v56 = vrot.slane %v1887_v8, 2  ;;  %v1896_v9 = vadd.f32 %v1895_v20, %v1894_v5  ;;  %v1919_v28 = vsel %vm271_vm0, %v6903_v19, 0.0  ;;  %v1920_v33 = vsel %vm271_vm0, %v6912_v32, 0.0 }
 0x155   :  { %v1873_v44 = vadd.f32 %v1872_v31, %v1871_v55  ;;  %v1905_v29 = vadd.f32 %v1904_v59, %v1903_v13  ;;  %v1881_v17 = vrot.slane %v1880_v63, 1  ;;  %v1913_v11 = vrot.slane %v1912_v39, 4 }
 0x156   :  { %v1889_v21 = vadd.f32 %v1888_v56, %v1887_v8  ;;  %v1897_v3 = vrot.slane %v1896_v9, 2  ;;  %v1921_v22 = vadd.f32 %v1920_v33, %v1919_v28  ;;  %v2624_v0 = vmul.f32 0.0625, %v1864_v62 }
 0x157   :  { %v1906_v36 = vrot.slane %v1905_v29, 2  ;;  %v2625_v23 = vmul.f32 0.0625, %v1873_v44  ;;  %v1882_v49 = vadd.f32 %v1881_v17, %v1880_v63  ;;  %v1914_v38 = vadd.f32 %v1913_v11, %v1912_v39 }
 0x158   :  { %v1890_v41 = vrot.slane %v1889_v21, 1  ;;  %v1898_v5 = vadd.f32 %v1897_v3, %v1896_v9  ;;  %v1922_v55 = vrot.slane %v1921_v22, 4  ;;  %v2752_v13 = vadd.f32 %v2624_v0, %v6896_v27  ;;  %v6972_v27 = vld [vmem:[%s10408_s0 + $0x480] sm:$0xff]  ;;  %v6990_v3 = vld [vmem:[%s10408_s0 + $0x490] sm:$0xff] }
 0x159   :  { %v1907_v25 = vadd.f32 %v1906_v36, %v1905_v29  ;;  %v2753_v19 = vadd.f32 %v2625_v23, %v6905_v46  ;;  %v1915_v20 = vrot.slane %v1914_v38, 2  ;;  %v2626_v8 = vmul.f32 0.0625, %v1882_v49 }
 0x15a   :  { %v1891_v15 = vadd.f32 %v1890_v41, %v1889_v21  ;;  %v1899_v32 = vrot.slane %v1898_v5, 1  ;;  %v1923_v31 = vadd.f32 %v1922_v55, %v1921_v22  ;;  %v6964_v59 = vmul.f32 0.5, %v2752_v13 }
 0x15b   :  { %v1908_v50 = vrot.slane %v1907_v25, 1  ;;  %v6966_v62 = vmul.f32 0.5, %v2753_v19  ;;  %v1916_v63 = vadd.f32 %v1915_v20, %v1914_v38  ;;  %v2754_v9 = vadd.f32 %v2626_v8, %v6920_v12  ;;  %v6985_v12 = vld [vmem:[%s10408_s0 + $0x488] sm:$0xff] }
 0x15c   :  { %10643 = vst [vmem:[#allocation38_spill] sm:$0xff] %v6964_v59  ;;  %v1900_v24 = vadd.f32 %v1899_v32, %v1898_v5  ;;  %v2627_v56 = vmul.f32 0.0625, %v1891_v15  ;;  %v1924_v39 = vrot.slane %v1923_v31, 2  ;;  %v920_v29 = vsel %vm271_vm0, %v6972_v27, -inf  ;;  %v7004_v5 = vld [vmem:[%s10408_s0 + $0x498] sm:$0xff]  ;;  %v7016_v32 = vld [vmem:[%s10408_s0 + $0x4a0] sm:$0xff] }
 0x15d   :  { %10644 = vst [vmem:[#allocation39_spill] sm:$0xff] %v6966_v62  ;;  %v1909_v46 = vadd.f32 %v1908_v50, %v1907_v25  ;;  %v3137_v44 = vsel %vm3088_vm1, %v6966_v62, %v6964_v59  ;;  %v1917_v28 = vrot.slane %v1916_v63, 1  ;;  %v6980_v21 = vmul.f32 0.5, %v2754_v9 }
 0x15e   :  { %v2628_v33 = vmul.f32 0.0625, %v1900_v24  ;;  %v2755_v17 = vadd.f32 %v2627_v56, %v6926_v10  ;;  %v1925_v11 = vadd.f32 %v1924_v39, %v1923_v31  ;;  %v921_v22 = vsel %vm271_vm0, %v6985_v12, -inf }
 0x15f   :  { %10645 = vst [vmem:[#allocation40_spill] sm:$0xff] %v6980_v21  ;;  %v2629_v36 = vmul.f32 0.0625, %v1909_v46  ;;  %v929_v10 = vsel %vm271_vm0, %v6990_v3, -inf  ;;  %v1918_v0 = vadd.f32 %v1917_v28, %v1916_v63  ;;  %v3138_v41 = vsel %vm3090_vm2, %v6980_v21, %v3137_v44 }
 0x160   :  { %v2756_v23 = vadd.f32 %v2628_v33, %v6932_v4  ;;  %v6997_v49 = vmul.f32 0.5, %v2755_v17  ;;  %v1926_v38 = vrot.slane %v1925_v11, 1  ;;  %v922_v55 = vmax.f32 %v920_v29, %v921_v22  ;;  %v7037_v29 = vld [vmem:[%s10408_s0 + $0x4b0] sm:$0xff] }
 0x161   :  { %v2757_v25 = vadd.f32 %v2629_v36, %v6938_v45  ;;  %v930_v13 = vsel %vm271_vm0, %v7004_v5, -inf  ;;  %v2630_v19 = vmul.f32 0.0625, %v1918_v0  ;;  %v7023_v45 = vld [vmem:[%s10408_s0 + $0x4a8] sm:$0xff]  ;;  %v938_v24 = vsel %vm271_vm0, %v7016_v32, -inf  ;;  %v7054_v0 = vld [vmem:[%s10408_s0 + $0x4c0] sm:$0xff] }
 0x162   :  { %10646 = vst [vmem:[#allocation41_spill] sm:$0xff] %v6997_v49  ;;  %v7009_v15 = vmul.f32 0.5, %v2756_v23  ;;  %v3139_v4 = vsel %vm3092_vm3, %v6997_v49, %v3138_v41  ;;  %v931_v20 = vmax.f32 %v929_v10, %v930_v13  ;;  %v1927_v8 = vadd.f32 %v1926_v38, %v1925_v11  ;;  %v7059_v23 = vld [vmem:[%s10408_s0 + $0x4c8] sm:$0xff] }
 0x163   :  { %v7018_v50 = vmul.f32 0.5, %v2757_v25  ;;  %v923_v31 = vrot.slane %v922_v55, 4  ;;  %v2758_v63 = vadd.f32 %v2630_v19, %v6948_v43  ;;  %v939_v46 = vsel %vm271_vm0, %v7023_v45, -inf  ;;  %v7042_v43 = vld [vmem:[%s10408_s0 + $0x4b8] sm:$0xff] }
 0x164   :  { %10647 = vst [vmem:[#allocation42_spill] sm:$0xff] %v7009_v15  ;;  %v3140_v56 = vsel %vm3094_vm4, %v7009_v15, %v3139_v4  ;;  %v932_v9 = vrot.slane %v931_v20, 4  ;;  %v2631_v39 = vmul.f32 0.0625, %v1927_v8  ;;  %v940_v33 = vmax.f32 %v938_v24, %v939_v46  ;;  %v7077_v8 = vld [vmem:[%s10408_s0 + $0x4d8] sm:$0xff] }
 0x165   :  { %10648 = vst [vmem:[#allocation43_spill] sm:$0xff] %v7018_v50  ;;  %v3141_v44 = vsel %vm3096_vm5, %v7018_v50, %v3140_v56  ;;  %v924_v28 = vmax.f32 %v922_v55, %v923_v31  ;;  %v7044_v17 = vmul.f32 0.5, %v2758_v63  ;;  %v947_v36 = vsel %vm271_vm0, %v7037_v29, -inf }
 0x166   :  { %v933_v11 = vmax.f32 %v931_v20, %v932_v9  ;;  %v948_v22 = vsel %vm271_vm0, %v7042_v43, -inf  ;;  %v2759_v10 = vadd.f32 %v2631_v39, %v6952_v7  ;;  %v941_v38 = vrot.slane %v940_v33, 4  ;;  %v7072_v20 = vld [vmem:[%s10408_s0 + $0x4d0] sm:$0xff] }
 0x167   :  { %10649 = vst [vmem:[#allocation44_spill] sm:$0xff] %v7044_v17  ;;  %v925_v41 = vrot.slane %v924_v28, 2  ;;  %v949_v25 = vmax.f32 %v947_v36, %v948_v22  ;;  %v3142_v55 = vsel %vm3098_vm6, %v7044_v17, %v3141_v44  ;;  %v956_v7 = vsel %vm271_vm0, %v7054_v0, -inf }
 0x168   :  { %v934_v13 = vrot.slane %v933_v11, 2  ;;  %v957_v19 = vsel %vm271_vm0, %v7059_v23, -inf  ;;  %v7067_v4 = vmul.f32 0.5, %v2759_v10  ;;  %v942_v24 = vmax.f32 %v940_v33, %v941_v38  ;;  %v7094_v38 = vld [vmem:[%s10408_s0 + $0x4e8] sm:$0xff] }
 0x169   :  { %v926_v31 = vmax.f32 %v924_v28, %v925_v41  ;;  %v950_v63 = vrot.slane %v949_v25, 4  ;;  %v958_v9 = vmax.f32 %v956_v7, %v957_v19  ;;  %v965_v46 = vsel %vm271_vm0, %v7072_v20, -inf  ;;  %v7089_v28 = vld [vmem:[%s10408_s0 + $0x4e0] sm:$0xff]  ;;  %v7103_v19 = vld [vmem:[%s10408_s0 + $0x4f0] sm:$0xff] }
 0x16a   :  { %10650 = vst [vmem:[#allocation45_spill] sm:$0xff] %v7067_v4  ;;  %v935_v56 = vmax.f32 %v933_v11, %v934_v13  ;;  %v966_v39 = vsel %vm271_vm0, %v7077_v8, -inf  ;;  %v3143_v44 = vsel %vm3100_vm7, %v7067_v4, %v3142_v55  ;;  %v943_v22 = vrot.slane %v942_v24, 2 }
 0x16b   :  { %v927_v36 = vrot.slane %v926_v31, 1  ;;  %v951_v10 = vmax.f32 %v949_v25, %v950_v63  ;;  %v3241_v17 = vsel %vm271_vm0, %v3143_v44, 0.0  ;;  %v959_v11 = vrot.slane %v958_v9, 4 }
 0x16c   :  { %v936_v33 = vrot.slane %v935_v56, 1  ;;  %v967_v41 = vmax.f32 %v965_v46, %v966_v39  ;;  %3242 = vadd.xlane.f32.xlu0 %v3241_v17  ;;  %v944_v13 = vmax.f32 %v942_v24, %v943_v22  ;;  %v974_v7 = vsel %vm271_vm0, %v7089_v28, -inf }
 0x16d   :  { %v7096_v55 = vmax.f32 %v926_v31, %v927_v36  ;;  %v952_v25 = vrot.slane %v951_v10, 2  ;;  %v960_v17 = vmax.f32 %v958_v9, %v959_v11  ;;  %v975_v39 = vsel %vm271_vm0, %v7094_v38, -inf  ;;  %v7112_v31 = vld [vmem:[%s10408_s0 + $0x4f8] sm:$0xff] }
 0x16e   :  { %v7105_v63 = vmax.f32 %v935_v56, %v936_v33  ;;  %v968_v46 = vrot.slane %v967_v41, 4  ;;  %v945_v24 = vrot.slane %v944_v13, 1  ;;  %v976_v36 = vmax.f32 %v974_v7, %v975_v39 }
 0x16f   :  { %v953_v44 = vmax.f32 %v951_v10, %v952_v25  ;;  %v983_v22 = vsel %vm271_vm0, %v7103_v19, -inf  ;;  %v961_v4 = vrot.slane %v960_v17, 2  ;;  %v984_v56 = vsel %vm271_vm0, %v7112_v31, -inf }
 0x170   :  { %v969_v50 = vmax.f32 %v967_v41, %v968_v46  ;;  %v2072_v9 = vsel %vm271_vm0, %v6972_v27, 0.0  ;;  %v7120_v33 = vmax.f32 %v944_v13, %v945_v24  ;;  %v977_v15 = vrot.slane %v976_v36, 4 }
 0x171   :  { %v954_v11 = vrot.slane %v953_v44, 1  ;;  %v985_v49 = vmax.f32 %v983_v22, %v984_v56  ;;  %v962_v21 = vmax.f32 %v960_v17, %v961_v4  ;;  %v2073_v10 = vsel %vm271_vm0, %v6985_v12, 0.0 }
 0x172   :  { %v970_v62 = vrot.slane %v969_v50, 2  ;;  %v2081_v25 = vsel %vm271_vm0, %v6990_v3, 0.0  ;;  %v978_v7 = vmax.f32 %v976_v36, %v977_v15  ;;  %v2074_v39 = vadd.f32 %v2073_v10, %v2072_v9 }
 0x173   :  { %v7126_v41 = vmax.f32 %v953_v44, %v954_v11  ;;  %v986_v46 = vrot.slane %v985_v49, 4  ;;  %v963_v59 = vrot.slane %v962_v21, 1  ;;  %v2082_v13 = vsel %vm271_vm0, %v7004_v5, 0.0 }
 0x174   :  { %v971_v27 = vmax.f32 %v969_v50, %v970_v62  ;;  %v2090_v4 = vsel %vm271_vm0, %v7016_v32, 0.0  ;;  %v979_v17 = vrot.slane %v978_v7, 2  ;;  %v2075_v22 = vrot.slane %v2074_v39, 4 }
 0x175   :  { %v987_v24 = vmax.f32 %v985_v49, %v986_v46  ;;  %v2083_v12 = vadd.f32 %v2082_v13, %v2081_v25  ;;  %v7132_v56 = vmax.f32 %v962_v21, %v963_v59  ;;  %v2091_v15 = vsel %vm271_vm0, %v7023_v45, 0.0 }
 0x176   :  { %v972_v3 = vrot.slane %v971_v27, 1  ;;  %v2099_v44 = vsel %vm271_vm0, %v7037_v29, 0.0  ;;  %v980_v62 = vmax.f32 %v978_v7, %v979_v17  ;;  %v2076_v36 = vadd.f32 %v2075_v22, %v2074_v39 }
 0x177   :  { %v988_v50 = vrot.slane %v987_v24, 2  ;;  %v2084_v5 = vrot.slane %v2083_v12, 4  ;;  %v2092_v32 = vadd.f32 %v2091_v15, %v2090_v4  ;;  %v2100_v49 = vsel %vm271_vm0, %v7042_v43, 0.0 }
 0x178   :  { %v7138_v9 = vmax.f32 %v971_v27, %v972_v3  ;;  %v2108_v59 = vsel %vm271_vm0, %v7054_v0, 0.0  ;;  %v981_v21 = vrot.slane %v980_v62, 1  ;;  %v2077_v10 = vrot.slane %v2076_v36, 2 }
 0x179   :  { %v989_v11 = vmax.f32 %v987_v24, %v988_v50  ;;  %v2085_v45 = vadd.f32 %v2084_v5, %v2083_v12  ;;  %v2093_v25 = vrot.slane %v2092_v32, 4  ;;  %v2101_v46 = vadd.f32 %v2100_v49, %v2099_v44 }
 0x17a   :  { %v2109_v29 = vsel %vm271_vm0, %v7059_v23, 0.0  ;;  %v2117_v7 = vsel %vm271_vm0, %v7072_v20, 0.0  ;;  %v7148_v39 = vmax.f32 %v980_v62, %v981_v21  ;;  %v2078_v13 = vadd.f32 %v2077_v10, %v2076_v36 }
 0x17b   :  { %v990_v27 = vrot.slane %v989_v11, 1  ;;  %v2086_v43 = vrot.slane %v2085_v45, 2  ;;  %v2094_v4 = vadd.f32 %v2093_v25, %v2092_v32  ;;  %v2102_v17 = vrot.slane %v2101_v46, 4 }
 0x17c   :  { %v2110_v0 = vadd.f32 %v2109_v29, %v2108_v59  ;;  %v2118_v24 = vsel %vm271_vm0, %v7077_v8, 0.0  ;;  %v2079_v12 = vrot.slane %v2078_v13, 1  ;;  %v2126_v20 = vsel %vm271_vm0, %v7089_v28, 0.0 }
 0x17d   :  { %v7152_v22 = vmax.f32 %v989_v11, %v990_v27  ;;  %v2087_v3 = vadd.f32 %v2086_v43, %v2085_v45  ;;  %v2119_v15 = vadd.f32 %v2118_v24, %v2117_v7  ;;  %v2095_v23 = vrot.slane %v2094_v4, 2 }
 0x17e   :  { %v2103_v44 = vadd.f32 %v2102_v17, %v2101_v46  ;;  %v2111_v50 = vrot.slane %v2110_v0, 4  ;;  %v2080_v62 = vadd.f32 %v2079_v12, %v2078_v13  ;;  %v2127_v32 = vsel %vm271_vm0, %v7094_v38, 0.0 }
 0x17f   :  { %v2088_v36 = vrot.slane %v2087_v3, 1  ;;  %v2120_v5 = vrot.slane %v2119_v15, 4  ;;  %v2096_v49 = vadd.f32 %v2095_v23, %v2094_v4  ;;  %v2128_v21 = vadd.f32 %v2127_v32, %v2126_v20 }
 0x180   :  { %v2104_v59 = vrot.slane %v2103_v44, 2  ;;  %v2112_v8 = vadd.f32 %v2111_v50, %v2110_v0  ;;  %v2135_v45 = vsel %vm271_vm0, %v7103_v19, 0.0  ;;  %v2136_v25 = vsel %vm271_vm0, %v7112_v31, 0.0 }
 0x181   :  { %v2089_v11 = vadd.f32 %v2088_v36, %v2087_v3  ;;  %v2121_v10 = vadd.f32 %v2120_v5, %v2119_v15  ;;  %v2097_v46 = vrot.slane %v2096_v49, 1  ;;  %v2129_v7 = vrot.slane %v2128_v21, 4 }
 0x182   :  { %v2105_v28 = vadd.f32 %v2104_v59, %v2103_v44  ;;  %v2113_v29 = vrot.slane %v2112_v8, 2  ;;  %v2137_v13 = vadd.f32 %v2136_v25, %v2135_v45  ;;  %v2648_v43 = vmul.f32 0.0625, %v2080_v62 }
 0x183   :  { %v2122_v27 = vrot.slane %v2121_v10, 2  ;;  %v2649_v38 = vmul.f32 0.0625, %v2089_v11  ;;  %v2098_v4 = vadd.f32 %v2097_v46, %v2096_v49  ;;  %v2130_v24 = vadd.f32 %v2129_v7, %v2128_v21 }
 0x184   :  { %v2106_v17 = vrot.slane %v2105_v28, 1  ;;  %v2114_v0 = vadd.f32 %v2113_v29, %v2112_v8  ;;  %v2138_v3 = vrot.slane %v2137_v13, 4  ;;  %v2776_v15 = vadd.f32 %v2648_v43, %v7096_v55  ;;  %v7172_v55 = vld [vmem:[%s10408_s0 + $0x400] sm:$0xff]  ;;  %v7190_v29 = vld [vmem:[%s10408_s0 + $0x410] sm:$0xff] }
 0x185   :  { %v2123_v12 = vadd.f32 %v2122_v27, %v2121_v10  ;;  %v2777_v19 = vadd.f32 %v2649_v38, %v7105_v63  ;;  %v2131_v50 = vrot.slane %v2130_v24, 2  ;;  %v2650_v44 = vmul.f32 0.0625, %v2098_v4 }
 0x186   :  { %v2107_v23 = vadd.f32 %v2106_v17, %v2105_v28  ;;  %v2115_v31 = vrot.slane %v2114_v0, 1  ;;  %v2139_v36 = vadd.f32 %v2138_v3, %v2137_v13  ;;  %v7164_v5 = vmul.f32 0.5, %v2776_v15 }
 0x187   :  { %v2124_v20 = vrot.slane %v2123_v12, 1  ;;  %v7166_v62 = vmul.f32 0.5, %v2777_v19  ;;  %v2132_v49 = vadd.f32 %v2131_v50, %v2130_v24  ;;  %v2778_v8 = vadd.f32 %v2650_v44, %v7120_v33  ;;  %v7185_v33 = vld [vmem:[%s10408_s0 + $0x408] sm:$0xff] }
 0x188   :  { %10651 = vst [vmem:[#allocation46_spill] sm:$0xff] %v7164_v5  ;;  %v2116_v32 = vadd.f32 %v2115_v31, %v2114_v0  ;;  %v2651_v59 = vmul.f32 0.0625, %v2107_v23  ;;  %v2140_v21 = vrot.slane %v2139_v36, 2  ;;  %v848_v10 = vsel %vm271_vm0, %v7172_v55, -inf  ;;  %v7204_v0 = vld [vmem:[%s10408_s0 + $0x418] sm:$0xff]  ;;  %v7216_v31 = vld [vmem:[%s10408_s0 + $0x420] sm:$0xff] }
 0x189   :  { %10652 = vst [vmem:[#allocation47_spill] sm:$0xff] %v7166_v62  ;;  %v2125_v63 = vadd.f32 %v2124_v20, %v2123_v12  ;;  %v3158_v11 = vsel %vm3088_vm1, %v7166_v62, %v7164_v5  ;;  %v2133_v45 = vrot.slane %v2132_v49, 1  ;;  %v7180_v28 = vmul.f32 0.5, %v2778_v8 }
 0x18a   :  { %v2652_v25 = vmul.f32 0.0625, %v2116_v32  ;;  %v2779_v46 = vadd.f32 %v2651_v59, %v7126_v41  ;;  %v2141_v7 = vadd.f32 %v2140_v21, %v2139_v36  ;;  %v849_v13 = vsel %vm271_vm0, %v7185_v33, -inf }
 0x18b   :  { %10653 = vst [vmem:[#allocation48_spill] sm:$0xff] %v7180_v28  ;;  %v2653_v27 = vmul.f32 0.0625, %v2125_v63  ;;  %v857_v41 = vsel %vm271_vm0, %v7190_v29, -inf  ;;  %v2134_v43 = vadd.f32 %v2133_v45, %v2132_v49  ;;  %v3159_v17 = vsel %vm3090_vm2, %v7180_v28, %v3158_v11 }
 0x18c   :  { %v2780_v38 = vadd.f32 %v2652_v25, %v7132_v56  ;;  %v7197_v4 = vmul.f32 0.5, %v2779_v46  ;;  %v2142_v24 = vrot.slane %v2141_v7, 1  ;;  %v850_v3 = vmax.f32 %v848_v10, %v849_v13  ;;  %v7237_v10 = vld [vmem:[%s10408_s0 + $0x430] sm:$0xff] }
 0x18d   :  { %v2781_v12 = vadd.f32 %v2653_v27, %v7138_v9  ;;  %v858_v15 = vsel %vm271_vm0, %v7204_v0, -inf  ;;  %v2654_v19 = vmul.f32 0.0625, %v2134_v43  ;;  %v7223_v9 = vld [vmem:[%s10408_s0 + $0x428] sm:$0xff]  ;;  %v866_v32 = vsel %vm271_vm0, %v7216_v31, -inf  ;;  %v7254_v43 = vld [vmem:[%s10408_s0 + $0x440] sm:$0xff] }
 0x18e   :  { %10654 = vst [vmem:[#allocation49_spill] sm:$0xff] %v7197_v4  ;;  %v7209_v23 = vmul.f32 0.5, %v2780_v38  ;;  %v3160_v56 = vsel %vm3092_vm3, %v7197_v4, %v3159_v17  ;;  %v859_v50 = vmax.f32 %v857_v41, %v858_v15  ;;  %v2143_v44 = vadd.f32 %v2142_v24, %v2141_v7  ;;  %v7259_v38 = vld [vmem:[%s10408_s0 + $0x448] sm:$0xff] }
 0x18f   :  { %v7218_v20 = vmul.f32 0.5, %v2781_v12  ;;  %v851_v36 = vrot.slane %v850_v3, 4  ;;  %v2782_v49 = vadd.f32 %v2654_v19, %v7148_v39  ;;  %v867_v63 = vsel %vm271_vm0, %v7223_v9, -inf  ;;  %v7242_v39 = vld [vmem:[%s10408_s0 + $0x438] sm:$0xff] }
 0x190   :  { %10655 = vst [vmem:[#allocation50_spill] sm:$0xff] %v7209_v23  ;;  %v3161_v59 = vsel %vm3094_vm4, %v7209_v23, %v3160_v56  ;;  %v860_v8 = vrot.slane %v859_v50, 4  ;;  %v2655_v21 = vmul.f32 0.0625, %v2143_v44  ;;  %v868_v25 = vmax.f32 %v866_v32, %v867_v63  ;;  %v7277_v44 = vld [vmem:[%s10408_s0 + $0x458] sm:$0xff] }
 0x191   :  { %10656 = vst [vmem:[#allocation51_spill] sm:$0xff] %v7218_v20  ;;  %v3162_v11 = vsel %vm3096_vm5, %v7218_v20, %v3161_v59  ;;  %v852_v45 = vmax.f32 %v850_v3, %v851_v36  ;;  %v7244_v46 = vmul.f32 0.5, %v2782_v49  ;;  %v875_v27 = vsel %vm271_vm0, %v7237_v10, -inf }
 0x192   :  { %v861_v7 = vmax.f32 %v859_v50, %v860_v8  ;;  %v876_v13 = vsel %vm271_vm0, %v7242_v39, -inf  ;;  %v2783_v41 = vadd.f32 %v2655_v21, %v7152_v22  ;;  %v869_v24 = vrot.slane %v868_v25, 4  ;;  %v7272_v50 = vld [vmem:[%s10408_s0 + $0x450] sm:$0xff] }
 0x193   :  { %10657 = vst [vmem:[#allocation52_spill] sm:$0xff] %v7244_v46  ;;  %v853_v17 = vrot.slane %v852_v45, 2  ;;  %v877_v12 = vmax.f32 %v875_v27, %v876_v13  ;;  %v3163_v3 = vsel %vm3098_vm6, %v7244_v46, %v3162_v11  ;;  %v884_v22 = vsel %vm271_vm0, %v7254_v43, -inf }
 0x194   :  { %v862_v15 = vrot.slane %v861_v7, 2  ;;  %v885_v19 = vsel %vm271_vm0, %v7259_v38, -inf  ;;  %v7267_v56 = vmul.f32 0.5, %v2783_v41  ;;  %v870_v32 = vmax.f32 %v868_v25, %v869_v24  ;;  %v7294_v24 = vld [vmem:[%s10408_s0 + $0x468] sm:$0xff] }
 0x195   :  { %v854_v36 = vmax.f32 %v852_v45, %v853_v17  ;;  %v878_v49 = vrot.slane %v877_v12, 4  ;;  %v886_v8 = vmax.f32 %v884_v22, %v885_v19  ;;  %v893_v63 = vsel %vm271_vm0, %v7272_v50, -inf  ;;  %v7289_v45 = vld [vmem:[%s10408_s0 + $0x460] sm:$0xff]  ;;  %v7303_v19 = vld [vmem:[%s10408_s0 + $0x470] sm:$0xff] }
 0x196   :  { %10658 = vst [vmem:[#allocation53_spill] sm:$0xff] %v7267_v56  ;;  %v863_v59 = vmax.f32 %v861_v7, %v862_v15  ;;  %v894_v21 = vsel %vm271_vm0, %v7277_v44, -inf  ;;  %v3164_v11 = vsel %vm3100_vm7, %v7267_v56, %v3163_v3  ;;  %v871_v13 = vrot.slane %v870_v32, 2 }
 0x197   :  { %v855_v27 = vrot.slane %v854_v36, 1  ;;  %v879_v41 = vmax.f32 %v877_v12, %v878_v49  ;;  %v3250_v46 = vsel %vm271_vm0, %v3164_v11, 0.0  ;;  %v887_v7 = vrot.slane %v886_v8, 4 }
 0x198   :  { %v864_v25 = vrot.slane %v863_v59, 1  ;;  %v895_v17 = vmax.f32 %v893_v63, %v894_v21  ;;  %3251 = vadd.xlane.f32.xlu1 %v3250_v46  ;;  %v872_v15 = vmax.f32 %v870_v32, %v871_v13  ;;  %v902_v22 = vsel %vm271_vm0, %v7289_v45, -inf }
 0x199   :  { %v7296_v3 = vmax.f32 %v854_v36, %v855_v27  ;;  %v880_v12 = vrot.slane %v879_v41, 2  ;;  %v888_v46 = vmax.f32 %v886_v8, %v887_v7  ;;  %v903_v21 = vsel %vm271_vm0, %v7294_v24, -inf  ;;  %v7312_v36 = vld [vmem:[%s10408_s0 + $0x478] sm:$0xff] }
 0x19a   :  { %v7305_v49 = vmax.f32 %v863_v59, %v864_v25  ;;  %v896_v63 = vrot.slane %v895_v17, 4  ;;  %v873_v32 = vrot.slane %v872_v15, 1  ;;  %v904_v27 = vmax.f32 %v902_v22, %v903_v21 }
 0x19b   :  { %v881_v11 = vmax.f32 %v879_v41, %v880_v12  ;;  %v911_v13 = vsel %vm271_vm0, %v7303_v19, -inf  ;;  %v889_v56 = vrot.slane %v888_v46, 2  ;;  %v912_v59 = vsel %vm271_vm0, %v7312_v36, -inf }
 0x19c   :  { %v897_v20 = vmax.f32 %v895_v17, %v896_v63  ;;  %v2000_v8 = vsel %vm271_vm0, %v7172_v55, 0.0  ;;  %v7320_v25 = vmax.f32 %v872_v15, %v873_v32  ;;  %v905_v23 = vrot.slane %v904_v27, 4 }
 0x19d   :  { %v882_v7 = vrot.slane %v881_v11, 1  ;;  %v913_v4 = vmax.f32 %v911_v13, %v912_v59  ;;  %v890_v28 = vmax.f32 %v888_v46, %v889_v56  ;;  %v2001_v41 = vsel %vm271_vm0, %v7185_v33, 0.0 }
 0x19e   :  { %v898_v62 = vrot.slane %v897_v20, 2  ;;  %v2009_v12 = vsel %vm271_vm0, %v7190_v29, 0.0  ;;  %v906_v22 = vmax.f32 %v904_v27, %v905_v23  ;;  %v2002_v21 = vadd.f32 %v2001_v41, %v2000_v8 }
 0x19f   :  { %v7326_v17 = vmax.f32 %v881_v11, %v882_v7  ;;  %v914_v63 = vrot.slane %v913_v4, 4  ;;  %v891_v5 = vrot.slane %v890_v28, 1  ;;  %v2010_v15 = vsel %vm271_vm0, %v7204_v0, 0.0 }
 0x1a0   :  { %v899_v55 = vmax.f32 %v897_v20, %v898_v62  ;;  %v2018_v56 = vsel %vm271_vm0, %v7216_v31, 0.0  ;;  %v907_v46 = vrot.slane %v906_v22, 2  ;;  %v2003_v13 = vrot.slane %v2002_v21, 4 }
 0x1a1   :  { %v915_v32 = vmax.f32 %v913_v4, %v914_v63  ;;  %v2011_v33 = vadd.f32 %v2010_v15, %v2009_v12  ;;  %v7332_v59 = vmax.f32 %v890_v28, %v891_v5  ;;  %v2019_v23 = vsel %vm271_vm0, %v7223_v9, 0.0 }
 0x1a2   :  { %v900_v29 = vrot.slane %v899_v55, 1  ;;  %v2027_v11 = vsel %vm271_vm0, %v7237_v10, 0.0  ;;  %v908_v62 = vmax.f32 %v906_v22, %v907_v46  ;;  %v2004_v27 = vadd.f32 %v2003_v13, %v2002_v21 }
 0x1a3   :  { %v916_v20 = vrot.slane %v915_v32, 2  ;;  %v2012_v0 = vrot.slane %v2011_v33, 4  ;;  %v2020_v31 = vadd.f32 %v2019_v23, %v2018_v56  ;;  %v2028_v4 = vsel %vm271_vm0, %v7242_v39, 0.0 }
 0x1a4   :  { %v7338_v8 = vmax.f32 %v899_v55, %v900_v29  ;;  %v2036_v5 = vsel %vm271_vm0, %v7254_v43, 0.0  ;;  %v909_v28 = vrot.slane %v908_v62, 1  ;;  %v2005_v41 = vrot.slane %v2004_v27, 2 }
 0x1a5   :  { %v917_v7 = vmax.f32 %v915_v32, %v916_v20  ;;  %v2013_v9 = vadd.f32 %v2012_v0, %v2011_v33  ;;  %v2021_v12 = vrot.slane %v2020_v31, 4  ;;  %v2029_v63 = vadd.f32 %v2028_v4, %v2027_v11 }
 0x1a6   :  { %v2037_v10 = vsel %vm271_vm0, %v7259_v38, 0.0  ;;  %v2045_v22 = vsel %vm271_vm0, %v7272_v50, 0.0  ;;  %v7348_v21 = vmax.f32 %v908_v62, %v909_v28  ;;  %v2006_v15 = vadd.f32 %v2005_v41, %v2004_v27 }
 0x1a7   :  { %v918_v55 = vrot.slane %v917_v7, 1  ;;  %v2014_v39 = vrot.slane %v2013_v9, 2  ;;  %v2022_v56 = vadd.f32 %v2021_v12, %v2020_v31  ;;  %v2030_v46 = vrot.slane %v2029_v63, 4 }
 0x1a8   :  { %v2038_v43 = vadd.f32 %v2037_v10, %v2036_v5  ;;  %v2046_v32 = vsel %vm271_vm0, %v7277_v44, 0.0  ;;  %v2007_v33 = vrot.slane %v2006_v15, 1  ;;  %v2054_v50 = vsel %vm271_vm0, %v7289_v45, 0.0 }
 0x1a9   :  { %v7352_v13 = vmax.f32 %v917_v7, %v918_v55  ;;  %v2015_v29 = vadd.f32 %v2014_v39, %v2013_v9  ;;  %v2047_v23 = vadd.f32 %v2046_v32, %v2045_v22  ;;  %v2023_v38 = vrot.slane %v2022_v56, 2 }
 0x1aa   :  { %v2031_v11 = vadd.f32 %v2030_v46, %v2029_v63  ;;  %v2039_v20 = vrot.slane %v2038_v43, 4  ;;  %v2008_v62 = vadd.f32 %v2007_v33, %v2006_v15  ;;  %v2055_v31 = vsel %vm271_vm0, %v7294_v24, 0.0 }
 0x1ab   :  { %v2016_v27 = vrot.slane %v2015_v29, 1  ;;  %v2048_v0 = vrot.slane %v2047_v23, 4  ;;  %v2024_v4 = vadd.f32 %v2023_v38, %v2022_v56  ;;  %v2056_v28 = vadd.f32 %v2055_v31, %v2054_v50 }
 0x1ac   :  { %v2032_v5 = vrot.slane %v2031_v11, 2  ;;  %v2040_v44 = vadd.f32 %v2039_v20, %v2038_v43  ;;  %v2063_v9 = vsel %vm271_vm0, %v7303_v19, 0.0  ;;  %v2064_v12 = vsel %vm271_vm0, %v7312_v36, 0.0 }
 0x1ad   :  { %v2017_v7 = vadd.f32 %v2016_v27, %v2015_v29  ;;  %v2049_v41 = vadd.f32 %v2048_v0, %v2047_v23  ;;  %v2025_v63 = vrot.slane %v2024_v4, 1  ;;  %v2057_v22 = vrot.slane %v2056_v28, 4 }
 0x1ae   :  { %v2033_v45 = vadd.f32 %v2032_v5, %v2031_v11  ;;  %v2041_v10 = vrot.slane %v2040_v44, 2  ;;  %v2065_v15 = vadd.f32 %v2064_v12, %v2063_v9  ;;  %v2640_v39 = vmul.f32 0.0625, %v2008_v62 }
 0x1af   :  { %v2050_v55 = vrot.slane %v2049_v41, 2  ;;  %v2641_v24 = vmul.f32 0.0625, %v2017_v7  ;;  %v2026_v56 = vadd.f32 %v2025_v63, %v2024_v4  ;;  %v2058_v32 = vadd.f32 %v2057_v22, %v2056_v28 }
 0x1b0   :  { %v2034_v46 = vrot.slane %v2033_v45, 1  ;;  %v2042_v43 = vadd.f32 %v2041_v10, %v2040_v44  ;;  %v2066_v29 = vrot.slane %v2065_v15, 4  ;;  %v2768_v23 = vadd.f32 %v2640_v39, %v7296_v3  ;;  %v7372_v3 = vld [vmem:[%s10408_s0 + $0x580] sm:$0xff]  ;;  %v7390_v10 = vld [vmem:[%s10408_s0 + $0x590] sm:$0xff] }
 0x1b1   :  { %v2051_v33 = vadd.f32 %v2050_v55, %v2049_v41  ;;  %v2769_v19 = vadd.f32 %v2641_v24, %v7305_v49  ;;  %v2059_v20 = vrot.slane %v2058_v32, 2  ;;  %v2642_v11 = vmul.f32 0.0625, %v2026_v56 }
 0x1b2   :  { %v2035_v38 = vadd.f32 %v2034_v46, %v2033_v45  ;;  %v2043_v36 = vrot.slane %v2042_v43, 1  ;;  %v2067_v27 = vadd.f32 %v2066_v29, %v2065_v15  ;;  %v7364_v0 = vmul.f32 0.5, %v2768_v23 }
 0x1b3   :  { %v2052_v50 = vrot.slane %v2051_v33, 1  ;;  %v7366_v62 = vmul.f32 0.5, %v2769_v19  ;;  %v2060_v4 = vadd.f32 %v2059_v20, %v2058_v32  ;;  %v2770_v44 = vadd.f32 %v2642_v11, %v7320_v25  ;;  %v7385_v25 = vld [vmem:[%s10408_s0 + $0x588] sm:$0xff] }
 0x1b4   :  { %10659 = vst [vmem:[#allocation54_spill] sm:$0xff] %v7364_v0  ;;  %v2044_v31 = vadd.f32 %v2043_v36, %v2042_v43  ;;  %v2643_v5 = vmul.f32 0.0625, %v2035_v38  ;;  %v2068_v28 = vrot.slane %v2067_v27, 2  ;;  %v1064_v41 = vsel %vm271_vm0, %v7372_v3, -inf  ;;  %v7404_v43 = vld [vmem:[%s10408_s0 + $0x598] sm:$0xff]  ;;  %v7416_v36 = vld [vmem:[%s10408_s0 + $0x5a0] sm:$0xff] }
 0x1b5   :  { %10660 = vst [vmem:[#allocation55_spill] sm:$0xff] %v7366_v62  ;;  %v2053_v49 = vadd.f32 %v2052_v50, %v2051_v33  ;;  %v3151_v7 = vsel %vm3088_vm1, %v7366_v62, %v7364_v0  ;;  %v2061_v9 = vrot.slane %v2060_v4, 1  ;;  %v7380_v45 = vmul.f32 0.5, %v2770_v44 }
 0x1b6   :  { %v2644_v12 = vmul.f32 0.0625, %v2044_v31  ;;  %v2771_v63 = vadd.f32 %v2643_v5, %v7326_v17  ;;  %v2069_v22 = vadd.f32 %v2068_v28, %v2067_v27  ;;  %v1065_v15 = vsel %vm271_vm0, %v7385_v25, -inf }
 0x1b7   :  { %10661 = vst [vmem:[#allocation56_spill] sm:$0xff] %v7380_v45  ;;  %v2645_v55 = vmul.f32 0.0625, %v2053_v49  ;;  %v1073_v17 = vsel %vm271_vm0, %v7390_v10, -inf  ;;  %v2062_v39 = vadd.f32 %v2061_v9, %v2060_v4  ;;  %v3152_v46 = vsel %vm3090_vm2, %v7380_v45, %v3151_v7 }
 0x1b8   :  { %v2772_v24 = vadd.f32 %v2644_v12, %v7332_v59  ;;  %v7397_v56 = vmul.f32 0.5, %v2771_v63  ;;  %v2070_v32 = vrot.slane %v2069_v22, 1  ;;  %v1066_v29 = vmax.f32 %v1064_v41, %v1065_v15  ;;  %v7437_v41 = vld [vmem:[%s10408_s0 + $0x5b0] sm:$0xff] }
 0x1b9   :  { %v2773_v33 = vadd.f32 %v2645_v55, %v7338_v8  ;;  %v1074_v23 = vsel %vm271_vm0, %v7404_v43, -inf  ;;  %v2646_v19 = vmul.f32 0.0625, %v2062_v39  ;;  %v7423_v8 = vld [vmem:[%s10408_s0 + $0x5a8] sm:$0xff]  ;;  %v1082_v31 = vsel %vm271_vm0, %v7416_v36, -inf  ;;  %v7454_v39 = vld [vmem:[%s10408_s0 + $0x5c0] sm:$0xff] }
 0x1ba   :  { %10662 = vst [vmem:[#allocation57_spill] sm:$0xff] %v7397_v56  ;;  %v7409_v38 = vmul.f32 0.5, %v2772_v24  ;;  %v3153_v59 = vsel %vm3092_vm3, %v7397_v56, %v3152_v46  ;;  %v1075_v20 = vmax.f32 %v1073_v17, %v1074_v23  ;;  %v2071_v11 = vadd.f32 %v2070_v32, %v2069_v22  ;;  %v7459_v24 = vld [vmem:[%s10408_s0 + $0x5c8] sm:$0xff] }
 0x1bb   :  { %v7418_v50 = vmul.f32 0.5, %v2773_v33  ;;  %v1067_v27 = vrot.slane %v1066_v29, 4  ;;  %v2774_v4 = vadd.f32 %v2646_v19, %v7348_v21  ;;  %v1083_v49 = vsel %vm271_vm0, %v7423_v8, -inf  ;;  %v7442_v21 = vld [vmem:[%s10408_s0 + $0x5b8] sm:$0xff] }
 0x1bc   :  { %10663 = vst [vmem:[#allocation58_spill] sm:$0xff] %v7409_v38  ;;  %v3154_v5 = vsel %vm3094_vm4, %v7409_v38, %v3153_v59  ;;  %v1076_v44 = vrot.slane %v1075_v20, 4  ;;  %v2647_v28 = vmul.f32 0.0625, %v2071_v11  ;;  %v1084_v12 = vmax.f32 %v1082_v31, %v1083_v49  ;;  %v7477_v11 = vld [vmem:[%s10408_s0 + $0x5d8] sm:$0xff] }
 0x1bd   :  { %10664 = vst [vmem:[#allocation59_spill] sm:$0xff] %v7418_v50  ;;  %v3155_v7 = vsel %vm3096_vm5, %v7418_v50, %v3154_v5  ;;  %v1068_v9 = vmax.f32 %v1066_v29, %v1067_v27  ;;  %v7444_v63 = vmul.f32 0.5, %v2774_v4  ;;  %v1091_v55 = vsel %vm271_vm0, %v7437_v41, -inf }
 0x1be   :  { %v1077_v22 = vmax.f32 %v1075_v20, %v1076_v44  ;;  %v1092_v15 = vsel %vm271_vm0, %v7442_v21, -inf  ;;  %v2775_v17 = vadd.f32 %v2647_v28, %v7352_v13  ;;  %v1085_v32 = vrot.slane %v1084_v12, 4  ;;  %v7472_v20 = vld [vmem:[%s10408_s0 + $0x5d0] sm:$0xff] }
 0x1bf   :  { %10665 = vst [vmem:[#allocation60_spill] sm:$0xff] %v7444_v63  ;;  %v1069_v46 = vrot.slane %v1068_v9, 2  ;;  %v1093_v33 = vmax.f32 %v1091_v55, %v1092_v15  ;;  %v3156_v29 = vsel %vm3098_vm6, %v7444_v63, %v3155_v7  ;;  %v1100_v13 = vsel %vm271_vm0, %v7454_v39, -inf }
 0x1c0   :  { %v1078_v23 = vrot.slane %v1077_v22, 2  ;;  %v1101_v19 = vsel %vm271_vm0, %v7459_v24, -inf  ;;  %v7467_v59 = vmul.f32 0.5, %v2775_v17  ;;  %v1086_v31 = vmax.f32 %v1084_v12, %v1085_v32  ;;  %v7494_v32 = vld [vmem:[%s10408_s0 + $0x5e8] sm:$0xff] }
 0x1c1   :  { %v1070_v27 = vmax.f32 %v1068_v9, %v1069_v46  ;;  %v1094_v4 = vrot.slane %v1093_v33, 4  ;;  %v1102_v44 = vmax.f32 %v1100_v13, %v1101_v19  ;;  %v1109_v49 = vsel %vm271_vm0, %v7472_v20, -inf  ;;  %v7489_v9 = vld [vmem:[%s10408_s0 + $0x5e0] sm:$0xff]  ;;  %v7503_v19 = vld [vmem:[%s10408_s0 + $0x5f0] sm:$0xff] }
 0x1c2   :  { %10666 = vst [vmem:[#allocation61_spill] sm:$0xff] %v7467_v59  ;;  %v1079_v5 = vmax.f32 %v1077_v22, %v1078_v23  ;;  %v1110_v28 = vsel %vm271_vm0, %v7477_v11, -inf  ;;  %v3157_v7 = vsel %vm3100_vm7, %v7467_v59, %v3156_v29  ;;  %v1087_v15 = vrot.slane %v1086_v31, 2 }
 0x1c3   :  { %v1071_v55 = vrot.slane %v1070_v27, 1  ;;  %v1095_v17 = vmax.f32 %v1093_v33, %v1094_v4  ;;  %v3247_v63 = vsel %vm271_vm0, %v3157_v7, 0.0  ;;  %v1103_v22 = vrot.slane %v1102_v44, 4 }
 0x1c4   :  { %v1080_v12 = vrot.slane %v1079_v5, 1  ;;  %v1111_v46 = vmax.f32 %v1109_v49, %v1110_v28  ;;  %3248 = vadd.xlane.f32.xlu0 %v3247_v63  ;;  %v1088_v23 = vmax.f32 %v1086_v31, %v1087_v15  ;;  %v1118_v13 = vsel %vm271_vm0, %v7489_v9, -inf }
 0x1c5   :  { %v7496_v29 = vmax.f32 %v1070_v27, %v1071_v55  ;;  %v1096_v33 = vrot.slane %v1095_v17, 2  ;;  %v1104_v63 = vmax.f32 %v1102_v44, %v1103_v22  ;;  %v1119_v28 = vsel %vm271_vm0, %v7494_v32, -inf  ;;  %v7512_v27 = vld [vmem:[%s10408_s0 + $0x5f8] sm:$0xff] }
 0x1c6   :  { %v7505_v4 = vmax.f32 %v1079_v5, %v1080_v12  ;;  %v1112_v49 = vrot.slane %v1111_v46, 4  ;;  %v1089_v31 = vrot.slane %v1088_v23, 1  ;;  %v1120_v55 = vmax.f32 %v1118_v13, %v1119_v28 }
 0x1c7   :  { %v1097_v7 = vmax.f32 %v1095_v17, %v1096_v33  ;;  %v1127_v15 = vsel %vm271_vm0, %v7503_v19, -inf  ;;  %v1105_v59 = vrot.slane %v1104_v63, 2  ;;  %v1128_v5 = vsel %vm271_vm0, %v7512_v27, -inf }
 0x1c8   :  { %v1113_v50 = vmax.f32 %v1111_v46, %v1112_v49  ;;  %v2216_v44 = vsel %vm271_vm0, %v7372_v3, 0.0  ;;  %v7520_v12 = vmax.f32 %v1088_v23, %v1089_v31  ;;  %v1121_v38 = vrot.slane %v1120_v55, 4 }
 0x1c9   :  { %v1098_v22 = vrot.slane %v1097_v7, 1  ;;  %v1129_v56 = vmax.f32 %v1127_v15, %v1128_v5  ;;  %v1106_v45 = vmax.f32 %v1104_v63, %v1105_v59  ;;  %v2217_v17 = vsel %vm271_vm0, %v7385_v25, 0.0 }
 0x1ca   :  { %v1114_v62 = vrot.slane %v1113_v50, 2  ;;  %v2225_v33 = vsel %vm271_vm0, %v7390_v10, 0.0  ;;  %v1122_v13 = vmax.f32 %v1120_v55, %v1121_v38  ;;  %v2218_v28 = vadd.f32 %v2217_v17, %v2216_v44 }
 0x1cb   :  { %v7526_v46 = vmax.f32 %v1097_v7, %v1098_v22  ;;  %v1130_v49 = vrot.slane %v1129_v56, 4  ;;  %v1107_v0 = vrot.slane %v1106_v45, 1  ;;  %v2226_v23 = vsel %vm271_vm0, %v7404_v43, 0.0 }
 0x1cc   :  { %v1115_v3 = vmax.f32 %v1113_v50, %v1114_v62  ;;  %v2234_v59 = vsel %vm271_vm0, %v7416_v36, 0.0  ;;  %v1123_v63 = vrot.slane %v1122_v13, 2  ;;  %v2219_v15 = vrot.slane %v2218_v28, 4 }
 0x1cd   :  { %v1131_v31 = vmax.f32 %v1129_v56, %v1130_v49  ;;  %v2227_v25 = vadd.f32 %v2226_v23, %v2225_v33  ;;  %v7532_v5 = vmax.f32 %v1106_v45, %v1107_v0  ;;  %v2235_v38 = vsel %vm271_vm0, %v7423_v8, 0.0 }
 0x1ce   :  { %v1116_v10 = vrot.slane %v1115_v3, 1  ;;  %v2243_v7 = vsel %vm271_vm0, %v7437_v41, 0.0  ;;  %v1124_v62 = vmax.f32 %v1122_v13, %v1123_v63  ;;  %v2220_v55 = vadd.f32 %v2219_v15, %v2218_v28 }
 0x1cf   :  { %v1132_v50 = vrot.slane %v1131_v31, 2  ;;  %v2228_v43 = vrot.slane %v2227_v25, 4  ;;  %v2236_v36 = vadd.f32 %v2235_v38, %v2234_v59  ;;  %v2244_v56 = vsel %vm271_vm0, %v7442_v21, 0.0 }
 0x1d0   :  { %v7538_v44 = vmax.f32 %v1115_v3, %v1116_v10  ;;  %v2252_v0 = vsel %vm271_vm0, %v7454_v39, 0.0  ;;  %v1125_v45 = vrot.slane %v1124_v62, 1  ;;  %v2221_v17 = vrot.slane %v2220_v55, 2 }
 0x1d1   :  { %v1133_v22 = vmax.f32 %v1131_v31, %v1132_v50  ;;  %v2229_v8 = vadd.f32 %v2228_v43, %v2227_v25  ;;  %v2237_v33 = vrot.slane %v2236_v36, 4  ;;  %v2245_v49 = vadd.f32 %v2244_v56, %v2243_v7 }
 0x1d2   :  { %v2253_v41 = vsel %vm271_vm0, %v7459_v24, 0.0  ;;  %v2261_v13 = vsel %vm271_vm0, %v7472_v20, 0.0  ;;  %v7548_v28 = vmax.f32 %v1124_v62, %v1125_v45  ;;  %v2222_v23 = vadd.f32 %v2221_v17, %v2220_v55 }
 0x1d3   :  { %v1134_v3 = vrot.slane %v1133_v22, 1  ;;  %v2230_v21 = vrot.slane %v2229_v8, 2  ;;  %v2238_v59 = vadd.f32 %v2237_v33, %v2236_v36  ;;  %v2246_v63 = vrot.slane %v2245_v49, 4 }
 0x1d4   :  { %v2254_v39 = vadd.f32 %v2253_v41, %v2252_v0  ;;  %v2262_v31 = vsel %vm271_vm0, %v7477_v11, 0.0  ;;  %v2223_v25 = vrot.slane %v2222_v23, 1  ;;  %v2270_v20 = vsel %vm271_vm0, %v7489_v9, 0.0 }
 0x1d5   :  { %v7552_v15 = vmax.f32 %v1133_v22, %v1134_v3  ;;  %v2231_v10 = vadd.f32 %v2230_v21, %v2229_v8  ;;  %v2263_v38 = vadd.f32 %v2262_v31, %v2261_v13  ;;  %v2239_v24 = vrot.slane %v2238_v59, 2 }
 0x1d6   :  { %v2247_v7 = vadd.f32 %v2246_v63, %v2245_v49  ;;  %v2255_v50 = vrot.slane %v2254_v39, 4  ;;  %v2224_v62 = vadd.f32 %v2223_v25, %v2222_v23  ;;  %v2271_v36 = vsel %vm271_vm0, %v7494_v32, 0.0 }
 0x1d7   :  { %v2232_v55 = vrot.slane %v2231_v10, 1  ;;  %v2264_v43 = vrot.slane %v2263_v38, 4  ;;  %v2240_v56 = vadd.f32 %v2239_v24, %v2238_v59  ;;  %v2272_v45 = vadd.f32 %v2271_v36, %v2270_v20 }
 0x1d8   :  { %v2248_v0 = vrot.slane %v2247_v7, 2  ;;  %v2256_v11 = vadd.f32 %v2255_v50, %v2254_v39  ;;  %v2279_v8 = vsel %vm271_vm0, %v7503_v19, 0.0  ;;  %v2280_v33 = vsel %vm271_vm0, %v7512_v27, 0.0 }
 0x1d9   :  { %v2233_v22 = vadd.f32 %v2232_v55, %v2231_v10  ;;  %v2265_v17 = vadd.f32 %v2264_v43, %v2263_v38  ;;  %v2241_v49 = vrot.slane %v2240_v56, 1  ;;  %v2273_v13 = vrot.slane %v2272_v45, 4 }
 0x1da   :  { %v2249_v9 = vadd.f32 %v2248_v0, %v2247_v7  ;;  %v2257_v41 = vrot.slane %v2256_v11, 2  ;;  %v2281_v23 = vadd.f32 %v2280_v33, %v2279_v8  ;;  %v2664_v21 = vmul.f32 0.0625, %v2224_v62 }
 0x1db   :  { %v2266_v3 = vrot.slane %v2265_v17, 2  ;;  %v2665_v32 = vmul.f32 0.0625, %v2233_v22  ;;  %v2242_v59 = vadd.f32 %v2241_v49, %v2240_v56  ;;  %v2274_v31 = vadd.f32 %v2273_v13, %v2272_v45 }
 0x1dc   :  { %v2250_v63 = vrot.slane %v2249_v9, 1  ;;  %v2258_v39 = vadd.f32 %v2257_v41, %v2256_v11  ;;  %v2282_v10 = vrot.slane %v2281_v23, 4  ;;  %v2792_v38 = vadd.f32 %v2664_v21, %v7496_v29  ;;  %v7572_v29 = vld [vmem:[%s10408_s0 + $0x500] sm:$0xff]  ;;  %v7590_v41 = vld [vmem:[%s10408_s0 + $0x510] sm:$0xff] }
 0x1dd   :  { %v2267_v25 = vadd.f32 %v2266_v3, %v2265_v17  ;;  %v2793_v19 = vadd.f32 %v2665_v32, %v7505_v4  ;;  %v2275_v50 = vrot.slane %v2274_v31, 2  ;;  %v2666_v7 = vmul.f32 0.0625, %v2242_v59 }
 0x1de   :  { %v2251_v24 = vadd.f32 %v2250_v63, %v2249_v9  ;;  %v2259_v27 = vrot.slane %v2258_v39, 1  ;;  %v2283_v55 = vadd.f32 %v2282_v10, %v2281_v23  ;;  %v7564_v43 = vmul.f32 0.5, %v2792_v38 }
 0x1df   :  { %v2268_v20 = vrot.slane %v2267_v25, 1  ;;  %v7566_v62 = vmul.f32 0.5, %v2793_v19  ;;  %v2276_v56 = vadd.f32 %v2275_v50, %v2274_v31  ;;  %v2794_v11 = vadd.f32 %v2666_v7, %v7520_v12  ;;  %v7585_v12 = vld [vmem:[%s10408_s0 + $0x508] sm:$0xff] }
 0x1e0   :  { %10667 = vst [vmem:[#allocation62_spill] sm:$0xff] %v7564_v43  ;;  %v2260_v36 = vadd.f32 %v2259_v27, %v2258_v39  ;;  %v2667_v0 = vmul.f32 0.0625, %v2251_v24  ;;  %v2284_v45 = vrot.slane %v2283_v55, 2  ;;  %v992_v17 = vsel %vm271_vm0, %v7572_v29, -inf  ;;  %v7604_v39 = vld [vmem:[%s10408_s0 + $0x518] sm:$0xff]  ;;  %v7616_v27 = vld [vmem:[%s10408_s0 + $0x520] sm:$0xff] }
 0x1e1   :  { %10668 = vst [vmem:[#allocation63_spill] sm:$0xff] %v7566_v62  ;;  %v2269_v4 = vadd.f32 %v2268_v20, %v2267_v25  ;;  %v3172_v22 = vsel %vm3088_vm1, %v7566_v62, %v7564_v43  ;;  %v2277_v8 = vrot.slane %v2276_v56, 1  ;;  %v7580_v9 = vmul.f32 0.5, %v2794_v11 }
 0x1e2   :  { %v2668_v33 = vmul.f32 0.0625, %v2260_v36  ;;  %v2795_v49 = vadd.f32 %v2667_v0, %v7526_v46  ;;  %v2285_v13 = vadd.f32 %v2284_v45, %v2283_v55  ;;  %v993_v23 = vsel %vm271_vm0, %v7585_v12, -inf }
 0x1e3   :  { %10669 = vst [vmem:[#allocation64_spill] sm:$0xff] %v7580_v9  ;;  %v2669_v3 = vmul.f32 0.0625, %v2269_v4  ;;  %v1001_v46 = vsel %vm271_vm0, %v7590_v41, -inf  ;;  %v2278_v21 = vadd.f32 %v2277_v8, %v2276_v56  ;;  %v3173_v63 = vsel %vm3090_vm2, %v7580_v9, %v3172_v22 }
 0x1e4   :  { %v2796_v32 = vadd.f32 %v2668_v33, %v7532_v5  ;;  %v7597_v59 = vmul.f32 0.5, %v2795_v49  ;;  %v2286_v31 = vrot.slane %v2285_v13, 1  ;;  %v994_v10 = vmax.f32 %v992_v17, %v993_v23  ;;  %v7637_v17 = vld [vmem:[%s10408_s0 + $0x530] sm:$0xff] }
 0x1e5   :  { %v2797_v25 = vadd.f32 %v2669_v3, %v7538_v44  ;;  %v1002_v38 = vsel %vm271_vm0, %v7604_v39, -inf  ;;  %v2670_v19 = vmul.f32 0.0625, %v2278_v21  ;;  %v7623_v44 = vld [vmem:[%s10408_s0 + $0x528] sm:$0xff]  ;;  %v1010_v36 = vsel %vm271_vm0, %v7616_v27, -inf  ;;  %v7654_v21 = vld [vmem:[%s10408_s0 + $0x540] sm:$0xff] }
 0x1e6   :  { %10670 = vst [vmem:[#allocation65_spill] sm:$0xff] %v7597_v59  ;;  %v7609_v24 = vmul.f32 0.5, %v2796_v32  ;;  %v3174_v5 = vsel %vm3092_vm3, %v7597_v59, %v3173_v63  ;;  %v1003_v50 = vmax.f32 %v1001_v46, %v1002_v38  ;;  %v2287_v7 = vadd.f32 %v2286_v31, %v2285_v13  ;;  %v7659_v32 = vld [vmem:[%s10408_s0 + $0x548] sm:$0xff] }
 0x1e7   :  { %v7618_v20 = vmul.f32 0.5, %v2797_v25  ;;  %v995_v55 = vrot.slane %v994_v10, 4  ;;  %v2798_v56 = vadd.f32 %v2670_v19, %v7548_v28  ;;  %v1011_v4 = vsel %vm271_vm0, %v7623_v44, -inf  ;;  %v7642_v28 = vld [vmem:[%s10408_s0 + $0x538] sm:$0xff] }
 0x1e8   :  { %10671 = vst [vmem:[#allocation66_spill] sm:$0xff] %v7609_v24  ;;  %v3175_v0 = vsel %vm3094_vm4, %v7609_v24, %v3174_v5  ;;  %v1004_v11 = vrot.slane %v1003_v50, 4  ;;  %v2671_v45 = vmul.f32 0.0625, %v2287_v7  ;;  %v1012_v33 = vmax.f32 %v1010_v36, %v1011_v4  ;;  %v7677_v7 = vld [vmem:[%s10408_s0 + $0x558] sm:$0xff] }
 0x1e9   :  { %10672 = vst [vmem:[#allocation67_spill] sm:$0xff] %v7618_v20  ;;  %v3176_v22 = vsel %vm3096_vm5, %v7618_v20, %v3175_v0  ;;  %v996_v8 = vmax.f32 %v994_v10, %v995_v55  ;;  %v7644_v49 = vmul.f32 0.5, %v2798_v56  ;;  %v1019_v3 = vsel %vm271_vm0, %v7637_v17, -inf }
 0x1ea   :  { %v1005_v13 = vmax.f32 %v1003_v50, %v1004_v11  ;;  %v1020_v23 = vsel %vm271_vm0, %v7642_v28, -inf  ;;  %v2799_v46 = vadd.f32 %v2671_v45, %v7552_v15  ;;  %v1013_v31 = vrot.slane %v1012_v33, 4  ;;  %v7672_v50 = vld [vmem:[%s10408_s0 + $0x550] sm:$0xff] }
 0x1eb   :  { %10673 = vst [vmem:[#allocation68_spill] sm:$0xff] %v7644_v49  ;;  %v997_v63 = vrot.slane %v996_v8, 2  ;;  %v1021_v25 = vmax.f32 %v1019_v3, %v1020_v23  ;;  %v3177_v10 = vsel %vm3098_vm6, %v7644_v49, %v3176_v22  ;;  %v1028_v15 = vsel %vm271_vm0, %v7654_v21, -inf }
 0x1ec   :  { %v1006_v38 = vrot.slane %v1005_v13, 2  ;;  %v1029_v19 = vsel %vm271_vm0, %v7659_v32, -inf  ;;  %v7667_v5 = vmul.f32 0.5, %v2799_v46  ;;  %v1014_v36 = vmax.f32 %v1012_v33, %v1013_v31  ;;  %v7694_v31 = vld [vmem:[%s10408_s0 + $0x568] sm:$0xff] }
 0x1ed   :  { %v998_v55 = vmax.f32 %v996_v8, %v997_v63  ;;  %v1022_v56 = vrot.slane %v1021_v25, 4  ;;  %v1030_v11 = vmax.f32 %v1028_v15, %v1029_v19  ;;  %v1037_v4 = vsel %vm271_vm0, %v7672_v50, -inf  ;;  %v7689_v8 = vld [vmem:[%s10408_s0 + $0x560] sm:$0xff]  ;;  %v7703_v19 = vld [vmem:[%s10408_s0 + $0x570] sm:$0xff] }
 0x1ee   :  { %10674 = vst [vmem:[#allocation69_spill] sm:$0xff] %v7667_v5  ;;  %v1007_v0 = vmax.f32 %v1005_v13, %v1006_v38  ;;  %v1038_v45 = vsel %vm271_vm0, %v7677_v7, -inf  ;;  %v3178_v22 = vsel %vm3100_vm7, %v7667_v5, %v3177_v10  ;;  %v1015_v23 = vrot.slane %v1014_v36, 2 }
 0x1ef   :  { %v999_v3 = vrot.slane %v998_v55, 1  ;;  %v1023_v46 = vmax.f32 %v1021_v25, %v1022_v56  ;;  %v3256_v49 = vsel %vm271_vm0, %v3178_v22, 0.0  ;;  %v1031_v13 = vrot.slane %v1030_v11, 4 }
 0x1f0   :  { %v1008_v33 = vrot.slane %v1007_v0, 1  ;;  %v1039_v63 = vmax.f32 %v1037_v4, %v1038_v45  ;;  %3257 = vadd.xlane.f32.xlu1 %v3256_v49  ;;  %v1016_v38 = vmax.f32 %v1014_v36, %v1015_v23  ;;  %v1046_v15 = vsel %vm271_vm0, %v7689_v8, -inf }
 0x1f1   :  { %v7696_v10 = vmax.f32 %v998_v55, %v999_v3  ;;  %v1024_v25 = vrot.slane %v1023_v46, 2  ;;  %v1032_v49 = vmax.f32 %v1030_v11, %v1031_v13  ;;  %v1047_v45 = vsel %vm271_vm0, %v7694_v31, -inf  ;;  %v7712_v55 = vld [vmem:[%s10408_s0 + $0x578] sm:$0xff] }
 0x1f2   :  { %v7705_v56 = vmax.f32 %v1007_v0, %v1008_v33  ;;  %v1040_v4 = vrot.slane %v1039_v63, 4  ;;  %v1017_v36 = vrot.slane %v1016_v38, 1  ;;  %v1048_v3 = vmax.f32 %v1046_v15, %v1047_v45 }
 0x1f3   :  { %v1025_v22 = vmax.f32 %v1023_v46, %v1024_v25  ;;  %v1055_v23 = vsel %vm271_vm0, %v7703_v19, -inf  ;;  %v1033_v5 = vrot.slane %v1032_v49, 2  ;;  %v1056_v0 = vsel %vm271_vm0, %v7712_v55, -inf }
 0x1f4   :  { %v1041_v20 = vmax.f32 %v1039_v63, %v1040_v4  ;;  %v2144_v11 = vsel %vm271_vm0, %v7572_v29, 0.0  ;;  %v7720_v33 = vmax.f32 %v1016_v38, %v1017_v36  ;;  %v1049_v24 = vrot.slane %v1048_v3, 4 }
 0x1f5   :  { %v1026_v13 = vrot.slane %v1025_v22, 1  ;;  %v1057_v59 = vmax.f32 %v1055_v23, %v1056_v0  ;;  %v1034_v9 = vmax.f32 %v1032_v49, %v1033_v5  ;;  %v2145_v46 = vsel %vm271_vm0, %v7585_v12, 0.0 }
 0x1f6   :  { %v1042_v62 = vrot.slane %v1041_v20, 2  ;;  %v2153_v25 = vsel %vm271_vm0, %v7590_v41, 0.0  ;;  %v1050_v15 = vmax.f32 %v1048_v3, %v1049_v24  ;;  %v2146_v45 = vadd.f32 %v2145_v46, %v2144_v11 }
 0x1f7   :  { %v7726_v63 = vmax.f32 %v1025_v22, %v1026_v13  ;;  %v1058_v4 = vrot.slane %v1057_v59, 4  ;;  %v1035_v43 = vrot.slane %v1034_v9, 1  ;;  %v2154_v38 = vsel %vm271_vm0, %v7604_v39, 0.0 }
 0x1f8   :  { %v1043_v29 = vmax.f32 %v1041_v20, %v1042_v62  ;;  %v2162_v5 = vsel %vm271_vm0, %v7616_v27, 0.0  ;;  %v1051_v49 = vrot.slane %v1050_v15, 2  ;;  %v2147_v23 = vrot.slane %v2146_v45, 4 }
 0x1f9   :  { %v1059_v36 = vmax.f32 %v1057_v59, %v1058_v4  ;;  %v2155_v12 = vadd.f32 %v2154_v38, %v2153_v25  ;;  %v7732_v0 = vmax.f32 %v1034_v9, %v1035_v43  ;;  %v2163_v24 = vsel %vm271_vm0, %v7623_v44, 0.0 }
 0x1fa   :  { %v1044_v41 = vrot.slane %v1043_v29, 1  ;;  %v2171_v22 = vsel %vm271_vm0, %v7637_v17, 0.0  ;;  %v1052_v62 = vmax.f32 %v1050_v15, %v1051_v49  ;;  %v2148_v3 = vadd.f32 %v2147_v23, %v2146_v45 }
 0x1fb   :  { %v1060_v20 = vrot.slane %v1059_v36, 2  ;;  %v2156_v39 = vrot.slane %v2155_v12, 4  ;;  %v2164_v27 = vadd.f32 %v2163_v24, %v2162_v5  ;;  %v2172_v59 = vsel %vm271_vm0, %v7642_v28, 0.0 }
 0x1fc   :  { %v7738_v11 = vmax.f32 %v1043_v29, %v1044_v41  ;;  %v2180_v43 = vsel %vm271_vm0, %v7654_v21, 0.0  ;;  %v1053_v9 = vrot.slane %v1052_v62, 1  ;;  %v2149_v46 = vrot.slane %v2148_v3, 2 }
 0x1fd   :  { %v1061_v13 = vmax.f32 %v1059_v36, %v1060_v20  ;;  %v2157_v44 = vadd.f32 %v2156_v39, %v2155_v12  ;;  %v2165_v25 = vrot.slane %v2164_v27, 4  ;;  %v2173_v4 = vadd.f32 %v2172_v59, %v2171_v22 }
 0x1fe   :  { %v2181_v17 = vsel %vm271_vm0, %v7659_v32, 0.0  ;;  %v2189_v15 = vsel %vm271_vm0, %v7672_v50, 0.0  ;;  %v7748_v45 = vmax.f32 %v1052_v62, %v1053_v9  ;;  %v2150_v38 = vadd.f32 %v2149_v46, %v2148_v3 }
 0x1ff   :  { %v1062_v29 = vrot.slane %v1061_v13, 1  ;;  %v2158_v28 = vrot.slane %v2157_v44, 2  ;;  %v2166_v5 = vadd.f32 %v2165_v25, %v2164_v27  ;;  %v2174_v49 = vrot.slane %v2173_v4, 4 }
 0x200   :  { %v2182_v21 = vadd.f32 %v2181_v17, %v2180_v43  ;;  %v2190_v36 = vsel %vm271_vm0, %v7677_v7, 0.0  ;;  %v2151_v12 = vrot.slane %v2150_v38, 1  ;;  %v2198_v50 = vsel %vm271_vm0, %v7689_v8, 0.0 }
 0x201   :  { %v7752_v23 = vmax.f32 %v1061_v13, %v1062_v29  ;;  %v2159_v41 = vadd.f32 %v2158_v28, %v2157_v44  ;;  %v2191_v24 = vadd.f32 %v2190_v36, %v2189_v15  ;;  %v2167_v32 = vrot.slane %v2166_v5, 2 }
 0x202   :  { %v2175_v22 = vadd.f32 %v2174_v49, %v2173_v4  ;;  %v2183_v20 = vrot.slane %v2182_v21, 4  ;;  %v2152_v62 = vadd.f32 %v2151_v12, %v2150_v38  ;;  %v2199_v27 = vsel %vm271_vm0, %v7694_v31, 0.0 }
 0x203   :  { %v2160_v3 = vrot.slane %v2159_v41, 1  ;;  %v2192_v39 = vrot.slane %v2191_v24, 4  ;;  %v2168_v59 = vadd.f32 %v2167_v32, %v2166_v5  ;;  %v2200_v9 = vadd.f32 %v2199_v27, %v2198_v50 }
 0x204   :  { %v2176_v43 = vrot.slane %v2175_v22, 2  ;;  %v2184_v7 = vadd.f32 %v2183_v20, %v2182_v21  ;;  %v2207_v44 = vsel %vm271_vm0, %v7703_v19, 0.0  ;;  %v2208_v25 = vsel %vm271_vm0, %v7712_v55, 0.0 }
 0x205   :  { %v2161_v13 = vadd.f32 %v2160_v3, %v2159_v41  ;;  %v2193_v46 = vadd.f32 %v2192_v39, %v2191_v24  ;;  %v2169_v4 = vrot.slane %v2168_v59, 1  ;;  %v2201_v15 = vrot.slane %v2200_v9, 4 }
 0x206   :  { %v2177_v8 = vadd.f32 %v2176_v43, %v2175_v22  ;;  %v2185_v17 = vrot.slane %v2184_v7, 2  ;;  %v2209_v38 = vadd.f32 %v2208_v25, %v2207_v44  ;;  %v2656_v28 = vmul.f32 0.0625, %v2152_v62 }
 0x207   :  { %v2194_v29 = vrot.slane %v2193_v46, 2  ;;  %v2657_v31 = vmul.f32 0.0625, %v2161_v13  ;;  %v2170_v5 = vadd.f32 %v2169_v4, %v2168_v59  ;;  %v2202_v36 = vadd.f32 %v2201_v15, %v2200_v9 }
 0x208   :  { %v2178_v49 = vrot.slane %v2177_v8, 1  ;;  %v2186_v21 = vadd.f32 %v2185_v17, %v2184_v7  ;;  %v2210_v41 = vrot.slane %v2209_v38, 4  ;;  %v2784_v24 = vadd.f32 %v2656_v28, %v7696_v10  ;;  %v7772_v10 = vld [vmem:[%s10408_s0 + $0x680] sm:$0xff]  ;;  %v7790_v17 = vld [vmem:[%s10408_s0 + $0x690] sm:$0xff] }
 0x209   :  { %v2195_v12 = vadd.f32 %v2194_v29, %v2193_v46  ;;  %v2785_v19 = vadd.f32 %v2657_v31, %v7705_v56  ;;  %v2203_v20 = vrot.slane %v2202_v36, 2  ;;  %v2658_v22 = vmul.f32 0.0625, %v2170_v5 }
 0x20a   :  { %v2179_v32 = vadd.f32 %v2178_v49, %v2177_v8  ;;  %v2187_v55 = vrot.slane %v2186_v21, 1  ;;  %v2211_v3 = vadd.f32 %v2210_v41, %v2209_v38  ;;  %v7764_v39 = vmul.f32 0.5, %v2784_v24 }
 0x20b   :  { %v2196_v50 = vrot.slane %v2195_v12, 1  ;;  %v7766_v62 = vmul.f32 0.5, %v2785_v19  ;;  %v2204_v59 = vadd.f32 %v2203_v20, %v2202_v36  ;;  %v2786_v7 = vadd.f32 %v2658_v22, %v7720_v33  ;;  %v7785_v33 = vld [vmem:[%s10408_s0 + $0x688] sm:$0xff] }
 0x20c   :  { %10675 = vst [vmem:[#allocation70_spill] sm:$0xff] %v7764_v39  ;;  %v2188_v27 = vadd.f32 %v2187_v55, %v2186_v21  ;;  %v2659_v43 = vmul.f32 0.0625, %v2179_v32  ;;  %v2212_v9 = vrot.slane %v2211_v3, 2  ;;  %v1208_v46 = vsel %vm271_vm0, %v7772_v10, -inf  ;;  %v7804_v21 = vld [vmem:[%s10408_s0 + $0x698] sm:$0xff]  ;;  %v7816_v55 = vld [vmem:[%s10408_s0 + $0x6a0] sm:$0xff] }
 0x20d   :  { %10676 = vst [vmem:[#allocation71_spill] sm:$0xff] %v7766_v62  ;;  %v2197_v56 = vadd.f32 %v2196_v50, %v2195_v12  ;;  %v3165_v13 = vsel %vm3088_vm1, %v7766_v62, %v7764_v39  ;;  %v2205_v44 = vrot.slane %v2204_v59, 1  ;;  %v7780_v8 = vmul.f32 0.5, %v2786_v7 }
 0x20e   :  { %v2660_v25 = vmul.f32 0.0625, %v2188_v27  ;;  %v2787_v4 = vadd.f32 %v2659_v43, %v7726_v63  ;;  %v2213_v15 = vadd.f32 %v2212_v9, %v2211_v3  ;;  %v1209_v38 = vsel %vm271_vm0, %v7785_v33, -inf }
 0x20f   :  { %10677 = vst [vmem:[#allocation72_spill] sm:$0xff] %v7780_v8  ;;  %v2661_v29 = vmul.f32 0.0625, %v2197_v56  ;;  %v1217_v63 = vsel %vm271_vm0, %v7790_v17, -inf  ;;  %v2206_v28 = vadd.f32 %v2205_v44, %v2204_v59  ;;  %v3166_v49 = vsel %vm3090_vm2, %v7780_v8, %v3165_v13 }
 0x210   :  { %v2788_v31 = vadd.f32 %v2660_v25, %v7732_v0  ;;  %v7797_v5 = vmul.f32 0.5, %v2787_v4  ;;  %v2214_v36 = vrot.slane %v2213_v15, 1  ;;  %v1210_v41 = vmax.f32 %v1208_v46, %v1209_v38  ;;  %v7837_v46 = vld [vmem:[%s10408_s0 + $0x6b0] sm:$0xff] }
 0x211   :  { %v2789_v12 = vadd.f32 %v2661_v29, %v7738_v11  ;;  %v1218_v24 = vsel %vm271_vm0, %v7804_v21, -inf  ;;  %v2662_v19 = vmul.f32 0.0625, %v2206_v28  ;;  %v7823_v11 = vld [vmem:[%s10408_s0 + $0x6a8] sm:$0xff]  ;;  %v1226_v27 = vsel %vm271_vm0, %v7816_v55, -inf  ;;  %v7854_v28 = vld [vmem:[%s10408_s0 + $0x6c0] sm:$0xff] }
 0x212   :  { %10678 = vst [vmem:[#allocation73_spill] sm:$0xff] %v7797_v5  ;;  %v7809_v32 = vmul.f32 0.5, %v2788_v31  ;;  %v3167_v0 = vsel %vm3092_vm3, %v7797_v5, %v3166_v49  ;;  %v1219_v20 = vmax.f32 %v1217_v63, %v1218_v24  ;;  %v2215_v22 = vadd.f32 %v2214_v36, %v2213_v15  ;;  %v7859_v31 = vld [vmem:[%s10408_s0 + $0x6c8] sm:$0xff] }
 0x213   :  { %v7818_v50 = vmul.f32 0.5, %v2789_v12  ;;  %v1211_v3 = vrot.slane %v1210_v41, 4  ;;  %v2790_v59 = vadd.f32 %v2662_v19, %v7748_v45  ;;  %v1227_v56 = vsel %vm271_vm0, %v7823_v11, -inf  ;;  %v7842_v45 = vld [vmem:[%s10408_s0 + $0x6b8] sm:$0xff] }
 0x214   :  { %10679 = vst [vmem:[#allocation74_spill] sm:$0xff] %v7809_v32  ;;  %v3168_v43 = vsel %vm3094_vm4, %v7809_v32, %v3167_v0  ;;  %v1220_v7 = vrot.slane %v1219_v20, 4  ;;  %v2663_v9 = vmul.f32 0.0625, %v2215_v22  ;;  %v1228_v25 = vmax.f32 %v1226_v27, %v1227_v56  ;;  %v7877_v22 = vld [vmem:[%s10408_s0 + $0x6d8] sm:$0xff] }
 0x215   :  { %10680 = vst [vmem:[#allocation75_spill] sm:$0xff] %v7818_v50  ;;  %v3169_v13 = vsel %vm3096_vm5, %v7818_v50, %v3168_v43  ;;  %v1212_v44 = vmax.f32 %v1210_v41, %v1211_v3  ;;  %v7844_v4 = vmul.f32 0.5, %v2790_v59  ;;  %v1235_v29 = vsel %vm271_vm0, %v7837_v46, -inf }
 0x216   :  { %v1221_v15 = vmax.f32 %v1219_v20, %v1220_v7  ;;  %v1236_v38 = vsel %vm271_vm0, %v7842_v45, -inf  ;;  %v2791_v63 = vadd.f32 %v2663_v9, %v7752_v23  ;;  %v1229_v36 = vrot.slane %v1228_v25, 4  ;;  %v7872_v20 = vld [vmem:[%s10408_s0 + $0x6d0] sm:$0xff] }
 0x217   :  { %10681 = vst [vmem:[#allocation76_spill] sm:$0xff] %v7844_v4  ;;  %v1213_v49 = vrot.slane %v1212_v44, 2  ;;  %v1237_v12 = vmax.f32 %v1235_v29, %v1236_v38  ;;  %v3170_v41 = vsel %vm3098_vm6, %v7844_v4, %v3169_v13  ;;  %v1244_v23 = vsel %vm271_vm0, %v7854_v28, -inf }
 0x218   :  { %v1222_v24 = vrot.slane %v1221_v15, 2  ;;  %v1245_v19 = vsel %vm271_vm0, %v7859_v31, -inf  ;;  %v7867_v0 = vmul.f32 0.5, %v2791_v63  ;;  %v1230_v27 = vmax.f32 %v1228_v25, %v1229_v36  ;;  %v7894_v36 = vld [vmem:[%s10408_s0 + $0x6e8] sm:$0xff] }
 0x219   :  { %v1214_v3 = vmax.f32 %v1212_v44, %v1213_v49  ;;  %v1238_v59 = vrot.slane %v1237_v12, 4  ;;  %v1246_v7 = vmax.f32 %v1244_v23, %v1245_v19  ;;  %v1253_v56 = vsel %vm271_vm0, %v7872_v20, -inf  ;;  %v7889_v44 = vld [vmem:[%s10408_s0 + $0x6e0] sm:$0xff]  ;;  %v7903_v19 = vld [vmem:[%s10408_s0 + $0x6f0] sm:$0xff] }
 0x21a   :  { %10682 = vst [vmem:[#allocation77_spill] sm:$0xff] %v7867_v0  ;;  %v1223_v43 = vmax.f32 %v1221_v15, %v1222_v24  ;;  %v1254_v9 = vsel %vm271_vm0, %v7877_v22, -inf  ;;  %v3171_v13 = vsel %vm3100_vm7, %v7867_v0, %v3170_v41  ;;  %v1231_v38 = vrot.slane %v1230_v27, 2 }
 0x21b   :  { %v1215_v29 = vrot.slane %v1214_v3, 1  ;;  %v1239_v63 = vmax.f32 %v1237_v12, %v1238_v59  ;;  %v3253_v4 = vsel %vm271_vm0, %v3171_v13, 0.0  ;;  %v1247_v15 = vrot.slane %v1246_v7, 4 }
 0x21c   :  { %v1224_v25 = vrot.slane %v1223_v43, 1  ;;  %v1255_v49 = vmax.f32 %v1253_v56, %v1254_v9  ;;  %3254 = vadd.xlane.f32.xlu0 %v3253_v4  ;;  %v1232_v24 = vmax.f32 %v1230_v27, %v1231_v38  ;;  %v1262_v23 = vsel %vm271_vm0, %v7889_v44, -inf }
 0x21d   :  { %v7896_v41 = vmax.f32 %v1214_v3, %v1215_v29  ;;  %v1240_v12 = vrot.slane %v1239_v63, 2  ;;  %v1248_v4 = vmax.f32 %v1246_v7, %v1247_v15  ;;  %v1263_v9 = vsel %vm271_vm0, %v7894_v36, -inf  ;;  %v7912_v3 = vld [vmem:[%s10408_s0 + $0x6f8] sm:$0xff] }
 0x21e   :  { %v7905_v59 = vmax.f32 %v1223_v43, %v1224_v25  ;;  %v1256_v56 = vrot.slane %v1255_v49, 4  ;;  %v1233_v27 = vrot.slane %v1232_v24, 1  ;;  %v1264_v29 = vmax.f32 %v1262_v23, %v1263_v9 }
 0x21f   :  { %v1241_v13 = vmax.f32 %v1239_v63, %v1240_v12  ;;  %v1271_v38 = vsel %vm271_vm0, %v7903_v19, -inf  ;;  %v1249_v0 = vrot.slane %v1248_v4, 2  ;;  %v1272_v43 = vsel %vm271_vm0, %v7912_v3, -inf }
 0x220   :  { %v1257_v50 = vmax.f32 %v1255_v49, %v1256_v56  ;;  %v2360_v7 = vsel %vm271_vm0, %v7772_v10, 0.0  ;;  %v7920_v25 = vmax.f32 %v1232_v24, %v1233_v27  ;;  %v1265_v32 = vrot.slane %v1264_v29, 4 }
 0x221   :  { %v1242_v15 = vrot.slane %v1241_v13, 1  ;;  %v1273_v5 = vmax.f32 %v1271_v38, %v1272_v43  ;;  %v1250_v8 = vmax.f32 %v1248_v4, %v1249_v0  ;;  %v2361_v63 = vsel %vm271_vm0, %v7785_v33, 0.0 }
 0x222   :  { %v1258_v62 = vrot.slane %v1257_v50, 2  ;;  %v2369_v12 = vsel %vm271_vm0, %v7790_v17, 0.0  ;;  %v1266_v23 = vmax.f32 %v1264_v29, %v1265_v32  ;;  %v2362_v9 = vadd.f32 %v2361_v63, %v2360_v7 }
 0x223   :  { %v7926_v49 = vmax.f32 %v1241_v13, %v1242_v15  ;;  %v1274_v56 = vrot.slane %v1273_v5, 4  ;;  %v1251_v39 = vrot.slane %v1250_v8, 1  ;;  %v2370_v24 = vsel %vm271_vm0, %v7804_v21, 0.0 }
 0x224   :  { %v1259_v10 = vmax.f32 %v1257_v50, %v1258_v62  ;;  %v2378_v0 = vsel %vm271_vm0, %v7816_v55, 0.0  ;;  %v1267_v4 = vrot.slane %v1266_v23, 2  ;;  %v2363_v38 = vrot.slane %v2362_v9, 4 }
 0x225   :  { %v1275_v27 = vmax.f32 %v1273_v5, %v1274_v56  ;;  %v2371_v33 = vadd.f32 %v2370_v24, %v2369_v12  ;;  %v7932_v43 = vmax.f32 %v1250_v8, %v1251_v39  ;;  %v2379_v32 = vsel %vm271_vm0, %v7823_v11, 0.0 }
 0x226   :  { %v1260_v17 = vrot.slane %v1259_v10, 1  ;;  %v2387_v13 = vsel %vm271_vm0, %v7837_v46, 0.0  ;;  %v1268_v62 = vmax.f32 %v1266_v23, %v1267_v4  ;;  %v2364_v29 = vadd.f32 %v2363_v38, %v2362_v9 }
 0x227   :  { %v1276_v50 = vrot.slane %v1275_v27, 2  ;;  %v2372_v21 = vrot.slane %v2371_v33, 4  ;;  %v2380_v55 = vadd.f32 %v2379_v32, %v2378_v0  ;;  %v2388_v5 = vsel %vm271_vm0, %v7842_v45, 0.0 }
 0x228   :  { %v7938_v7 = vmax.f32 %v1259_v10, %v1260_v17  ;;  %v2396_v39 = vsel %vm271_vm0, %v7854_v28, 0.0  ;;  %v1269_v8 = vrot.slane %v1268_v62, 1  ;;  %v2365_v63 = vrot.slane %v2364_v29, 2 }
 0x229   :  { %v1277_v15 = vmax.f32 %v1275_v27, %v1276_v50  ;;  %v2373_v11 = vadd.f32 %v2372_v21, %v2371_v33  ;;  %v2381_v12 = vrot.slane %v2380_v55, 4  ;;  %v2389_v56 = vadd.f32 %v2388_v5, %v2387_v13 }
 0x22a   :  { %v2397_v46 = vsel %vm271_vm0, %v7859_v31, 0.0  ;;  %v2405_v23 = vsel %vm271_vm0, %v7872_v20, 0.0  ;;  %v7948_v9 = vmax.f32 %v1268_v62, %v1269_v8  ;;  %v2366_v24 = vadd.f32 %v2365_v63, %v2364_v29 }
 0x22b   :  { %v1278_v10 = vrot.slane %v1277_v15, 1  ;;  %v2374_v45 = vrot.slane %v2373_v11, 2  ;;  %v2382_v0 = vadd.f32 %v2381_v12, %v2380_v55  ;;  %v2390_v4 = vrot.slane %v2389_v56, 4 }
 0x22c   :  { %v2398_v28 = vadd.f32 %v2397_v46, %v2396_v39  ;;  %v2406_v27 = vsel %vm271_vm0, %v7877_v22, 0.0  ;;  %v2367_v33 = vrot.slane %v2366_v24, 1  ;;  %v2414_v20 = vsel %vm271_vm0, %v7889_v44, 0.0 }
 0x22d   :  { %v7952_v38 = vmax.f32 %v1277_v15, %v1278_v10  ;;  %v2375_v17 = vadd.f32 %v2374_v45, %v2373_v11  ;;  %v2407_v32 = vadd.f32 %v2406_v27, %v2405_v23  ;;  %v2383_v31 = vrot.slane %v2382_v0, 2 }
 0x22e   :  { %v2391_v13 = vadd.f32 %v2390_v4, %v2389_v56  ;;  %v2399_v50 = vrot.slane %v2398_v28, 4  ;;  %v2368_v62 = vadd.f32 %v2367_v33, %v2366_v24  ;;  %v2415_v55 = vsel %vm271_vm0, %v7894_v36, 0.0 }
 0x22f   :  { %v2376_v29 = vrot.slane %v2375_v17, 1  ;;  %v2408_v21 = vrot.slane %v2407_v32, 4  ;;  %v2384_v5 = vadd.f32 %v2383_v31, %v2382_v0  ;;  %v2416_v8 = vadd.f32 %v2415_v55, %v2414_v20 }
 0x230   :  { %v2392_v39 = vrot.slane %v2391_v13, 2  ;;  %v2400_v22 = vadd.f32 %v2399_v50, %v2398_v28  ;;  %v2423_v11 = vsel %vm271_vm0, %v7903_v19, 0.0  ;;  %v2424_v12 = vsel %vm271_vm0, %v7912_v3, 0.0 }
 0x231   :  { %v2377_v15 = vadd.f32 %v2376_v29, %v2375_v17  ;;  %v2409_v63 = vadd.f32 %v2408_v21, %v2407_v32  ;;  %v2385_v56 = vrot.slane %v2384_v5, 1  ;;  %v2417_v23 = vrot.slane %v2416_v8, 4 }
 0x232   :  { %v2393_v44 = vadd.f32 %v2392_v39, %v2391_v13  ;;  %v2401_v46 = vrot.slane %v2400_v22, 2  ;;  %v2425_v24 = vadd.f32 %v2424_v12, %v2423_v11  ;;  %v2680_v45 = vmul.f32 0.0625, %v2368_v62 }
 0x233   :  { %v2410_v10 = vrot.slane %v2409_v63, 2  ;;  %v2681_v36 = vmul.f32 0.0625, %v2377_v15  ;;  %v2386_v0 = vadd.f32 %v2385_v56, %v2384_v5  ;;  %v2418_v27 = vadd.f32 %v2417_v23, %v2416_v8 }
 0x234   :  { %v2394_v4 = vrot.slane %v2393_v44, 1  ;;  %v2402_v28 = vadd.f32 %v2401_v46, %v2400_v22  ;;  %v2426_v17 = vrot.slane %v2425_v24, 4  ;;  %v2808_v32 = vadd.f32 %v2680_v45, %v7896_v41  ;;  %v7972_v41 = vld [vmem:[%s10408_s0 + $0x600] sm:$0xff]  ;;  %v7990_v46 = vld [vmem:[%s10408_s0 + $0x610] sm:$0xff] }
 0x235   :  { %v2411_v33 = vadd.f32 %v2410_v10, %v2409_v63  ;;  %v2809_v19 = vadd.f32 %v2681_v36, %v7905_v59  ;;  %v2419_v50 = vrot.slane %v2418_v27, 2  ;;  %v2682_v13 = vmul.f32 0.0625, %v2386_v0 }
 0x236   :  { %v2395_v31 = vadd.f32 %v2394_v4, %v2393_v44  ;;  %v2403_v3 = vrot.slane %v2402_v28, 1  ;;  %v2427_v29 = vadd.f32 %v2426_v17, %v2425_v24  ;;  %v7964_v21 = vmul.f32 0.5, %v2808_v32 }
 0x237   :  { %v2412_v20 = vrot.slane %v2411_v33, 1  ;;  %v7966_v62 = vmul.f32 0.5, %v2809_v19  ;;  %v2420_v5 = vadd.f32 %v2419_v50, %v2418_v27  ;;  %v2810_v22 = vadd.f32 %v2682_v13, %v7920_v25  ;;  %v7985_v25 = vld [vmem:[%s10408_s0 + $0x608] sm:$0xff] }
 0x238   :  { %10683 = vst [vmem:[#allocation78_spill] sm:$0xff] %v7964_v21  ;;  %v2404_v55 = vadd.f32 %v2403_v3, %v2402_v28  ;;  %v2683_v39 = vmul.f32 0.0625, %v2395_v31  ;;  %v2428_v8 = vrot.slane %v2427_v29, 2  ;;  %v1136_v63 = vsel %vm271_vm0, %v7972_v41, -inf  ;;  %v8004_v28 = vld [vmem:[%s10408_s0 + $0x618] sm:$0xff]  ;;  %v8016_v3 = vld [vmem:[%s10408_s0 + $0x620] sm:$0xff] }
 0x239   :  { %10684 = vst [vmem:[#allocation79_spill] sm:$0xff] %v7966_v62  ;;  %v2413_v59 = vadd.f32 %v2412_v20, %v2411_v33  ;;  %v3186_v15 = vsel %vm3088_vm1, %v7966_v62, %v7964_v21  ;;  %v2421_v11 = vrot.slane %v2420_v5, 1  ;;  %v7980_v44 = vmul.f32 0.5, %v2810_v22 }
 0x23a   :  { %v2684_v12 = vmul.f32 0.0625, %v2404_v55  ;;  %v2811_v56 = vadd.f32 %v2683_v39, %v7926_v49  ;;  %v2429_v23 = vadd.f32 %v2428_v8, %v2427_v29  ;;  %v1137_v24 = vsel %vm271_vm0, %v7985_v25, -inf }
 0x23b   :  { %10685 = vst [vmem:[#allocation80_spill] sm:$0xff] %v7980_v44  ;;  %v2685_v10 = vmul.f32 0.0625, %v2413_v59  ;;  %v1145_v49 = vsel %vm271_vm0, %v7990_v46, -inf  ;;  %v2422_v45 = vadd.f32 %v2421_v11, %v2420_v5  ;;  %v3187_v4 = vsel %vm3090_vm2, %v7980_v44, %v3186_v15 }
 0x23c   :  { %v2812_v36 = vadd.f32 %v2684_v12, %v7932_v43  ;;  %v7997_v0 = vmul.f32 0.5, %v2811_v56  ;;  %v2430_v27 = vrot.slane %v2429_v23, 1  ;;  %v1138_v17 = vmax.f32 %v1136_v63, %v1137_v24  ;;  %v8037_v63 = vld [vmem:[%s10408_s0 + $0x630] sm:$0xff] }
 0x23d   :  { %v2813_v33 = vadd.f32 %v2685_v10, %v7938_v7  ;;  %v1146_v32 = vsel %vm271_vm0, %v8004_v28, -inf  ;;  %v2686_v19 = vmul.f32 0.0625, %v2422_v45  ;;  %v8023_v7 = vld [vmem:[%s10408_s0 + $0x628] sm:$0xff]  ;;  %v1154_v55 = vsel %vm271_vm0, %v8016_v3, -inf  ;;  %v8054_v45 = vld [vmem:[%s10408_s0 + $0x640] sm:$0xff] }
 0x23e   :  { %10686 = vst [vmem:[#allocation81_spill] sm:$0xff] %v7997_v0  ;;  %v8009_v31 = vmul.f32 0.5, %v2812_v36  ;;  %v3188_v43 = vsel %vm3092_vm3, %v7997_v0, %v3187_v4  ;;  %v1147_v50 = vmax.f32 %v1145_v49, %v1146_v32  ;;  %v2431_v13 = vadd.f32 %v2430_v27, %v2429_v23  ;;  %v8059_v36 = vld [vmem:[%s10408_s0 + $0x648] sm:$0xff] }
 0x23f   :  { %v8018_v20 = vmul.f32 0.5, %v2813_v33  ;;  %v1139_v29 = vrot.slane %v1138_v17, 4  ;;  %v2814_v5 = vadd.f32 %v2686_v19, %v7948_v9  ;;  %v1155_v59 = vsel %vm271_vm0, %v8023_v7, -inf  ;;  %v8042_v9 = vld [vmem:[%s10408_s0 + $0x638] sm:$0xff] }
 0x240   :  { %10687 = vst [vmem:[#allocation82_spill] sm:$0xff] %v8009_v31  ;;  %v3189_v39 = vsel %vm3094_vm4, %v8009_v31, %v3188_v43  ;;  %v1148_v22 = vrot.slane %v1147_v50, 4  ;;  %v2687_v8 = vmul.f32 0.0625, %v2431_v13  ;;  %v1156_v12 = vmax.f32 %v1154_v55, %v1155_v59  ;;  %v8077_v13 = vld [vmem:[%s10408_s0 + $0x658] sm:$0xff] }
 0x241   :  { %10688 = vst [vmem:[#allocation83_spill] sm:$0xff] %v8018_v20  ;;  %v3190_v15 = vsel %vm3096_vm5, %v8018_v20, %v3189_v39  ;;  %v1140_v11 = vmax.f32 %v1138_v17, %v1139_v29  ;;  %v8044_v56 = vmul.f32 0.5, %v2814_v5  ;;  %v1163_v10 = vsel %vm271_vm0, %v8037_v63, -inf }
 0x242   :  { %v1149_v23 = vmax.f32 %v1147_v50, %v1148_v22  ;;  %v1164_v24 = vsel %vm271_vm0, %v8042_v9, -inf  ;;  %v2815_v49 = vadd.f32 %v2687_v8, %v7952_v38  ;;  %v1157_v27 = vrot.slane %v1156_v12, 4  ;;  %v8072_v50 = vld [vmem:[%s10408_s0 + $0x650] sm:$0xff] }
 0x243   :  { %10689 = vst [vmem:[#allocation84_spill] sm:$0xff] %v8044_v56  ;;  %v1141_v4 = vrot.slane %v1140_v11, 2  ;;  %v1165_v33 = vmax.f32 %v1163_v10, %v1164_v24  ;;  %v3191_v17 = vsel %vm3098_vm6, %v8044_v56, %v3190_v15  ;;  %v1172_v38 = vsel %vm271_vm0, %v8054_v45, -inf }
 0x244   :  { %v1150_v32 = vrot.slane %v1149_v23, 2  ;;  %v1173_v19 = vsel %vm271_vm0, %v8059_v36, -inf  ;;  %v8067_v43 = vmul.f32 0.5, %v2815_v49  ;;  %v1158_v55 = vmax.f32 %v1156_v12, %v1157_v27  ;;  %v8094_v27 = vld [vmem:[%s10408_s0 + $0x668] sm:$0xff] }
 0x245   :  { %v1142_v29 = vmax.f32 %v1140_v11, %v1141_v4  ;;  %v1166_v5 = vrot.slane %v1165_v33, 4  ;;  %v1174_v22 = vmax.f32 %v1172_v38, %v1173_v19  ;;  %v1181_v59 = vsel %vm271_vm0, %v8072_v50, -inf  ;;  %v8089_v11 = vld [vmem:[%s10408_s0 + $0x660] sm:$0xff]  ;;  %v8103_v19 = vld [vmem:[%s10408_s0 + $0x670] sm:$0xff] }
 0x246   :  { %10690 = vst [vmem:[#allocation85_spill] sm:$0xff] %v8067_v43  ;;  %v1151_v39 = vmax.f32 %v1149_v23, %v1150_v32  ;;  %v1182_v8 = vsel %vm271_vm0, %v8077_v13, -inf  ;;  %v3192_v15 = vsel %vm3100_vm7, %v8067_v43, %v3191_v17  ;;  %v1159_v24 = vrot.slane %v1158_v55, 2 }
 0x247   :  { %v1143_v10 = vrot.slane %v1142_v29, 1  ;;  %v1167_v49 = vmax.f32 %v1165_v33, %v1166_v5  ;;  %v3262_v56 = vsel %vm271_vm0, %v3192_v15, 0.0  ;;  %v1175_v23 = vrot.slane %v1174_v22, 4 }
 0x248   :  { %v1152_v12 = vrot.slane %v1151_v39, 1  ;;  %v1183_v4 = vmax.f32 %v1181_v59, %v1182_v8  ;;  %3263 = vadd.xlane.f32.xlu1 %v3262_v56  ;;  %v1160_v32 = vmax.f32 %v1158_v55, %v1159_v24  ;;  %v1190_v38 = vsel %vm271_vm0, %v8089_v11, -inf }
 0x249   :  { %v8096_v17 = vmax.f32 %v1142_v29, %v1143_v10  ;;  %v1168_v33 = vrot.slane %v1167_v49, 2  ;;  %v1176_v56 = vmax.f32 %v1174_v22, %v1175_v23  ;;  %v1191_v8 = vsel %vm271_vm0, %v8094_v27, -inf  ;;  %v8112_v29 = vld [vmem:[%s10408_s0 + $0x678] sm:$0xff] }
 0x24a   :  { %v8105_v5 = vmax.f32 %v1151_v39, %v1152_v12  ;;  %v1184_v59 = vrot.slane %v1183_v4, 4  ;;  %v1161_v55 = vrot.slane %v1160_v32, 1  ;;  %v1192_v10 = vmax.f32 %v1190_v38, %v1191_v8 }
 0x24b   :  { %v1169_v15 = vmax.f32 %v1167_v49, %v1168_v33  ;;  %v1199_v24 = vsel %vm271_vm0, %v8103_v19, -inf  ;;  %v1177_v43 = vrot.slane %v1176_v56, 2  ;;  %v1200_v39 = vsel %vm271_vm0, %v8112_v29, -inf }
 0x24c   :  { %v1185_v20 = vmax.f32 %v1183_v4, %v1184_v59  ;;  %v2288_v22 = vsel %vm271_vm0, %v7972_v41, 0.0  ;;  %v8120_v12 = vmax.f32 %v1160_v32, %v1161_v55  ;;  %v1193_v31 = vrot.slane %v1192_v10, 4 }
 0x24d   :  { %v1170_v23 = vrot.slane %v1169_v15, 1  ;;  %v1201_v0 = vmax.f32 %v1199_v24, %v1200_v39  ;;  %v1178_v44 = vmax.f32 %v1176_v56, %v1177_v43  ;;  %v2289_v49 = vsel %vm271_vm0, %v7985_v25, 0.0 }
 0x24e   :  { %v1186_v62 = vrot.slane %v1185_v20, 2  ;;  %v2297_v33 = vsel %vm271_vm0, %v7990_v46, 0.0  ;;  %v1194_v38 = vmax.f32 %v1192_v10, %v1193_v31  ;;  %v2290_v8 = vadd.f32 %v2289_v49, %v2288_v22 }
 0x24f   :  { %v8126_v4 = vmax.f32 %v1169_v15, %v1170_v23  ;;  %v1202_v59 = vrot.slane %v1201_v0, 4  ;;  %v1179_v21 = vrot.slane %v1178_v44, 1  ;;  %v2298_v32 = vsel %vm271_vm0, %v8004_v28, 0.0 }
 0x250   :  { %v1187_v41 = vmax.f32 %v1185_v20, %v1186_v62  ;;  %v2306_v43 = vsel %vm271_vm0, %v8016_v3, 0.0  ;;  %v1195_v56 = vrot.slane %v1194_v38, 2  ;;  %v2291_v24 = vrot.slane %v2290_v8, 4 }
 0x251   :  { %v1203_v55 = vmax.f32 %v1201_v0, %v1202_v59  ;;  %v2299_v25 = vadd.f32 %v2298_v32, %v2297_v33  ;;  %v8132_v39 = vmax.f32 %v1178_v44, %v1179_v21  ;;  %v2307_v31 = vsel %vm271_vm0, %v8023_v7, 0.0 }
 0x252   :  { %v1188_v46 = vrot.slane %v1187_v41, 1  ;;  %v2315_v15 = vsel %vm271_vm0, %v8037_v63, 0.0  ;;  %v1196_v62 = vmax.f32 %v1194_v38, %v1195_v56  ;;  %v2292_v10 = vadd.f32 %v2291_v24, %v2290_v8 }
 0x253   :  { %v1204_v20 = vrot.slane %v1203_v55, 2  ;;  %v2300_v28 = vrot.slane %v2299_v25, 4  ;;  %v2308_v3 = vadd.f32 %v2307_v31, %v2306_v43  ;;  %v2316_v0 = vsel %vm271_vm0, %v8042_v9, 0.0 }
 0x254   :  { %v8138_v22 = vmax.f32 %v1187_v41, %v1188_v46  ;;  %v2324_v21 = vsel %vm271_vm0, %v8054_v45, 0.0  ;;  %v1197_v44 = vrot.slane %v1196_v62, 1  ;;  %v2293_v49 = vrot.slane %v2292_v10, 2 }
 0x255   :  { %v1205_v23 = vmax.f32 %v1203_v55, %v1204_v20  ;;  %v2301_v7 = vadd.f32 %v2300_v28, %v2299_v25  ;;  %v2309_v33 = vrot.slane %v2308_v3, 4  ;;  %v2317_v59 = vadd.f32 %v2316_v0, %v2315_v15 }
 0x256   :  { %v2325_v63 = vsel %vm271_vm0, %v8059_v36, 0.0  ;;  %v2333_v38 = vsel %vm271_vm0, %v8072_v50, 0.0  ;;  %v8148_v8 = vmax.f32 %v1196_v62, %v1197_v44  ;;  %v2294_v32 = vadd.f32 %v2293_v49, %v2292_v10 }
 0x257   :  { %v1206_v41 = vrot.slane %v1205_v23, 1  ;;  %v2302_v9 = vrot.slane %v2301_v7, 2  ;;  %v2310_v43 = vadd.f32 %v2309_v33, %v2308_v3  ;;  %v2318_v56 = vrot.slane %v2317_v59, 4 }
 0x258   :  { %v2326_v45 = vadd.f32 %v2325_v63, %v2324_v21  ;;  %v2334_v55 = vsel %vm271_vm0, %v8077_v13, 0.0  ;;  %v2295_v25 = vrot.slane %v2294_v32, 1  ;;  %v2342_v50 = vsel %vm271_vm0, %v8089_v11, 0.0 }
 0x259   :  { %v8152_v24 = vmax.f32 %v1205_v23, %v1206_v41  ;;  %v2303_v46 = vadd.f32 %v2302_v9, %v2301_v7  ;;  %v2335_v31 = vadd.f32 %v2334_v55, %v2333_v38  ;;  %v2311_v36 = vrot.slane %v2310_v43, 2 }
 0x25a   :  { %v2319_v15 = vadd.f32 %v2318_v56, %v2317_v59  ;;  %v2327_v20 = vrot.slane %v2326_v45, 4  ;;  %v2296_v62 = vadd.f32 %v2295_v25, %v2294_v32  ;;  %v2343_v3 = vsel %vm271_vm0, %v8094_v27, 0.0 }
 0x25b   :  { %v2304_v10 = vrot.slane %v2303_v46, 1  ;;  %v2336_v28 = vrot.slane %v2335_v31, 4  ;;  %v2312_v0 = vadd.f32 %v2311_v36, %v2310_v43  ;;  %v2344_v44 = vadd.f32 %v2343_v3, %v2342_v50 }
 0x25c   :  { %v2320_v21 = vrot.slane %v2319_v15, 2  ;;  %v2328_v13 = vadd.f32 %v2327_v20, %v2326_v45  ;;  %v2351_v7 = vsel %vm271_vm0, %v8103_v19, 0.0  ;;  %v2352_v33 = vsel %vm271_vm0, %v8112_v29, 0.0 }
 0x25d   :  { %v2305_v23 = vadd.f32 %v2304_v10, %v2303_v46  ;;  %v2337_v49 = vadd.f32 %v2336_v28, %v2335_v31  ;;  %v2313_v59 = vrot.slane %v2312_v0, 1  ;;  %v2345_v38 = vrot.slane %v2344_v44, 4 }
 0x25e   :  { %v2321_v11 = vadd.f32 %v2320_v21, %v2319_v15  ;;  %v2329_v63 = vrot.slane %v2328_v13, 2  ;;  %v2353_v32 = vadd.f32 %v2352_v33, %v2351_v7  ;;  %v2672_v9 = vmul.f32 0.0625, %v2296_v62 }
 0x25f   :  { %v2338_v41 = vrot.slane %v2337_v49, 2  ;;  %v2673_v27 = vmul.f32 0.0625, %v2305_v23  ;;  %v2314_v43 = vadd.f32 %v2313_v59, %v2312_v0  ;;  %v2346_v55 = vadd.f32 %v2345_v38, %v2344_v44 }
 0x260   :  { %v2322_v56 = vrot.slane %v2321_v11, 1  ;;  %v2330_v45 = vadd.f32 %v2329_v63, %v2328_v13  ;;  %v2354_v46 = vrot.slane %v2353_v32, 4  ;;  %v2800_v31 = vadd.f32 %v2672_v9, %v8096_v17  ;;  %v8172_v17 = vld [vmem:[%s10408_s0 + $0x780] sm:$0xff]  ;;  %v8190_v63 = vld [vmem:[%s10408_s0 + $0x790] sm:$0xff] }
 0x261   :  { %v2339_v25 = vadd.f32 %v2338_v41, %v2337_v49  ;;  %v2801_v19 = vadd.f32 %v2673_v27, %v8105_v5  ;;  %v2347_v20 = vrot.slane %v2346_v55, 2  ;;  %v2674_v15 = vmul.f32 0.0625, %v2314_v43 }
 0x262   :  { %v2323_v36 = vadd.f32 %v2322_v56, %v2321_v11  ;;  %v2331_v29 = vrot.slane %v2330_v45, 1  ;;  %v2355_v10 = vadd.f32 %v2354_v46, %v2353_v32  ;;  %v8164_v28 = vmul.f32 0.5, %v2800_v31 }
 0x263   :  { %v2340_v50 = vrot.slane %v2339_v25, 1  ;;  %v8166_v62 = vmul.f32 0.5, %v2801_v19  ;;  %v2348_v0 = vadd.f32 %v2347_v20, %v2346_v55  ;;  %v2802_v13 = vadd.f32 %v2674_v15, %v8120_v12  ;;  %v8185_v12 = vld [vmem:[%s10408_s0 + $0x788] sm:$0xff] }
 0x264   :  { %10691 = vst [vmem:[#allocation86_spill] sm:$0xff] %v8164_v28  ;;  %v2332_v3 = vadd.f32 %v2331_v29, %v2330_v45  ;;  %v2675_v21 = vmul.f32 0.0625, %v2323_v36  ;;  %v2356_v44 = vrot.slane %v2355_v10, 2  ;;  %v1352_v49 = vsel %vm271_vm0, %v8172_v17, -inf  ;;  %v8204_v45 = vld [vmem:[%s10408_s0 + $0x798] sm:$0xff]  ;;  %v8216_v29 = vld [vmem:[%s10408_s0 + $0x7a0] sm:$0xff] }
 0x265   :  { %10692 = vst [vmem:[#allocation87_spill] sm:$0xff] %v8166_v62  ;;  %v2341_v5 = vadd.f32 %v2340_v50, %v2339_v25  ;;  %v3179_v23 = vsel %vm3088_vm1, %v8166_v62, %v8164_v28  ;;  %v2349_v7 = vrot.slane %v2348_v0, 1  ;;  %v8180_v11 = vmul.f32 0.5, %v2802_v13 }
 0x266   :  { %v2676_v33 = vmul.f32 0.0625, %v2332_v3  ;;  %v2803_v59 = vadd.f32 %v2675_v21, %v8126_v4  ;;  %v2357_v38 = vadd.f32 %v2356_v44, %v2355_v10  ;;  %v1353_v32 = vsel %vm271_vm0, %v8185_v12, -inf }
 0x267   :  { %10693 = vst [vmem:[#allocation88_spill] sm:$0xff] %v8180_v11  ;;  %v2677_v41 = vmul.f32 0.0625, %v2341_v5  ;;  %v1361_v4 = vsel %vm271_vm0, %v8190_v63, -inf  ;;  %v2350_v9 = vadd.f32 %v2349_v7, %v2348_v0  ;;  %v3180_v56 = vsel %vm3090_vm2, %v8180_v11, %v3179_v23 }
 0x268   :  { %v2804_v27 = vadd.f32 %v2676_v33, %v8132_v39  ;;  %v8197_v43 = vmul.f32 0.5, %v2803_v59  ;;  %v2358_v55 = vrot.slane %v2357_v38, 1  ;;  %v1354_v46 = vmax.f32 %v1352_v49, %v1353_v32  ;;  %v8237_v49 = vld [vmem:[%s10408_s0 + $0x7b0] sm:$0xff] }
 0x269   :  { %v2805_v25 = vadd.f32 %v2677_v41, %v8138_v22  ;;  %v1362_v31 = vsel %vm271_vm0, %v8204_v45, -inf  ;;  %v2678_v19 = vmul.f32 0.0625, %v2350_v9  ;;  %v8223_v22 = vld [vmem:[%s10408_s0 + $0x7a8] sm:$0xff]  ;;  %v1370_v3 = vsel %vm271_vm0, %v8216_v29, -inf  ;;  %v8254_v9 = vld [vmem:[%s10408_s0 + $0x7c0] sm:$0xff] }
 0x26a   :  { %10694 = vst [vmem:[#allocation89_spill] sm:$0xff] %v8197_v43  ;;  %v8209_v36 = vmul.f32 0.5, %v2804_v27  ;;  %v3181_v39 = vsel %vm3092_vm3, %v8197_v43, %v3180_v56  ;;  %v1363_v20 = vmax.f32 %v1361_v4, %v1362_v31  ;;  %v2359_v15 = vadd.f32 %v2358_v55, %v2357_v38  ;;  %v8259_v27 = vld [vmem:[%s10408_s0 + $0x7c8] sm:$0xff] }
 0x26b   :  { %v8218_v50 = vmul.f32 0.5, %v2805_v25  ;;  %v1355_v10 = vrot.slane %v1354_v46, 4  ;;  %v2806_v0 = vadd.f32 %v2678_v19, %v8148_v8  ;;  %v1371_v5 = vsel %vm271_vm0, %v8223_v22, -inf  ;;  %v8242_v8 = vld [vmem:[%s10408_s0 + $0x7b8] sm:$0xff] }
 0x26c   :  { %10695 = vst [vmem:[#allocation90_spill] sm:$0xff] %v8209_v36  ;;  %v3182_v21 = vsel %vm3094_vm4, %v8209_v36, %v3181_v39  ;;  %v1364_v13 = vrot.slane %v1363_v20, 4  ;;  %v2679_v44 = vmul.f32 0.0625, %v2359_v15  ;;  %v1372_v33 = vmax.f32 %v1370_v3, %v1371_v5  ;;  %v8277_v15 = vld [vmem:[%s10408_s0 + $0x7d8] sm:$0xff] }
 0x26d   :  { %10696 = vst [vmem:[#allocation91_spill] sm:$0xff] %v8218_v50  ;;  %v3183_v23 = vsel %vm3096_vm5, %v8218_v50, %v3182_v21  ;;  %v1356_v7 = vmax.f32 %v1354_v46, %v1355_v10  ;;  %v8244_v59 = vmul.f32 0.5, %v2806_v0  ;;  %v1379_v41 = vsel %vm271_vm0, %v8237_v49, -inf }
 0x26e   :  { %v1365_v38 = vmax.f32 %v1363_v20, %v1364_v13  ;;  %v1380_v32 = vsel %vm271_vm0, %v8242_v8, -inf  ;;  %v2807_v4 = vadd.f32 %v2679_v44, %v8152_v24  ;;  %v1373_v55 = vrot.slane %v1372_v33, 4  ;;  %v8272_v20 = vld [vmem:[%s10408_s0 + $0x7d0] sm:$0xff] }
 0x26f   :  { %10697 = vst [vmem:[#allocation92_spill] sm:$0xff] %v8244_v59  ;;  %v1357_v56 = vrot.slane %v1356_v7, 2  ;;  %v1381_v25 = vmax.f32 %v1379_v41, %v1380_v32  ;;  %v3184_v46 = vsel %vm3098_vm6, %v8244_v59, %v3183_v23  ;;  %v1388_v24 = vsel %vm271_vm0, %v8254_v9, -inf }
 0x270   :  { %v1366_v31 = vrot.slane %v1365_v38, 2  ;;  %v1389_v19 = vsel %vm271_vm0, %v8259_v27, -inf  ;;  %v8267_v39 = vmul.f32 0.5, %v2807_v4  ;;  %v1374_v3 = vmax.f32 %v1372_v33, %v1373_v55  ;;  %v8294_v55 = vld [vmem:[%s10408_s0 + $0x7e8] sm:$0xff] }
 0x271   :  { %v1358_v10 = vmax.f32 %v1356_v7, %v1357_v56  ;;  %v1382_v0 = vrot.slane %v1381_v25, 4  ;;  %v1390_v13 = vmax.f32 %v1388_v24, %v1389_v19  ;;  %v1397_v5 = vsel %vm271_vm0, %v8272_v20, -inf  ;;  %v8289_v7 = vld [vmem:[%s10408_s0 + $0x7e0] sm:$0xff]  ;;  %v8303_v19 = vld [vmem:[%s10408_s0 + $0x7f0] sm:$0xff] }
 0x272   :  { %10698 = vst [vmem:[#allocation93_spill] sm:$0xff] %v8267_v39  ;;  %v1367_v21 = vmax.f32 %v1365_v38, %v1366_v31  ;;  %v1398_v44 = vsel %vm271_vm0, %v8277_v15, -inf  ;;  %v3185_v23 = vsel %vm3100_vm7, %v8267_v39, %v3184_v46  ;;  %v1375_v32 = vrot.slane %v1374_v3, 2 }
 0x273   :  { %v1359_v41 = vrot.slane %v1358_v10, 1  ;;  %v1383_v4 = vmax.f32 %v1381_v25, %v1382_v0  ;;  %v3259_v59 = vsel %vm271_vm0, %v3185_v23, 0.0  ;;  %v1391_v38 = vrot.slane %v1390_v13, 4 }
 0x274   :  { %v1368_v33 = vrot.slane %v1367_v21, 1  ;;  %v1399_v56 = vmax.f32 %v1397_v5, %v1398_v44  ;;  %3260 = vadd.xlane.f32.xlu0 %v3259_v59  ;;  %v1376_v31 = vmax.f32 %v1374_v3, %v1375_v32  ;;  %v1406_v24 = vsel %vm271_vm0, %v8289_v7, -inf }
 0x275   :  { %v8296_v46 = vmax.f32 %v1358_v10, %v1359_v41  ;;  %v1384_v25 = vrot.slane %v1383_v4, 2  ;;  %v1392_v59 = vmax.f32 %v1390_v13, %v1391_v38  ;;  %v1407_v44 = vsel %vm271_vm0, %v8294_v55, -inf  ;;  %v8312_v10 = vld [vmem:[%s10408_s0 + $0x7f8] sm:$0xff] }
 0x276   :  { %v8305_v0 = vmax.f32 %v1367_v21, %v1368_v33  ;;  %v1400_v5 = vrot.slane %v1399_v56, 4  ;;  %v1377_v3 = vrot.slane %v1376_v31, 1  ;;  %v1408_v41 = vmax.f32 %v1406_v24, %v1407_v44 }
 0x277   :  { %v1385_v23 = vmax.f32 %v1383_v4, %v1384_v25  ;;  %v1415_v32 = vsel %vm271_vm0, %v8303_v19, -inf  ;;  %v1393_v39 = vrot.slane %v1392_v59, 2  ;;  %v1416_v21 = vsel %vm271_vm0, %v8312_v10, -inf }
 0x278   :  { %v1401_v50 = vmax.f32 %v1399_v56, %v1400_v5  ;;  %v2504_v13 = vsel %vm271_vm0, %v8172_v17, 0.0  ;;  %v8320_v33 = vmax.f32 %v1376_v31, %v1377_v3  ;;  %v1409_v36 = vrot.slane %v1408_v41, 4 }
 0x279   :  { %v1386_v38 = vrot.slane %v1385_v23, 1  ;;  %v1417_v43 = vmax.f32 %v1415_v32, %v1416_v21  ;;  %v1394_v11 = vmax.f32 %v1392_v59, %v1393_v39  ;;  %v2505_v4 = vsel %vm271_vm0, %v8185_v12, 0.0 }
 0x27a   :  { %v1402_v62 = vrot.slane %v1401_v50, 2  ;;  %v2513_v25 = vsel %vm271_vm0, %v8190_v63, 0.0  ;;  %v1410_v24 = vmax.f32 %v1408_v41, %v1409_v36  ;;  %v2506_v44 = vadd.f32 %v2505_v4, %v2504_v13 }
 0x27b   :  { %v8326_v56 = vmax.f32 %v1385_v23, %v1386_v38  ;;  %v1418_v5 = vrot.slane %v1417_v43, 4  ;;  %v1395_v28 = vrot.slane %v1394_v11, 1  ;;  %v2514_v31 = vsel %vm271_vm0, %v8204_v45, 0.0 }
 0x27c   :  { %v1403_v17 = vmax.f32 %v1401_v50, %v1402_v62  ;;  %v2522_v39 = vsel %vm271_vm0, %v8216_v29, 0.0  ;;  %v1411_v59 = vrot.slane %v1410_v24, 2  ;;  %v2507_v32 = vrot.slane %v2506_v44, 4 }
 0x27d   :  { %v1419_v3 = vmax.f32 %v1417_v43, %v1418_v5  ;;  %v2515_v12 = vadd.f32 %v2514_v31, %v2513_v25  ;;  %v8332_v21 = vmax.f32 %v1394_v11, %v1395_v28  ;;  %v2523_v36 = vsel %vm271_vm0, %v8223_v22, 0.0 }
 0x27e   :  { %v1404_v63 = vrot.slane %v1403_v17, 1  ;;  %v2531_v23 = vsel %vm271_vm0, %v8237_v49, 0.0  ;;  %v1412_v62 = vmax.f32 %v1410_v24, %v1411_v59  ;;  %v2508_v41 = vadd.f32 %v2507_v32, %v2506_v44 }
 0x27f   :  { %v1420_v50 = vrot.slane %v1419_v3, 2  ;;  %v2516_v45 = vrot.slane %v2515_v12, 4  ;;  %v2524_v29 = vadd.f32 %v2523_v36, %v2522_v39  ;;  %v2532_v43 = vsel %vm271_vm0, %v8242_v8, 0.0 }
 0x280   :  { %v8338_v13 = vmax.f32 %v1403_v17, %v1404_v63  ;;  %v2540_v28 = vsel %vm271_vm0, %v8254_v9, 0.0  ;;  %v1413_v11 = vrot.slane %v1412_v62, 1  ;;  %v2509_v4 = vrot.slane %v2508_v41, 2 }
 0x281   :  { %v1421_v38 = vmax.f32 %v1419_v3, %v1420_v50  ;;  %v2517_v22 = vadd.f32 %v2516_v45, %v2515_v12  ;;  %v2525_v25 = vrot.slane %v2524_v29, 4  ;;  %v2533_v5 = vadd.f32 %v2532_v43, %v2531_v23 }
 0x282   :  { %v2541_v49 = vsel %vm271_vm0, %v8259_v27, 0.0  ;;  %v2549_v24 = vsel %vm271_vm0, %v8272_v20, 0.0  ;;  %v8348_v44 = vmax.f32 %v1412_v62, %v1413_v11  ;;  %v2510_v31 = vadd.f32 %v2509_v4, %v2508_v41 }
 0x283   :  { %v1422_v17 = vrot.slane %v1421_v38, 1  ;;  %v2518_v8 = vrot.slane %v2517_v22, 2  ;;  %v2526_v39 = vadd.f32 %v2525_v25, %v2524_v29  ;;  %v2534_v59 = vrot.slane %v2533_v5, 4 }
 0x284   :  { %v2542_v9 = vadd.f32 %v2541_v49, %v2540_v28  ;;  %v2550_v3 = vsel %vm271_vm0, %v8277_v15, 0.0  ;;  %v2511_v12 = vrot.slane %v2510_v31, 1  ;;  %v2558_v20 = vsel %vm271_vm0, %v8289_v7, 0.0 }
 0x285   :  { %v8352_v32 = vmax.f32 %v1421_v38, %v1422_v17  ;;  %v2519_v63 = vadd.f32 %v2518_v8, %v2517_v22  ;;  %v2551_v36 = vadd.f32 %v2550_v3, %v2549_v24  ;;  %v2527_v27 = vrot.slane %v2526_v39, 2 }
 0x286   :  { %v2535_v23 = vadd.f32 %v2534_v59, %v2533_v5  ;;  %v2543_v50 = vrot.slane %v2542_v9, 4  ;;  %v2512_v62 = vadd.f32 %v2511_v12, %v2510_v31  ;;  %v2559_v29 = vsel %vm271_vm0, %v8294_v55, 0.0 }
 0x287   :  { %v2520_v41 = vrot.slane %v2519_v63, 1  ;;  %v2552_v45 = vrot.slane %v2551_v36, 4  ;;  %v2528_v43 = vadd.f32 %v2527_v27, %v2526_v39  ;;  %v2560_v11 = vadd.f32 %v2559_v29, %v2558_v20 }
 0x288   :  { %v2536_v28 = vrot.slane %v2535_v23, 2  ;;  %v2544_v15 = vadd.f32 %v2543_v50, %v2542_v9  ;;  %v2567_v22 = vsel %vm271_vm0, %v8303_v19, 0.0  ;;  %v2568_v25 = vsel %vm271_vm0, %v8312_v10, 0.0 }
 0x289   :  { %v2521_v38 = vadd.f32 %v2520_v41, %v2519_v63  ;;  %v2553_v4 = vadd.f32 %v2552_v45, %v2551_v36  ;;  %v2529_v5 = vrot.slane %v2528_v43, 1  ;;  %v2561_v24 = vrot.slane %v2560_v11, 4 }
 0x28a   :  { %v2537_v7 = vadd.f32 %v2536_v28, %v2535_v23  ;;  %v2545_v49 = vrot.slane %v2544_v15, 2  ;;  %v2569_v31 = vadd.f32 %v2568_v25, %v2567_v22  ;;  %v2696_v8 = vmul.f32 0.0625, %v2512_v62 }
 0x28b   :  { %v2554_v17 = vrot.slane %v2553_v4, 2  ;;  %v2697_v55 = vmul.f32 0.0625, %v2521_v38  ;;  %v2530_v39 = vadd.f32 %v2529_v5, %v2528_v43  ;;  %v2562_v3 = vadd.f32 %v2561_v24, %v2560_v11 }
 0x28c   :  { %v2538_v59 = vrot.slane %v2537_v7, 1  ;;  %v2546_v9 = vadd.f32 %v2545_v49, %v2544_v15  ;;  %v2570_v63 = vrot.slane %v2569_v31, 4  ;;  %v2824_v36 = vadd.f32 %v2696_v8, %v8296_v46  ;;  %v8372_v46 = vld [vmem:[%s10408_s0 + $0x700] sm:$0xff]  ;;  %v8390_v49 = vld [vmem:[%s10408_s0 + $0x710] sm:$0xff] }
 0x28d   :  { %v2555_v12 = vadd.f32 %v2554_v17, %v2553_v4  ;;  %v2825_v19 = vadd.f32 %v2697_v55, %v8305_v0  ;;  %v2563_v50 = vrot.slane %v2562_v3, 2  ;;  %v2698_v23 = vmul.f32 0.0625, %v2530_v39 }
 0x28e   :  { %v2539_v27 = vadd.f32 %v2538_v59, %v2537_v7  ;;  %v2547_v10 = vrot.slane %v2546_v9, 1  ;;  %v2571_v41 = vadd.f32 %v2570_v63, %v2569_v31  ;;  %v8364_v45 = vmul.f32 0.5, %v2824_v36 }
 0x28f   :  { %v2556_v20 = vrot.slane %v2555_v12, 1  ;;  %v8366_v62 = vmul.f32 0.5, %v2825_v19  ;;  %v2564_v43 = vadd.f32 %v2563_v50, %v2562_v3  ;;  %v2826_v15 = vadd.f32 %v2698_v23, %v8320_v33  ;;  %v8385_v33 = vld [vmem:[%s10408_s0 + $0x708] sm:$0xff] }
 0x290   :  { %10699 = vst [vmem:[#allocation94_spill] sm:$0xff] %v8364_v45  ;;  %v2548_v29 = vadd.f32 %v2547_v10, %v2546_v9  ;;  %v2699_v28 = vmul.f32 0.0625, %v2539_v27  ;;  %v2572_v11 = vrot.slane %v2571_v41, 2  ;;  %v1280_v4 = vsel %vm271_vm0, %v8372_v46, -inf  ;;  %v8404_v9 = vld [vmem:[%s10408_s0 + $0x718] sm:$0xff]  ;;  %v8416_v10 = vld [vmem:[%s10408_s0 + $0x720] sm:$0xff] }
 0x291   :  { %10700 = vst [vmem:[#allocation95_spill] sm:$0xff] %v8366_v62  ;;  %v2557_v0 = vadd.f32 %v2556_v20, %v2555_v12  ;;  %v3200_v38 = vsel %vm3088_vm1, %v8366_v62, %v8364_v45  ;;  %v2565_v22 = vrot.slane %v2564_v43, 1  ;;  %v8380_v7 = vmul.f32 0.5, %v2826_v15 }
 0x292   :  { %v2700_v25 = vmul.f32 0.0625, %v2548_v29  ;;  %v2827_v5 = vadd.f32 %v2699_v28, %v8326_v56  ;;  %v2573_v24 = vadd.f32 %v2572_v11, %v2571_v41  ;;  %v1281_v31 = vsel %vm271_vm0, %v8385_v33, -inf }
 0x293   :  { %10701 = vst [vmem:[#allocation96_spill] sm:$0xff] %v8380_v7  ;;  %v2701_v17 = vmul.f32 0.0625, %v2557_v0  ;;  %v1289_v56 = vsel %vm271_vm0, %v8390_v49, -inf  ;;  %v2566_v8 = vadd.f32 %v2565_v22, %v2564_v43  ;;  %v3201_v59 = vsel %vm3090_vm2, %v8380_v7, %v3200_v38 }
 0x294   :  { %v2828_v55 = vadd.f32 %v2700_v25, %v8332_v21  ;;  %v8397_v39 = vmul.f32 0.5, %v2827_v5  ;;  %v2574_v3 = vrot.slane %v2573_v24, 1  ;;  %v1282_v63 = vmax.f32 %v1280_v4, %v1281_v31  ;;  %v8437_v4 = vld [vmem:[%s10408_s0 + $0x730] sm:$0xff] }
 0x295   :  { %v2829_v12 = vadd.f32 %v2701_v17, %v8338_v13  ;;  %v1290_v36 = vsel %vm271_vm0, %v8404_v9, -inf  ;;  %v2702_v19 = vmul.f32 0.0625, %v2566_v8  ;;  %v8423_v13 = vld [vmem:[%s10408_s0 + $0x728] sm:$0xff]  ;;  %v1298_v29 = vsel %vm271_vm0, %v8416_v10, -inf  ;;  %v8454_v8 = vld [vmem:[%s10408_s0 + $0x740] sm:$0xff] }
 0x296   :  { %10702 = vst [vmem:[#allocation97_spill] sm:$0xff] %v8397_v39  ;;  %v8409_v27 = vmul.f32 0.5, %v2828_v55  ;;  %v3202_v21 = vsel %vm3092_vm3, %v8397_v39, %v3201_v59  ;;  %v1291_v50 = vmax.f32 %v1289_v56, %v1290_v36  ;;  %v2575_v23 = vadd.f32 %v2574_v3, %v2573_v24  ;;  %v8459_v55 = vld [vmem:[%s10408_s0 + $0x748] sm:$0xff] }
 0x297   :  { %v8418_v20 = vmul.f32 0.5, %v2829_v12  ;;  %v1283_v41 = vrot.slane %v1282_v63, 4  ;;  %v2830_v43 = vadd.f32 %v2702_v19, %v8348_v44  ;;  %v1299_v0 = vsel %vm271_vm0, %v8423_v13, -inf  ;;  %v8442_v44 = vld [vmem:[%s10408_s0 + $0x738] sm:$0xff] }
 0x298   :  { %10703 = vst [vmem:[#allocation98_spill] sm:$0xff] %v8409_v27  ;;  %v3203_v28 = vsel %vm3094_vm4, %v8409_v27, %v3202_v21  ;;  %v1292_v15 = vrot.slane %v1291_v50, 4  ;;  %v2703_v11 = vmul.f32 0.0625, %v2575_v23  ;;  %v1300_v25 = vmax.f32 %v1298_v29, %v1299_v0  ;;  %v8477_v23 = vld [vmem:[%s10408_s0 + $0x758] sm:$0xff] }
 0x299   :  { %10704 = vst [vmem:[#allocation99_spill] sm:$0xff] %v8418_v20  ;;  %v3204_v38 = vsel %vm3096_vm5, %v8418_v20, %v3203_v28  ;;  %v1284_v22 = vmax.f32 %v1282_v63, %v1283_v41  ;;  %v8444_v5 = vmul.f32 0.5, %v2830_v43  ;;  %v1307_v17 = vsel %vm271_vm0, %v8437_v4, -inf }
 0x29a   :  { %v1293_v24 = vmax.f32 %v1291_v50, %v1292_v15  ;;  %v1308_v31 = vsel %vm271_vm0, %v8442_v44, -inf  ;;  %v2831_v56 = vadd.f32 %v2703_v11, %v8352_v32  ;;  %v1301_v3 = vrot.slane %v1300_v25, 4  ;;  %v8472_v50 = vld [vmem:[%s10408_s0 + $0x750] sm:$0xff] }
 0x29b   :  { %10705 = vst [vmem:[#allocation100_spill] sm:$0xff] %v8444_v5  ;;  %v1285_v59 = vrot.slane %v1284_v22, 2  ;;  %v1309_v12 = vmax.f32 %v1307_v17, %v1308_v31  ;;  %v3205_v63 = vsel %vm3098_vm6, %v8444_v5, %v3204_v38  ;;  %v1316_v32 = vsel %vm271_vm0, %v8454_v8, -inf }
 0x29c   :  { %v1294_v36 = vrot.slane %v1293_v24, 2  ;;  %v1317_v19 = vsel %vm271_vm0, %v8459_v55, -inf  ;;  %v8467_v21 = vmul.f32 0.5, %v2831_v56  ;;  %v1302_v29 = vmax.f32 %v1300_v25, %v1301_v3  ;;  %v8494_v3 = vld [vmem:[%s10408_s0 + $0x768] sm:$0xff] }
 0x29d   :  { %v1286_v41 = vmax.f32 %v1284_v22, %v1285_v59  ;;  %v1310_v43 = vrot.slane %v1309_v12, 4  ;;  %v1318_v15 = vmax.f32 %v1316_v32, %v1317_v19  ;;  %v1325_v0 = vsel %vm271_vm0, %v8472_v50, -inf  ;;  %v8489_v22 = vld [vmem:[%s10408_s0 + $0x760] sm:$0xff]  ;;  %v8503_v19 = vld [vmem:[%s10408_s0 + $0x770] sm:$0xff] }
 0x29e   :  { %10706 = vst [vmem:[#allocation101_spill] sm:$0xff] %v8467_v21  ;;  %v1295_v28 = vmax.f32 %v1293_v24, %v1294_v36  ;;  %v1326_v11 = vsel %vm271_vm0, %v8477_v23, -inf  ;;  %v3206_v38 = vsel %vm3100_vm7, %v8467_v21, %v3205_v63  ;;  %v1303_v31 = vrot.slane %v1302_v29, 2 }
 0x29f   :  { %v1287_v17 = vrot.slane %v1286_v41, 1  ;;  %v1311_v56 = vmax.f32 %v1309_v12, %v1310_v43  ;;  %v3268_v5 = vsel %vm271_vm0, %v3206_v38, 0.0  ;;  %v1319_v24 = vrot.slane %v1318_v15, 4 }
 0x2a0   :  { %v1296_v25 = vrot.slane %v1295_v28, 1  ;;  %v1327_v59 = vmax.f32 %v1325_v0, %v1326_v11  ;;  %3269 = vadd.xlane.f32.xlu1 %v3268_v5  ;;  %v1304_v36 = vmax.f32 %v1302_v29, %v1303_v31  ;;  %v1334_v32 = vsel %vm271_vm0, %v8489_v22, -inf }
 0x2a1   :  { %v8496_v63 = vmax.f32 %v1286_v41, %v1287_v17  ;;  %v1312_v12 = vrot.slane %v1311_v56, 2  ;;  %v1320_v5 = vmax.f32 %v1318_v15, %v1319_v24  ;;  %v1335_v11 = vsel %vm271_vm0, %v8494_v3, -inf  ;;  %v8512_v41 = vld [vmem:[%s10408_s0 + $0x778] sm:$0xff] }
 0x2a2   :  { %v8505_v43 = vmax.f32 %v1295_v28, %v1296_v25  ;;  %v1328_v0 = vrot.slane %v1327_v59, 4  ;;  %v1305_v29 = vrot.slane %v1304_v36, 1  ;;  %v1336_v17 = vmax.f32 %v1334_v32, %v1335_v11 }
 0x2a3   :  { %v1313_v38 = vmax.f32 %v1311_v56, %v1312_v12  ;;  %v1343_v31 = vsel %vm271_vm0, %v8503_v19, -inf  ;;  %v1321_v21 = vrot.slane %v1320_v5, 2  ;;  %v1344_v28 = vsel %vm271_vm0, %v8512_v41, -inf }
 0x2a4   :  { %v1329_v20 = vmax.f32 %v1327_v59, %v1328_v0  ;;  %v2432_v15 = vsel %vm271_vm0, %v8372_v46, 0.0  ;;  %v8520_v25 = vmax.f32 %v1304_v36, %v1305_v29  ;;  %v1337_v27 = vrot.slane %v1336_v17, 4 }
 0x2a5   :  { %v1314_v24 = vrot.slane %v1313_v38, 1  ;;  %v1345_v39 = vmax.f32 %v1343_v31, %v1344_v28  ;;  %v1322_v7 = vmax.f32 %v1320_v5, %v1321_v21  ;;  %v2433_v56 = vsel %vm271_vm0, %v8385_v33, 0.0 }
 0x2a6   :  { %v1330_v62 = vrot.slane %v1329_v20, 2  ;;  %v2441_v12 = vsel %vm271_vm0, %v8390_v49, 0.0  ;;  %v1338_v32 = vmax.f32 %v1336_v17, %v1337_v27  ;;  %v2434_v11 = vadd.f32 %v2433_v56, %v2432_v15 }
 0x2a7   :  { %v8526_v59 = vmax.f32 %v1313_v38, %v1314_v24  ;;  %v1346_v0 = vrot.slane %v1345_v39, 4  ;;  %v1323_v45 = vrot.slane %v1322_v7, 1  ;;  %v2442_v36 = vsel %vm271_vm0, %v8404_v9, 0.0 }
 0x2a8   :  { %v1331_v46 = vmax.f32 %v1329_v20, %v1330_v62  ;;  %v2450_v21 = vsel %vm271_vm0, %v8416_v10, 0.0  ;;  %v1339_v5 = vrot.slane %v1338_v32, 2  ;;  %v2435_v31 = vrot.slane %v2434_v11, 4 }
 0x2a9   :  { %v1347_v29 = vmax.f32 %v1345_v39, %v1346_v0  ;;  %v2443_v33 = vadd.f32 %v2442_v36, %v2441_v12  ;;  %v8532_v28 = vmax.f32 %v1322_v7, %v1323_v45  ;;  %v2451_v27 = vsel %vm271_vm0, %v8423_v13, 0.0 }
 0x2aa   :  { %v1332_v49 = vrot.slane %v1331_v46, 1  ;;  %v2459_v38 = vsel %vm271_vm0, %v8437_v4, 0.0  ;;  %v1340_v62 = vmax.f32 %v1338_v32, %v1339_v5  ;;  %v2436_v17 = vadd.f32 %v2435_v31, %v2434_v11 }
 0x2ab   :  { %v1348_v20 = vrot.slane %v1347_v29, 2  ;;  %v2444_v9 = vrot.slane %v2443_v33, 4  ;;  %v2452_v10 = vadd.f32 %v2451_v27, %v2450_v21  ;;  %v2460_v39 = vsel %vm271_vm0, %v8442_v44, 0.0 }
 0x2ac   :  { %v8538_v15 = vmax.f32 %v1331_v46, %v1332_v49  ;;  %v2468_v45 = vsel %vm271_vm0, %v8454_v8, 0.0  ;;  %v1341_v7 = vrot.slane %v1340_v62, 1  ;;  %v2437_v56 = vrot.slane %v2436_v17, 2 }
 0x2ad   :  { %v1349_v24 = vmax.f32 %v1347_v29, %v1348_v20  ;;  %v2445_v13 = vadd.f32 %v2444_v9, %v2443_v33  ;;  %v2453_v12 = vrot.slane %v2452_v10, 4  ;;  %v2461_v0 = vadd.f32 %v2460_v39, %v2459_v38 }
 0x2ae   :  { %v2469_v4 = vsel %vm271_vm0, %v8459_v55, 0.0  ;;  %v2477_v32 = vsel %vm271_vm0, %v8472_v50, 0.0  ;;  %v8548_v11 = vmax.f32 %v1340_v62, %v1341_v7  ;;  %v2438_v36 = vadd.f32 %v2437_v56, %v2436_v17 }
 0x2af   :  { %v1350_v46 = vrot.slane %v1349_v24, 1  ;;  %v2446_v44 = vrot.slane %v2445_v13, 2  ;;  %v2454_v21 = vadd.f32 %v2453_v12, %v2452_v10  ;;  %v2462_v5 = vrot.slane %v2461_v0, 4 }
 0x2b0   :  { %v2470_v8 = vadd.f32 %v2469_v4, %v2468_v45  ;;  %v2478_v29 = vsel %vm271_vm0, %v8477_v23, 0.0  ;;  %v2439_v33 = vrot.slane %v2438_v36, 1  ;;  %v2486_v50 = vsel %vm271_vm0, %v8489_v22, 0.0 }
 0x2b1   :  { %v8552_v31 = vmax.f32 %v1349_v24, %v1350_v46  ;;  %v2447_v49 = vadd.f32 %v2446_v44, %v2445_v13  ;;  %v2479_v27 = vadd.f32 %v2478_v29, %v2477_v32  ;;  %v2455_v55 = vrot.slane %v2454_v21, 2 }
 0x2b2   :  { %v2463_v38 = vadd.f32 %v2462_v5, %v2461_v0  ;;  %v2471_v20 = vrot.slane %v2470_v8, 4  ;;  %v2440_v62 = vadd.f32 %v2439_v33, %v2438_v36  ;;  %v2487_v10 = vsel %vm271_vm0, %v8494_v3, 0.0 }
 0x2b3   :  { %v2448_v17 = vrot.slane %v2447_v49, 1  ;;  %v2480_v9 = vrot.slane %v2479_v27, 4  ;;  %v2456_v39 = vadd.f32 %v2455_v55, %v2454_v21  ;;  %v2488_v7 = vadd.f32 %v2487_v10, %v2486_v50  ;;  %v3225_v50 = vpop.xlane.xlu0 %3224 }
 0x2b4   :  { %v2464_v45 = vrot.slane %v2463_v38, 2  ;;  %v2472_v23 = vadd.f32 %v2471_v20, %v2470_v8  ;;  %v2495_v13 = vsel %vm271_vm0, %v8503_v19, 0.0  ;;  %v2496_v12 = vsel %vm271_vm0, %v8512_v41, 0.0 }
 0x2b5   :  { %v2449_v24 = vadd.f32 %v2448_v17, %v2447_v49  ;;  %v2481_v56 = vadd.f32 %v2480_v9, %v2479_v27  ;;  %v2457_v0 = vrot.slane %v2456_v39, 1  ;;  %v2489_v32 = vrot.slane %v2488_v7, 4 }
 0x2b6   :  { %v2465_v22 = vadd.f32 %v2464_v45, %v2463_v38  ;;  %v2473_v4 = vrot.slane %v2472_v23, 2  ;;  %v2497_v36 = vadd.f32 %v2496_v12, %v2495_v13  ;;  %v2688_v44 = vmul.f32 0.0625, %v2440_v62 }
 0x2b7   :  { %v2482_v46 = vrot.slane %v2481_v56, 2  ;;  %v2689_v3 = vmul.f32 0.0625, %v2449_v24  ;;  %v2458_v21 = vadd.f32 %v2457_v0, %v2456_v39  ;;  %v2490_v29 = vadd.f32 %v2489_v32, %v2488_v7 }
 0x2b8   :  { %v2466_v5 = vrot.slane %v2465_v22, 1  ;;  %v2474_v8 = vadd.f32 %v2473_v4, %v2472_v23  ;;  %v2498_v49 = vrot.slane %v2497_v36, 4  ;;  %v2816_v27 = vadd.f32 %v2688_v44, %v8496_v63  ;;  %v3231_v4 = vpop.xlane.xlu1 %3230 }
 0x2b9   :  { %v2483_v33 = vadd.f32 %v2482_v46, %v2481_v56  ;;  %v2817_v19 = vadd.f32 %v2689_v3, %v8505_v43  ;;  %v2491_v20 = vrot.slane %v2490_v29, 2  ;;  %v2690_v38 = vmul.f32 0.0625, %v2458_v21 }
 0x2ba   :  { %v2467_v55 = vadd.f32 %v2466_v5, %v2465_v22  ;;  %v2475_v41 = vrot.slane %v2474_v8, 1  ;;  %v2499_v9 = vadd.f32 %v2498_v49, %v2497_v36  ;;  %v8564_v10 = vmul.f32 0.5, %v2816_v27 }
 0x2bb   :  { %v2484_v17 = vrot.slane %v2483_v33, 1  ;;  %v8566_v62 = vmul.f32 0.5, %v2817_v19  ;;  %v2492_v45 = vadd.f32 %v2491_v20, %v2490_v29  ;;  %v2818_v7 = vadd.f32 %v2690_v38, %v8520_v25 }
 0x2bc   :  { %v2476_v39 = vadd.f32 %v2475_v41, %v2474_v8  ;;  %v2691_v23 = vmul.f32 0.0625, %v2467_v55  ;;  %v2500_v63 = vrot.slane %v2499_v9, 2  ;;  %v3272_v56 = vmul.f32 0.010416667, %v3225_v50 }
 0x2bd   :  { %v2485_v24 = vadd.f32 %v2484_v17, %v2483_v33  ;;  %v3193_v43 = vsel %vm3088_vm1, %v8566_v62, %v8564_v10  ;;  %v2493_v13 = vrot.slane %v2492_v45, 1  ;;  %v8573_v22 = vmul.f32 0.5, %v2818_v7 }
 0x2be   :  { %v2692_v12 = vmul.f32 0.0625, %v2476_v39  ;;  %v2819_v0 = vadd.f32 %v2691_v23, %v8526_v59  ;;  %v2501_v32 = vadd.f32 %v2500_v63, %v2499_v9  ;;  %v3304_v36 = vrot.slane %v3272_v56, 1  ;;  %v3228_v9 = vpop.xlane.xlu0 %3227 }
 0x2bf   :  { %v2693_v46 = vmul.f32 0.0625, %v2485_v24  ;;  %v3305_v44 = vrot.slane %v3272_v56, 2  ;;  %v2494_v3 = vadd.f32 %v2493_v13, %v2492_v45  ;;  %v3194_v5 = vsel %vm3090_vm2, %v8573_v22, %v3193_v43 }
 0x2c0   :  { %v2820_v25 = vadd.f32 %v2692_v12, %v8532_v28  ;;  %v8576_v21 = vmul.f32 0.5, %v2819_v0  ;;  %v2502_v8 = vrot.slane %v2501_v32, 1  ;;  %v3306_v33 = vrot.slane %v3272_v56, 3 }
 0x2c1   :  { %v2821_v29 = vadd.f32 %v2693_v46, %v8538_v15  ;;  %v3307_v59 = vrot.slane %v3272_v56, 4  ;;  %v2694_v49 = vmul.f32 0.0625, %v2494_v3  ;;  %v3308_v55 = vrot.slane %v3272_v56, 5  ;;  %v3234_v15 = vpop.xlane.xlu1 %3233 }
 0x2c2   :  { %v8581_v27 = vmul.f32 0.5, %v2820_v25  ;;  %v3195_v19 = vsel %vm3092_vm3, %v8576_v21, %v3194_v5  ;;  %v2503_v41 = vadd.f32 %v2502_v8, %v2501_v32  ;;  %v3309_v28 = vrot.slane %v3272_v56, 6 }
 0x2c3   :  { %v8585_v20 = vmul.f32 0.5, %v2821_v29  ;;  %v3310_v38 = vrot.slane %v3272_v56, 7  ;;  %v2822_v50 = vadd.f32 %v2694_v49, %v8548_v11  ;;  %v8591_v39 = vsub.f32 %v5765_v35, %v3272_v56 }
 0x2c4   :  { %v3196_v17 = vsel %vm3094_vm4, %v8581_v27, %v3195_v19  ;;  %v8594_v45 = vsub.f32 %v5767_v52, %v3304_v36  ;;  %v2695_v23 = vmul.f32 0.0625, %v2503_v41  ;;  %v8599_v24 = vsub.f32 %v5774_v1, %v3305_v44  ;;  %v3237_v36 = vpop.xlane.xlu0 %3236 }
 0x2c5   :  { %v3197_v7 = vsel %vm3096_vm5, %v8585_v20, %v3196_v17  ;;  %v8602_v11 = vsub.f32 %v5799_v58, %v3306_v33  ;;  %v8604_v63 = vmul.f32 0.5, %v2822_v50  ;;  %v8607_v43 = vsub.f32 %v5816_v61, %v3307_v59  ;;  %v3240_v46 = vpop.xlane.xlu1 %3239 }
 0x2c6   :  { %v8610_v35 = vsub.f32 %v5828_v26, %v3308_v55  ;;  %v8613_v52 = vsub.f32 %v5844_v14, %v3309_v28  ;;  %v2823_v56 = vadd.f32 %v2695_v23, %v8552_v31  ;;  %v8617_v13 = vsub.f32 %v5867_v34, %v3310_v38 }
 0x2c7   :  { %v3672_v1 = vmul.f32 %v8591_v39, %v8591_v39  ;;  %v3673_v58 = vmul.f32 %v8594_v45, %v8594_v45  ;;  %v3198_v61 = vsel %vm3098_vm6, %v8604_v63, %v3197_v7  ;;  %v3674_v26 = vmul.f32 %v8599_v24, %v8599_v24 }
 0x2c8   :  { %v3675_v14 = vmul.f32 %v8602_v11, %v8602_v11  ;;  %v3676_v31 = vmul.f32 %v8607_v43, %v8607_v43  ;;  %v8631_v34 = vmul.f32 0.5, %v2823_v56  ;;  %v3677_v12 = vmul.f32 %v8610_v35, %v8610_v35 }
 0x2c9   :  { %v3678_v0 = vmul.f32 %v8613_v52, %v8613_v52  ;;  %v3679_v32 = vmul.f32 %v8617_v13, %v8617_v13  ;;  %v3928_v44 = vrot.slane %v3673_v58, 7  ;;  %v3930_v3 = vrot.slane %v3674_v26, 6 }
 0x2ca   :  { %v3932_v25 = vrot.slane %v3675_v14, 5  ;;  %v3934_v5 = vrot.slane %v3676_v31, 4  ;;  %v3199_v8 = vsel %vm3100_vm7, %v8631_v34, %v3198_v61  ;;  %v3936_v29 = vrot.slane %v3677_v12, 3 }
 0x2cb   :  { %v3938_v33 = vrot.slane %v3678_v0, 2  ;;  %v3940_v59 = vrot.slane %v3679_v32, 1  ;;  %v3265_v49 = vsel %vm271_vm0, %v3199_v8, 0.0  ;;  %v3929_v19 = vsel %vm3088_vm1, %v3928_v44, %v3672_v1 }
 0x2cc   :  { %v3274_v55 = vmul.f32 0.010416667, %v3231_v4  ;;  %v8643_v41 = vmul.f32 0.010416667, %v3228_v9  ;;  %3266 = vadd.xlane.f32.xlu0 %v3265_v49  ;;  %v3931_v28 = vsel %vm3090_vm2, %v3930_v3, %v3929_v19  ;;  %v8646_v38 = vmul.f32 0.010416667, %v3234_v15 }
 0x2cd   :  { %v8648_v50 = vmul.f32 0.010416667, %v3237_v36  ;;  %v8650_v17 = vmul.f32 0.010416667, %v3240_v46  ;;  %v3933_v23 = vsel %vm3092_vm3, %v3932_v25, %v3931_v28 }
 0x2ce   :  { %v3318_v7 = vrot.slane %v3274_v55, 1  ;;  %v3319_v56 = vrot.slane %v3274_v55, 2  ;;  %v3320_v58 = vrot.slane %v3274_v55, 3  ;;  %v3935_v61 = vsel %vm3094_vm4, %v3934_v5, %v3933_v23 }
 0x2cf   :  { %v3321_v1 = vrot.slane %v3274_v55, 4  ;;  %v3322_v4 = vrot.slane %v3274_v55, 5  ;;  %v3323_v9 = vrot.slane %v3274_v55, 6  ;;  %v3937_v26 = vsel %vm3096_vm5, %v3936_v29, %v3935_v61 }
 0x2d0   :  { %v3324_v14 = vrot.slane %v3274_v55, 7  ;;  %v8656_v15 = vsub.f32 %v5565_v48, %v3274_v55  ;;  %v8659_v31 = vsub.f32 %v5567_v51, %v3318_v7  ;;  %v3939_v12 = vsel %vm3098_vm6, %v3938_v33, %v3937_v26 }
 0x2d1   :  { %v8663_v0 = vsub.f32 %v5569_v53, %v3319_v56  ;;  %v8666_v32 = vsub.f32 %v5573_v57, %v3320_v58  ;;  %v8669_v46 = vsub.f32 %v5581_v60, %v3321_v1  ;;  %v3941_v36 = vsel %vm3100_vm7, %v3940_v59, %v3939_v12 }
 0x2d2   :  { %v8673_v44 = vsub.f32 %v5602_v6, %v3322_v4  ;;  %v8676_v48 = vsub.f32 %v5638_v37, %v3323_v9  ;;  %v8679_v51 = vsub.f32 %v5656_v40, %v3324_v14  ;;  %v4168_v53 = vsel %vm271_vm0, %v3941_v36, 0.0 }
 0x2d3   :  { %v3688_v57 = vmul.f32 %v8656_v15, %v8656_v15  ;;  %v3689_v60 = vmul.f32 %v8659_v31, %v8659_v31  ;;  %v3690_v3 = vmul.f32 %v8663_v0, %v8663_v0  ;;  %4169 = vadd.xlane.f32.xlu0 %v4168_v53  ;;  %v3691_v6 = vmul.f32 %v8666_v32, %v8666_v32 }
 0x2d4   :  { %v3692_v37 = vmul.f32 %v8669_v46, %v8669_v46  ;;  %v3693_v40 = vmul.f32 %v8673_v44, %v8673_v44  ;;  %v3694_v25 = vmul.f32 %v8676_v48, %v8676_v48  ;;  %v3695_v5 = vmul.f32 %v8679_v51, %v8679_v51 }
 0x2d5   :  { %v3956_v8 = vrot.slane %v3689_v60, 7  ;;  %v3958_v29 = vrot.slane %v3690_v3, 6  ;;  %v3311_v33 = vrot.slane %v8643_v41, 1  ;;  %v3960_v59 = vrot.slane %v3691_v6, 5 }
 0x2d6   :  { %v3962_v49 = vrot.slane %v3692_v37, 4  ;;  %v3964_v19 = vrot.slane %v3693_v40, 3  ;;  %v3966_v55 = vrot.slane %v3694_v25, 2  ;;  %v3968_v23 = vrot.slane %v3695_v5, 1 }
 0x2d7   :  { %v3957_v28 = vsel %vm3088_vm1, %v3956_v8, %v3688_v57  ;;  %v3312_v7 = vrot.slane %v8643_v41, 2  ;;  %v3313_v56 = vrot.slane %v8643_v41, 3  ;;  %v3314_v61 = vrot.slane %v8643_v41, 4 }
 0x2d8   :  { %v3959_v58 = vsel %vm3090_vm2, %v3958_v29, %v3957_v28  ;;  %v3315_v1 = vrot.slane %v8643_v41, 5  ;;  %v3316_v4 = vrot.slane %v8643_v41, 6  ;;  %v3317_v26 = vrot.slane %v8643_v41, 7 }
 0x2d9   :  { %v3961_v9 = vsel %vm3092_vm3, %v3960_v59, %v3959_v58  ;;  %v8710_v14 = vsub.f32 %v6164_v42, %v8643_v41  ;;  %v8713_v12 = vsub.f32 %v6166_v54, %v3311_v33  ;;  %v8717_v53 = vsub.f32 %v6180_v47, %v3312_v7  ;;  %v10707_v54 = vld [vmem:[#allocation13_spill] sm:$0xff] }
 0x2da   :  { %v3963_v36 = vsel %vm3094_vm4, %v3962_v49, %v3961_v9  ;;  %v8720_v57 = vsub.f32 %v6197_v30, %v3313_v56  ;;  %v8723_v60 = vsub.f32 %v6209_v16, %v3314_v61  ;;  %v8727_v6 = vsub.f32 %v6218_v2, %v3315_v1 }
 0x2db   :  { %v3965_v3 = vsel %vm3096_vm5, %v3964_v19, %v3963_v36  ;;  %v8730_v42 = vsub.f32 %v6244_v18, %v3316_v4  ;;  %v8733_v41 = vsub.f32 %v10707_v54, %v3317_v26  ;;  %v3680_v30 = vmul.f32 %v8710_v14, %v8710_v14 }
 0x2dc   :  { %v3967_v47 = vsel %vm3098_vm6, %v3966_v55, %v3965_v3  ;;  %v3681_v16 = vmul.f32 %v8713_v12, %v8713_v12  ;;  %v3682_v37 = vmul.f32 %v8717_v53, %v8717_v53  ;;  %v3683_v18 = vmul.f32 %v8720_v57, %v8720_v57 }
 0x2dd   :  { %v3969_v2 = vsel %vm3100_vm7, %v3968_v23, %v3967_v47  ;;  %v3684_v40 = vmul.f32 %v8723_v60, %v8723_v60  ;;  %v3685_v25 = vmul.f32 %v8727_v6, %v8727_v6  ;;  %v3686_v8 = vmul.f32 %v8730_v42, %v8730_v42  ;;  %v10708_v47 = vld [vmem:[#allocation5_spill] sm:$0xff] }
 0x2de   :  { %v4174_v5 = vsel %vm271_vm0, %v3969_v2, 0.0  ;;  %v3687_v29 = vmul.f32 %v8733_v41, %v8733_v41  ;;  %v3942_v33 = vrot.slane %v3681_v16, 7  ;;  %v3944_v59 = vrot.slane %v3682_v37, 6  ;;  %v10709_v16 = vld [vmem:[#allocation6_spill] sm:$0xff]  ;;  %v10710_v2 = vld [vmem:[#allocation7_spill] sm:$0xff] }
 0x2df   :  { %4175 = vadd.xlane.f32.xlu0 %v4174_v5  ;;  %v3946_v49 = vrot.slane %v3683_v18, 5  ;;  %v3948_v19 = vrot.slane %v3684_v40, 4  ;;  %v3950_v55 = vrot.slane %v3685_v25, 3  ;;  %v3952_v23 = vrot.slane %v3686_v8, 2  ;;  %v10712_v25 = vld [vmem:[#allocation8_spill] sm:$0xff]  ;;  %v10714_v8 = vld [vmem:[#allocation9_spill] sm:$0xff] }
 0x2e0   :  { %v3943_v28 = vsel %vm3088_vm1, %v3942_v33, %v3680_v30  ;;  %v3954_v7 = vrot.slane %v3687_v29, 1  ;;  %v3325_v56 = vrot.slane %v8646_v38, 1  ;;  %v3326_v61 = vrot.slane %v8646_v38, 2  ;;  %v10716_v33 = vld [vmem:[#allocation10_spill] sm:$0xff] }
 0x2e1   :  { %v3945_v58 = vsel %vm3090_vm2, %v3944_v59, %v3943_v28  ;;  %v3327_v1 = vrot.slane %v8646_v38, 3  ;;  %v3328_v4 = vrot.slane %v8646_v38, 4  ;;  %v3329_v26 = vrot.slane %v8646_v38, 5  ;;  %v10720_v28 = vld [vmem:[#allocation12_spill] sm:$0xff] }
 0x2e2   :  { %v3947_v9 = vsel %vm3092_vm3, %v3946_v49, %v3945_v58  ;;  %v3330_v36 = vrot.slane %v8646_v38, 6  ;;  %v3331_v3 = vrot.slane %v8646_v38, 7  ;;  %v8767_v30 = vsub.f32 %v10708_v47, %v8646_v38  ;;  %v10718_v49 = vld [vmem:[#allocation11_spill] sm:$0xff] }
 0x2e3   :  { %v3949_v54 = vsel %vm3094_vm4, %v3948_v19, %v3947_v9  ;;  %v8770_v37 = vsub.f32 %v10709_v16, %v3325_v56  ;;  %v8773_v18 = vsub.f32 %v10710_v2, %v3326_v61  ;;  %v8777_v5 = vsub.f32 %v10712_v25, %v3327_v1 }
 0x2e4   :  { %v3951_v40 = vsel %vm3096_vm5, %v3950_v55, %v3949_v54  ;;  %v8780_v29 = vsub.f32 %v10714_v8, %v3328_v4  ;;  %v8783_v59 = vsub.f32 %v10716_v33, %v3329_v26  ;;  %v8787_v19 = vsub.f32 %v10718_v49, %v3330_v36 }
 0x2e5   :  { %10711 = vst [vmem:[#allocation13_spill] sm:$0xff] %v8773_v18  ;;  %10713 = vst [vmem:[#allocation5_spill] sm:$0xff] %v8777_v5  ;;  %v3953_v38 = vsel %vm3098_vm6, %v3952_v23, %v3951_v40  ;;  %v8790_v56 = vsub.f32 %v10720_v28, %v3331_v3  ;;  %v3696_v55 = vmul.f32 %v8767_v30, %v8767_v30  ;;  %v3332_v25 = vrot.slane %v8648_v50, 1 }
 0x2e6   :  { %10715 = vst [vmem:[#allocation6_spill] sm:$0xff] %v8780_v29  ;;  %10717 = vst [vmem:[#allocation7_spill] sm:$0xff] %v8783_v59  ;;  %v3955_v58 = vsel %vm3100_vm7, %v3954_v7, %v3953_v38  ;;  %v3697_v61 = vmul.f32 %v8770_v37, %v8770_v37  ;;  %v3698_v1 = vmul.f32 %v8773_v18, %v8773_v18  ;;  %v3333_v38 = vrot.slane %v8648_v50, 2  ;;  %v10796_v18 = vld [vmem:[#allocation59_spill] sm:$0xff] }
 0x2e7   :  { %10719 = vst [vmem:[#allocation8_spill] sm:$0xff] %v8787_v19  ;;  %10721 = vst [vmem:[#allocation9_spill] sm:$0xff] %v8790_v56  ;;  %v3699_v23 = vmul.f32 %v8777_v5, %v8777_v5  ;;  %v4171_v4 = vsel %vm271_vm0, %v3955_v58, 0.0  ;;  %v3700_v9 = vmul.f32 %v8780_v29, %v8780_v29  ;;  %v3701_v26 = vmul.f32 %v8783_v59, %v8783_v59 }
 0x2e8   :  { %v3702_v7 = vmul.f32 %v8787_v19, %v8787_v19  ;;  %4172 = vadd.xlane.f32.xlu1 %v4171_v4  ;;  %v3703_v36 = vmul.f32 %v8790_v56, %v8790_v56  ;;  %v3970_v3 = vrot.slane %v3697_v61, 7  ;;  %v3972_v54 = vrot.slane %v3698_v1, 6  ;;  %v10730_v19 = vld [vmem:[#allocation26_spill] sm:$0xff] }
 0x2e9   :  { %v3974_v47 = vrot.slane %v3699_v23, 5  ;;  %v3976_v16 = vrot.slane %v3700_v9, 4  ;;  %v3978_v2 = vrot.slane %v3701_v26, 3  ;;  %v3334_v49 = vrot.slane %v8648_v50, 3  ;;  %v10722_v9 = vld [vmem:[#allocation22_spill] sm:$0xff]  ;;  %v10724_v26 = vld [vmem:[#allocation23_spill] sm:$0xff] }
 0x2ea   :  { %v3980_v40 = vrot.slane %v3702_v7, 2  ;;  %v3971_v8 = vsel %vm3088_vm1, %v3970_v3, %v3696_v55  ;;  %v3982_v33 = vrot.slane %v3703_v36, 1  ;;  %v3335_v58 = vrot.slane %v8648_v50, 4  ;;  %v10726_v3 = vld [vmem:[#allocation24_spill] sm:$0xff] }
 0x2eb   :  { %v3973_v28 = vsel %vm3090_vm2, %v3972_v54, %v3971_v8  ;;  %v3336_v61 = vrot.slane %v8648_v50, 5  ;;  %v3337_v1 = vrot.slane %v8648_v50, 6  ;;  %v3338_v4 = vrot.slane %v8648_v50, 7  ;;  %v10728_v8 = vld [vmem:[#allocation25_spill] sm:$0xff] }
 0x2ec   :  { %v3975_v23 = vsel %vm3092_vm3, %v3974_v47, %v3973_v28  ;;  %v8822_v55 = vsub.f32 %v10722_v9, %v8648_v50  ;;  %v8825_v7 = vsub.f32 %v10724_v26, %v3332_v25  ;;  %v8829_v54 = vsub.f32 %v10726_v3, %v3333_v38  ;;  %v10732_v28 = vld [vmem:[#allocation27_spill] sm:$0xff]  ;;  %v10734_v50 = vld [vmem:[#allocation28_spill] sm:$0xff]  ;;  %v10736_v25 = vld [vmem:[#allocation29_spill] sm:$0xff] }
 0x2ed   :  { %v3977_v36 = vsel %vm3094_vm4, %v3976_v16, %v3975_v23  ;;  %v8832_v56 = vsub.f32 %v10728_v8, %v3334_v49  ;;  %v8835_v59 = vsub.f32 %v10730_v19, %v3335_v58  ;;  %v8839_v29 = vsub.f32 %v10732_v28, %v3336_v61 }
 0x2ee   :  { %10723 = vst [vmem:[#allocation10_spill] sm:$0xff] %v8822_v55  ;;  %10725 = vst [vmem:[#allocation11_spill] sm:$0xff] %v8825_v7  ;;  %v3979_v47 = vsel %vm3096_vm5, %v3978_v2, %v3977_v36  ;;  %v8842_v9 = vsub.f32 %v10734_v50, %v3337_v1  ;;  %v8845_v26 = vsub.f32 %v10736_v25, %v3338_v4 }
 0x2ef   :  { %10727 = vst [vmem:[#allocation12_spill] sm:$0xff] %v8829_v54  ;;  %10729 = vst [vmem:[#allocation22_spill] sm:$0xff] %v8832_v56  ;;  %v3981_v16 = vsel %vm3098_vm6, %v3980_v40, %v3979_v47  ;;  %v3704_v38 = vmul.f32 %v8822_v55, %v8822_v55  ;;  %v3705_v19 = vmul.f32 %v8825_v7, %v8825_v7  ;;  %v10748_v7 = vld [vmem:[#allocation19_spill] sm:$0xff] }
 0x2f0   :  { %10731 = vst [vmem:[#allocation23_spill] sm:$0xff] %v8835_v59  ;;  %10733 = vst [vmem:[#allocation24_spill] sm:$0xff] %v8839_v29  ;;  %v3706_v2 = vmul.f32 %v8829_v54, %v8829_v54  ;;  %v3983_v49 = vsel %vm3100_vm7, %v3982_v33, %v3981_v16  ;;  %v3707_v58 = vmul.f32 %v8832_v56, %v8832_v56  ;;  %v3339_v16 = vrot.slane %v8650_v17, 1  ;;  %v10746_v56 = vld [vmem:[#allocation18_spill] sm:$0xff] }
 0x2f1   :  { %10735 = vst [vmem:[#allocation25_spill] sm:$0xff] %v8842_v9  ;;  %10737 = vst [vmem:[#allocation26_spill] sm:$0xff] %v8845_v26  ;;  %v3708_v61 = vmul.f32 %v8835_v59, %v8835_v59  ;;  %v3709_v40 = vmul.f32 %v8839_v29, %v8839_v29  ;;  %v4177_v1 = vsel %vm271_vm0, %v3983_v49, 0.0  ;;  %v3710_v23 = vmul.f32 %v8842_v9, %v8842_v9  ;;  %v3243_v29 = vpop.xlane.xlu0 %3242 }
 0x2f2   :  { %v3711_v4 = vmul.f32 %v8845_v26, %v8845_v26  ;;  %v3984_v36 = vrot.slane %v3705_v19, 7  ;;  %4178 = vadd.xlane.f32.xlu1 %v4177_v1  ;;  %v3986_v33 = vrot.slane %v3706_v2, 6  ;;  %v3988_v3 = vrot.slane %v3707_v58, 5  ;;  %v10738_v1 = vld [vmem:[#allocation14_spill] sm:$0xff] }
 0x2f3   :  { %v3990_v8 = vrot.slane %v3708_v61, 4  ;;  %v3992_v47 = vrot.slane %v3709_v40, 3  ;;  %v3994_v50 = vrot.slane %v3710_v23, 2  ;;  %v3340_v9 = vrot.slane %v8650_v17, 2 }
 0x2f4   :  { %v3985_v28 = vsel %vm3088_vm1, %v3984_v36, %v3704_v38  ;;  %v3996_v25 = vrot.slane %v3711_v4, 1  ;;  %v3341_v59 = vrot.slane %v8650_v17, 3  ;;  %v3342_v19 = vrot.slane %v8650_v17, 4  ;;  %v10740_v4 = vld [vmem:[#allocation15_spill] sm:$0xff] }
 0x2f5   :  { %v3987_v49 = vsel %vm3090_vm2, %v3986_v33, %v3985_v28  ;;  %v3343_v58 = vrot.slane %v8650_v17, 5  ;;  %v3344_v61 = vrot.slane %v8650_v17, 6  ;;  %v3345_v38 = vrot.slane %v8650_v17, 7  ;;  %v10742_v33 = vld [vmem:[#allocation16_spill] sm:$0xff] }
 0x2f6   :  { %v3989_v2 = vsel %vm3092_vm3, %v3988_v3, %v3987_v49  ;;  %v8879_v23 = vsub.f32 %v10738_v1, %v8650_v17  ;;  %v8882_v36 = vsub.f32 %v10740_v4, %v3339_v16  ;;  %v8885_v28 = vsub.f32 %v10742_v33, %v3340_v9  ;;  %v10744_v49 = vld [vmem:[#allocation17_spill] sm:$0xff] }
 0x2f7   :  { %v3991_v40 = vsel %vm3094_vm4, %v3990_v8, %v3989_v2  ;;  %v8889_v26 = vsub.f32 %v10744_v49, %v3341_v59  ;;  %v8892_v54 = vsub.f32 %v10746_v56, %v3342_v19  ;;  %v8895_v8 = vsub.f32 %v10748_v7, %v3343_v58  ;;  %v10750_v2 = vld [vmem:[#allocation20_spill] sm:$0xff]  ;;  %v10752_v16 = vld [vmem:[#allocation21_spill] sm:$0xff]  ;;  %v3249_v19 = vpop.xlane.xlu0 %3248 }
 0x2f8   :  { %10739 = vst [vmem:[#allocation27_spill] sm:$0xff] %v8879_v23  ;;  %10741 = vst [vmem:[#allocation28_spill] sm:$0xff] %v8882_v36  ;;  %v3993_v3 = vsel %vm3096_vm5, %v3992_v47, %v3991_v40  ;;  %v8899_v1 = vsub.f32 %v10750_v2, %v3344_v61  ;;  %v8902_v4 = vsub.f32 %v10752_v16, %v3345_v38 }
 0x2f9   :  { %10743 = vst [vmem:[#allocation29_spill] sm:$0xff] %v8885_v28  ;;  %10745 = vst [vmem:[#allocation14_spill] sm:$0xff] %v8889_v26  ;;  %v3995_v17 = vsel %vm3098_vm6, %v3994_v50, %v3993_v3  ;;  %v3712_v9 = vmul.f32 %v8879_v23, %v8879_v23  ;;  %v3713_v56 = vmul.f32 %v8882_v36, %v8882_v36  ;;  %v3246_v50 = vpop.xlane.xlu1 %3245  ;;  %v8923_v36 = vmul.f32 0.010416667, %v3249_v19 }
 0x2fa   :  { %10747 = vst [vmem:[#allocation15_spill] sm:$0xff] %v8892_v54  ;;  %10749 = vst [vmem:[#allocation16_spill] sm:$0xff] %v8895_v8  ;;  %v3997_v59 = vsel %vm3100_vm7, %v3996_v25, %v3995_v17  ;;  %v3714_v7 = vmul.f32 %v8885_v28, %v8885_v28  ;;  %v3715_v47 = vmul.f32 %v8889_v26, %v8889_v26  ;;  %v3279_v28 = vmul.f32 0.010416667, %v3246_v50 }
 0x2fb   :  { %10751 = vst [vmem:[#allocation17_spill] sm:$0xff] %v8899_v1  ;;  %10753 = vst [vmem:[#allocation18_spill] sm:$0xff] %v8902_v4  ;;  %v4180_v58 = vsel %vm271_vm0, %v3997_v59, 0.0  ;;  %v3716_v61 = vmul.f32 %v8892_v54, %v8892_v54  ;;  %v3717_v38 = vmul.f32 %v8895_v8, %v8895_v8  ;;  %v3718_v25 = vmul.f32 %v8899_v1, %v8899_v1 }
 0x2fc   :  { %4181 = vadd.xlane.f32.xlu0 %v4180_v58  ;;  %v3719_v40 = vmul.f32 %v8902_v4, %v8902_v4  ;;  %v3998_v33 = vrot.slane %v3713_v56, 7  ;;  %v4000_v3 = vrot.slane %v3714_v7, 6  ;;  %v4002_v49 = vrot.slane %v3715_v47, 5 }
 0x2fd   :  { %v4004_v17 = vrot.slane %v3716_v61, 4  ;;  %v4006_v2 = vrot.slane %v3717_v38, 3  ;;  %v4008_v16 = vrot.slane %v3718_v25, 2  ;;  %v3278_v59 = vmul.f32 0.010416667, %v3243_v29  ;;  %v10754_v29 = vld [vmem:[#allocation38_spill] sm:$0xff] }
 0x2fe   :  { %v3999_v26 = vsel %vm3088_vm1, %v3998_v33, %v3712_v9  ;;  %v4010_v54 = vrot.slane %v3719_v40, 1  ;;  %v10756_v9 = vld [vmem:[#allocation39_spill] sm:$0xff]  ;;  %v10760_v33 = vld [vmem:[#allocation41_spill] sm:$0xff] }
 0x2ff   :  { %v4001_v8 = vsel %vm3090_vm2, %v4000_v3, %v3999_v26  ;;  %v3346_v1 = vrot.slane %v3278_v59, 1  ;;  %v3347_v58 = vrot.slane %v3278_v59, 2  ;;  %v3348_v23 = vrot.slane %v3278_v59, 3  ;;  %v10758_v26 = vld [vmem:[#allocation40_spill] sm:$0xff] }
 0x300   :  { %v4003_v4 = vsel %vm3092_vm3, %v4002_v49, %v4001_v8  ;;  %v3349_v56 = vrot.slane %v3278_v59, 4  ;;  %v3350_v7 = vrot.slane %v3278_v59, 5  ;;  %v3351_v47 = vrot.slane %v3278_v59, 6  ;;  %v10762_v8 = vld [vmem:[#allocation42_spill] sm:$0xff] }
 0x301   :  { %v4005_v61 = vsel %vm3094_vm4, %v4004_v17, %v4003_v4  ;;  %v3352_v38 = vrot.slane %v3278_v59, 7  ;;  %v8929_v25 = vsub.f32 %v10754_v29, %v3278_v59  ;;  %v8932_v50 = vsub.f32 %v10756_v9, %v3346_v1  ;;  %v10764_v17 = vld [vmem:[#allocation43_spill] sm:$0xff]  ;;  %v10766_v59 = vld [vmem:[#allocation44_spill] sm:$0xff]  ;;  %v10768_v1 = vld [vmem:[#allocation45_spill] sm:$0xff] }
 0x302   :  { %v4007_v19 = vsel %vm3096_vm5, %v4006_v2, %v4005_v61  ;;  %v8936_v40 = vsub.f32 %v10758_v26, %v3347_v58  ;;  %v8939_v3 = vsub.f32 %v10760_v33, %v3348_v23  ;;  %v8942_v49 = vsub.f32 %v10762_v8, %v3349_v56 }
 0x303   :  { %10755 = vst [vmem:[#allocation19_spill] sm:$0xff] %v8929_v25  ;;  %10757 = vst [vmem:[#allocation20_spill] sm:$0xff] %v8932_v50  ;;  %v4009_v4 = vsel %vm3098_vm6, %v4008_v16, %v4007_v19  ;;  %v8946_v55 = vsub.f32 %v10764_v17, %v3350_v7  ;;  %v8949_v29 = vsub.f32 %v10766_v59, %v3351_v47  ;;  %v3353_v17 = vrot.slane %v3279_v28, 1 }
 0x304   :  { %10759 = vst [vmem:[#allocation21_spill] sm:$0xff] %v8936_v40  ;;  %10761 = vst [vmem:[#allocation38_spill] sm:$0xff] %v8939_v3  ;;  %v8952_v9 = vsub.f32 %v10768_v1, %v3352_v38  ;;  %v4011_v2 = vsel %vm3100_vm7, %v4010_v54, %v4009_v4  ;;  %v3720_v23 = vmul.f32 %v8929_v25, %v8929_v25 }
 0x305   :  { %10763 = vst [vmem:[#allocation39_spill] sm:$0xff] %v8942_v49  ;;  %10765 = vst [vmem:[#allocation40_spill] sm:$0xff] %v8946_v55  ;;  %v3721_v58 = vmul.f32 %v8932_v50, %v8932_v50  ;;  %v3722_v16 = vmul.f32 %v8936_v40, %v8936_v40  ;;  %v4183_v56 = vsel %vm271_vm0, %v4011_v2, 0.0  ;;  %v3723_v7 = vmul.f32 %v8939_v3, %v8939_v3 }
 0x306   :  { %10767 = vst [vmem:[#allocation41_spill] sm:$0xff] %v8949_v29  ;;  %10769 = vst [vmem:[#allocation42_spill] sm:$0xff] %v8952_v9  ;;  %v3724_v47 = vmul.f32 %v8942_v49, %v8942_v49  ;;  %v3725_v54 = vmul.f32 %v8946_v55, %v8946_v55  ;;  %4184 = vadd.xlane.f32.xlu1 %v4183_v56  ;;  %v3726_v61 = vmul.f32 %v8949_v29, %v8949_v29 }
 0x307   :  { %v3727_v38 = vmul.f32 %v8952_v9, %v8952_v9  ;;  %v4012_v19 = vrot.slane %v3721_v58, 7  ;;  %v4014_v26 = vrot.slane %v3722_v16, 6  ;;  %v4016_v33 = vrot.slane %v3723_v7, 5  ;;  %v10770_v58 = vld [vmem:[#allocation30_spill] sm:$0xff] }
 0x308   :  { %v4018_v8 = vrot.slane %v3724_v47, 4  ;;  %v4020_v4 = vrot.slane %v3725_v54, 3  ;;  %v4022_v1 = vrot.slane %v3726_v61, 2  ;;  %v3354_v49 = vrot.slane %v3279_v28, 2  ;;  %v10772_v47 = vld [vmem:[#allocation31_spill] sm:$0xff] }
 0x309   :  { %v4013_v59 = vsel %vm3088_vm1, %v4012_v19, %v3720_v23  ;;  %v4024_v2 = vrot.slane %v3727_v38, 1  ;;  %v3355_v56 = vrot.slane %v3279_v28, 3  ;;  %v3356_v3 = vrot.slane %v3279_v28, 4  ;;  %v10774_v23 = vld [vmem:[#allocation32_spill] sm:$0xff]  ;;  %v10776_v38 = vld [vmem:[#allocation33_spill] sm:$0xff] }
 0x30a   :  { %v4015_v55 = vsel %vm3090_vm2, %v4014_v26, %v4013_v59  ;;  %v3357_v40 = vrot.slane %v3279_v28, 5  ;;  %v3358_v50 = vrot.slane %v3279_v28, 6  ;;  %v3359_v9 = vrot.slane %v3279_v28, 7  ;;  %v10778_v59 = vld [vmem:[#allocation34_spill] sm:$0xff] }
 0x30b   :  { %v4017_v29 = vsel %vm3092_vm3, %v4016_v33, %v4015_v55  ;;  %v8976_v16 = vsub.f32 %v10770_v58, %v3279_v28  ;;  %v8980_v54 = vsub.f32 %v10772_v47, %v3353_v17  ;;  %v8983_v61 = vsub.f32 %v10774_v23, %v3354_v49  ;;  %v10780_v33 = vld [vmem:[#allocation35_spill] sm:$0xff]  ;;  %v10782_v28 = vld [vmem:[#allocation36_spill] sm:$0xff]  ;;  %v10784_v49 = vld [vmem:[#allocation37_spill] sm:$0xff] }
 0x30c   :  { %v4019_v7 = vsel %vm3094_vm4, %v4018_v8, %v4017_v29  ;;  %v8986_v19 = vsub.f32 %v10776_v38, %v3355_v56  ;;  %v8990_v55 = vsub.f32 %v10778_v59, %v3356_v3  ;;  %v8993_v25 = vsub.f32 %v10780_v33, %v3357_v40  ;;  %v8998_v29 = vpop.xlane.xlu1 %3251 }
 0x30d   :  { %10771 = vst [vmem:[#allocation43_spill] sm:$0xff] %v8976_v16  ;;  %10773 = vst [vmem:[#allocation44_spill] sm:$0xff] %v8980_v54  ;;  %v4021_v26 = vsel %vm3096_vm5, %v4020_v4, %v4019_v7  ;;  %v8996_v58 = vsub.f32 %v10782_v28, %v3358_v50  ;;  %v9002_v17 = vsub.f32 %v10784_v49, %v3359_v9  ;;  %v3360_v49 = vrot.slane %v8923_v36, 1 }
 0x30e   :  { %10775 = vst [vmem:[#allocation45_spill] sm:$0xff] %v8983_v61  ;;  %10777 = vst [vmem:[#allocation30_spill] sm:$0xff] %v8986_v19  ;;  %v4023_v8 = vsel %vm3098_vm6, %v4022_v1, %v4021_v26  ;;  %v3728_v56 = vmul.f32 %v8976_v16, %v8976_v16  ;;  %v3729_v3 = vmul.f32 %v8980_v54, %v8980_v54  ;;  %v10794_v16 = vld [vmem:[#allocation58_spill] sm:$0xff] }
 0x30f   :  { %10779 = vst [vmem:[#allocation31_spill] sm:$0xff] %v8990_v55  ;;  %10781 = vst [vmem:[#allocation32_spill] sm:$0xff] %v8993_v25  ;;  %v4025_v4 = vsel %vm3100_vm7, %v4024_v2, %v4023_v8  ;;  %v3730_v40 = vmul.f32 %v8983_v61, %v8983_v61  ;;  %v3731_v50 = vmul.f32 %v8986_v19, %v8986_v19 }
 0x310   :  { %10783 = vst [vmem:[#allocation33_spill] sm:$0xff] %v8996_v58  ;;  %10785 = vst [vmem:[#allocation34_spill] sm:$0xff] %v9002_v17  ;;  %v3732_v1 = vmul.f32 %v8990_v55, %v8990_v55  ;;  %v4186_v9 = vsel %vm271_vm0, %v4025_v4, 0.0  ;;  %v3733_v7 = vmul.f32 %v8993_v25, %v8993_v25  ;;  %v3734_v47 = vmul.f32 %v8996_v58, %v8996_v58  ;;  %v3258_v19 = vpop.xlane.xlu1 %3257 }
 0x311   :  { %v3735_v2 = vmul.f32 %v9002_v17, %v9002_v17  ;;  %4187 = vadd.xlane.f32.xlu0 %v4186_v9  ;;  %v4026_v23 = vrot.slane %v3729_v3, 7  ;;  %v4028_v38 = vrot.slane %v3730_v40, 6  ;;  %v4030_v26 = vrot.slane %v3731_v50, 5  ;;  %v3255_v17 = vpop.xlane.xlu0 %3254 }
 0x312   :  { %v4032_v59 = vrot.slane %v3732_v1, 4  ;;  %v4034_v33 = vrot.slane %v3733_v7, 3  ;;  %v4036_v28 = vrot.slane %v3734_v47, 2  ;;  %v3361_v25 = vrot.slane %v8923_v36, 2  ;;  %v10788_v47 = vld [vmem:[#allocation55_spill] sm:$0xff] }
 0x313   :  { %v4038_v8 = vrot.slane %v3735_v2, 1  ;;  %v4027_v4 = vsel %vm3088_vm1, %v4026_v23, %v3728_v56  ;;  %v3362_v55 = vrot.slane %v8923_v36, 3  ;;  %v3363_v58 = vrot.slane %v8923_v36, 4  ;;  %v10786_v56 = vld [vmem:[#allocation54_spill] sm:$0xff]  ;;  %v10790_v23 = vld [vmem:[#allocation56_spill] sm:$0xff] }
 0x314   :  { %v4029_v3 = vsel %vm3090_vm2, %v4028_v38, %v4027_v4  ;;  %v3364_v40 = vrot.slane %v8923_v36, 5  ;;  %v3365_v50 = vrot.slane %v8923_v36, 6  ;;  %v3366_v1 = vrot.slane %v8923_v36, 7  ;;  %v10792_v4 = vld [vmem:[#allocation57_spill] sm:$0xff] }
 0x315   :  { %v4031_v9 = vsel %vm3092_vm3, %v4030_v26, %v4029_v3  ;;  %v9034_v7 = vsub.f32 %v10786_v56, %v8923_v36  ;;  %v9037_v2 = vsub.f32 %v10788_v47, %v3360_v49  ;;  %v9040_v61 = vsub.f32 %v10790_v23, %v3361_v25  ;;  %v10798_v3 = vld [vmem:[#allocation60_spill] sm:$0xff]  ;;  %v10800_v49 = vld [vmem:[#allocation61_spill] sm:$0xff] }
 0x316   :  { %v4033_v38 = vsel %vm3094_vm4, %v4032_v59, %v4031_v9  ;;  %v9044_v54 = vsub.f32 %v10792_v4, %v3362_v55  ;;  %v9047_v5 = vsub.f32 %v10794_v16, %v3363_v58  ;;  %v9050_v26 = vsub.f32 %v10796_v18, %v3364_v40 }
 0x317   :  { %10787 = vst [vmem:[#allocation35_spill] sm:$0xff] %v9034_v7  ;;  %10789 = vst [vmem:[#allocation36_spill] sm:$0xff] %v9037_v2  ;;  %v4035_v36 = vsel %vm3096_vm5, %v4034_v33, %v4033_v38  ;;  %v9054_v56 = vsub.f32 %v10798_v3, %v3365_v50  ;;  %v9057_v47 = vsub.f32 %v10800_v49, %v3366_v1  ;;  %v3264_v50 = vpop.xlane.xlu1 %3263  ;;  %v3261_v1 = vpop.xlane.xlu0 %3260 }
 0x318   :  { %10791 = vst [vmem:[#allocation37_spill] sm:$0xff] %v9040_v61  ;;  %10793 = vst [vmem:[#allocation54_spill] sm:$0xff] %v9044_v54  ;;  %v3736_v25 = vmul.f32 %v9034_v7, %v9034_v7  ;;  %v4037_v55 = vsel %vm3098_vm6, %v4036_v28, %v4035_v36  ;;  %v3737_v16 = vmul.f32 %v9037_v2, %v9037_v2 }
 0x319   :  { %10795 = vst [vmem:[#allocation55_spill] sm:$0xff] %v9047_v5  ;;  %10797 = vst [vmem:[#allocation56_spill] sm:$0xff] %v9050_v26  ;;  %v3738_v18 = vmul.f32 %v9040_v61, %v9040_v61  ;;  %v3739_v58 = vmul.f32 %v9044_v54, %v9044_v54  ;;  %v4039_v59 = vsel %vm3100_vm7, %v4038_v8, %v4037_v55  ;;  %v9081_v61 = vmul.f32 0.010416667, %v3258_v19 }
 0x31a   :  { %10799 = vst [vmem:[#allocation57_spill] sm:$0xff] %v9054_v56  ;;  %10801 = vst [vmem:[#allocation58_spill] sm:$0xff] %v9057_v47  ;;  %v3740_v33 = vmul.f32 %v9047_v5, %v9047_v5  ;;  %v3741_v40 = vmul.f32 %v9050_v26, %v9050_v26  ;;  %v3742_v28 = vmul.f32 %v9054_v56, %v9054_v56  ;;  %v4189_v9 = vsel %vm271_vm0, %v4039_v59, 0.0 }
 0x31b   :  { %v3743_v23 = vmul.f32 %v9057_v47, %v9057_v47  ;;  %v4040_v38 = vrot.slane %v3737_v16, 7  ;;  %v4042_v4 = vrot.slane %v3738_v18, 6  ;;  %4190 = vadd.xlane.f32.xlu1 %v4189_v9  ;;  %v4044_v8 = vrot.slane %v3739_v58, 5 }
 0x31c   :  { %v4046_v36 = vrot.slane %v3740_v33, 4  ;;  %v4048_v3 = vrot.slane %v3741_v40, 3  ;;  %v4050_v49 = vrot.slane %v3742_v28, 2  ;;  %v3281_v5 = vmul.f32 0.010416667, %v8998_v29 }
 0x31d   :  { %v4041_v55 = vsel %vm3088_vm1, %v4040_v38, %v3736_v25  ;;  %v4052_v26 = vrot.slane %v3743_v23, 1  ;;  %v3282_v56 = vmul.f32 0.010416667, %v3255_v17  ;;  %v9083_v59 = vmul.f32 0.010416667, %v3261_v1  ;;  %v10802_v23 = vld [vmem:[#allocation46_spill] sm:$0xff] }
 0x31e   :  { %v4043_v54 = vsel %vm3090_vm2, %v4042_v4, %v4041_v55  ;;  %v9085_v47 = vmul.f32 0.010416667, %v3264_v50  ;;  %v3367_v18 = vrot.slane %v3281_v5, 1  ;;  %v3368_v58 = vrot.slane %v3281_v5, 2  ;;  %v10804_v1 = vld [vmem:[#allocation47_spill] sm:$0xff] }
 0x31f   :  { %v4045_v16 = vsel %vm3092_vm3, %v4044_v8, %v4043_v54  ;;  %v3369_v33 = vrot.slane %v3281_v5, 3  ;;  %v3370_v25 = vrot.slane %v3281_v5, 4  ;;  %v3371_v28 = vrot.slane %v3281_v5, 5  ;;  %v10806_v54 = vld [vmem:[#allocation48_spill] sm:$0xff]  ;;  %v10808_v8 = vld [vmem:[#allocation49_spill] sm:$0xff] }
 0x320   :  { %v4047_v40 = vsel %vm3094_vm4, %v4046_v36, %v4045_v16  ;;  %v3372_v9 = vrot.slane %v3281_v5, 6  ;;  %v3373_v17 = vrot.slane %v3281_v5, 7  ;;  %v9091_v19 = vsub.f32 %v10802_v23, %v3281_v5  ;;  %v10810_v36 = vld [vmem:[#allocation50_spill] sm:$0xff]  ;;  %v10814_v5 = vld [vmem:[#allocation52_spill] sm:$0xff] }
 0x321   :  { %v4049_v29 = vsel %vm3096_vm5, %v4048_v3, %v4047_v40  ;;  %v9094_v38 = vsub.f32 %v10804_v1, %v3367_v18  ;;  %v9098_v4 = vsub.f32 %v10806_v54, %v3368_v58  ;;  %v9101_v55 = vsub.f32 %v10808_v8, %v3369_v33  ;;  %v10812_v40 = vld [vmem:[#allocation51_spill] sm:$0xff]  ;;  %v10816_v18 = vld [vmem:[#allocation53_spill] sm:$0xff] }
 0x322   :  { %10803 = vst [vmem:[#allocation59_spill] sm:$0xff] %v9091_v19  ;;  %v4051_v50 = vsel %vm3098_vm6, %v4050_v49, %v4049_v29  ;;  %v9104_v16 = vsub.f32 %v10810_v36, %v3370_v25  ;;  %v9108_v2 = vsub.f32 %v10812_v40, %v3371_v28  ;;  %v9111_v23 = vsub.f32 %v10814_v5, %v3372_v9 }
 0x323   :  { %10805 = vst [vmem:[#allocation60_spill] sm:$0xff] %v9094_v38  ;;  %10807 = vst [vmem:[#allocation61_spill] sm:$0xff] %v9098_v4  ;;  %v4053_v3 = vsel %vm3100_vm7, %v4052_v26, %v4051_v50  ;;  %v9114_v1 = vsub.f32 %v10816_v18, %v3373_v17  ;;  %v3744_v58 = vmul.f32 %v9091_v19, %v9091_v19  ;;  %v3374_v8 = vrot.slane %v3282_v56, 1 }
 0x324   :  { %10809 = vst [vmem:[#allocation46_spill] sm:$0xff] %v9101_v55  ;;  %10811 = vst [vmem:[#allocation47_spill] sm:$0xff] %v9104_v16  ;;  %v4192_v49 = vsel %vm271_vm0, %v4053_v3, 0.0  ;;  %v3745_v33 = vmul.f32 %v9094_v38, %v9094_v38  ;;  %v3746_v26 = vmul.f32 %v9098_v4, %v9098_v4  ;;  %v3747_v25 = vmul.f32 %v9101_v55, %v9101_v55 }
 0x325   :  { %10813 = vst [vmem:[#allocation48_spill] sm:$0xff] %v9108_v2  ;;  %10815 = vst [vmem:[#allocation49_spill] sm:$0xff] %v9111_v23  ;;  %4193 = vadd.xlane.f32.xlu0 %v4192_v49  ;;  %v3748_v28 = vmul.f32 %v9104_v16, %v9104_v16  ;;  %v3749_v9 = vmul.f32 %v9108_v2, %v9108_v2  ;;  %v3750_v29 = vmul.f32 %v9111_v23, %v9111_v23 }
 0x326   :  { %10817 = vst [vmem:[#allocation50_spill] sm:$0xff] %v9114_v1  ;;  %v3751_v17 = vmul.f32 %v9114_v1, %v9114_v1  ;;  %v4054_v50 = vrot.slane %v3745_v33, 7  ;;  %v4056_v54 = vrot.slane %v3746_v26, 6  ;;  %v4058_v36 = vrot.slane %v3747_v25, 5  ;;  %v10818_v33 = vld [vmem:[#allocation70_spill] sm:$0xff]  ;;  %v10819_v25 = vld [vmem:[#allocation71_spill] sm:$0xff] }
 0x327   :  { %v4060_v3 = vrot.slane %v3748_v28, 4  ;;  %v4062_v40 = vrot.slane %v3749_v9, 3  ;;  %v4064_v5 = vrot.slane %v3750_v29, 2  ;;  %v3375_v16 = vrot.slane %v3282_v56, 2 }
 0x328   :  { %v4055_v18 = vsel %vm3088_vm1, %v4054_v50, %v3744_v58  ;;  %v4066_v49 = vrot.slane %v3751_v17, 1  ;;  %v3376_v55 = vrot.slane %v3282_v56, 3  ;;  %v3377_v4 = vrot.slane %v3282_v56, 4  ;;  %v10820_v58 = vld [vmem:[#allocation72_spill] sm:$0xff]  ;;  %v10822_v17 = vld [vmem:[#allocation73_spill] sm:$0xff] }
 0x329   :  { %v4057_v2 = vsel %vm3090_vm2, %v4056_v54, %v4055_v18  ;;  %v3378_v38 = vrot.slane %v3282_v56, 5  ;;  %v3379_v23 = vrot.slane %v3282_v56, 6  ;;  %v3380_v1 = vrot.slane %v3282_v56, 7  ;;  %v10824_v54 = vld [vmem:[#allocation74_spill] sm:$0xff] }
 0x32a   :  { %v4059_v19 = vsel %vm3092_vm3, %v4058_v36, %v4057_v2  ;;  %v9137_v26 = vsub.f32 %v10818_v33, %v3282_v56  ;;  %v9140_v28 = vsub.f32 %v10819_v25, %v3374_v8  ;;  %v9144_v29 = vsub.f32 %v10820_v58, %v3375_v16  ;;  %v10826_v36 = vld [vmem:[#allocation75_spill] sm:$0xff]  ;;  %v10828_v56 = vld [vmem:[#allocation76_spill] sm:$0xff]  ;;  %v10830_v8 = vld [vmem:[#allocation77_spill] sm:$0xff] }
 0x32b   :  { %v4061_v9 = vsel %vm3094_vm4, %v4060_v3, %v4059_v19  ;;  %v9147_v50 = vsub.f32 %v10822_v17, %v3376_v55  ;;  %v9150_v18 = vsub.f32 %v10824_v54, %v3377_v4  ;;  %v9154_v7 = vsub.f32 %v10826_v36, %v3378_v38 }
 0x32c   :  { %10821 = vst [vmem:[#allocation51_spill] sm:$0xff] %v9144_v29  ;;  %v4063_v2 = vsel %vm3096_vm5, %v4062_v40, %v4061_v9  ;;  %v9157_v33 = vsub.f32 %v10828_v56, %v3379_v23  ;;  %v9160_v25 = vsub.f32 %v10830_v8, %v3380_v1  ;;  %v3752_v55 = vmul.f32 %v9137_v26, %v9137_v26 }
 0x32d   :  { %10823 = vst [vmem:[#allocation52_spill] sm:$0xff] %v9147_v50  ;;  %10825 = vst [vmem:[#allocation53_spill] sm:$0xff] %v9150_v18  ;;  %v4065_v19 = vsel %vm3098_vm6, %v4064_v5, %v4063_v2  ;;  %v3753_v4 = vmul.f32 %v9140_v28, %v9140_v28  ;;  %v3754_v16 = vmul.f32 %v9144_v29, %v9144_v29  ;;  %v10842_v29 = vld [vmem:[#allocation67_spill] sm:$0xff] }
 0x32e   :  { %10827 = vst [vmem:[#allocation70_spill] sm:$0xff] %v9154_v7  ;;  %10829 = vst [vmem:[#allocation71_spill] sm:$0xff] %v9157_v33  ;;  %v4067_v38 = vsel %vm3100_vm7, %v4066_v49, %v4065_v19  ;;  %v3755_v23 = vmul.f32 %v9147_v50, %v9147_v50  ;;  %v3756_v1 = vmul.f32 %v9150_v18, %v9150_v18  ;;  %v3381_v19 = vrot.slane %v9081_v61, 1  ;;  %v10840_v18 = vld [vmem:[#allocation66_spill] sm:$0xff] }
 0x32f   :  { %10831 = vst [vmem:[#allocation72_spill] sm:$0xff] %v9160_v25  ;;  %v3757_v3 = vmul.f32 %v9154_v7, %v9154_v7  ;;  %v4195_v40 = vsel %vm271_vm0, %v4067_v38, 0.0  ;;  %v3758_v5 = vmul.f32 %v9157_v33, %v9157_v33  ;;  %v3759_v9 = vmul.f32 %v9160_v25, %v9160_v25 }
 0x330   :  { %v4068_v58 = vrot.slane %v3753_v4, 7  ;;  %4196 = vadd.xlane.f32.xlu1 %v4195_v40  ;;  %v4070_v49 = vrot.slane %v3754_v16, 6  ;;  %v4072_v17 = vrot.slane %v3755_v23, 5  ;;  %v4074_v54 = vrot.slane %v3756_v1, 4 }
 0x331   :  { %v4076_v2 = vrot.slane %v3757_v3, 3  ;;  %v4078_v56 = vrot.slane %v3758_v5, 2  ;;  %v4080_v8 = vrot.slane %v3759_v9, 1  ;;  %v3382_v7 = vrot.slane %v9081_v61, 2  ;;  %v10832_v3 = vld [vmem:[#allocation62_spill] sm:$0xff]  ;;  %v10834_v5 = vld [vmem:[#allocation63_spill] sm:$0xff] }
 0x332   :  { %v4069_v36 = vsel %vm3088_vm1, %v4068_v58, %v3752_v55  ;;  %v3383_v33 = vrot.slane %v9081_v61, 3  ;;  %v3384_v25 = vrot.slane %v9081_v61, 4  ;;  %v3385_v16 = vrot.slane %v9081_v61, 5  ;;  %v10836_v58 = vld [vmem:[#allocation64_spill] sm:$0xff] }
 0x333   :  { %v4071_v38 = vsel %vm3090_vm2, %v4070_v49, %v4069_v36  ;;  %v3386_v23 = vrot.slane %v9081_v61, 6  ;;  %v3387_v55 = vrot.slane %v9081_v61, 7  ;;  %v9194_v40 = vsub.f32 %v10832_v3, %v9081_v61  ;;  %v10838_v36 = vld [vmem:[#allocation65_spill] sm:$0xff] }
 0x334   :  { %v4073_v4 = vsel %vm3092_vm3, %v4072_v17, %v4071_v38  ;;  %v9197_v9 = vsub.f32 %v10834_v5, %v3381_v19  ;;  %v9200_v49 = vsub.f32 %v10836_v58, %v3382_v7  ;;  %v9204_v38 = vsub.f32 %v10838_v36, %v3383_v33  ;;  %v10846_v19 = vld [vmem:[#allocation69_spill] sm:$0xff] }
 0x335   :  { %v4075_v1 = vsel %vm3094_vm4, %v4074_v54, %v4073_v4  ;;  %10833 = vst [vmem:[#allocation73_spill] sm:$0xff] %v9194_v40  ;;  %v9207_v50 = vsub.f32 %v10840_v18, %v3384_v25  ;;  %v9210_v54 = vsub.f32 %v10842_v29, %v3385_v16  ;;  %v10844_v4 = vld [vmem:[#allocation68_spill] sm:$0xff]  ;;  %v9217_v5 = vsub.f32 %v10846_v19, %v3387_v55 }
 0x336   :  { %10835 = vst [vmem:[#allocation74_spill] sm:$0xff] %v9197_v9  ;;  %10837 = vst [vmem:[#allocation75_spill] sm:$0xff] %v9200_v49  ;;  %v4077_v17 = vsel %vm3096_vm5, %v4076_v2, %v4075_v1  ;;  %v9214_v3 = vsub.f32 %v10844_v4, %v3386_v23  ;;  %v3760_v7 = vmul.f32 %v9194_v40, %v9194_v40  ;;  %v3388_v4 = vrot.slane %v9083_v59, 1 }
 0x337   :  { %10839 = vst [vmem:[#allocation76_spill] sm:$0xff] %v9204_v38  ;;  %10841 = vst [vmem:[#allocation77_spill] sm:$0xff] %v9207_v50  ;;  %v4079_v61 = vsel %vm3098_vm6, %v4078_v56, %v4077_v17  ;;  %v3761_v18 = vmul.f32 %v9197_v9, %v9197_v9  ;;  %v3762_v29 = vmul.f32 %v9200_v49, %v9200_v49  ;;  %v10854_v49 = vld [vmem:[#allocation90_spill] sm:$0xff] }
 0x338   :  { %10843 = vst [vmem:[#allocation62_spill] sm:$0xff] %v9210_v54  ;;  %10845 = vst [vmem:[#allocation63_spill] sm:$0xff] %v9214_v3  ;;  %v4081_v33 = vsel %vm3100_vm7, %v4080_v8, %v4079_v61  ;;  %v3763_v25 = vmul.f32 %v9204_v38, %v9204_v38  ;;  %v3764_v56 = vmul.f32 %v9207_v50, %v9207_v50  ;;  %v3390_v50 = vrot.slane %v9083_v59, 3 }
 0x339   :  { %10847 = vst [vmem:[#allocation64_spill] sm:$0xff] %v9217_v5  ;;  %v4198_v2 = vsel %vm271_vm0, %v4081_v33, 0.0  ;;  %v3765_v16 = vmul.f32 %v9210_v54, %v9210_v54  ;;  %v3766_v8 = vmul.f32 %v9214_v3, %v9214_v3  ;;  %v3767_v23 = vmul.f32 %v9217_v5, %v9217_v5  ;;  %v10852_v5 = vld [vmem:[#allocation89_spill] sm:$0xff] }
 0x33a   :  { %4199 = vadd.xlane.f32.xlu0 %v4198_v2  ;;  %v4082_v55 = vrot.slane %v3761_v18, 7  ;;  %v4084_v1 = vrot.slane %v3762_v29, 6  ;;  %v4086_v58 = vrot.slane %v3763_v25, 5  ;;  %v4088_v17 = vrot.slane %v3764_v56, 4 }
 0x33b   :  { %v4090_v36 = vrot.slane %v3765_v16, 3  ;;  %v4092_v61 = vrot.slane %v3766_v8, 2  ;;  %v4094_v33 = vrot.slane %v3767_v23, 1  ;;  %v3389_v54 = vrot.slane %v9083_v59, 2  ;;  %v10848_v16 = vld [vmem:[#allocation86_spill] sm:$0xff]  ;;  %v10849_v8 = vld [vmem:[#allocation87_spill] sm:$0xff] }
 0x33c   :  { %v4083_v19 = vsel %vm3088_vm1, %v4082_v55, %v3760_v7  ;;  %v3391_v3 = vrot.slane %v9083_v59, 4  ;;  %v3392_v18 = vrot.slane %v9083_v59, 5  ;;  %v3393_v29 = vrot.slane %v9083_v59, 6 }
 0x33d   :  { %v4085_v2 = vsel %vm3090_vm2, %v4084_v1, %v4083_v19  ;;  %v3394_v56 = vrot.slane %v9083_v59, 7  ;;  %v9249_v7 = vsub.f32 %v10848_v16, %v9083_v59  ;;  %v9252_v23 = vsub.f32 %v10849_v8, %v3388_v4  ;;  %v10850_v1 = vld [vmem:[#allocation88_spill] sm:$0xff]  ;;  %v10860_v4 = vld [vmem:[#allocation93_spill] sm:$0xff] }
 0x33e   :  { %v4087_v25 = vsel %vm3092_vm3, %v4086_v58, %v4085_v2  ;;  %v9256_v19 = vsub.f32 %v10850_v1, %v3389_v54  ;;  %v9259_v38 = vsub.f32 %v10852_v5, %v3390_v50  ;;  %v9262_v9 = vsub.f32 %v10854_v49, %v3391_v3  ;;  %v10856_v2 = vld [vmem:[#allocation91_spill] sm:$0xff]  ;;  %v10858_v59 = vld [vmem:[#allocation92_spill] sm:$0xff] }
 0x33f   :  { %v4089_v55 = vsel %vm3094_vm4, %v4088_v17, %v4087_v25  ;;  %v9266_v40 = vsub.f32 %v10856_v2, %v3392_v18  ;;  %v9269_v16 = vsub.f32 %v10858_v59, %v3393_v29  ;;  %v9272_v8 = vsub.f32 %v10860_v4, %v3394_v56 }
 0x340   :  { %10851 = vst [vmem:[#allocation65_spill] sm:$0xff] %v9256_v19  ;;  %10853 = vst [vmem:[#allocation66_spill] sm:$0xff] %v9259_v38  ;;  %v4091_v58 = vsel %vm3096_vm5, %v4090_v36, %v4089_v55  ;;  %v3768_v50 = vmul.f32 %v9249_v7, %v9249_v7  ;;  %v3769_v49 = vmul.f32 %v9252_v23, %v9252_v23 }
 0x341   :  { %10855 = vst [vmem:[#allocation67_spill] sm:$0xff] %v9262_v9  ;;  %10857 = vst [vmem:[#allocation68_spill] sm:$0xff] %v9266_v40  ;;  %v4093_v54 = vsel %vm3098_vm6, %v4092_v61, %v4091_v58  ;;  %v3770_v3 = vmul.f32 %v9256_v19, %v9256_v19  ;;  %v3771_v17 = vmul.f32 %v9259_v38, %v9259_v38  ;;  %v10872_v19 = vld [vmem:[#allocation83_spill] sm:$0xff] }
 0x342   :  { %10859 = vst [vmem:[#allocation69_spill] sm:$0xff] %v9269_v16  ;;  %10861 = vst [vmem:[#allocation86_spill] sm:$0xff] %v9272_v8  ;;  %v4095_v5 = vsel %vm3100_vm7, %v4094_v33, %v4093_v54  ;;  %v3772_v36 = vmul.f32 %v9262_v9, %v9262_v9  ;;  %v3773_v61 = vmul.f32 %v9266_v40, %v9266_v40  ;;  %v4096_v56 = vrot.slane %v3769_v49, 7  ;;  %v10870_v9 = vld [vmem:[#allocation82_spill] sm:$0xff] }
 0x343   :  { %v4201_v18 = vsel %vm271_vm0, %v4095_v5, 0.0  ;;  %v3774_v29 = vmul.f32 %v9269_v16, %v9269_v16  ;;  %v3775_v25 = vmul.f32 %v9272_v8, %v9272_v8  ;;  %v4098_v33 = vrot.slane %v3770_v3, 6 }
 0x344   :  { %4202 = vadd.xlane.f32.xlu1 %v4201_v18  ;;  %v4100_v55 = vrot.slane %v3771_v17, 5  ;;  %v4102_v1 = vrot.slane %v3772_v36, 4  ;;  %v4104_v58 = vrot.slane %v3773_v61, 3  ;;  %v4097_v2 = vsel %vm3088_vm1, %v4096_v56, %v3768_v50  ;;  %v10862_v61 = vld [vmem:[#allocation78_spill] sm:$0xff]  ;;  %v10866_v56 = vld [vmem:[#allocation80_spill] sm:$0xff] }
 0x345   :  { %v4106_v59 = vrot.slane %v3774_v29, 2  ;;  %v4108_v4 = vrot.slane %v3775_v25, 1  ;;  %v3395_v54 = vrot.slane %v9085_v47, 1  ;;  %v4099_v5 = vsel %vm3090_vm2, %v4098_v33, %v4097_v2  ;;  %v10864_v29 = vld [vmem:[#allocation79_spill] sm:$0xff]  ;;  %v10868_v2 = vld [vmem:[#allocation81_spill] sm:$0xff] }
 0x346   :  { %v3396_v40 = vrot.slane %v9085_v47, 2  ;;  %v3397_v16 = vrot.slane %v9085_v47, 3  ;;  %v3398_v8 = vrot.slane %v9085_v47, 4  ;;  %v4101_v49 = vsel %vm3092_vm3, %v4100_v55, %v4099_v5 }
 0x347   :  { %v3399_v3 = vrot.slane %v9085_v47, 5  ;;  %v3400_v17 = vrot.slane %v9085_v47, 6  ;;  %v3401_v50 = vrot.slane %v9085_v47, 7  ;;  %v4103_v36 = vsel %vm3094_vm4, %v4102_v1, %v4101_v49  ;;  %v10874_v49 = vld [vmem:[#allocation84_spill] sm:$0xff] }
 0x348   :  { %v9306_v18 = vsub.f32 %v10862_v61, %v9085_v47  ;;  %v9309_v25 = vsub.f32 %v10864_v29, %v3395_v54  ;;  %v9312_v33 = vsub.f32 %v10866_v56, %v3396_v40  ;;  %v4105_v55 = vsel %vm3096_vm5, %v4104_v58, %v4103_v36  ;;  %v10876_v54 = vld [vmem:[#allocation85_spill] sm:$0xff]  ;;  %v3270_v58 = vpop.xlane.xlu1 %3269 }
 0x349   :  { %v9316_v5 = vsub.f32 %v10868_v2, %v3397_v16  ;;  %v9319_v38 = vsub.f32 %v10870_v9, %v3398_v8  ;;  %v9322_v1 = vsub.f32 %v10872_v19, %v3399_v3  ;;  %v4107_v47 = vsel %vm3098_vm6, %v4106_v59, %v4105_v55 }
 0x34a   :  { %10863 = vst [vmem:[#allocation87_spill] sm:$0xff] %v9306_v18  ;;  %10865 = vst [vmem:[#allocation88_spill] sm:$0xff] %v9309_v25  ;;  %v9326_v61 = vsub.f32 %v10874_v49, %v3400_v17  ;;  %v9329_v29 = vsub.f32 %v10876_v54, %v3401_v50  ;;  %v3776_v40 = vmul.f32 %v9306_v18, %v9306_v18 }
 0x34b   :  { %10867 = vst [vmem:[#allocation89_spill] sm:$0xff] %v9312_v33  ;;  %10869 = vst [vmem:[#allocation90_spill] sm:$0xff] %v9316_v5  ;;  %v4109_v16 = vsel %vm3100_vm7, %v4108_v4, %v4107_v47  ;;  %v3777_v9 = vmul.f32 %v9309_v25, %v9309_v25  ;;  %v3778_v19 = vmul.f32 %v9312_v33, %v9312_v33  ;;  %v3287_v47 = vmul.f32 0.010416667, %v3270_v58 }
 0x34c   :  { %10871 = vst [vmem:[#allocation91_spill] sm:$0xff] %v9319_v38  ;;  %10873 = vst [vmem:[#allocation92_spill] sm:$0xff] %v9322_v1  ;;  %v3779_v8 = vmul.f32 %v9316_v5, %v9316_v5  ;;  %v4204_v59 = vsel %vm271_vm0, %v4109_v16, 0.0  ;;  %v3780_v3 = vmul.f32 %v9319_v38, %v9319_v38  ;;  %v3781_v17 = vmul.f32 %v9322_v1, %v9322_v1 }
 0x34d   :  { %10875 = vst [vmem:[#allocation93_spill] sm:$0xff] %v9326_v61  ;;  %10877 = vst [vmem:[#allocation78_spill] sm:$0xff] %v9329_v29  ;;  %v3782_v4 = vmul.f32 %v9326_v61, %v9326_v61  ;;  %4205 = vadd.xlane.f32.xlu0 %v4204_v59  ;;  %v3783_v50 = vmul.f32 %v9329_v29, %v9329_v29  ;;  %v4110_v36 = vrot.slane %v3777_v9, 7  ;;  %v4112_v56 = vrot.slane %v3778_v19, 6 }
 0x34e   :  { %v4114_v55 = vrot.slane %v3779_v8, 5  ;;  %v4116_v2 = vrot.slane %v3780_v3, 4  ;;  %v4118_v54 = vrot.slane %v3781_v17, 3  ;;  %v3409_v1 = vrot.slane %v3287_v47, 1  ;;  %v10878_v8 = vld [vmem:[#allocation94_spill] sm:$0xff] }
 0x34f   :  { %v4111_v49 = vsel %vm3088_vm1, %v4110_v36, %v3776_v40  ;;  %v4120_v16 = vrot.slane %v3782_v4, 2  ;;  %v4122_v38 = vrot.slane %v3783_v50, 1  ;;  %v3410_v33 = vrot.slane %v3287_v47, 2  ;;  %v10880_v40 = vld [vmem:[#allocation95_spill] sm:$0xff]  ;;  %v10882_v4 = vld [vmem:[#allocation96_spill] sm:$0xff]  ;;  %v10884_v36 = vld [vmem:[#allocation97_spill] sm:$0xff] }
 0x350   :  { %v4113_v5 = vsel %vm3090_vm2, %v4112_v56, %v4111_v49  ;;  %v3411_v25 = vrot.slane %v3287_v47, 3  ;;  %v3412_v61 = vrot.slane %v3287_v47, 4  ;;  %v3413_v18 = vrot.slane %v3287_v47, 5  ;;  %v10888_v49 = vld [vmem:[#allocation99_spill] sm:$0xff] }
 0x351   :  { %v4115_v59 = vsel %vm3092_vm3, %v4114_v55, %v4113_v5  ;;  %v3414_v29 = vrot.slane %v3287_v47, 6  ;;  %v3415_v19 = vrot.slane %v3287_v47, 7  ;;  %v9354_v58 = vsub.f32 %v10878_v8, %v3287_v47  ;;  %v10886_v5 = vld [vmem:[#allocation98_spill] sm:$0xff]  ;;  %v10890_v47 = vld [vmem:[#allocation100_spill] sm:$0xff] }
 0x352   :  { %v4117_v9 = vsel %vm3094_vm4, %v4116_v2, %v4115_v59  ;;  %v9357_v3 = vsub.f32 %v10880_v40, %v3409_v1  ;;  %v9361_v50 = vsub.f32 %v10882_v4, %v3410_v33  ;;  %v9364_v56 = vsub.f32 %v10884_v36, %v3411_v25 }
 0x353   :  { %10879 = vst [vmem:[#allocation79_spill] sm:$0xff] %v9354_v58  ;;  %v4119_v17 = vsel %vm3096_vm5, %v4118_v54, %v4117_v9  ;;  %v9367_v55 = vsub.f32 %v10886_v5, %v3412_v61  ;;  %v9371_v59 = vsub.f32 %v10888_v49, %v3413_v18  ;;  %v9374_v8 = vsub.f32 %v10890_v47, %v3414_v29 }
 0x354   :  { %10881 = vst [vmem:[#allocation80_spill] sm:$0xff] %v9357_v3  ;;  %10883 = vst [vmem:[#allocation81_spill] sm:$0xff] %v9361_v50  ;;  %v4121_v2 = vsel %vm3098_vm6, %v4120_v16, %v4119_v17  ;;  %v3792_v33 = vmul.f32 %v9354_v58, %v9354_v58  ;;  %v3793_v25 = vmul.f32 %v9357_v3, %v9357_v3  ;;  %v10892_v16 = vld [vmem:[#allocation101_spill] sm:$0xff] }
 0x355   :  { %10885 = vst [vmem:[#allocation82_spill] sm:$0xff] %v9364_v56  ;;  %10887 = vst [vmem:[#allocation83_spill] sm:$0xff] %v9367_v55  ;;  %v4123_v1 = vsel %vm3100_vm7, %v4122_v38, %v4121_v2  ;;  %v3794_v61 = vmul.f32 %v9361_v50, %v9361_v50  ;;  %v3795_v18 = vmul.f32 %v9364_v56, %v9364_v56  ;;  %v3267_v49 = vpop.xlane.xlu0 %3266 }
 0x356   :  { %10889 = vst [vmem:[#allocation84_spill] sm:$0xff] %v9371_v59  ;;  %10891 = vst [vmem:[#allocation85_spill] sm:$0xff] %v9374_v8  ;;  %v4207_v54 = vsel %vm271_vm0, %v4123_v1, 0.0  ;;  %v3796_v29 = vmul.f32 %v9367_v55, %v9367_v55  ;;  %v9389_v38 = vsub.f32 %v10892_v16, %v3415_v19  ;;  %v4138_v9 = vrot.slane %v3793_v25, 7 }
 0x357   :  { %4208 = vadd.xlane.f32.xlu1 %v4207_v54  ;;  %v4140_v40 = vrot.slane %v3794_v61, 6  ;;  %v3797_v17 = vmul.f32 %v9371_v59, %v9371_v59  ;;  %v3798_v4 = vmul.f32 %v9374_v8, %v9374_v8  ;;  %v4142_v36 = vrot.slane %v3795_v18, 5 }
 0x358   :  { %10893 = vst [vmem:[#allocation94_spill] sm:$0xff] %v9389_v38  ;;  %v4144_v5 = vrot.slane %v3796_v29, 4  ;;  %v4139_v2 = vsel %vm3088_vm1, %v4138_v9, %v3792_v33  ;;  %v3286_v1 = vmul.f32 0.010416667, %v3267_v49  ;;  %v3799_v19 = vmul.f32 %v9389_v38, %v9389_v38  ;;  %v10915_v38 = vld [vmem:[#allocation26_spill] sm:$0xff] }
 0x359   :  { %v4141_v47 = vsel %vm3090_vm2, %v4140_v40, %v4139_v2  ;;  %v4146_v61 = vrot.slane %v3797_v17, 3  ;;  %v4148_v16 = vrot.slane %v3798_v4, 2 }
 0x35a   :  { %v4143_v54 = vsel %vm3092_vm3, %v4142_v36, %v4141_v47  ;;  %v3402_v59 = vrot.slane %v3286_v1, 1  ;;  %v3403_v55 = vrot.slane %v3286_v1, 2  ;;  %v3404_v8 = vrot.slane %v3286_v1, 3 }
 0x35b   :  { %v4145_v25 = vsel %vm3094_vm4, %v4144_v5, %v4143_v54  ;;  %v3405_v18 = vrot.slane %v3286_v1, 4  ;;  %v3406_v29 = vrot.slane %v3286_v1, 5  ;;  %v3407_v56 = vrot.slane %v3286_v1, 6 }
 0x35c   :  { %v3408_v33 = vrot.slane %v3286_v1, 7  ;;  %v9402_v9 = vsub.f32 %v8564_v10, %v3286_v1  ;;  %v9405_v40 = vsub.f32 %v8566_v62, %v3402_v59  ;;  %v9408_v36 = vsub.f32 %v8573_v22, %v3403_v55  ;;  %v4170_v55 = vpop.xlane.xlu0 %4169 }
 0x35d   :  { %v9411_v5 = vsub.f32 %v8576_v21, %v3404_v8  ;;  %v9414_v17 = vsub.f32 %v8581_v27, %v3405_v18  ;;  %v9417_v4 = vsub.f32 %v8585_v20, %v3406_v29  ;;  %v9420_v2 = vsub.f32 %v8604_v63, %v3407_v56 }
 0x35e   :  { %10894 = vst [vmem:[#allocation95_spill] sm:$0xff] %v9402_v9  ;;  %10895 = vst [vmem:[#allocation96_spill] sm:$0xff] %v9405_v40  ;;  %v9423_v10 = vsub.f32 %v8631_v34, %v3408_v33  ;;  %v3784_v62 = vmul.f32 %v9402_v9, %v9402_v9  ;;  %v3785_v22 = vmul.f32 %v9405_v40, %v9405_v40  ;;  %v4150_v47 = vrot.slane %v3799_v19, 1  ;;  %v10914_v40 = vld [vmem:[#allocation25_spill] sm:$0xff] }
 0x35f   :  { %10896 = vst [vmem:[#allocation97_spill] sm:$0xff] %v9408_v36  ;;  %10897 = vst [vmem:[#allocation98_spill] sm:$0xff] %v9411_v5  ;;  %v3786_v21 = vmul.f32 %v9408_v36, %v9408_v36  ;;  %v3787_v27 = vmul.f32 %v9411_v5, %v9411_v5  ;;  %v3788_v20 = vmul.f32 %v9414_v17, %v9414_v17 }
 0x360   :  { %10898 = vst [vmem:[#allocation99_spill] sm:$0xff] %v9414_v17  ;;  %10899 = vst [vmem:[#allocation100_spill] sm:$0xff] %v9417_v4  ;;  %v3789_v63 = vmul.f32 %v9417_v4, %v9417_v4  ;;  %v3790_v34 = vmul.f32 %v9420_v2, %v9420_v2  ;;  %v4147_v56 = vsel %vm3096_vm5, %v4146_v61, %v4145_v25  ;;  %v4124_v59 = vrot.slane %v3785_v22, 7 }
 0x361   :  { %10900 = vst [vmem:[#allocation101_spill] sm:$0xff] %v9420_v2  ;;  %10901 = vst [vmem:[#allocation102_spill] sm:$0xff] %v9423_v10  ;;  %v4126_v8 = vrot.slane %v3786_v21, 6  ;;  %v4128_v49 = vrot.slane %v3787_v27, 5  ;;  %v3791_v1 = vmul.f32 %v9423_v10, %v9423_v10  ;;  %v4130_v54 = vrot.slane %v3788_v20, 4 }
 0x362   :  { %v4149_v18 = vsel %vm3098_vm6, %v4148_v16, %v4147_v56  ;;  %v4125_v29 = vsel %vm3088_vm1, %v4124_v59, %v3784_v62  ;;  %v4132_v33 = vrot.slane %v3789_v63, 3  ;;  %v4216_v17 = vmul.f32 0.010416667, %v4170_v55 }
 0x363   :  { %v4151_v4 = vsel %vm3100_vm7, %v4150_v47, %v4149_v18  ;;  %v4127_v2 = vsel %vm3090_vm2, %v4126_v8, %v4125_v29  ;;  %v4134_v25 = vrot.slane %v3790_v34, 2  ;;  %v4136_v16 = vrot.slane %v3791_v1, 1  ;;  %v9456_v1 = vld [vmem:[%s10409_s1] ss:$0 sm:$0xff] }
 0x364   :  { %v4213_v61 = vsel %vm271_vm0, %v4151_v4, 0.0  ;;  %v4129_v22 = vsel %vm3092_vm3, %v4128_v49, %v4127_v2  ;;  %v4232_v19 = vadd.f32 1e-05, %v4216_v17 }
 0x365   :  { %4214 = vadd.xlane.f32.xlu1 %v4213_v61  ;;  %v4131_v21 = vsel %vm3094_vm4, %v4130_v54, %v4129_v22 }
 0x366   :  { %v4133_v27 = vsel %vm3096_vm5, %v4132_v33, %v4131_v21  ;;  %5323 = vrsqrt.f32 %v4232_v19 }
 0x367   :  { %v4135_v62 = vsel %vm3098_vm6, %v4134_v25, %v4133_v27 }
 0x368   :  { %v4137_v20 = vsel %vm3100_vm7, %v4136_v16, %v4135_v62  ;;  %v4176_v56 = vpop.xlane.xlu0 %4175 }
 0x369   :  { %v4210_v63 = vsel %vm271_vm0, %v4137_v20, 0.0  ;;  %v4218_v34 = vmul.f32 0.010416667, %v4176_v56 }
 0x36a   :  { %4211 = vadd.xlane.f32.xlu0 %v4210_v63 }
 0x36b   :  { %v4234_v4 = vadd.f32 1e-05, %v4218_v34 }
 0x36d   :  { %5325 = vrsqrt.f32 %v4234_v4 }
 0x371   :  { %v4173_v2 = vpop.xlane.xlu1 %4172 }
 0x372   :  { %v4217_v17 = vmul.f32 0.010416667, %v4173_v2 }
 0x373   :  { %v5324_v55 = vpop.eup %5323 }
 0x374   :  { %v4280_v59 = vrot.slane %v5324_v55, 1  ;;  %v4281_v8 = vrot.slane %v5324_v55, 2  ;;  %v4282_v49 = vrot.slane %v5324_v55, 3  ;;  %v4283_v47 = vrot.slane %v5324_v55, 4 }
 0x375   :  { %v4233_v54 = vadd.f32 1e-05, %v4217_v17  ;;  %v4284_v18 = vrot.slane %v5324_v55, 5  ;;  %v4285_v29 = vrot.slane %v5324_v55, 6  ;;  %v4286_v33 = vrot.slane %v5324_v55, 7 }
 0x376   :  { %v4520_v25 = vmul.f32 %v5324_v55, %v8591_v39  ;;  %v4521_v61 = vmul.f32 %v4280_v59, %v8594_v45  ;;  %v4522_v22 = vmul.f32 %v4281_v8, %v8599_v24  ;;  %v4523_v19 = vmul.f32 %v4282_v49, %v8602_v11  ;;  %v9472_v45 = vld [vmem:[%s10410_s2] ss:$0 sm:$0xff] }
 0x377   :  { %5327 = vrsqrt.f32 %v4233_v54  ;;  %v4524_v21 = vmul.f32 %v4283_v47, %v8607_v43  ;;  %v4525_v27 = vmul.f32 %v4284_v18, %v8610_v35  ;;  %v4526_v16 = vmul.f32 %v4285_v29, %v8613_v52 }
 0x378   :  { %v4527_v62 = vmul.f32 %v4286_v33, %v8617_v13  ;;  %v4655_v20 = vmul.f32 %v9456_v1, %v4520_v25  ;;  %v4656_v63 = vmul.f32 %v9456_v1, %v4521_v61  ;;  %v4657_v39 = vmul.f32 %v9456_v1, %v4522_v22 }
 0x379   :  { %v4658_v24 = vmul.f32 %v9456_v1, %v4523_v19  ;;  %v4659_v11 = vmul.f32 %v9456_v1, %v4524_v21  ;;  %v4660_v43 = vmul.f32 %v9456_v1, %v4525_v27  ;;  %v4661_v35 = vmul.f32 %v9456_v1, %v4526_v16 }
 0x37a   :  { %v4662_v52 = vmul.f32 %v9456_v1, %v4527_v62  ;;  %v5326_v13 = vpop.eup %5325  ;;  %v9480_v56 = vadd.f32 %v9472_v45, %v4655_v20  ;;  %v9483_v34 = vadd.f32 %v9472_v45, %v4656_v63  ;;  %v9486_v4 = vadd.f32 %v9472_v45, %v4657_v39 }
 0x37b   :  { %v9489_v2 = vadd.f32 %v9472_v45, %v4658_v24  ;;  %v4179_v55 = vpop.xlane.xlu1 %4178  ;;  %v4294_v17 = vrot.slane %v5326_v13, 1  ;;  %v4295_v59 = vrot.slane %v5326_v13, 2  ;;  %v4296_v8 = vrot.slane %v5326_v13, 3 }
 0x37c   :  { %v4297_v49 = vrot.slane %v5326_v13, 4  ;;  %v4219_v47 = vmul.f32 0.010416667, %v4179_v55  ;;  %v4298_v54 = vrot.slane %v5326_v13, 5  ;;  %v4299_v18 = vrot.slane %v5326_v13, 6 }
 0x37d   :  { %v4300_v29 = vrot.slane %v5326_v13, 7  ;;  %v4536_v33 = vmul.f32 %v5326_v13, %v8656_v15  ;;  %v4537_v25 = vmul.f32 %v4294_v17, %v8659_v31  ;;  %v4538_v61 = vmul.f32 %v4295_v59, %v8663_v0 }
 0x37e   :  { %v4539_v22 = vmul.f32 %v4296_v8, %v8666_v32  ;;  %v4235_v19 = vadd.f32 1e-05, %v4219_v47  ;;  %v4540_v21 = vmul.f32 %v4297_v49, %v8669_v46  ;;  %v4541_v27 = vmul.f32 %v4298_v54, %v8673_v44 }
 0x37f   :  { %v4542_v16 = vmul.f32 %v4299_v18, %v8676_v48  ;;  %v4543_v62 = vmul.f32 %v4300_v29, %v8679_v51  ;;  %v4671_v20 = vmul.f32 %v9456_v1, %v4536_v33  ;;  %v4672_v63 = vmul.f32 %v9456_v1, %v4537_v25 }
 0x380   :  { %v4673_v15 = vmul.f32 %v9456_v1, %v4538_v61  ;;  %5329 = vrsqrt.f32 %v4235_v19  ;;  %v4674_v31 = vmul.f32 %v9456_v1, %v4539_v22  ;;  %v4675_v0 = vmul.f32 %v9456_v1, %v4540_v21 }
 0x381   :  { %v9505_v32 = vadd.f32 %v9472_v45, %v4659_v11  ;;  %v4676_v46 = vmul.f32 %v9456_v1, %v4541_v27  ;;  %v4677_v44 = vmul.f32 %v9456_v1, %v4542_v16  ;;  %v9510_v48 = vadd.f32 %v9472_v45, %v4660_v43 }
 0x382   :  { %v9513_v51 = vadd.f32 %v9472_v45, %v4661_v35  ;;  %v4678_v39 = vmul.f32 %v9456_v1, %v4543_v62  ;;  %v9517_v24 = vadd.f32 %v9472_v45, %v4662_v52  ;;  %v9520_v13 = vadd.f32 %v9472_v45, %v4671_v20 }
 0x383   :  { %v9523_v11 = vadd.f32 %v9472_v45, %v4672_v63  ;;  %v9526_v17 = vadd.f32 %v9472_v45, %v4673_v15  ;;  %v9529_v43 = vadd.f32 %v9472_v45, %v4674_v31  ;;  %v9532_v35 = vadd.f32 %v9472_v45, %v4675_v0 }
 0x384   :  { %v5328_v55 = vpop.eup %5327  ;;  %v5046_v59 = vrot.slane %v9483_v34, 7 }
 0x385   :  { %v4182_v52 = vpop.xlane.xlu0 %4181  ;;  %v4287_v8 = vrot.slane %v5328_v55, 1  ;;  %v4288_v49 = vrot.slane %v5328_v55, 2  ;;  %v4289_v47 = vrot.slane %v5328_v55, 3  ;;  %v4290_v54 = vrot.slane %v5328_v55, 4 }
 0x386   :  { %v4220_v18 = vmul.f32 0.010416667, %v4182_v52  ;;  %v4291_v29 = vrot.slane %v5328_v55, 5  ;;  %v4292_v33 = vrot.slane %v5328_v55, 6  ;;  %v4293_v25 = vrot.slane %v5328_v55, 7 }
 0x387   :  { %v4528_v61 = vmul.f32 %v5328_v55, %v8710_v14  ;;  %v4529_v22 = vmul.f32 %v4287_v8, %v8713_v12  ;;  %v4530_v19 = vmul.f32 %v4288_v49, %v8717_v53  ;;  %v4531_v21 = vmul.f32 %v4289_v47, %v8720_v57 }
 0x388   :  { %v4236_v27 = vadd.f32 1e-05, %v4220_v18  ;;  %v4532_v34 = vmul.f32 %v4290_v54, %v8723_v60  ;;  %v4533_v16 = vmul.f32 %v4291_v29, %v8727_v6  ;;  %v4534_v62 = vmul.f32 %v4292_v33, %v8730_v42  ;;  %v10907_v29 = vld [vmem:[#allocation9_spill] sm:$0xff] }
 0x389   :  { %v4535_v20 = vmul.f32 %v4293_v25, %v8733_v41  ;;  %v4663_v63 = vmul.f32 %v9456_v1, %v4528_v61  ;;  %v4664_v15 = vmul.f32 %v9456_v1, %v4529_v22  ;;  %v4665_v14 = vmul.f32 %v9456_v1, %v4530_v19 }
 0x38a   :  { %5331 = vrsqrt.f32 %v4236_v27  ;;  %v4666_v12 = vmul.f32 %v9456_v1, %v4531_v21  ;;  %v4667_v53 = vmul.f32 %v9456_v1, %v4532_v34  ;;  %v4668_v57 = vmul.f32 %v9456_v1, %v4533_v16 }
 0x38b   :  { %v4669_v60 = vmul.f32 %v9456_v1, %v4534_v62  ;;  %v4670_v6 = vmul.f32 %v9456_v1, %v4535_v20  ;;  %v9552_v42 = vadd.f32 %v9472_v45, %v4676_v46  ;;  %v9555_v41 = vadd.f32 %v9472_v45, %v4677_v44 }
 0x38c   :  { %v9558_v31 = vadd.f32 %v9472_v45, %v4663_v63  ;;  %v9561_v0 = vadd.f32 %v9472_v45, %v4664_v15  ;;  %v9564_v55 = vadd.f32 %v9472_v45, %v4665_v14  ;;  %v9567_v52 = vadd.f32 %v9472_v45, %v4678_v39  ;;  %v10902_v63 = vld [vmem:[#allocation13_spill] sm:$0xff]  ;;  %v10904_v14 = vld [vmem:[#allocation6_spill] sm:$0xff] }
 0x38d   :  { %v9570_v8 = vadd.f32 %v9472_v45, %v4666_v12  ;;  %v9573_v46 = vadd.f32 %v9472_v45, %v4667_v53  ;;  %v9576_v44 = vadd.f32 %v9472_v45, %v4668_v57  ;;  %v9579_v49 = vadd.f32 %v9472_v45, %v4669_v60  ;;  %v5330_v47 = vpop.eup %5329  ;;  %v10905_v53 = vld [vmem:[#allocation7_spill] sm:$0xff]  ;;  %v10906_v60 = vld [vmem:[#allocation8_spill] sm:$0xff] }
 0x38e   :  { %v9582_v54 = vadd.f32 %v9472_v45, %v4670_v6  ;;  %v5047_v39 = vsel %vm3088_vm1, %v5046_v59, %v9480_v56  ;;  %v5048_v18 = vrot.slane %v9486_v4, 6  ;;  %v4301_v25 = vrot.slane %v5330_v47, 1  ;;  %v10903_v56 = vld [vmem:[#allocation5_spill] sm:$0xff] }
 0x38f   :  { %v4185_v33 = vpop.xlane.xlu1 %4184  ;;  %v4302_v61 = vrot.slane %v5330_v47, 2  ;;  %v4303_v22 = vrot.slane %v5330_v47, 3  ;;  %v4304_v19 = vrot.slane %v5330_v47, 4  ;;  %v4305_v27 = vrot.slane %v5330_v47, 5 }
 0x390   :  { %v4221_v21 = vmul.f32 0.010416667, %v4185_v33  ;;  %v4306_v34 = vrot.slane %v5330_v47, 6  ;;  %v4307_v16 = vrot.slane %v5330_v47, 7  ;;  %v4544_v62 = vmul.f32 %v5330_v47, %v8767_v30 }
 0x391   :  { %v4545_v20 = vmul.f32 %v4301_v25, %v8770_v37  ;;  %v4546_v15 = vmul.f32 %v4302_v61, %v10902_v63  ;;  %v4547_v59 = vmul.f32 %v4303_v22, %v10903_v56  ;;  %v4548_v12 = vmul.f32 %v4304_v19, %v10904_v14  ;;  %v10912_v19 = vld [vmem:[#allocation23_spill] sm:$0xff] }
 0x392   :  { %v4237_v4 = vadd.f32 1e-05, %v4221_v21  ;;  %v4549_v57 = vmul.f32 %v4305_v27, %v10905_v53  ;;  %v4550_v6 = vmul.f32 %v4306_v34, %v10906_v60  ;;  %v4551_v33 = vmul.f32 %v4307_v16, %v10907_v29  ;;  %v10911_v29 = vld [vmem:[#allocation22_spill] sm:$0xff] }
 0x393   :  { %v4679_v10 = vmul.f32 %v9456_v1, %v4544_v62  ;;  %v4680_v5 = vmul.f32 %v9456_v1, %v4545_v20  ;;  %v4681_v30 = vmul.f32 %v9456_v1, %v4546_v15  ;;  %v4682_v37 = vmul.f32 %v9456_v1, %v4547_v59 }
 0x394   :  { %5333 = vrsqrt.f32 %v4237_v4  ;;  %v4683_v47 = vmul.f32 %v9456_v1, %v4548_v12  ;;  %v4684_v25 = vmul.f32 %v9456_v1, %v4549_v57  ;;  %v4685_v61 = vmul.f32 %v9456_v1, %v4550_v6  ;;  %v10908_v57 = vld [vmem:[#allocation10_spill] sm:$0xff] }
 0x395   :  { %v5052_v22 = vrot.slane %v9505_v32, 4  ;;  %v4686_v21 = vmul.f32 %v9456_v1, %v4551_v33  ;;  %v9608_v27 = vadd.f32 %v9472_v45, %v4679_v10  ;;  %v9611_v34 = vadd.f32 %v9472_v45, %v4680_v5  ;;  %v10909_v33 = vld [vmem:[#allocation11_spill] sm:$0xff] }
 0x396   :  { %v9614_v16 = vadd.f32 %v9472_v45, %v4681_v30  ;;  %v9617_v20 = vadd.f32 %v9472_v45, %v4682_v37  ;;  %v9620_v32 = vadd.f32 %v9472_v45, %v4683_v47  ;;  %v9623_v63 = vadd.f32 %v9472_v45, %v4684_v25  ;;  %v10910_v37 = vld [vmem:[#allocation12_spill] sm:$0xff] }
 0x397   :  { %v5332_v62 = vpop.eup %5331  ;;  %v5049_v15 = vsel %vm3090_vm2, %v5048_v18, %v5047_v39  ;;  %v10913_v39 = vld [vmem:[#allocation24_spill] sm:$0xff] }
 0x398   :  { %v4308_v10 = vrot.slane %v5332_v62, 1  ;;  %v4309_v56 = vrot.slane %v5332_v62, 2  ;;  %v4310_v59 = vrot.slane %v5332_v62, 3  ;;  %v4311_v5 = vrot.slane %v5332_v62, 4 }
 0x399   :  { %v4312_v14 = vrot.slane %v5332_v62, 5  ;;  %v4313_v12 = vrot.slane %v5332_v62, 6  ;;  %v4314_v53 = vrot.slane %v5332_v62, 7  ;;  %v4552_v60 = vmul.f32 %v5332_v62, %v10908_v57 }
 0x39a   :  { %v4188_v4 = vpop.xlane.xlu0 %4187  ;;  %v4553_v30 = vmul.f32 %v4308_v10, %v10909_v33  ;;  %v4554_v47 = vmul.f32 %v4309_v56, %v10910_v37  ;;  %v4555_v25 = vmul.f32 %v4310_v59, %v10911_v29  ;;  %v4556_v36 = vmul.f32 %v4311_v5, %v10912_v19 }
 0x39b   :  { %v4222_v6 = vmul.f32 0.010416667, %v4188_v4  ;;  %v4557_v18 = vmul.f32 %v4312_v14, %v10913_v39  ;;  %v4558_v9 = vmul.f32 %v4313_v12, %v10914_v40  ;;  %v4559_v50 = vmul.f32 %v4314_v53, %v10915_v38 }
 0x39c   :  { %v4687_v58 = vmul.f32 %v9456_v1, %v4552_v60  ;;  %v4688_v62 = vmul.f32 %v9456_v1, %v4553_v30  ;;  %v4689_v4 = vmul.f32 %v9456_v1, %v4554_v47  ;;  %v4690_v10 = vmul.f32 %v9456_v1, %v4555_v25 }
 0x39d   :  { %v4238_v3 = vadd.f32 1e-05, %v4222_v6  ;;  %v4691_v56 = vmul.f32 %v9456_v1, %v4556_v36  ;;  %v4692_v29 = vmul.f32 %v9456_v1, %v4557_v18  ;;  %v4693_v19 = vmul.f32 %v9456_v1, %v4558_v9 }
 0x39e   :  { %v9642_v40 = vadd.f32 %v9472_v45, %v4685_v61  ;;  %v9645_v38 = vadd.f32 %v9472_v45, %v4686_v21  ;;  %v4694_v5 = vmul.f32 %v9456_v1, %v4559_v50  ;;  %v9650_v14 = vadd.f32 %v9472_v45, %v4687_v58 }
 0x39f   :  { %5335 = vrsqrt.f32 %v4238_v3  ;;  %v9653_v36 = vadd.f32 %v9472_v45, %v4688_v62  ;;  %v9656_v12 = vadd.f32 %v9472_v45, %v4689_v4  ;;  %v9659_v3 = vadd.f32 %v9472_v45, %v4690_v10  ;;  %v10923_v62 = vld [vmem:[#allocation27_spill] sm:$0xff]  ;;  %v10924_v10 = vld [vmem:[#allocation28_spill] sm:$0xff] }
 0x3a0   :  { %10916 = vst [vmem:[#allocation13_spill] sm:$0xff] %v9645_v38  ;;  %10917 = vst [vmem:[#allocation5_spill] sm:$0xff] %v9650_v14  ;;  %v9662_v9 = vadd.f32 %v9472_v45, %v4691_v56  ;;  %v9665_v61 = vadd.f32 %v9472_v45, %v4692_v29  ;;  %v10921_v50 = vrot.slane %v9489_v2, 5  ;;  %v9671_v53 = vadd.f32 %v9472_v45, %v4693_v19  ;;  %v10925_v29 = vld [vmem:[#allocation29_spill] sm:$0xff] }
 0x3a1   :  { %10918 = vst [vmem:[#allocation6_spill] sm:$0xff] %v9659_v3  ;;  %v5334_v21 = vpop.eup %5333  ;;  %v5060_v60 = vrot.slane %v9561_v0, 7  ;;  %v5062_v6 = vrot.slane %v9564_v55, 6  ;;  %v10927_v0 = vld [vmem:[#allocation15_spill] sm:$0xff]  ;;  %v10928_v55 = vld [vmem:[#allocation16_spill] sm:$0xff] }
 0x3a2   :  { %10919 = vst [vmem:[#allocation7_spill] sm:$0xff] %v9662_v9  ;;  %10920 = vst [vmem:[#allocation8_spill] sm:$0xff] %v9665_v61  ;;  %v5051_v58 = vsel %vm3092_vm3, %v10921_v50, %v5049_v15  ;;  %v4315_v33 = vrot.slane %v5334_v21, 1  ;;  %v4316_v30 = vrot.slane %v5334_v21, 2  ;;  %v4317_v37 = vrot.slane %v5334_v21, 3  ;;  %v10930_v9 = vld [vmem:[#allocation18_spill] sm:$0xff] }
 0x3a3   :  { %10922 = vst [vmem:[#allocation9_spill] sm:$0xff] %v9671_v53  ;;  %v5053_v57 = vsel %vm3094_vm4, %v5052_v22, %v5051_v58  ;;  %v4318_v47 = vrot.slane %v5334_v21, 4  ;;  %v4319_v39 = vrot.slane %v5334_v21, 5  ;;  %v4320_v18 = vrot.slane %v5334_v21, 6  ;;  %v10926_v22 = vld [vmem:[#allocation14_spill] sm:$0xff]  ;;  %v10929_v53 = vld [vmem:[#allocation17_spill] sm:$0xff] }
 0x3a4   :  { %v4191_v25 = vpop.xlane.xlu1 %4190  ;;  %v4321_v2 = vrot.slane %v5334_v21, 7  ;;  %v4560_v15 = vmul.f32 %v5334_v21, %v10923_v62  ;;  %v4561_v56 = vmul.f32 %v4315_v33, %v10924_v10  ;;  %v4562_v19 = vmul.f32 %v4316_v30, %v10925_v29 }
 0x3a5   :  { %v4223_v4 = vmul.f32 0.010416667, %v4191_v25  ;;  %v4563_v50 = vmul.f32 %v4317_v37, %v10926_v22  ;;  %v4564_v58 = vmul.f32 %v4318_v47, %v10927_v0  ;;  %v4565_v59 = vmul.f32 %v4319_v39, %v10928_v55 }
 0x3a6   :  { %v4566_v61 = vmul.f32 %v4320_v18, %v10929_v53  ;;  %v4567_v14 = vmul.f32 %v4321_v2, %v10930_v9  ;;  %v4695_v38 = vmul.f32 %v9456_v1, %v4560_v15  ;;  %v4696_v21 = vmul.f32 %v9456_v1, %v4561_v56 }
 0x3a7   :  { %v4239_v3 = vadd.f32 1e-05, %v4223_v4  ;;  %v4697_v25 = vmul.f32 %v9456_v1, %v4562_v19  ;;  %v4698_v33 = vmul.f32 %v9456_v1, %v4563_v50  ;;  %v4699_v30 = vmul.f32 %v9456_v1, %v4564_v58  ;;  %v10937_v58 = vld [vmem:[#allocation19_spill] sm:$0xff] }
 0x3a8   :  { %v4700_v37 = vmul.f32 %v9456_v1, %v4565_v59  ;;  %v4701_v47 = vmul.f32 %v9456_v1, %v4566_v61  ;;  %v9692_v53 = vadd.f32 %v9472_v45, %v4694_v5  ;;  %v5064_v9 = vrot.slane %v9570_v8, 5 }
 0x3a9   :  { %5337 = vrsqrt.f32 %v4239_v3  ;;  %v5066_v39 = vrot.slane %v9573_v46, 4  ;;  %v4702_v18 = vmul.f32 %v9456_v1, %v4567_v14  ;;  %v9698_v2 = vadd.f32 %v9472_v45, %v4695_v38 }
 0x3aa   :  { %v9701_v62 = vadd.f32 %v9472_v45, %v4696_v21  ;;  %v9704_v59 = vadd.f32 %v9472_v45, %v4697_v25  ;;  %v9707_v3 = vadd.f32 %v9472_v45, %v4698_v33  ;;  %v9710_v5 = vadd.f32 %v9472_v45, %v4699_v30  ;;  %v10938_v21 = vld [vmem:[#allocation20_spill] sm:$0xff]  ;;  %v10939_v33 = vld [vmem:[#allocation21_spill] sm:$0xff] }
 0x3ab   :  { %10931 = vst [vmem:[#allocation10_spill] sm:$0xff] %v9698_v2  ;;  %v10933_v8 = vrot.slane %v9510_v48, 3  ;;  %v5061_v38 = vsel %vm3088_vm1, %v5060_v60, %v9558_v31  ;;  %v9718_v61 = vadd.f32 %v9472_v45, %v4700_v37  ;;  %v9721_v15 = vadd.f32 %v9472_v45, %v4701_v47 }
 0x3ac   :  { %10932 = vst [vmem:[#allocation11_spill] sm:$0xff] %v9710_v5  ;;  %v5336_v14 = vpop.eup %5335  ;;  %v10936_v4 = vrot.slane %v9513_v51, 2  ;;  %v5063_v56 = vsel %vm3090_vm2, %v5062_v6, %v5061_v38  ;;  %v10940_v51 = vld [vmem:[#allocation38_spill] sm:$0xff] }
 0x3ad   :  { %v5055_v46 = vsel %vm3096_vm5, %v10933_v8, %v5053_v57  ;;  %10934 = vst [vmem:[#allocation12_spill] sm:$0xff] %v9718_v61  ;;  %10935 = vst [vmem:[#allocation22_spill] sm:$0xff] %v9721_v15  ;;  %v4322_v48 = vrot.slane %v5336_v14, 1  ;;  %v4323_v19 = vrot.slane %v5336_v14, 2  ;;  %v4324_v57 = vrot.slane %v5336_v14, 3  ;;  %v10941_v8 = vld [vmem:[#allocation39_spill] sm:$0xff] }
 0x3ae   :  { %v5057_v10 = vsel %vm3098_vm6, %v10936_v4, %v5055_v46  ;;  %v4194_v29 = vpop.xlane.xlu0 %4193  ;;  %v4325_v22 = vrot.slane %v5336_v14, 4  ;;  %v4326_v31 = vrot.slane %v5336_v14, 5  ;;  %v4327_v60 = vrot.slane %v5336_v14, 6  ;;  %v10942_v46 = vld [vmem:[#allocation40_spill] sm:$0xff]  ;;  %v10943_v4 = vld [vmem:[#allocation41_spill] sm:$0xff]  ;;  %v10944_v61 = vld [vmem:[#allocation42_spill] sm:$0xff] }
 0x3af   :  { %v4224_v50 = vmul.f32 0.010416667, %v4194_v29  ;;  %v4328_v0 = vrot.slane %v5336_v14, 7  ;;  %v4568_v55 = vmul.f32 %v5336_v14, %v10937_v58  ;;  %v4569_v25 = vmul.f32 %v4322_v48, %v10938_v21 }
 0x3b0   :  { %v4570_v30 = vmul.f32 %v4323_v19, %v10939_v33  ;;  %v4571_v37 = vmul.f32 %v4324_v57, %v10940_v51  ;;  %v4572_v6 = vmul.f32 %v4325_v22, %v10941_v8  ;;  %v4573_v38 = vmul.f32 %v4326_v31, %v10942_v46  ;;  %v10951_v46 = vld [vmem:[#allocation43_spill] sm:$0xff] }
 0x3b1   :  { %v4240_v47 = vadd.f32 1e-05, %v4224_v50  ;;  %v4574_v15 = vmul.f32 %v4327_v60, %v10943_v4  ;;  %v4575_v29 = vmul.f32 %v4328_v0, %v10944_v61  ;;  %v4703_v5 = vmul.f32 %v9456_v1, %v4568_v55 }
 0x3b2   :  { %v4704_v2 = vmul.f32 %v9456_v1, %v4569_v25  ;;  %v4705_v14 = vmul.f32 %v9456_v1, %v4570_v30  ;;  %v4706_v48 = vmul.f32 %v9456_v1, %v4571_v37  ;;  %v4707_v19 = vmul.f32 %v9456_v1, %v4572_v6 }
 0x3b3   :  { %5339 = vrsqrt.f32 %v4240_v47  ;;  %v4708_v57 = vmul.f32 %v9456_v1, %v4573_v38  ;;  %v4709_v22 = vmul.f32 %v9456_v1, %v4574_v15  ;;  %v4710_v50 = vmul.f32 %v9456_v1, %v4575_v29  ;;  %v10952_v29 = vld [vmem:[#allocation44_spill] sm:$0xff] }
 0x3b4   :  { %v9744_v31 = vadd.f32 %v9472_v45, %v4702_v18  ;;  %v5068_v61 = vrot.slane %v9576_v44, 3  ;;  %v9748_v60 = vadd.f32 %v9472_v45, %v4703_v5  ;;  %v9751_v0 = vadd.f32 %v9472_v45, %v4704_v2 }
 0x3b5   :  { %v9754_v58 = vadd.f32 %v9472_v45, %v4705_v14  ;;  %v9758_v15 = vadd.f32 %v9472_v45, %v4706_v48  ;;  %v9761_v21 = vadd.f32 %v9472_v45, %v4707_v19  ;;  %v10947_v18 = vrot.slane %v9517_v24, 1  ;;  %v10953_v48 = vld [vmem:[#allocation45_spill] sm:$0xff] }
 0x3b6   :  { %10945 = vst [vmem:[#allocation23_spill] sm:$0xff] %v9748_v60  ;;  %v5065_v5 = vsel %vm3092_vm3, %v5064_v9, %v5063_v56  ;;  %v5338_v25 = vpop.eup %5337  ;;  %v9768_v2 = vadd.f32 %v9472_v45, %v4708_v57  ;;  %v9771_v33 = vadd.f32 %v9472_v45, %v4709_v22  ;;  %v9774_v30 = vadd.f32 %v9472_v45, %v4710_v50  ;;  %v10954_v57 = vld [vmem:[#allocation30_spill] sm:$0xff] }
 0x3b7   :  { %10946 = vst [vmem:[#allocation24_spill] sm:$0xff] %v9761_v21  ;;  %v5059_v44 = vsel %vm3100_vm7, %v10947_v18, %v5057_v10  ;;  %v5067_v51 = vsel %vm3094_vm4, %v5066_v39, %v5065_v5  ;;  %v4329_v37 = vrot.slane %v5338_v25, 1  ;;  %v4330_v24 = vrot.slane %v5338_v25, 2  ;;  %v10955_v39 = vld [vmem:[#allocation31_spill] sm:$0xff]  ;;  %v10956_v18 = vld [vmem:[#allocation32_spill] sm:$0xff]  ;;  %v10957_v5 = vld [vmem:[#allocation33_spill] sm:$0xff] }
 0x3b8   :  { %10948 = vst [vmem:[#allocation25_spill] sm:$0xff] %v9768_v2  ;;  %10949 = vst [vmem:[#allocation26_spill] sm:$0xff] %v9771_v33  ;;  %v4331_v47 = vrot.slane %v5338_v25, 3  ;;  %v4332_v10 = vrot.slane %v5338_v25, 4  ;;  %v4333_v9 = vrot.slane %v5338_v25, 5  ;;  %v4334_v56 = vrot.slane %v5338_v25, 6 }
 0x3b9   :  { %10950 = vst [vmem:[#allocation27_spill] sm:$0xff] %v9774_v30  ;;  %5286 = vst.msk [vmem:[#allocation2] sm:$0xff] %vm271_vm0, %v5059_v44  ;;  %v4197_v8 = vpop.xlane.xlu1 %4196  ;;  %v4335_v6 = vrot.slane %v5338_v25, 7  ;;  %v4576_v38 = vmul.f32 %v5338_v25, %v10951_v46  ;;  %v4577_v14 = vmul.f32 %v4329_v37, %v10952_v29  ;;  %v4578_v19 = vmul.f32 %v4330_v24, %v10953_v48  ;;  %v10958_v30 = vld [vmem:[#allocation34_spill] sm:$0xff] }
 0x3ba   :  { %v4225_v4 = vmul.f32 0.010416667, %v4197_v8  ;;  %v4579_v22 = vmul.f32 %v4331_v47, %v10954_v57  ;;  %v4580_v50 = vmul.f32 %v4332_v10, %v10955_v39  ;;  %v4581_v44 = vmul.f32 %v4333_v9, %v10956_v18  ;;  %v10965_v39 = vld [vmem:[#allocation35_spill] sm:$0xff] }
 0x3bb   :  { %v4582_v55 = vmul.f32 %v4334_v56, %v10957_v5  ;;  %v4583_v33 = vmul.f32 %v4335_v6, %v10958_v30  ;;  %v4711_v21 = vmul.f32 %v9456_v1, %v4576_v38  ;;  %v4712_v25 = vmul.f32 %v9456_v1, %v4577_v14 }
 0x3bc   :  { %v4241_v2 = vadd.f32 1e-05, %v4225_v4  ;;  %v4713_v8 = vmul.f32 %v9456_v1, %v4578_v19  ;;  %v4714_v37 = vmul.f32 %v9456_v1, %v4579_v22  ;;  %v4715_v24 = vmul.f32 %v9456_v1, %v4580_v50 }
 0x3bd   :  { %v4716_v47 = vmul.f32 %v9456_v1, %v4581_v44  ;;  %v5072_v10 = vrot.slane %v9582_v54, 1  ;;  %v4717_v9 = vmul.f32 %v9456_v1, %v4582_v55  ;;  %v5074_v30 = vrot.slane %v9523_v11, 7  ;;  %v10966_v44 = vld [vmem:[#allocation36_spill] sm:$0xff] }
 0x3be   :  { %5341 = vrsqrt.f32 %v4241_v2  ;;  %v5076_v56 = vrot.slane %v9526_v17, 6  ;;  %v4718_v6 = vmul.f32 %v9456_v1, %v4583_v33  ;;  %v9798_v46 = vadd.f32 %v9472_v45, %v4711_v21 }
 0x3bf   :  { %v9801_v38 = vadd.f32 %v9472_v45, %v4712_v25  ;;  %v9804_v4 = vadd.f32 %v9472_v45, %v4713_v8  ;;  %v9807_v54 = vadd.f32 %v9472_v45, %v4714_v37  ;;  %v9810_v55 = vadd.f32 %v9472_v45, %v4715_v24  ;;  %v10967_v25 = vld [vmem:[#allocation37_spill] sm:$0xff]  ;;  %v10968_v37 = vld [vmem:[#allocation54_spill] sm:$0xff] }
 0x3c0   :  { %10959 = vst [vmem:[#allocation28_spill] sm:$0xff] %v9798_v46  ;;  %v5340_v29 = vpop.eup %5339  ;;  %v9813_v11 = vadd.f32 %v9472_v45, %v4716_v47  ;;  %v5069_v17 = vsel %vm3096_vm5, %v5068_v61, %v5067_v51  ;;  %v10969_v47 = vld [vmem:[#allocation55_spill] sm:$0xff]  ;;  %v10970_v61 = vld [vmem:[#allocation56_spill] sm:$0xff]  ;;  %v10972_v46 = vld [vmem:[#allocation58_spill] sm:$0xff] }
 0x3c1   :  { %10960 = vst [vmem:[#allocation29_spill] sm:$0xff] %v9801_v38  ;;  %10961 = vst [vmem:[#allocation14_spill] sm:$0xff] %v9804_v4  ;;  %v4336_v21 = vrot.slane %v5340_v29, 1  ;;  %v4337_v2 = vrot.slane %v5340_v29, 2  ;;  %v4338_v33 = vrot.slane %v5340_v29, 3  ;;  %v4339_v14 = vrot.slane %v5340_v29, 4 }
 0x3c2   :  { %10962 = vst [vmem:[#allocation15_spill] sm:$0xff] %v9807_v54  ;;  %10963 = vst [vmem:[#allocation16_spill] sm:$0xff] %v9810_v55  ;;  %v4340_v19 = vrot.slane %v5340_v29, 5  ;;  %v4341_v57 = vrot.slane %v5340_v29, 6  ;;  %v4342_v22 = vrot.slane %v5340_v29, 7  ;;  %v4584_v50 = vmul.f32 %v5340_v29, %v10965_v39  ;;  %v10971_v55 = vld [vmem:[#allocation57_spill] sm:$0xff] }
 0x3c3   :  { %10964 = vst [vmem:[#allocation17_spill] sm:$0xff] %v9813_v11  ;;  %v4200_v48 = vpop.xlane.xlu0 %4199  ;;  %v4585_v5 = vmul.f32 %v4336_v21, %v10966_v44  ;;  %v4586_v8 = vmul.f32 %v4337_v2, %v10967_v25  ;;  %v4587_v24 = vmul.f32 %v4338_v33, %v10968_v37  ;;  %v4588_v11 = vmul.f32 %v4339_v14, %v10969_v47  ;;  %v10983_v25 = vld [vmem:[#allocation49_spill] sm:$0xff] }
 0x3c4   :  { %v4226_v18 = vmul.f32 0.010416667, %v4200_v48  ;;  %v4589_v51 = vmul.f32 %v4340_v19, %v10970_v61  ;;  %v4590_v54 = vmul.f32 %v4341_v57, %v10971_v55  ;;  %v4591_v4 = vmul.f32 %v4342_v22, %v10972_v46 }
 0x3c5   :  { %v4719_v60 = vmul.f32 %v9456_v1, %v4584_v50  ;;  %v4720_v29 = vmul.f32 %v9456_v1, %v4585_v5  ;;  %v4721_v48 = vmul.f32 %v9456_v1, %v4586_v8  ;;  %v4722_v21 = vmul.f32 %v9456_v1, %v4587_v24 }
 0x3c6   :  { %v4242_v38 = vadd.f32 1e-05, %v4226_v18  ;;  %v4723_v2 = vmul.f32 %v9456_v1, %v4588_v11  ;;  %v4724_v33 = vmul.f32 %v9456_v1, %v4589_v51  ;;  %v4725_v14 = vmul.f32 %v9456_v1, %v4590_v54 }
 0x3c7   :  { %v4726_v55 = vmul.f32 %v9456_v1, %v4591_v4  ;;  %v9833_v46 = vadd.f32 %v9472_v45, %v4717_v9  ;;  %v5075_v19 = vsel %vm3088_vm1, %v5074_v30, %v9520_v13  ;;  %v9838_v57 = vadd.f32 %v9472_v45, %v4718_v6 }
 0x3c8   :  { %5343 = vrsqrt.f32 %v4242_v38  ;;  %v9841_v22 = vadd.f32 %v9472_v45, %v4719_v60  ;;  %v9844_v11 = vadd.f32 %v9472_v45, %v4720_v29  ;;  %v9847_v54 = vadd.f32 %v9472_v45, %v4721_v48  ;;  %v10977_v29 = vld [vmem:[#allocation59_spill] sm:$0xff] }
 0x3c9   :  { %v9850_v38 = vadd.f32 %v9472_v45, %v4722_v21  ;;  %v9853_v9 = vadd.f32 %v9472_v45, %v4723_v2  ;;  %v9856_v13 = vadd.f32 %v9472_v45, %v4724_v33  ;;  %v10974_v30 = vrot.slane %v9579_v49, 2  ;;  %v10979_v2 = vld [vmem:[#allocation61_spill] sm:$0xff] }
 0x3ca   :  { %10973 = vst [vmem:[#allocation18_spill] sm:$0xff] %v9841_v22  ;;  %v9862_v6 = vadd.f32 %v9472_v45, %v4725_v14  ;;  %v9865_v4 = vadd.f32 %v9472_v45, %v4726_v55  ;;  %v5077_v50 = vsel %vm3090_vm2, %v5076_v56, %v5075_v19  ;;  %v5078_v44 = vrot.slane %v9529_v43, 5  ;;  %v10978_v43 = vld [vmem:[#allocation60_spill] sm:$0xff]  ;;  %v10980_v14 = vld [vmem:[#allocation46_spill] sm:$0xff] }
 0x3cb   :  { %v5071_v60 = vsel %vm3098_vm6, %v10974_v30, %v5069_v17  ;;  %v5342_v18 = vpop.eup %5341  ;;  %v10981_v30 = vld [vmem:[#allocation47_spill] sm:$0xff] }
 0x3cc   :  { %10975 = vst [vmem:[#allocation19_spill] sm:$0xff] %v9862_v6  ;;  %10976 = vst [vmem:[#allocation20_spill] sm:$0xff] %v9865_v4  ;;  %v5073_v39 = vsel %vm3100_vm7, %v5072_v10, %v5071_v60  ;;  %v4343_v8 = vrot.slane %v5342_v18, 1  ;;  %v4344_v37 = vrot.slane %v5342_v18, 2  ;;  %v4345_v24 = vrot.slane %v5342_v18, 3  ;;  %v10984_v4 = vld [vmem:[#allocation50_spill] sm:$0xff] }
 0x3cd   :  { %5287 = vst.msk [vmem:[#allocation2 + $0x8] sm:$0xff] %vm271_vm0, %v5073_v39  ;;  %v4203_v17 = vpop.xlane.xlu1 %4202  ;;  %v4346_v47 = vrot.slane %v5342_v18, 4  ;;  %v4347_v10 = vrot.slane %v5342_v18, 5  ;;  %v4348_v51 = vrot.slane %v5342_v18, 6  ;;  %v4349_v56 = vrot.slane %v5342_v18, 7  ;;  %v10982_v39 = vld [vmem:[#allocation48_spill] sm:$0xff] }
 0x3ce   :  { %v4227_v61 = vmul.f32 0.010416667, %v4203_v17  ;;  %v4592_v48 = vmul.f32 %v5342_v18, %v10977_v29  ;;  %v4593_v21 = vmul.f32 %v4343_v8, %v10978_v43  ;;  %v4594_v33 = vmul.f32 %v4344_v37, %v10979_v2 }
 0x3cf   :  { %v4595_v55 = vmul.f32 %v4345_v24, %v10980_v14  ;;  %v4596_v60 = vmul.f32 %v4346_v47, %v10981_v30  ;;  %v4597_v49 = vmul.f32 %v4347_v10, %v10982_v39  ;;  %v4598_v5 = vmul.f32 %v4348_v51, %v10983_v25  ;;  %v10990_v39 = vld [vmem:[#allocation51_spill] sm:$0xff] }
 0x3d0   :  { %v4243_v19 = vadd.f32 1e-05, %v4227_v61  ;;  %v4599_v17 = vmul.f32 %v4349_v56, %v10984_v4  ;;  %v4727_v6 = vmul.f32 %v9456_v1, %v4592_v48  ;;  %v4728_v22 = vmul.f32 %v9456_v1, %v4593_v21 }
 0x3d1   :  { %v4729_v18 = vmul.f32 %v9456_v1, %v4594_v33  ;;  %v4730_v8 = vmul.f32 %v9456_v1, %v4595_v55  ;;  %v4731_v37 = vmul.f32 %v9456_v1, %v4596_v60  ;;  %v4732_v24 = vmul.f32 %v9456_v1, %v4597_v49 }
 0x3d2   :  { %5345 = vrsqrt.f32 %v4243_v19  ;;  %v4733_v47 = vmul.f32 %v9456_v1, %v4598_v5  ;;  %v5088_v25 = vrot.slane %v9611_v34, 7  ;;  %v5090_v4 = vrot.slane %v9614_v16, 6 }
 0x3d3   :  { %v4734_v10 = vmul.f32 %v9456_v1, %v4599_v17  ;;  %v9894_v51 = vadd.f32 %v9472_v45, %v4727_v6  ;;  %v9897_v56 = vadd.f32 %v9472_v45, %v4728_v22  ;;  %v9900_v29 = vadd.f32 %v9472_v45, %v4729_v18  ;;  %v10991_v18 = vld [vmem:[#allocation52_spill] sm:$0xff] }
 0x3d4   :  { %v9903_v5 = vadd.f32 %v9472_v45, %v4730_v8  ;;  %v9906_v48 = vadd.f32 %v9472_v45, %v4731_v37  ;;  %v9909_v34 = vadd.f32 %v9472_v45, %v4732_v24  ;;  %v5079_v16 = vsel %vm3092_vm3, %v5078_v44, %v5077_v50  ;;  %v10992_v24 = vld [vmem:[#allocation53_spill] sm:$0xff]  ;;  %v10993_v44 = vld [vmem:[#allocation70_spill] sm:$0xff] }
 0x3d5   :  { %10985 = vst [vmem:[#allocation21_spill] sm:$0xff] %v9894_v51  ;;  %10986 = vst [vmem:[#allocation38_spill] sm:$0xff] %v9900_v29  ;;  %v5344_v49 = vpop.eup %5343 }
 0x3d6   :  { %10987 = vst [vmem:[#allocation39_spill] sm:$0xff] %v9903_v5  ;;  %10988 = vst [vmem:[#allocation40_spill] sm:$0xff] %v9906_v48  ;;  %v4206_v6 = vpop.xlane.xlu0 %4205  ;;  %v4350_v43 = vrot.slane %v5344_v49, 1  ;;  %v4351_v21 = vrot.slane %v5344_v49, 2  ;;  %v4352_v22 = vrot.slane %v5344_v49, 3  ;;  %v4353_v2 = vrot.slane %v5344_v49, 4 }
 0x3d7   :  { %10989 = vst [vmem:[#allocation41_spill] sm:$0xff] %v9909_v34  ;;  %v4228_v33 = vmul.f32 0.010416667, %v4206_v6  ;;  %v4354_v14 = vrot.slane %v5344_v49, 5  ;;  %v4355_v55 = vrot.slane %v5344_v49, 6  ;;  %v4356_v19 = vrot.slane %v5344_v49, 7 }
 0x3d8   :  { %v4600_v30 = vmul.f32 %v5344_v49, %v9137_v26  ;;  %v4601_v60 = vmul.f32 %v4350_v43, %v9140_v28  ;;  %v4602_v17 = vmul.f32 %v4351_v21, %v10990_v39  ;;  %v4603_v8 = vmul.f32 %v4352_v22, %v10991_v18  ;;  %v10994_v34 = vld [vmem:[#allocation71_spill] sm:$0xff]  ;;  %v10995_v5 = vld [vmem:[#allocation72_spill] sm:$0xff] }
 0x3d9   :  { %v4244_v37 = vadd.f32 1e-05, %v4228_v33  ;;  %v4604_v50 = vmul.f32 %v4353_v2, %v10992_v24  ;;  %v4605_v61 = vmul.f32 %v4354_v14, %v10993_v44  ;;  %v4606_v48 = vmul.f32 %v4355_v55, %v10994_v34  ;;  %v11002_v44 = vld [vmem:[#allocation73_spill] sm:$0xff] }
 0x3da   :  { %v4607_v6 = vmul.f32 %v4356_v19, %v10995_v5  ;;  %v4735_v51 = vmul.f32 %v9456_v1, %v4600_v30  ;;  %v4736_v29 = vmul.f32 %v9456_v1, %v4601_v60  ;;  %v4737_v26 = vmul.f32 %v9456_v1, %v4602_v17 }
 0x3db   :  { %5347 = vrsqrt.f32 %v4244_v37  ;;  %v4738_v28 = vmul.f32 %v9456_v1, %v4603_v8  ;;  %v4739_v49 = vmul.f32 %v9456_v1, %v4604_v50  ;;  %v4740_v43 = vmul.f32 %v9456_v1, %v4605_v61 }
 0x3dc   :  { %v4741_v21 = vmul.f32 %v9456_v1, %v4606_v48  ;;  %v4742_v22 = vmul.f32 %v9456_v1, %v4607_v6  ;;  %v9929_v34 = vadd.f32 %v9472_v45, %v4733_v47  ;;  %v5089_v5 = vsel %vm3088_vm1, %v5088_v25, %v9608_v27 }
 0x3dd   :  { %v9934_v2 = vadd.f32 %v9472_v45, %v4734_v10  ;;  %v9937_v33 = vadd.f32 %v9472_v45, %v4735_v51  ;;  %v9940_v14 = vadd.f32 %v9472_v45, %v4736_v29  ;;  %v9943_v61 = vadd.f32 %v9472_v45, %v4737_v26  ;;  %v11003_v26 = vld [vmem:[#allocation74_spill] sm:$0xff] }
 0x3de   :  { %v9946_v48 = vadd.f32 %v9472_v45, %v4738_v28  ;;  %v9949_v47 = vadd.f32 %v9472_v45, %v4739_v49  ;;  %v9952_v27 = vadd.f32 %v9472_v45, %v4740_v43  ;;  %v10998_v25 = vrot.slane %v9532_v35, 4  ;;  %v11004_v49 = vld [vmem:[#allocation75_spill] sm:$0xff]  ;;  %v11005_v43 = vld [vmem:[#allocation76_spill] sm:$0xff] }
 0x3df   :  { %v5346_v51 = vpop.eup %5345  ;;  %v9958_v29 = vadd.f32 %v9472_v45, %v4741_v21  ;;  %v9961_v55 = vadd.f32 %v9472_v45, %v4742_v22  ;;  %v11001_v19 = vrot.slane %v9552_v42, 3  ;;  %v9967_v60 = vsel %vm3090_vm2, %v5090_v4, %v5089_v5  ;;  %v11006_v4 = vld [vmem:[#allocation77_spill] sm:$0xff] }
 0x3e0   :  { %10996 = vst [vmem:[#allocation42_spill] sm:$0xff] %v9949_v47  ;;  %10997 = vst [vmem:[#allocation43_spill] sm:$0xff] %v9952_v27  ;;  %v5081_v10 = vsel %vm3094_vm4, %v10998_v25, %v5079_v16  ;;  %v4209_v39 = vpop.xlane.xlu1 %4208  ;;  %v4357_v17 = vrot.slane %v5346_v51, 1  ;;  %v4358_v18 = vrot.slane %v5346_v51, 2  ;;  %v4359_v35 = vrot.slane %v5346_v51, 3  ;;  %v11007_v25 = vld [vmem:[#allocation62_spill] sm:$0xff] }
 0x3e1   :  { %10999 = vst [vmem:[#allocation44_spill] sm:$0xff] %v9958_v29  ;;  %11000 = vst [vmem:[#allocation45_spill] sm:$0xff] %v9961_v55  ;;  %v5083_v30 = vsel %vm3096_vm5, %v11001_v19, %v5081_v10  ;;  %v4360_v8 = vrot.slane %v5346_v51, 4  ;;  %v4229_v16 = vmul.f32 0.010416667, %v4209_v39  ;;  %v4361_v37 = vrot.slane %v5346_v51, 5 }
 0x3e2   :  { %v4362_v24 = vrot.slane %v5346_v51, 6  ;;  %v4363_v50 = vrot.slane %v5346_v51, 7  ;;  %v4608_v6 = vmul.f32 %v5346_v51, %v11002_v44  ;;  %v4609_v28 = vmul.f32 %v4357_v17, %v11003_v26  ;;  %v11008_v19 = vld [vmem:[#allocation63_spill] sm:$0xff]  ;;  %v11009_v29 = vld [vmem:[#allocation64_spill] sm:$0xff] }
 0x3e3   :  { %v4610_v42 = vmul.f32 %v4358_v18, %v11004_v49  ;;  %v4611_v21 = vmul.f32 %v4359_v35, %v11005_v43  ;;  %v4245_v22 = vadd.f32 1e-05, %v4229_v16  ;;  %v4612_v5 = vmul.f32 %v4360_v8, %v11006_v4 }
 0x3e4   :  { %v4613_v10 = vmul.f32 %v4361_v37, %v11007_v25  ;;  %v4614_v55 = vmul.f32 %v4362_v24, %v11008_v19  ;;  %v4615_v39 = vmul.f32 %v4363_v50, %v11009_v29  ;;  %v4743_v27 = vmul.f32 %v9456_v1, %v4608_v6  ;;  %v11014_v25 = vld [vmem:[#allocation65_spill] sm:$0xff]  ;;  %v11015_v19 = vld [vmem:[#allocation66_spill] sm:$0xff] }
 0x3e5   :  { %v4744_v47 = vmul.f32 %v9456_v1, %v4609_v28  ;;  %v4745_v51 = vmul.f32 %v9456_v1, %v4610_v42  ;;  %5349 = vrsqrt.f32 %v4245_v22  ;;  %v4746_v17 = vmul.f32 %v9456_v1, %v4611_v21 }
 0x3e6   :  { %v4747_v18 = vmul.f32 %v9456_v1, %v4612_v5  ;;  %v4748_v35 = vmul.f32 %v9456_v1, %v4613_v10  ;;  %v4749_v8 = vmul.f32 %v9456_v1, %v4614_v55  ;;  %v5092_v16 = vrot.slane %v9617_v20, 5 }
 0x3e7   :  { %v5094_v37 = vrot.slane %v9620_v32, 4  ;;  %v5096_v29 = vrot.slane %v9623_v63, 3  ;;  %v4750_v24 = vmul.f32 %v9456_v1, %v4615_v39  ;;  %v9989_v50 = vadd.f32 %v9472_v45, %v4743_v27 }
 0x3e8   :  { %v9992_v44 = vadd.f32 %v9472_v45, %v4744_v47  ;;  %v9995_v6 = vadd.f32 %v9472_v45, %v4745_v51  ;;  %v5348_v26 = vpop.eup %5347  ;;  %v9998_v55 = vadd.f32 %v9472_v45, %v4746_v17  ;;  %v10001_v20 = vadd.f32 %v9472_v45, %v4747_v18  ;;  %v11016_v51 = vld [vmem:[#allocation67_spill] sm:$0xff] }
 0x3e9   :  { %v10004_v32 = vadd.f32 %v9472_v45, %v4748_v35  ;;  %v11013_v63 = vrot.slane %v9555_v41, 2  ;;  %v4364_v28 = vrot.slane %v5348_v26, 1  ;;  %v4365_v47 = vrot.slane %v5348_v26, 2  ;;  %v11017_v41 = vld [vmem:[#allocation68_spill] sm:$0xff] }
 0x3ea   :  { %11010 = vst [vmem:[#allocation30_spill] sm:$0xff] %v9998_v55  ;;  %11011 = vst [vmem:[#allocation31_spill] sm:$0xff] %v10001_v20  ;;  %v4366_v49 = vrot.slane %v5348_v26, 3  ;;  %v4367_v42 = vrot.slane %v5348_v26, 4  ;;  %v4368_v43 = vrot.slane %v5348_v26, 5  ;;  %v4369_v21 = vrot.slane %v5348_v26, 6 }
 0x3eb   :  { %11012 = vst [vmem:[#allocation32_spill] sm:$0xff] %v10004_v32  ;;  %v5085_v27 = vsel %vm3098_vm6, %v11013_v63, %v5083_v30  ;;  %v4370_v22 = vrot.slane %v5348_v26, 7  ;;  %v4616_v4 = vmul.f32 %v5348_v26, %v9249_v7  ;;  %v4617_v5 = vmul.f32 %v4364_v28, %v9252_v23  ;;  %v11018_v30 = vld [vmem:[#allocation69_spill] sm:$0xff]  ;;  %v11019_v63 = vld [vmem:[#allocation86_spill] sm:$0xff] }
 0x3ec   :  { %v4618_v10 = vmul.f32 %v4365_v47, %v11014_v25  ;;  %v4619_v39 = vmul.f32 %v4366_v49, %v11015_v19  ;;  %v4620_v17 = vmul.f32 %v4367_v42, %v11016_v51  ;;  %v4621_v18 = vmul.f32 %v4368_v43, %v11017_v41 }
 0x3ed   :  { %v4622_v35 = vmul.f32 %v4369_v21, %v11018_v30  ;;  %v4623_v32 = vmul.f32 %v4370_v22, %v11019_v63  ;;  %v4751_v20 = vmul.f32 %v9456_v1, %v4616_v4  ;;  %v4752_v55 = vmul.f32 %v9456_v1, %v4617_v5 }
 0x3ee   :  { %v4753_v7 = vmul.f32 %v9456_v1, %v4618_v10  ;;  %v4754_v23 = vmul.f32 %v9456_v1, %v4619_v39  ;;  %v4755_v26 = vmul.f32 %v9456_v1, %v4620_v17  ;;  %v4756_v28 = vmul.f32 %v9456_v1, %v4621_v18  ;;  %v4215_v5 = vpop.xlane.xlu1 %4214 }
 0x3ef   :  { %v4757_v47 = vmul.f32 %v9456_v1, %v4622_v35  ;;  %v4758_v49 = vmul.f32 %v9456_v1, %v4623_v32  ;;  %v5093_v42 = vsel %vm3092_vm3, %v5092_v16, %v9967_v60  ;;  %v10028_v43 = vadd.f32 %v9472_v45, %v4749_v8 }
 0x3f0   :  { %v10031_v21 = vadd.f32 %v9472_v45, %v4750_v24  ;;  %v10034_v22 = vadd.f32 %v9472_v45, %v4751_v20  ;;  %v10037_v4 = vadd.f32 %v9472_v45, %v4752_v55  ;;  %v10040_v25 = vadd.f32 %v9472_v45, %v4753_v7  ;;  %v11029_v7 = vld [vmem:[#allocation87_spill] sm:$0xff] }
 0x3f1   :  { %v10043_v1 = vadd.f32 %v9472_v45, %v4754_v23  ;;  %v10046_v60 = vadd.f32 %v9472_v45, %v4755_v26  ;;  %v11025_v8 = vrot.slane %v9567_v52, 1  ;;  %v4231_v24 = vmul.f32 0.010416667, %v4215_v5  ;;  %v11030_v26 = vld [vmem:[#allocation88_spill] sm:$0xff] }
 0x3f2   :  { %11020 = vst [vmem:[#allocation33_spill] sm:$0xff] %v10031_v21  ;;  %11021 = vst [vmem:[#allocation34_spill] sm:$0xff] %v10034_v22  ;;  %v10052_v20 = vadd.f32 %v9472_v45, %v4756_v28  ;;  %v10055_v55 = vadd.f32 %v9472_v45, %v4757_v47  ;;  %v5095_v32 = vsel %vm3094_vm4, %v5094_v37, %v5093_v42  ;;  %v5350_v10 = vpop.eup %5349  ;;  %v5098_v52 = vrot.slane %v9642_v40, 2  ;;  %v11031_v28 = vld [vmem:[#allocation89_spill] sm:$0xff]  ;;  %v11033_v42 = vld [vmem:[#allocation91_spill] sm:$0xff] }
 0x3f3   :  { %11022 = vst [vmem:[#allocation35_spill] sm:$0xff] %v10040_v25  ;;  %11023 = vst [vmem:[#allocation36_spill] sm:$0xff] %v10043_v1  ;;  %v5087_v16 = vsel %vm3100_vm7, %v11025_v8, %v5085_v27  ;;  %v10060_v19 = vadd.f32 %v9472_v45, %v4758_v49  ;;  %v5097_v39 = vsel %vm3096_vm5, %v5096_v29, %v5095_v32  ;;  %v5102_v27 = vrot.slane %v9653_v36, 7  ;;  %v4212_v29 = vpop.xlane.xlu0 %4211  ;;  %v11032_v49 = vld [vmem:[#allocation90_spill] sm:$0xff]  ;;  %v11034_v5 = vld [vmem:[#allocation92_spill] sm:$0xff] }
 0x3f4   :  { %11024 = vst [vmem:[#allocation37_spill] sm:$0xff] %v10046_v60  ;;  %11026 = vst [vmem:[#allocation54_spill] sm:$0xff] %v10052_v20  ;;  %v4247_v51 = vadd.f32 1e-05, %v4231_v24  ;;  %v4371_v17 = vrot.slane %v5350_v10, 1  ;;  %v4372_v41 = vrot.slane %v5350_v10, 2  ;;  %v4624_v23 = vmul.f32 %v5350_v10, %v11029_v7 }
 0x3f5   :  { %11027 = vst [vmem:[#allocation55_spill] sm:$0xff] %v10055_v55  ;;  %5288 = vst.msk [vmem:[#allocation2 + $0x10] sm:$0xff] %vm271_vm0, %v5087_v16  ;;  %v4373_v18 = vrot.slane %v5350_v10, 3  ;;  %v4374_v30 = vrot.slane %v5350_v10, 4  ;;  %v4375_v35 = vrot.slane %v5350_v10, 5  ;;  %v4376_v63 = vrot.slane %v5350_v10, 6 }
 0x3f6   :  { %11028 = vst [vmem:[#allocation56_spill] sm:$0xff] %v10060_v19  ;;  %v4377_v37 = vrot.slane %v5350_v10, 7  ;;  %5351 = vrsqrt.f32 %v4247_v51  ;;  %v4625_v45 = vmul.f32 %v4371_v17, %v11030_v26  ;;  %v4626_v47 = vmul.f32 %v4372_v41, %v11031_v28  ;;  %v11035_v16 = vld [vmem:[#allocation93_spill] sm:$0xff]  ;;  %v11036_v19 = vld [vmem:[#allocation78_spill] sm:$0xff] }
 0x3f7   :  { %v4627_v40 = vmul.f32 %v4373_v18, %v11032_v49  ;;  %v4628_v36 = vmul.f32 %v4374_v30, %v11033_v42  ;;  %v4629_v8 = vmul.f32 %v4375_v35, %v11034_v5  ;;  %v4630_v24 = vmul.f32 %v4376_v63, %v11035_v16  ;;  %v10076_v10 = vld [vmem:[%s10409_s1] ss:$0 sm:$0xff]  ;;  %v11072_v1 = vld [vmem:[#allocation102_spill] sm:$0xff] }
 0x3f8   :  { %v4230_v32 = vmul.f32 0.010416667, %v4212_v29  ;;  %v4631_v55 = vmul.f32 %v4377_v37, %v11036_v19  ;;  %v4759_v51 = vmul.f32 %v10076_v10, %v4624_v23  ;;  %v4760_v17 = vmul.f32 %v10076_v10, %v4625_v45  ;;  %v10090_v23 = vld [vmem:[%s10410_s2] ss:$0 sm:$0xff]  ;;  %v11040_v29 = vld [vmem:[#allocation6_spill] sm:$0xff]  ;;  %s5379_s2 = smov [#allocation2]  }
 0x3f9   :  { %v4761_v41 = vmul.f32 %v10076_v10, %v4626_v47  ;;  %v4762_v18 = vmul.f32 %v10076_v10, %v4627_v40  ;;  %v4763_v30 = vmul.f32 %v10076_v10, %v4628_v36  ;;  %v4764_v35 = vmul.f32 %v10076_v10, %v4629_v8  ;;  %v11039_v28 = vld [vmem:[#allocation13_spill] sm:$0xff]  ;;  %s5307_s17 = sshll.u32 %s5379_s2, 4  ;;  %s5308_s17 = int_to_ptr.vmem [resolvable:$true] %s5307_s17 }
 0x3fa   :  { %v4246_v63 = vadd.f32 1e-05, %v4230_v32  ;;  %v4765_v19 = vmul.f32 %v10076_v10, %v4630_v24  ;;  %v4766_v37 = vmul.f32 %v10076_v10, %v4631_v55  ;;  %v5104_v7 = vrot.slane %v9656_v12, 6  ;;  %v11046_v8 = vld [vmem:[#allocation5_spill] sm:$0xff]  ;;  %s5357_s18 = scalar_lea.vmem %s5308_s17, 2048  ;;  %p5362_p1 = scmp.lt.s32.totalorder %s5308_s17, %s5308_s17 }
 0x3fb   :  { %v10093_v26 = vadd.f32 %v10090_v23, %v4759_v51  ;;  %v10096_v45 = vadd.f32 %v10090_v23, %v4760_v17  ;;  %v5100_v47 = vrot.slane %v11039_v28, 1  ;;  %v5106_v49 = vrot.slane %v11040_v29, 5  ;;  %v11048_v17 = vld [vmem:[#allocation7_spill] sm:$0xff]  ;;  %p5358_p0 = scmp.ne.s32.totalorder %s5308_s17, %s5357_s18  ;;  %p5363_p2 = scmp.lt.s32.totalorder %s5357_s18, %s5357_s18 }
 0x3fc   :  { %5353 = vrsqrt.f32 %v4246_v63  ;;  %v10101_v55 = vadd.f32 %v10090_v23, %v4761_v41  ;;  %v10104_v12 = vadd.f32 %v10090_v23, %v4762_v18  ;;  %v10107_v40 = vadd.f32 %v10090_v23, %v4763_v30  ;;  %v11049_v30 = vld [vmem:[#allocation8_spill] sm:$0xff] }
 0x3fd   :  { %11037 = vst [vmem:[#allocation57_spill] sm:$0xff] %v10093_v26  ;;  %11038 = vst [vmem:[#allocation58_spill] sm:$0xff] %v10096_v45  ;;  %v10110_v42 = vadd.f32 %v10090_v23, %v4764_v35  ;;  %v10113_v36 = vadd.f32 %v10090_v23, %v4765_v19  ;;  %v5099_v5 = vsel %vm3098_vm6, %v5098_v52, %v5097_v39  ;;  %v5108_v41 = vrot.slane %v11048_v17, 4  ;;  %v11063_v26 = vld [vmem:[#allocation85_spill] sm:$0xff]  ;;  %p5364_p3 = por %p5363_p2, %p5362_p1 }
 0x3fe   :  { %11041 = vst [vmem:[#allocation59_spill] sm:$0xff] %v10101_v55  ;;  %11042 = vst [vmem:[#allocation60_spill] sm:$0xff] %v10104_v12  ;;  %v5103_v16 = vsel %vm3088_vm1, %v5102_v27, %v11046_v8  ;;  %v10119_v24 = vadd.f32 %v10090_v23, %v4766_v37  ;;  %v5101_v32 = vsel %vm3100_vm7, %v5100_v47, %v5099_v5  ;;  %v5110_v35 = vrot.slane %v11049_v30, 3  ;;  %v11050_v27 = vld [vmem:[#allocation9_spill] sm:$0xff]  ;;  %v11051_v47 = vld [vmem:[#allocation10_spill] sm:$0xff] }
 0x3ff   :  { %11043 = vst [vmem:[#allocation61_spill] sm:$0xff] %v10107_v40  ;;  %11044 = vst [vmem:[#allocation46_spill] sm:$0xff] %v10110_v42  ;;  %v5105_v51 = vsel %vm3090_vm2, %v5104_v7, %v5103_v16  ;;  %v5116_v63 = vrot.slane %v9701_v62, 7  ;;  %v5118_v39 = vrot.slane %v9704_v59, 6  ;;  %v5112_v19 = vrot.slane %v11050_v27, 2  ;;  %v11053_v62 = vld [vmem:[#allocation12_spill] sm:$0xff]  ;;  %p5365_p4 = pnand %p5364_p3, %p5358_p0 }
 0x400   :  { %11045 = vst [vmem:[#allocation47_spill] sm:$0xff] %v10113_v36  ;;  %11047 = vst [vmem:[#allocation48_spill] sm:$0xff] %v10119_v24  ;;  %v5107_v18 = vsel %vm3092_vm3, %v5106_v49, %v5105_v51  ;;  %v5114_v37 = vrot.slane %v9692_v53, 1  ;;  %v5120_v7 = vrot.slane %v9707_v3, 5  ;;  %v11052_v49 = vld [vmem:[#allocation11_spill] sm:$0xff]  ;;  %v11054_v16 = vld [vmem:[#allocation22_spill] sm:$0xff] }
 0x401   :  { %5289 = vst.msk [vmem:[#allocation2 + $0x18] sm:$0xff] %vm271_vm0, %v5101_v32  ;;  %v5109_v52 = vsel %vm3094_vm4, %v5108_v41, %v5107_v18  ;;  %v5117_v29 = vsel %vm3088_vm1, %v5116_v63, %v11051_v47  ;;  %v5130_v17 = vrot.slane %v9751_v0, 7  ;;  %v11055_v51 = vld [vmem:[#allocation79_spill] sm:$0xff]  ;;  %v11056_v32 = vld [vmem:[#allocation80_spill] sm:$0xff] }
 0x402   :  { %v5111_v28 = vsel %vm3096_vm5, %v5110_v35, %v5109_v52  ;;  %v5119_v41 = vsel %vm3090_vm2, %v5118_v39, %v5117_v29  ;;  %v11058_v39 = vld [vmem:[#allocation82_spill] sm:$0xff]  ;;  %v11059_v18 = vld [vmem:[#allocation83_spill] sm:$0xff]  ;;  %v11060_v30 = vld [vmem:[#allocation84_spill] sm:$0xff] }
 0x403   :  { %v5113_v59 = vsel %vm3098_vm6, %v5112_v19, %v5111_v28  ;;  %v5352_v53 = vpop.eup %5351  ;;  %v5121_v36 = vsel %vm3092_vm3, %v5120_v7, %v5119_v41  ;;  %v11061_v42 = vld [vmem:[#allocation23_spill] sm:$0xff]  ;;  %v11062_v40 = vld [vmem:[#allocation24_spill] sm:$0xff] }
 0x404   :  { %v5115_v3 = vsel %vm3100_vm7, %v5114_v37, %v5113_v59  ;;  %v4385_v35 = vrot.slane %v5352_v53, 1  ;;  %v4386_v63 = vrot.slane %v5352_v53, 2  ;;  %v4387_v52 = vrot.slane %v5352_v53, 3  ;;  %v11057_v37 = vld [vmem:[#allocation81_spill] sm:$0xff] }
 0x405   :  { %v4388_v27 = vrot.slane %v5352_v53, 4  ;;  %5290 = vst.msk [vmem:[#allocation2 + $0x20] sm:$0xff] %vm271_vm0, %v5115_v3  ;;  %v4389_v19 = vrot.slane %v5352_v53, 5  ;;  %v4390_v28 = vrot.slane %v5352_v53, 6  ;;  %v4391_v47 = vrot.slane %v5352_v53, 7 }
 0x406   :  { %v4640_v0 = vmul.f32 %v5352_v53, %v11055_v51  ;;  %v4641_v8 = vmul.f32 %v4385_v35, %v11056_v32  ;;  %v4642_v59 = vmul.f32 %v4386_v63, %v11057_v37  ;;  %v4643_v29 = vmul.f32 %v4387_v52, %v11058_v39  ;;  %v11064_v51 = vld [vmem:[#allocation94_spill] sm:$0xff]  ;;  %v11067_v37 = vld [vmem:[#allocation97_spill] sm:$0xff] }
 0x407   :  { %v4644_v5 = vmul.f32 %v4388_v27, %v11059_v18  ;;  %v4645_v24 = vmul.f32 %v4389_v19, %v11060_v30  ;;  %v5131_v3 = vsel %vm3088_vm1, %v5130_v17, %v11061_v42  ;;  %v5136_v12 = vrot.slane %v11062_v40, 4 }
 0x408   :  { %v4646_v55 = vmul.f32 %v4390_v28, %v11063_v26  ;;  %v4647_v53 = vmul.f32 %v4391_v47, %v11064_v51  ;;  %v4775_v32 = vmul.f32 %v10076_v10, %v4640_v0  ;;  %v4776_v35 = vmul.f32 %v10076_v10, %v4641_v8  ;;  %v11065_v28 = vld [vmem:[#allocation95_spill] sm:$0xff]  ;;  %v11066_v0 = vld [vmem:[#allocation96_spill] sm:$0xff] }
 0x409   :  { %v5354_v63 = vpop.eup %5353  ;;  %v4777_v18 = vmul.f32 %v10076_v10, %v4642_v59  ;;  %v4778_v30 = vmul.f32 %v10076_v10, %v4643_v29  ;;  %v4779_v7 = vmul.f32 %v10076_v10, %v4644_v5  ;;  %v4780_v41 = vmul.f32 %v10076_v10, %v4645_v24  ;;  %v11068_v59 = vld [vmem:[#allocation98_spill] sm:$0xff]  ;;  %v11069_v29 = vld [vmem:[#allocation99_spill] sm:$0xff]  ;;  %v11070_v5 = vld [vmem:[#allocation100_spill] sm:$0xff] }
 0x40a   :  { %v4378_v42 = vrot.slane %v5354_v63, 1  ;;  %v4379_v17 = vrot.slane %v5354_v63, 2  ;;  %v4380_v40 = vrot.slane %v5354_v63, 3  ;;  %v4381_v52 = vrot.slane %v5354_v63, 4  ;;  %v11071_v24 = vld [vmem:[#allocation101_spill] sm:$0xff] }
 0x40b   :  { %v4382_v26 = vrot.slane %v5354_v63, 5  ;;  %v4383_v27 = vrot.slane %v5354_v63, 6  ;;  %v4384_v19 = vrot.slane %v5354_v63, 7  ;;  %v4632_v47 = vmul.f32 %v5354_v63, %v11065_v28 }
 0x40c   :  { %v4633_v8 = vmul.f32 %v4378_v42, %v11066_v0  ;;  %v4634_v39 = vmul.f32 %v4379_v17, %v11067_v37  ;;  %v4635_v51 = vmul.f32 %v4380_v40, %v11068_v59  ;;  %v4636_v45 = vmul.f32 %v4381_v52, %v11069_v29 }
 0x40d   :  { %v4637_v20 = vmul.f32 %v4382_v26, %v11070_v5  ;;  %v4638_v60 = vmul.f32 %v4383_v27, %v11071_v24  ;;  %v4639_v22 = vmul.f32 %v4384_v19, %v11072_v1  ;;  %v4767_v21 = vmul.f32 %v10076_v10, %v4632_v47 }
 0x40e   :  { %v4768_v25 = vmul.f32 %v10076_v10, %v4633_v8  ;;  %v4769_v63 = vmul.f32 %v10076_v10, %v4634_v39  ;;  %v4770_v42 = vmul.f32 %v10076_v10, %v4635_v51  ;;  %v4771_v17 = vmul.f32 %v10076_v10, %v4636_v45  ;;  %v11077_v51 = vld [vmem:[#allocation25_spill] sm:$0xff] }
 0x40f   :  { %v4772_v40 = vmul.f32 %v10076_v10, %v4637_v20  ;;  %v4773_v52 = vmul.f32 %v10076_v10, %v4638_v60  ;;  %v4774_v26 = vmul.f32 %v10076_v10, %v4639_v22  ;;  %v10182_v27 = vmul.f32 %v10076_v10, %v4646_v55 }
 0x410   :  { %v10185_v1 = vmul.f32 %v10076_v10, %v4647_v53  ;;  %v10188_v19 = vadd.f32 %v10090_v23, %v4767_v21  ;;  %v10191_v28 = vadd.f32 %v10090_v23, %v4768_v25  ;;  %v10194_v45 = vadd.f32 %v10090_v23, %v4775_v32 }
 0x411   :  { %v10197_v20 = vadd.f32 %v10090_v23, %v4769_v63  ;;  %v10200_v22 = vadd.f32 %v10090_v23, %v4770_v42  ;;  %v10203_v60 = vadd.f32 %v10090_v23, %v4771_v17  ;;  %v10206_v10 = vadd.f32 %v10090_v23, %v4772_v40  ;;  %v11082_v42 = vld [vmem:[#allocation27_spill] sm:$0xff]  ;;  %v11083_v40 = vld [vmem:[#allocation14_spill] sm:$0xff] }
 0x412   :  { %v10209_v21 = vadd.f32 %v10090_v23, %v4773_v52  ;;  %v10212_v25 = vadd.f32 %v10090_v23, %v4774_v26  ;;  %v10215_v55 = vadd.f32 %v10090_v23, %v4776_v35  ;;  %v10218_v53 = vadd.f32 %v10090_v23, %v4777_v18  ;;  %v11084_v26 = vld [vmem:[#allocation28_spill] sm:$0xff] }
 0x413   :  { %v10221_v32 = vadd.f32 %v10090_v23, %v4778_v30  ;;  %v10224_v47 = vadd.f32 %v10090_v23, %v4779_v7  ;;  %v11073_v0 = vrot.slane %v11052_v49, 4  ;;  %v11074_v37 = vrot.slane %v9754_v58, 6 }
 0x414   :  { %v10233_v35 = vadd.f32 %v10090_v23, %v4780_v41  ;;  %v11075_v18 = vrot.slane %v11053_v62, 3  ;;  %v11076_v30 = vrot.slane %v9758_v15, 5  ;;  %v5138_v29 = vrot.slane %v11077_v51, 3  ;;  %v11080_v41 = vld [vmem:[#allocation29_spill] sm:$0xff] }
 0x415   :  { %v5123_v8 = vsel %vm3094_vm4, %v11073_v0, %v5121_v36  ;;  %v5133_v39 = vsel %vm3090_vm2, %v11074_v37, %v5131_v3  ;;  %v11078_v49 = vrot.slane %v11054_v16, 2  ;;  %v11079_v3 = vld [vmem:[#allocation26_spill] sm:$0xff]  ;;  %v5144_v24 = vrot.slane %v11080_v41, 7  ;;  %v11086_v37 = vld [vmem:[#allocation16_spill] sm:$0xff] }
 0x416   :  { %v5125_v59 = vsel %vm3096_vm5, %v11075_v18, %v5123_v8  ;;  %v5135_v7 = vsel %vm3092_vm3, %v11076_v30, %v5133_v39  ;;  %v5140_v5 = vrot.slane %v11079_v3, 2  ;;  %v11081_v62 = vrot.slane %v9744_v31, 1 }
 0x417   :  { %v5127_v36 = vsel %vm3098_vm6, %v11078_v49, %v5125_v59  ;;  %v5137_v58 = vsel %vm3094_vm4, %v5136_v12, %v5135_v7  ;;  %v5142_v17 = vrot.slane %v11082_v42, 1  ;;  %v5146_v52 = vrot.slane %v11083_v40, 6  ;;  %v11085_v12 = vld [vmem:[#allocation15_spill] sm:$0xff]  ;;  %v11087_v59 = vld [vmem:[#allocation17_spill] sm:$0xff]  ;;  %v11090_v42 = vld [vmem:[#allocation20_spill] sm:$0xff] }
 0x418   :  { %v5129_v63 = vsel %vm3100_vm7, %v11081_v62, %v5127_v36  ;;  %v5139_v15 = vsel %vm3096_vm5, %v5138_v29, %v5137_v58  ;;  %v5145_v0 = vsel %vm3088_vm1, %v5144_v24, %v11084_v26  ;;  %v5148_v8 = vrot.slane %v11085_v12, 5  ;;  %v11088_v24 = vld [vmem:[#allocation18_spill] sm:$0xff]  ;;  %v11093_v26 = vld [vmem:[#allocation39_spill] sm:$0xff] }
 0x419   :  { %v5141_v16 = vsel %vm3098_vm6, %v5140_v5, %v5139_v15  ;;  %v5150_v39 = vrot.slane %v11086_v37, 4  ;;  %5291 = vst.msk [vmem:[#allocation2 + $0x28] sm:$0xff] %vm271_vm0, %v5129_v63  ;;  %v5147_v18 = vsel %vm3090_vm2, %v5146_v52, %v5145_v0  ;;  %v5152_v30 = vrot.slane %v11087_v59, 3  ;;  %v11092_v52 = vld [vmem:[#allocation21_spill] sm:$0xff] }
 0x41a   :  { %v5143_v31 = vsel %vm3100_vm7, %v5142_v17, %v5141_v16  ;;  %v5154_v7 = vrot.slane %v9833_v46, 2  ;;  %v5149_v51 = vsel %vm3092_vm3, %v5148_v8, %v5147_v18  ;;  %v5156_v29 = vrot.slane %v9838_v57, 1  ;;  %v11089_v57 = vld [vmem:[#allocation19_spill] sm:$0xff]  ;;  %v11094_v8 = vld [vmem:[#allocation40_spill] sm:$0xff] }
 0x41b   :  { %v5158_v49 = vrot.slane %v9844_v11, 7  ;;  %v5160_v36 = vrot.slane %v9847_v54, 6  ;;  %5292 = vst.msk [vmem:[#allocation2 + $0x30] sm:$0xff] %vm271_vm0, %v5143_v31  ;;  %v5151_v58 = vsel %vm3094_vm4, %v5150_v39, %v5149_v51  ;;  %v5162_v3 = vrot.slane %v9850_v38, 5  ;;  %v11091_v38 = vld [vmem:[#allocation38_spill] sm:$0xff]  ;;  %v11095_v39 = vld [vmem:[#allocation41_spill] sm:$0xff] }
 0x41c   :  { %v5164_v5 = vrot.slane %v9853_v9, 4  ;;  %v5166_v41 = vrot.slane %v9856_v13, 3  ;;  %v5153_v46 = vsel %vm3096_vm5, %v5152_v30, %v5151_v58  ;;  %v5168_v63 = vrot.slane %v11089_v57, 2  ;;  %v11097_v57 = vld [vmem:[#allocation43_spill] sm:$0xff] }
 0x41d   :  { %v5159_v62 = vsel %vm3088_vm1, %v5158_v49, %v11088_v24  ;;  %v5172_v11 = vrot.slane %v9897_v56, 7  ;;  %v5155_v54 = vsel %vm3098_vm6, %v5154_v7, %v5153_v46  ;;  %v5170_v17 = vrot.slane %v11090_v42, 1 }
 0x41e   :  { %v5161_v15 = vsel %vm3090_vm2, %v5160_v36, %v5159_v62  ;;  %v5174_v40 = vrot.slane %v11091_v38, 6  ;;  %v5157_v9 = vsel %vm3100_vm7, %v5156_v29, %v5155_v54  ;;  %v5176_v0 = vrot.slane %v11093_v26, 5  ;;  %v11099_v54 = vld [vmem:[#allocation45_spill] sm:$0xff]  ;;  %v11102_v26 = vld [vmem:[#allocation32_spill] sm:$0xff] }
 0x41f   :  { %v5163_v13 = vsel %vm3092_vm3, %v5162_v3, %v5161_v15  ;;  %v5173_v16 = vsel %vm3088_vm1, %v5172_v11, %v11092_v52  ;;  %v5178_v37 = vrot.slane %v11094_v8, 4  ;;  %v5180_v31 = vrot.slane %v11095_v39, 3  ;;  %5293 = vst.msk [vmem:[#allocation2 + $0x38] sm:$0xff] %vm271_vm0, %v5157_v9 }
 0x420   :  { %v5165_v12 = vsel %vm3094_vm4, %v5164_v5, %v5163_v13  ;;  %v5175_v56 = vsel %vm3090_vm2, %v5174_v40, %v5173_v16  ;;  %v5182_v30 = vrot.slane %v9929_v34, 2  ;;  %v5186_v7 = vrot.slane %v9940_v14, 7  ;;  %v11100_v40 = vld [vmem:[#allocation30_spill] sm:$0xff]  ;;  %v11101_v13 = vld [vmem:[#allocation31_spill] sm:$0xff] }
 0x421   :  { %v5167_v18 = vsel %vm3096_vm5, %v5166_v41, %v5165_v12  ;;  %v5177_v59 = vsel %vm3092_vm3, %v5176_v0, %v5175_v56  ;;  %v5184_v49 = vrot.slane %v9934_v2, 1  ;;  %v5188_v36 = vrot.slane %v9943_v61, 6  ;;  %v11096_v2 = vld [vmem:[#allocation42_spill] sm:$0xff] }
 0x422   :  { %v5169_v51 = vsel %vm3098_vm6, %v5168_v63, %v5167_v18  ;;  %v5179_v29 = vsel %vm3094_vm4, %v5178_v37, %v5177_v59  ;;  %v5187_v5 = vsel %vm3088_vm1, %v5186_v7, %v9937_v33  ;;  %v5190_v41 = vrot.slane %v9946_v48, 5  ;;  %v11103_v37 = vld [vmem:[#allocation35_spill] sm:$0xff]  ;;  %v11105_v59 = vld [vmem:[#allocation34_spill] sm:$0xff]  ;;  %v11106_v7 = vld [vmem:[#allocation36_spill] sm:$0xff] }
 0x423   :  { %v5171_v58 = vsel %vm3100_vm7, %v5170_v17, %v5169_v51  ;;  %v5181_v3 = vsel %vm3096_vm5, %v5180_v31, %v5179_v29  ;;  %v10307_v34 = vadd.f32 %v10090_v23, %v10182_v27  ;;  %v5189_v46 = vsel %vm3090_vm2, %v5188_v36, %v5187_v5  ;;  %v11098_v27 = vld [vmem:[#allocation44_spill] sm:$0xff]  ;;  %v11104_v31 = vld [vmem:[#allocation33_spill] sm:$0xff] }
 0x424   :  { %v5183_v14 = vsel %vm3098_vm6, %v5182_v30, %v5181_v3  ;;  %v5192_v24 = vrot.slane %v11096_v2, 4  ;;  %5294 = vst.msk [vmem:[#allocation2 + $0x40] sm:$0xff] %vm271_vm0, %v5171_v58  ;;  %v5191_v62 = vsel %vm3092_vm3, %v5190_v41, %v5189_v46  ;;  %v5194_v33 = vrot.slane %v11097_v57, 3  ;;  %v11109_v41 = vld [vmem:[#allocation58_spill] sm:$0xff]  ;;  %v11110_v46 = vld [vmem:[#allocation59_spill] sm:$0xff] }
 0x425   :  { %v5185_v61 = vsel %vm3100_vm7, %v5184_v49, %v5183_v14  ;;  %v5200_v48 = vrot.slane %v9992_v44, 7  ;;  %v5196_v11 = vrot.slane %v11098_v27, 2  ;;  %v5198_v15 = vrot.slane %v11099_v54, 1  ;;  %v11107_v49 = vld [vmem:[#allocation37_spill] sm:$0xff]  ;;  %v11114_v54 = vld [vmem:[#allocation60_spill] sm:$0xff] }
 0x426   :  { %v5193_v63 = vsel %vm3094_vm4, %v5192_v24, %v5191_v62  ;;  %v5202_v42 = vrot.slane %v9995_v6, 6  ;;  %5295 = vst.msk [vmem:[#allocation2 + $0x48] sm:$0xff] %vm271_vm0, %v5185_v61  ;;  %v5204_v9 = vrot.slane %v11100_v40, 5  ;;  %v5206_v52 = vrot.slane %v11101_v13, 4  ;;  %v11111_v62 = vld [vmem:[#allocation55_spill] sm:$0xff]  ;;  %v11113_v27 = vld [vmem:[#allocation57_spill] sm:$0xff] }
 0x427   :  { %v5195_v17 = vsel %vm3096_vm5, %v5194_v33, %v5193_v63  ;;  %v5201_v38 = vsel %vm3088_vm1, %v5200_v48, %v9989_v50  ;;  %v5208_v0 = vrot.slane %v11102_v26, 3  ;;  %v5214_v12 = vrot.slane %v10037_v4, 7  ;;  %v11112_v33 = vld [vmem:[#allocation56_spill] sm:$0xff]  ;;  %v11117_v26 = vld [vmem:[#allocation47_spill] sm:$0xff] }
 0x428   :  { %v5197_v44 = vsel %vm3098_vm6, %v5196_v11, %v5195_v17  ;;  %v5203_v16 = vsel %vm3090_vm2, %v5202_v42, %v5201_v38  ;;  %v5210_v8 = vrot.slane %v10028_v43, 2  ;;  %v5216_v50 = vrot.slane %v11103_v37, 6  ;;  %v11108_v43 = vld [vmem:[#allocation54_spill] sm:$0xff]  ;;  %v11115_v42 = vld [vmem:[#allocation61_spill] sm:$0xff] }
 0x429   :  { %v5199_v6 = vsel %vm3100_vm7, %v5198_v15, %v5197_v44  ;;  %v5205_v56 = vsel %vm3092_vm3, %v5204_v9, %v5203_v16  ;;  %v5212_v18 = vrot.slane %v11104_v31, 1  ;;  %v5215_v30 = vsel %vm3088_vm1, %v5214_v12, %v11105_v59  ;;  %v11116_v9 = vld [vmem:[#allocation46_spill] sm:$0xff] }
 0x42a   :  { %v5207_v39 = vsel %vm3094_vm4, %v5206_v52, %v5205_v56  ;;  %v5218_v51 = vrot.slane %v11106_v7, 5  ;;  %5296 = vst.msk [vmem:[#allocation2 + $0x50] sm:$0xff] %vm271_vm0, %v5199_v6  ;;  %v5217_v29 = vsel %vm3090_vm2, %v5216_v50, %v5215_v30  ;;  %v5220_v36 = vrot.slane %v11107_v49, 4  ;;  %v11118_v56 = vld [vmem:[#allocation48_spill] sm:$0xff] }
 0x42b   :  { %v5209_v4 = vsel %vm3096_vm5, %v5208_v0, %v5207_v39  ;;  %v5222_v58 = vrot.slane %v11108_v43, 3  ;;  %v5228_v14 = vrot.slane %v11109_v41, 7  ;;  %v5230_v2 = vrot.slane %v11110_v46, 6 }
 0x42c   :  { %v5211_v3 = vsel %vm3098_vm6, %v5210_v8, %v5209_v4  ;;  %v5219_v5 = vsel %vm3092_vm3, %v5218_v51, %v5217_v29  ;;  %v5224_v57 = vrot.slane %v11111_v62, 2  ;;  %v5226_v48 = vrot.slane %v11112_v33, 1 }
 0x42d   :  { %v5213_v24 = vsel %vm3100_vm7, %v5212_v18, %v5211_v3  ;;  %v5221_v61 = vsel %vm3094_vm4, %v5220_v36, %v5219_v5  ;;  %v5229_v11 = vsel %vm3088_vm1, %v5228_v14, %v11113_v27  ;;  %v5232_v15 = vrot.slane %v11114_v54, 5 }
 0x42e   :  { %v5223_v63 = vsel %vm3096_vm5, %v5222_v58, %v5221_v61  ;;  %v5234_v17 = vrot.slane %v11115_v42, 4  ;;  %5297 = vst.msk [vmem:[#allocation2 + $0x58] sm:$0xff] %vm271_vm0, %v5213_v24  ;;  %v5231_v40 = vsel %vm3090_vm2, %v5230_v2, %v5229_v11  ;;  %v5236_v13 = vrot.slane %v11116_v9, 3 }
 0x42f   :  { %v5225_v38 = vsel %vm3098_vm6, %v5224_v57, %v5223_v63  ;;  %v5242_v52 = vrot.slane %v10191_v28, 7  ;;  %v5233_v16 = vsel %vm3092_vm3, %v5232_v15, %v5231_v40  ;;  %v5238_v0 = vrot.slane %v11117_v26, 2 }
 0x430   :  { %v5227_v44 = vsel %vm3100_vm7, %v5226_v48, %v5225_v38  ;;  %v5244_v12 = vrot.slane %v10197_v20, 6  ;;  %v5235_v6 = vsel %vm3094_vm4, %v5234_v17, %v5233_v16  ;;  %v5240_v8 = vrot.slane %v11118_v56, 1 }
 0x431   :  { %v5243_v37 = vsel %vm3088_vm1, %v5242_v52, %v10188_v19  ;;  %v5246_v50 = vrot.slane %v10200_v22, 5  ;;  %5298 = vst.msk [vmem:[#allocation2 + $0x60] sm:$0xff] %vm271_vm0, %v5227_v44  ;;  %v5237_v28 = vsel %vm3096_vm5, %v5236_v13, %v5235_v6  ;;  %v5248_v31 = vrot.slane %v10203_v60, 4 }
 0x432   :  { %v5245_v39 = vsel %vm3090_vm2, %v5244_v12, %v5243_v37  ;;  %v5250_v18 = vrot.slane %v10206_v10, 3  ;;  %v5239_v20 = vsel %vm3098_vm6, %v5238_v0, %v5237_v28  ;;  %v5256_v30 = vrot.slane %v10215_v55, 7 }
 0x433   :  { %v5247_v59 = vsel %vm3092_vm3, %v5246_v50, %v5245_v39  ;;  %v5258_v19 = vrot.slane %v10218_v53, 6  ;;  %v4917_v22 = vadd.f32 %v10090_v23, %v10185_v1  ;;  %v5241_v7 = vsel %vm3100_vm7, %v5240_v8, %v5239_v20 }
 0x434   :  { %v5249_v51 = vsel %vm3094_vm4, %v5248_v31, %v5247_v59  ;;  %v5252_v4 = vrot.slane %v10209_v21, 2  ;;  %v5254_v10 = vrot.slane %v10212_v25, 1  ;;  %v5257_v29 = vsel %vm3088_vm1, %v5256_v30, %v10194_v45  ;;  %5299 = vst.msk [vmem:[#allocation2 + $0x68] sm:$0xff] %vm271_vm0, %v5241_v7 }
 0x435   :  { %v5251_v60 = vsel %vm3096_vm5, %v5250_v18, %v5249_v51  ;;  %v5260_v55 = vrot.slane %v10221_v32, 5  ;;  %v5259_v23 = vsel %vm3090_vm2, %v5258_v19, %v5257_v29  ;;  %v5262_v1 = vrot.slane %v10224_v47, 4 }
 0x436   :  { %v5253_v53 = vsel %vm3098_vm6, %v5252_v4, %v5251_v60  ;;  %v5264_v36 = vrot.slane %v10233_v35, 3  ;;  %v5266_v25 = vrot.slane %v10307_v34, 2  ;;  %v5268_v43 = vrot.slane %v4917_v22, 1 }
 0x437   :  { %v5255_v49 = vsel %vm3100_vm7, %v5254_v10, %v5253_v53  ;;  %v5261_v21 = vsel %vm3092_vm3, %v5260_v55, %v5259_v23 }
 0x438   :  { %v5263_v45 = vsel %vm3094_vm4, %v5262_v1, %v5261_v21  ;;  %5300 = vst.msk [vmem:[#allocation2 + $0x70] sm:$0xff] %vm271_vm0, %v5255_v49 }
 0x439   :  { %v5265_v32 = vsel %vm3096_vm5, %v5264_v36, %v5263_v45 }
 0x43a   :  { %v5267_v58 = vsel %vm3098_vm6, %v5266_v25, %v5265_v32 }
 0x43b   :  { %v5269_v47 = vsel %vm3100_vm7, %v5268_v43, %v5267_v58 }
 0x43c   :  { %5301 = vst.msk [vmem:[#allocation2 + $0x78] sm:$0xff] %vm271_vm0, %v5269_v47 }
 0x43d   :  { %5368 = shalt.err (!%p5365_p4)
}
 0x43e   :  { %s5380_s19 = smov 128   ;;  %s5381_s20 = smov 8  }
 0x43f   :  { %5313 = dma.vmem_to_hbm [thread:$0]  %s5308_s17, 2048, %s10411_s3, [#allocation3], %s5380_s19, %s5380_s19, %s5381_s20  }
 0x440   :  { %5377 = dma.done.wait [#allocation3], 2048  }
 0x441   :  { %5378 = vsyncadd [#allocation3], 4294965248 }
 0x442   :  { %5317 = vsyncpa [#allocation3], 1 }

</bundles_post_ra>
